<compile_context>
chip_gen: v6e
topology: v6e:2x2x1
jax: 0.10.0
libtpu: 0.0.40
codegen_flags: <defaults>
</compile_context>

<pallas_src>
import jax
import jax.numpy as jnp
from jax.experimental import pallas as pl
from jax.experimental.pallas import tpu as pltpu

CANDIDATE_NUM = 4
PATCH = 32          # forward() calls augmentation() with the default patch=32
NOISE = 2

_SQRT_2_OVER_PI = 0.7978845608028654


def _round_up(x, m):
    return ((x + m - 1) // m) * m


# --------------------------------------------------------------------------
# GELU (tanh approximation).  In-kernel version builds tanh from EUP exp +
# approximate reciprocal so it rides the EUP slot instead of burning VALU ops.
# --------------------------------------------------------------------------
def _gelu_fast(x):
    u = _SQRT_2_OVER_PI * (x + 0.044715 * (x * x * x))
    # tanh(u) = 1 - 2 / (exp(2u) + 1); exp overflow -> inf -> recip 0 -> tanh=1.
    t = 1.0 - 2.0 * pl.reciprocal(jnp.exp(2.0 * u) + 1.0, approx=True)
    return 0.5 * x * (1.0 + t)


def _gelu_ref(x):
    u = _SQRT_2_OVER_PI * (x + 0.044715 * (x * x * x))
    return 0.5 * x * (1.0 + jnp.tanh(u))


# --------------------------------------------------------------------------
# Pallas kernel: fused encoder + (z_ref + z_can) + classifier, one N-row tile
# per grid step, K candidates handled by a short unrolled loop.
# --------------------------------------------------------------------------
def _encoder_classifier_kernel(sref_ref, cand_ref, wenc_ref, benc_ref,
                               w1_ref, b1_ref, w2_ref, b2_ref, out_ref):
    k_num = cand_ref.shape[0]
    tm = sref_ref.shape[0]
    f_p = wenc_ref.shape[1]
    k_pad = out_ref.shape[1]

    s = sref_ref[...]                    # (TM, DIN) bf16
    w_enc = wenc_ref[...]                # (DIN, F) bf16, VMEM-resident
    w1 = w1_ref[...]                     # (F, F)  f32
    b2 = b2_ref[0, 0]                    # scalar from SMEM

    # Broadcasts hoisted out of the K loop (JAX doesn't CSE broadcast_in_dim).
    b_enc2 = jnp.broadcast_to(2.0 * benc_ref[...], (tm, f_p))   # bias twice: z_ref + z_can
    b1 = jnp.broadcast_to(b1_ref[...], (tm, f_p))
    w2 = jnp.broadcast_to(w2_ref[...], (tm, f_p))

    lane = jax.lax.broadcasted_iota(jnp.int32, (tm, k_pad), 1)
    acc = jnp.zeros((tm, k_pad), jnp.float32)

    for k in range(k_num):               # K = 4, fully unrolled
        # encoder fused over sref + candidate: (s + c) @ W + 2b == (sW + b) + (cW + b)
        z = jnp.dot(s + cand_ref[k], w_enc,
                    preferred_element_type=jnp.float32) + b_enc2
        h = _gelu_fast(z)
        h = jnp.dot(h, w1, preferred_element_type=jnp.float32) + b1
        h = _gelu_fast(h)
        # final Linear(F, 1) as a VPU mul + lane reduction (avoids skinny matmul)
        logit = jnp.sum(h * w2, axis=-1, keepdims=True) + b2    # (TM, 1)
        # place logit in lane k of the 128-wide output slab (pure VPU select)
        acc = acc + jnp.where(lane == k, logit, 0.0)

    out_ref[...] = acc                   # single unmasked, lane-dense store


def _choose_tm(n, k_num, din_pad, bytes_per_elem=2, budget=24 * 1024 * 1024):
    # 2 pipeline buffers of (K candidates + 1 sref) rows of din_pad must fit the
    # budget (kept well under v7x's 64 MiB physical / 32 MiB scoped VMEM).
    per_row = (k_num + 1) * din_pad * bytes_per_elem * 2
    tm = max(8, min(256, budget // per_row))
    tm = max(8, (tm // 8) * 8)
    n8 = _round_up(max(n, 1), 8)
    return max(8, min(tm, n8))


def encoder_classifier_pallas(sref_flat, cand_flat, params):
    """sref_flat: (N, din) f32, cand_flat: (K, N, din) f32 -> logits (N, K) f32."""
    k_num, n, din = cand_flat.shape
    f = params["w_enc"].shape[1]

    din_p = _round_up(din, 128)
    f_p = _round_up(max(f, 128), 128)
    k_pad = 128                           # lane-dense output width
    tm = _choose_tm(n, k_num, din_p)
    n_p = _round_up(max(n, tm), tm)

    bf = jnp.bfloat16
    # zero-pad rows/din/feature dims (zeros are exact no-ops through the net)
    sref_p = jnp.zeros((n_p, din_p), bf).at[:n, :din].set(sref_flat.astype(bf))
    cand_p = jnp.zeros((k_num, n_p, din_p), bf).at[:, :n, :din].set(cand_flat.astype(bf))
    w_enc_p = jnp.zeros((din_p, f_p), bf).at[:din, :f].set(params["w_enc"].astype(bf))
    b_enc_p = jnp.zeros((1, f_p), jnp.float32).at[0, :f].set(params["b_enc"].reshape(-1))
    w1_p = jnp.zeros((f_p, f_p), jnp.float32).at[:f, :f].set(params["w1"])
    b1_p = jnp.zeros((1, f_p), jnp.float32).at[0, :f].set(params["b1"].reshape(-1))
    w2_p = jnp.zeros((1, f_p), jnp.float32).at[0, :f].set(params["w2"].reshape(-1))
    b2 = params["b2"].reshape(1, 1).astype(jnp.float32)

    grid = (n_p // tm,)
    out = pl.pallas_call(
        _encoder_classifier_kernel,
        out_shape=jax.ShapeDtypeStruct((n_p, k_pad), jnp.float32),
        grid_spec=pltpu.PrefetchScalarGridSpec(
            num_scalar_prefetch=0,
            grid=grid,
            in_specs=[
                pl.BlockSpec((tm, din_p), lambda i: (i, 0)),            # sref tile
                pl.BlockSpec((k_num, tm, din_p), lambda i: (0, i, 0)),  # K candidate tiles
                pl.BlockSpec((din_p, f_p), lambda i: (0, 0)),           # w_enc (resident)
                pl.BlockSpec((1, f_p), lambda i: (0, 0)),               # b_enc
                pl.BlockSpec((f_p, f_p), lambda i: (0, 0)),             # w1
                pl.BlockSpec((1, f_p), lambda i: (0, 0)),               # b1
                pl.BlockSpec((1, f_p), lambda i: (0, 0)),               # w2 (row)
                pl.BlockSpec(memory_space=pltpu.MemorySpace.SMEM),      # b2 scalar
            ],
            out_specs=pl.BlockSpec((tm, k_pad), lambda i: (i, 0)),
        ),
        compiler_params=pltpu.CompilerParams(
            dimension_semantics=("parallel",),
            vmem_limit_bytes=48 * 1024 * 1024,
        ),
    )(sref_p, cand_p, w_enc_p, b_enc_p, w1_p, b1_p, w2_p, b2)
    return out[:n, :k_num]


# --------------------------------------------------------------------------
# augmentation (plain JAX glue, mirrors the PyTorch index math exactly)
# --------------------------------------------------------------------------
def cut_state(state, x, y, patch, ref_indices=None):
    N, C, H, W = state.shape
    ix = jnp.arange(patch, dtype=jnp.int32).reshape(1, 1, patch, 1) + x.reshape(-1, 1, 1, 1)
    iy = jnp.arange(patch, dtype=jnp.int32).reshape(1, 1, 1, patch) + y.reshape(-1, 1, 1, 1)
    linear = iy + H * ix + jnp.arange(N, dtype=jnp.int32).reshape(-1, 1, 1, 1) * (C * H * W)
    if ref_indices is None:
        ref_indices = linear
    flat = jnp.zeros(state.size, dtype=state.dtype)
    vals = jnp.take(state.reshape(-1), linear.reshape(-1))
    flat = flat.at[ref_indices.reshape(-1)].set(vals)
    return linear, flat.reshape(N, C, H, W)


def augmentation(state, key, patch=PATCH, candidate_num=CANDIDATE_NUM, noise=NOISE):
    """Returns state_ref (N,C,H,W), candidates (K,N,C,H,W), targets (N,)."""
    N, C, H, W = state.shape
    n_keys = 2 + 2 * (candidate_num - 1) + 1
    keys = jax.random.split(key, n_keys)
    x = jax.random.randint(keys[0], (N,), 0, W - patch, dtype=jnp.int32)
    y = jax.random.randint(keys[1], (N,), 0, H - patch, dtype=jnp.int32)
    ref_indices, s = cut_state(state, x, y, patch)
    state_ref = state.reshape(-1).at[ref_indices.reshape(-1)].set(0.0).reshape(N, C, H, W)
    result = [s]
    target = [1]
    for i in range(candidate_num - 1):
        nx = jax.random.randint(keys[2 + 2 * i], (N,), -noise, noise, dtype=jnp.int32) + x
        ny = jax.random.randint(keys[3 + 2 * i], (N,), -noise, noise, dtype=jnp.int32) + y
        nx = jnp.clip(nx, 0, W - patch - 1)
        ny = jnp.clip(ny, 0, H - patch - 1)
        _, s_i = cut_state(state, nx, ny, patch, ref_indices)
        result.append(s_i)
        target.append(0)
    result = jnp.stack(result)                                      # (K, N, C, H, W)
    target = jnp.tile(jnp.array(target, dtype=jnp.int32)[:, None], (1, N))  # (K, N)
    indices = jnp.argsort(jax.random.uniform(keys[-1], (N, candidate_num)), axis=1)  # (N, K)
    idx_kn = indices.T                                              # (K, N)
    gather_idx = jnp.broadcast_to(idx_kn[:, :, None, None, None], result.shape)
    result = jnp.take_along_axis(result, gather_idx, axis=0)        # shuffled, still (K, N, ...)
    target = jnp.take_along_axis(target, idx_kn, axis=0)            # (K, N)
    target = jnp.argmax(target, axis=0).astype(jnp.int32)           # (N,)
    return state_ref, result, target


# --------------------------------------------------------------------------
# full forward
# --------------------------------------------------------------------------
def forward(state, params, key):
    N, C, H, W = state.shape
    K = CANDIDATE_NUM
    state_ref, candidates, targets = augmentation(state, key, candidate_num=K)
    sref_flat = state_ref.reshape(N, C * H * W)          # encoded ONCE per sample
    cand_flat = candidates.reshape(K, N, C * H * W)
    logits = encoder_classifier_pallas(sref_flat, cand_flat, params)   # (N, K)
    return logits, targets


# pure-JAX f32 reference for the kernel part (same math, XLA instead of Pallas)
def _reference_logits(sref_flat, cand_flat, params):
    f = params["w_enc"].shape[1]
    z_ref = sref_flat @ params["w_enc"] + params["b_enc"].reshape(1, f)          # (N, F)
    z_can = cand_flat @ params["w_enc"] + params["b_enc"].reshape(1, 1, f)       # (K, N, F)
    z = z_ref[None, :, :] + z_can
    h = _gelu_ref(z)
    h = h @ params["w1"] + params["b1"].reshape(1, 1, f)
    h = _gelu_ref(h)
    out = h @ params["w2"] + params["b2"].reshape(1, 1, 1)                       # (K, N, 1)
    return out[..., 0].T                                                         # (N, K)


# --------------------------------------------------------------------------
# deterministic parameter init (orthogonal classifier, gain=0.5)
# --------------------------------------------------------------------------
def init_params(key, din, feature_dim, gain=0.5):
    k_enc, k_b, k1, k2 = jax.random.split(key, 4)
    w_enc = jax.random.normal(k_enc, (din, feature_dim), jnp.float32) / (din ** 0.5)
    b_enc = 0.1 * jax.random.normal(k_b, (feature_dim,), jnp.float32)
    # classifier weights: PyTorch layout (out, in), orthogonal init, applied as x @ W.T
    w1_t = jax.nn.initializers.orthogonal(scale=gain)(k1, (feature_dim, feature_dim), jnp.float32)
    w2_t = jax.nn.initializers.orthogonal(scale=gain)(k2, (1, feature_dim), jnp.float32)
    return {
        "w_enc": w_enc,
        "b_enc": b_enc,
        "w1": w1_t.T,
        "b1": jnp.zeros((feature_dim,), jnp.float32),
        "w2": w2_t.T,
        "b2": jnp.zeros((1, 1), jnp.float32),
    }


if __name__ == "__main__":
    # small shapes consistent with the module (patch=32 requires H, W > 33)
    N, C, H, W = 2, 4, 36, 36
    FEATURE_DIM = 32

    root = jax.random.PRNGKey(0)
    k_state, k_aug, k_params = jax.random.split(root, 3)
    state = jax.random.uniform(k_state, (N, C, H, W), dtype=jnp.float32)
    params = init_params(k_params, C * H * W, FEATURE_DIM)

    logits, targets = jax.jit(forward)(state, params, k_aug)
    jax.block_until_ready((logits, targets))

    assert logits.shape == (N, CANDIDATE_NUM) and logits.dtype == jnp.float32
    assert targets.shape == (N,)

    # correctness check of the Pallas hot path against a pure-JAX f32 reference
    state_ref, candidates, _ = augmentation(state, k_aug, candidate_num=CANDIDATE_NUM)
    sref_flat = state_ref.reshape(N, -1)
    cand_flat = candidates.reshape(CANDIDATE_NUM, N, -1)
    ref = _reference_logits(sref_flat, cand_flat, params)
    assert bool(jnp.allclose(logits, ref, rtol=5e-2, atol=5e-2)), "kernel mismatch vs reference"

    print("KERNEL_OK")
</pallas_src>

<mosaic_0001>
module attributes {stable_mosaic.version = 11 : i64} {
  func.func @_encoder_classifier_kernel(%arg0: i32, %arg1: memref<8x5248xbf16, #tpu.memory_space<vmem>>, %arg2: memref<4x8x5248xbf16, #tpu.memory_space<vmem>>, %arg3: memref<5248x128xbf16, #tpu.memory_space<vmem>>, %arg4: memref<1x128xf32, #tpu.memory_space<vmem>>, %arg5: memref<128x128xf32, #tpu.memory_space<vmem>>, %arg6: memref<1x128xf32, #tpu.memory_space<vmem>>, %arg7: memref<1x128xf32, #tpu.memory_space<vmem>>, %arg8: memref<1x1xf32, #tpu.memory_space<smem>>, %arg9: memref<8x128xf32, #tpu.memory_space<vmem>>) attributes {dimension_semantics = [#tpu.dimension_semantics<parallel>], iteration_bounds = array<i64: 1>, scalar_prefetch = 0 : i64, scratch_operands = 0 : i64, tpu.core_type = #tpu.core_type<tc>, window_params = [{transform_indices = @transform_0, window_bounds = array<i64: 8, 5248>}, {transform_indices = @transform_1, window_bounds = array<i64: 4, 8, 5248>}, {pipeline_mode = #tpu.pipeline_mode<synchronous>, transform_indices = @transform_2, window_bounds = array<i64: 5248, 128>}, {pipeline_mode = #tpu.pipeline_mode<synchronous>, transform_indices = @transform_3, window_bounds = array<i64: 1, 128>}, {pipeline_mode = #tpu.pipeline_mode<synchronous>, transform_indices = @transform_4, window_bounds = array<i64: 128, 128>}, {pipeline_mode = #tpu.pipeline_mode<synchronous>, transform_indices = @transform_5, window_bounds = array<i64: 1, 128>}, {pipeline_mode = #tpu.pipeline_mode<synchronous>, transform_indices = @transform_6, window_bounds = array<i64: 1, 128>}, {transform_indices = @transform_7, window_bounds = array<i64: 1, 1>}, {transform_indices = @transform_8, window_bounds = array<i64: 8, 128>}]} {
    %c0 = arith.constant 0 : index
    %c0_0 = arith.constant 0 : index
    %0 = vector.load %arg1[%c0, %c0_0] : memref<8x5248xbf16, #tpu.memory_space<vmem>>, vector<8x5248xbf16>
    %c0_1 = arith.constant 0 : index
    %c0_2 = arith.constant 0 : index
    %1 = vector.load %arg3[%c0_1, %c0_2] : memref<5248x128xbf16, #tpu.memory_space<vmem>>, vector<5248x128xbf16>
    %c0_3 = arith.constant 0 : index
    %c0_4 = arith.constant 0 : index
    %2 = vector.load %arg5[%c0_3, %c0_4] : memref<128x128xf32, #tpu.memory_space<vmem>>, vector<128x128xf32>
    %c0_5 = arith.constant 0 : index
    %c0_6 = arith.constant 0 : index
    %3 = memref.load %arg8[%c0_5, %c0_6] : memref<1x1xf32, #tpu.memory_space<smem>>
    %c0_7 = arith.constant 0 : index
    %c0_8 = arith.constant 0 : index
    %4 = vector.load %arg4[%c0_7, %c0_8] : memref<1x128xf32, #tpu.memory_space<vmem>>, vector<1x128xf32>
    %cst = arith.constant 2.000000e+00 : f32
    %5 = vector.broadcast %cst : f32 to vector<1x128xf32>
    %6 = arith.mulf %5, %4 : vector<1x128xf32>
    %7 = vector.shape_cast %6 : vector<1x128xf32> to vector<1x128xf32>
    %8 = vector.broadcast %7 : vector<1x128xf32> to vector<8x128xf32>
    %c0_9 = arith.constant 0 : index
    %c0_10 = arith.constant 0 : index
    %9 = vector.load %arg6[%c0_9, %c0_10] : memref<1x128xf32, #tpu.memory_space<vmem>>, vector<1x128xf32>
    %10 = vector.shape_cast %9 : vector<1x128xf32> to vector<1x128xf32>
    %11 = vector.broadcast %10 : vector<1x128xf32> to vector<8x128xf32>
    %c0_11 = arith.constant 0 : index
    %c0_12 = arith.constant 0 : index
    %12 = vector.load %arg7[%c0_11, %c0_12] : memref<1x128xf32, #tpu.memory_space<vmem>>, vector<1x128xf32>
    %13 = vector.shape_cast %12 : vector<1x128xf32> to vector<1x128xf32>
    %14 = vector.broadcast %13 : vector<1x128xf32> to vector<8x128xf32>
    %15 = tpu.iota {dimensions = array<i32: 1>} : vector<8x128xi32>
    %cst_13 = arith.constant 0.000000e+00 : f32
    %16 = vector.broadcast %cst_13 : f32 to vector<8x128xf32>
    %c0_14 = arith.constant 0 : index
    %c0_15 = arith.constant 0 : index
    %c0_16 = arith.constant 0 : index
    %17 = vector.load %arg2[%c0_14, %c0_15, %c0_16] : memref<4x8x5248xbf16, #tpu.memory_space<vmem>>, vector<1x8x5248xbf16>
    %18 = vector.shape_cast %17 : vector<1x8x5248xbf16> to vector<8x5248xbf16>
    %19 = arith.addf %0, %18 : vector<8x5248xbf16>
    %cst_17 = arith.constant dense<0.000000e+00> : vector<8x128xf32>
    %20 = tpu.matmul %19, %1, %cst_17 {dimension_numbers = #tpu.dot_dimension_numbers<[1], [0], [0], [1], [0, 0, 1, 1], [], []>} : vector<8x5248xbf16>, vector<5248x128xbf16>, vector<8x128xf32> -> vector<8x128xf32>
    %21 = arith.addf %20, %8 : vector<8x128xf32>
    %22 = arith.mulf %21, %21 : vector<8x128xf32>
    %23 = arith.mulf %22, %21 : vector<8x128xf32>
    %cst_18 = arith.constant 4.471500e-02 : f32
    %24 = vector.broadcast %cst_18 : f32 to vector<8x128xf32>
    %25 = arith.mulf %24, %23 : vector<8x128xf32>
    %26 = arith.addf %21, %25 : vector<8x128xf32>
    %cst_19 = arith.constant 0.797884583 : f32
    %27 = vector.broadcast %cst_19 : f32 to vector<8x128xf32>
    %28 = arith.mulf %27, %26 : vector<8x128xf32>
    %cst_20 = arith.constant 2.000000e+00 : f32
    %29 = vector.broadcast %cst_20 : f32 to vector<8x128xf32>
    %30 = arith.mulf %29, %28 : vector<8x128xf32>
    %31 = math.exp %30 : vector<8x128xf32>
    %cst_21 = arith.constant 1.000000e+00 : f32
    %32 = vector.broadcast %cst_21 : f32 to vector<8x128xf32>
    %33 = arith.addf %31, %32 : vector<8x128xf32>
    %34 = tpu.reciprocal %33 {approx = true} : vector<8x128xf32> -> vector<8x128xf32>
    %cst_22 = arith.constant 2.000000e+00 : f32
    %35 = vector.broadcast %cst_22 : f32 to vector<8x128xf32>
    %36 = arith.mulf %35, %34 : vector<8x128xf32>
    %cst_23 = arith.constant 1.000000e+00 : f32
    %37 = vector.broadcast %cst_23 : f32 to vector<8x128xf32>
    %38 = arith.subf %37, %36 : vector<8x128xf32>
    %cst_24 = arith.constant 5.000000e-01 : f32
    %39 = vector.broadcast %cst_24 : f32 to vector<8x128xf32>
    %40 = arith.mulf %39, %21 : vector<8x128xf32>
    %cst_25 = arith.constant 1.000000e+00 : f32
    %41 = vector.broadcast %cst_25 : f32 to vector<8x128xf32>
    %42 = arith.addf %41, %38 : vector<8x128xf32>
    %43 = arith.mulf %40, %42 : vector<8x128xf32>
    %cst_26 = arith.constant dense<0.000000e+00> : vector<8x128xf32>
    %44 = tpu.matmul %43, %2, %cst_26 {dimension_numbers = #tpu.dot_dimension_numbers<[1], [0], [0], [1], [0, 0, 1, 1], [], []>} : vector<8x128xf32>, vector<128x128xf32>, vector<8x128xf32> -> vector<8x128xf32>
    %45 = arith.addf %44, %11 : vector<8x128xf32>
    %46 = arith.mulf %45, %45 : vector<8x128xf32>
    %47 = arith.mulf %46, %45 : vector<8x128xf32>
    %cst_27 = arith.constant 4.471500e-02 : f32
    %48 = vector.broadcast %cst_27 : f32 to vector<8x128xf32>
    %49 = arith.mulf %48, %47 : vector<8x128xf32>
    %50 = arith.addf %45, %49 : vector<8x128xf32>
    %cst_28 = arith.constant 0.797884583 : f32
    %51 = vector.broadcast %cst_28 : f32 to vector<8x128xf32>
    %52 = arith.mulf %51, %50 : vector<8x128xf32>
    %cst_29 = arith.constant 2.000000e+00 : f32
    %53 = vector.broadcast %cst_29 : f32 to vector<8x128xf32>
    %54 = arith.mulf %53, %52 : vector<8x128xf32>
    %55 = math.exp %54 : vector<8x128xf32>
    %cst_30 = arith.constant 1.000000e+00 : f32
    %56 = vector.broadcast %cst_30 : f32 to vector<8x128xf32>
    %57 = arith.addf %55, %56 : vector<8x128xf32>
    %58 = tpu.reciprocal %57 {approx = true} : vector<8x128xf32> -> vector<8x128xf32>
    %cst_31 = arith.constant 2.000000e+00 : f32
    %59 = vector.broadcast %cst_31 : f32 to vector<8x128xf32>
    %60 = arith.mulf %59, %58 : vector<8x128xf32>
    %cst_32 = arith.constant 1.000000e+00 : f32
    %61 = vector.broadcast %cst_32 : f32 to vector<8x128xf32>
    %62 = arith.subf %61, %60 : vector<8x128xf32>
    %cst_33 = arith.constant 5.000000e-01 : f32
    %63 = vector.broadcast %cst_33 : f32 to vector<8x128xf32>
    %64 = arith.mulf %63, %45 : vector<8x128xf32>
    %cst_34 = arith.constant 1.000000e+00 : f32
    %65 = vector.broadcast %cst_34 : f32 to vector<8x128xf32>
    %66 = arith.addf %65, %62 : vector<8x128xf32>
    %67 = arith.mulf %64, %66 : vector<8x128xf32>
    %68 = arith.mulf %67, %14 : vector<8x128xf32>
    %cst_35 = arith.constant dense<0.000000e+00> : vector<8xf32>
    %69 = vector.multi_reduction <add>, %68, %cst_35 [1] : vector<8x128xf32> to vector<8xf32>
    %70 = vector.shape_cast %69 : vector<8xf32> to vector<8x1xf32>
    %71 = vector.broadcast %3 : f32 to vector<8x1xf32>
    %72 = arith.addf %70, %71 : vector<8x1xf32>
    %c0_i32 = arith.constant 0 : i32
    %73 = vector.broadcast %c0_i32 : i32 to vector<8x128xi32>
    %74 = arith.cmpi eq, %15, %73 : vector<8x128xi32>
    %cst_36 = arith.constant 0.000000e+00 : f32
    %75 = vector.shape_cast %72 : vector<8x1xf32> to vector<8x1xf32>
    %76 = vector.broadcast %75 : vector<8x1xf32> to vector<8x128xf32>
    %77 = vector.broadcast %cst_36 : f32 to vector<8x128xf32>
    %78 = arith.select %74, %76, %77 : vector<8x128xi1>, vector<8x128xf32>
    %79 = arith.addf %16, %78 : vector<8x128xf32>
    %c1 = arith.constant 1 : index
    %c0_37 = arith.constant 0 : index
    %c0_38 = arith.constant 0 : index
    %80 = vector.load %arg2[%c1, %c0_37, %c0_38] : memref<4x8x5248xbf16, #tpu.memory_space<vmem>>, vector<1x8x5248xbf16>
    %81 = vector.shape_cast %80 : vector<1x8x5248xbf16> to vector<8x5248xbf16>
    %82 = arith.addf %0, %81 : vector<8x5248xbf16>
    %cst_39 = arith.constant dense<0.000000e+00> : vector<8x128xf32>
    %83 = tpu.matmul %82, %1, %cst_39 {dimension_numbers = #tpu.dot_dimension_numbers<[1], [0], [0], [1], [0, 0, 1, 1], [], []>} : vector<8x5248xbf16>, vector<5248x128xbf16>, vector<8x128xf32> -> vector<8x128xf32>
    %84 = arith.addf %83, %8 : vector<8x128xf32>
    %85 = arith.mulf %84, %84 : vector<8x128xf32>
    %86 = arith.mulf %85, %84 : vector<8x128xf32>
    %cst_40 = arith.constant 4.471500e-02 : f32
    %87 = vector.broadcast %cst_40 : f32 to vector<8x128xf32>
    %88 = arith.mulf %87, %86 : vector<8x128xf32>
    %89 = arith.addf %84, %88 : vector<8x128xf32>
    %cst_41 = arith.constant 0.797884583 : f32
    %90 = vector.broadcast %cst_41 : f32 to vector<8x128xf32>
    %91 = arith.mulf %90, %89 : vector<8x128xf32>
    %cst_42 = arith.constant 2.000000e+00 : f32
    %92 = vector.broadcast %cst_42 : f32 to vector<8x128xf32>
    %93 = arith.mulf %92, %91 : vector<8x128xf32>
    %94 = math.exp %93 : vector<8x128xf32>
    %cst_43 = arith.constant 1.000000e+00 : f32
    %95 = vector.broadcast %cst_43 : f32 to vector<8x128xf32>
    %96 = arith.addf %94, %95 : vector<8x128xf32>
    %97 = tpu.reciprocal %96 {approx = true} : vector<8x128xf32> -> vector<8x128xf32>
    %cst_44 = arith.constant 2.000000e+00 : f32
    %98 = vector.broadcast %cst_44 : f32 to vector<8x128xf32>
    %99 = arith.mulf %98, %97 : vector<8x128xf32>
    %cst_45 = arith.constant 1.000000e+00 : f32
    %100 = vector.broadcast %cst_45 : f32 to vector<8x128xf32>
    %101 = arith.subf %100, %99 : vector<8x128xf32>
    %cst_46 = arith.constant 5.000000e-01 : f32
    %102 = vector.broadcast %cst_46 : f32 to vector<8x128xf32>
    %103 = arith.mulf %102, %84 : vector<8x128xf32>
    %cst_47 = arith.constant 1.000000e+00 : f32
    %104 = vector.broadcast %cst_47 : f32 to vector<8x128xf32>
    %105 = arith.addf %104, %101 : vector<8x128xf32>
    %106 = arith.mulf %103, %105 : vector<8x128xf32>
    %cst_48 = arith.constant dense<0.000000e+00> : vector<8x128xf32>
    %107 = tpu.matmul %106, %2, %cst_48 {dimension_numbers = #tpu.dot_dimension_numbers<[1], [0], [0], [1], [0, 0, 1, 1], [], []>} : vector<8x128xf32>, vector<128x128xf32>, vector<8x128xf32> -> vector<8x128xf32>
    %108 = arith.addf %107, %11 : vector<8x128xf32>
    %109 = arith.mulf %108, %108 : vector<8x128xf32>
    %110 = arith.mulf %109, %108 : vector<8x128xf32>
    %cst_49 = arith.constant 4.471500e-02 : f32
    %111 = vector.broadcast %cst_49 : f32 to vector<8x128xf32>
    %112 = arith.mulf %111, %110 : vector<8x128xf32>
    %113 = arith.addf %108, %112 : vector<8x128xf32>
    %cst_50 = arith.constant 0.797884583 : f32
    %114 = vector.broadcast %cst_50 : f32 to vector<8x128xf32>
    %115 = arith.mulf %114, %113 : vector<8x128xf32>
    %cst_51 = arith.constant 2.000000e+00 : f32
    %116 = vector.broadcast %cst_51 : f32 to vector<8x128xf32>
    %117 = arith.mulf %116, %115 : vector<8x128xf32>
    %118 = math.exp %117 : vector<8x128xf32>
    %cst_52 = arith.constant 1.000000e+00 : f32
    %119 = vector.broadcast %cst_52 : f32 to vector<8x128xf32>
    %120 = arith.addf %118, %119 : vector<8x128xf32>
    %121 = tpu.reciprocal %120 {approx = true} : vector<8x128xf32> -> vector<8x128xf32>
    %cst_53 = arith.constant 2.000000e+00 : f32
    %122 = vector.broadcast %cst_53 : f32 to vector<8x128xf32>
    %123 = arith.mulf %122, %121 : vector<8x128xf32>
    %cst_54 = arith.constant 1.000000e+00 : f32
    %124 = vector.broadcast %cst_54 : f32 to vector<8x128xf32>
    %125 = arith.subf %124, %123 : vector<8x128xf32>
    %cst_55 = arith.constant 5.000000e-01 : f32
    %126 = vector.broadcast %cst_55 : f32 to vector<8x128xf32>
    %127 = arith.mulf %126, %108 : vector<8x128xf32>
    %cst_56 = arith.constant 1.000000e+00 : f32
    %128 = vector.broadcast %cst_56 : f32 to vector<8x128xf32>
    %129 = arith.addf %128, %125 : vector<8x128xf32>
    %130 = arith.mulf %127, %129 : vector<8x128xf32>
    %131 = arith.mulf %130, %14 : vector<8x128xf32>
    %cst_57 = arith.constant dense<0.000000e+00> : vector<8xf32>
    %132 = vector.multi_reduction <add>, %131, %cst_57 [1] : vector<8x128xf32> to vector<8xf32>
    %133 = vector.shape_cast %132 : vector<8xf32> to vector<8x1xf32>
    %134 = vector.broadcast %3 : f32 to vector<8x1xf32>
    %135 = arith.addf %133, %134 : vector<8x1xf32>
    %c1_i32 = arith.constant 1 : i32
    %136 = vector.broadcast %c1_i32 : i32 to vector<8x128xi32>
    %137 = arith.cmpi eq, %15, %136 : vector<8x128xi32>
    %cst_58 = arith.constant 0.000000e+00 : f32
    %138 = vector.shape_cast %135 : vector<8x1xf32> to vector<8x1xf32>
    %139 = vector.broadcast %138 : vector<8x1xf32> to vector<8x128xf32>
    %140 = vector.broadcast %cst_58 : f32 to vector<8x128xf32>
    %141 = arith.select %137, %139, %140 : vector<8x128xi1>, vector<8x128xf32>
    %142 = arith.addf %79, %141 : vector<8x128xf32>
    %c2 = arith.constant 2 : index
    %c0_59 = arith.constant 0 : index
    %c0_60 = arith.constant 0 : index
    %143 = vector.load %arg2[%c2, %c0_59, %c0_60] : memref<4x8x5248xbf16, #tpu.memory_space<vmem>>, vector<1x8x5248xbf16>
    %144 = vector.shape_cast %143 : vector<1x8x5248xbf16> to vector<8x5248xbf16>
    %145 = arith.addf %0, %144 : vector<8x5248xbf16>
    %cst_61 = arith.constant dense<0.000000e+00> : vector<8x128xf32>
    %146 = tpu.matmul %145, %1, %cst_61 {dimension_numbers = #tpu.dot_dimension_numbers<[1], [0], [0], [1], [0, 0, 1, 1], [], []>} : vector<8x5248xbf16>, vector<5248x128xbf16>, vector<8x128xf32> -> vector<8x128xf32>
    %147 = arith.addf %146, %8 : vector<8x128xf32>
    %148 = arith.mulf %147, %147 : vector<8x128xf32>
    %149 = arith.mulf %148, %147 : vector<8x128xf32>
    %cst_62 = arith.constant 4.471500e-02 : f32
    %150 = vector.broadcast %cst_62 : f32 to vector<8x128xf32>
    %151 = arith.mulf %150, %149 : vector<8x128xf32>
    %152 = arith.addf %147, %151 : vector<8x128xf32>
    %cst_63 = arith.constant 0.797884583 : f32
    %153 = vector.broadcast %cst_63 : f32 to vector<8x128xf32>
    %154 = arith.mulf %153, %152 : vector<8x128xf32>
    %cst_64 = arith.constant 2.000000e+00 : f32
    %155 = vector.broadcast %cst_64 : f32 to vector<8x128xf32>
    %156 = arith.mulf %155, %154 : vector<8x128xf32>
    %157 = math.exp %156 : vector<8x128xf32>
    %cst_65 = arith.constant 1.000000e+00 : f32
    %158 = vector.broadcast %cst_65 : f32 to vector<8x128xf32>
    %159 = arith.addf %157, %158 : vector<8x128xf32>
    %160 = tpu.reciprocal %159 {approx = true} : vector<8x128xf32> -> vector<8x128xf32>
    %cst_66 = arith.constant 2.000000e+00 : f32
    %161 = vector.broadcast %cst_66 : f32 to vector<8x128xf32>
    %162 = arith.mulf %161, %160 : vector<8x128xf32>
    %cst_67 = arith.constant 1.000000e+00 : f32
    %163 = vector.broadcast %cst_67 : f32 to vector<8x128xf32>
    %164 = arith.subf %163, %162 : vector<8x128xf32>
    %cst_68 = arith.constant 5.000000e-01 : f32
    %165 = vector.broadcast %cst_68 : f32 to vector<8x128xf32>
    %166 = arith.mulf %165, %147 : vector<8x128xf32>
    %cst_69 = arith.constant 1.000000e+00 : f32
    %167 = vector.broadcast %cst_69 : f32 to vector<8x128xf32>
    %168 = arith.addf %167, %164 : vector<8x128xf32>
    %169 = arith.mulf %166, %168 : vector<8x128xf32>
    %cst_70 = arith.constant dense<0.000000e+00> : vector<8x128xf32>
    %170 = tpu.matmul %169, %2, %cst_70 {dimension_numbers = #tpu.dot_dimension_numbers<[1], [0], [0], [1], [0, 0, 1, 1], [], []>} : vector<8x128xf32>, vector<128x128xf32>, vector<8x128xf32> -> vector<8x128xf32>
    %171 = arith.addf %170, %11 : vector<8x128xf32>
    %172 = arith.mulf %171, %171 : vector<8x128xf32>
    %173 = arith.mulf %172, %171 : vector<8x128xf32>
    %cst_71 = arith.constant 4.471500e-02 : f32
    %174 = vector.broadcast %cst_71 : f32 to vector<8x128xf32>
    %175 = arith.mulf %174, %173 : vector<8x128xf32>
    %176 = arith.addf %171, %175 : vector<8x128xf32>
    %cst_72 = arith.constant 0.797884583 : f32
    %177 = vector.broadcast %cst_72 : f32 to vector<8x128xf32>
    %178 = arith.mulf %177, %176 : vector<8x128xf32>
    %cst_73 = arith.constant 2.000000e+00 : f32
    %179 = vector.broadcast %cst_73 : f32 to vector<8x128xf32>
    %180 = arith.mulf %179, %178 : vector<8x128xf32>
    %181 = math.exp %180 : vector<8x128xf32>
    %cst_74 = arith.constant 1.000000e+00 : f32
    %182 = vector.broadcast %cst_74 : f32 to vector<8x128xf32>
    %183 = arith.addf %181, %182 : vector<8x128xf32>
    %184 = tpu.reciprocal %183 {approx = true} : vector<8x128xf32> -> vector<8x128xf32>
    %cst_75 = arith.constant 2.000000e+00 : f32
    %185 = vector.broadcast %cst_75 : f32 to vector<8x128xf32>
    %186 = arith.mulf %185, %184 : vector<8x128xf32>
    %cst_76 = arith.constant 1.000000e+00 : f32
    %187 = vector.broadcast %cst_76 : f32 to vector<8x128xf32>
    %188 = arith.subf %187, %186 : vector<8x128xf32>
    %cst_77 = arith.constant 5.000000e-01 : f32
    %189 = vector.broadcast %cst_77 : f32 to vector<8x128xf32>
    %190 = arith.mulf %189, %171 : vector<8x128xf32>
    %cst_78 = arith.constant 1.000000e+00 : f32
    %191 = vector.broadcast %cst_78 : f32 to vector<8x128xf32>
    %192 = arith.addf %191, %188 : vector<8x128xf32>
    %193 = arith.mulf %190, %192 : vector<8x128xf32>
    %194 = arith.mulf %193, %14 : vector<8x128xf32>
    %cst_79 = arith.constant dense<0.000000e+00> : vector<8xf32>
    %195 = vector.multi_reduction <add>, %194, %cst_79 [1] : vector<8x128xf32> to vector<8xf32>
    %196 = vector.shape_cast %195 : vector<8xf32> to vector<8x1xf32>
    %197 = vector.broadcast %3 : f32 to vector<8x1xf32>
    %198 = arith.addf %196, %197 : vector<8x1xf32>
    %c2_i32 = arith.constant 2 : i32
    %199 = vector.broadcast %c2_i32 : i32 to vector<8x128xi32>
    %200 = arith.cmpi eq, %15, %199 : vector<8x128xi32>
    %cst_80 = arith.constant 0.000000e+00 : f32
    %201 = vector.shape_cast %198 : vector<8x1xf32> to vector<8x1xf32>
    %202 = vector.broadcast %201 : vector<8x1xf32> to vector<8x128xf32>
    %203 = vector.broadcast %cst_80 : f32 to vector<8x128xf32>
    %204 = arith.select %200, %202, %203 : vector<8x128xi1>, vector<8x128xf32>
    %205 = arith.addf %142, %204 : vector<8x128xf32>
    %c3 = arith.constant 3 : index
    %c0_81 = arith.constant 0 : index
    %c0_82 = arith.constant 0 : index
    %206 = vector.load %arg2[%c3, %c0_81, %c0_82] : memref<4x8x5248xbf16, #tpu.memory_space<vmem>>, vector<1x8x5248xbf16>
    %207 = vector.shape_cast %206 : vector<1x8x5248xbf16> to vector<8x5248xbf16>
    %208 = arith.addf %0, %207 : vector<8x5248xbf16>
    %cst_83 = arith.constant dense<0.000000e+00> : vector<8x128xf32>
    %209 = tpu.matmul %208, %1, %cst_83 {dimension_numbers = #tpu.dot_dimension_numbers<[1], [0], [0], [1], [0, 0, 1, 1], [], []>} : vector<8x5248xbf16>, vector<5248x128xbf16>, vector<8x128xf32> -> vector<8x128xf32>
    %210 = arith.addf %209, %8 : vector<8x128xf32>
    %211 = arith.mulf %210, %210 : vector<8x128xf32>
    %212 = arith.mulf %211, %210 : vector<8x128xf32>
    %cst_84 = arith.constant 4.471500e-02 : f32
    %213 = vector.broadcast %cst_84 : f32 to vector<8x128xf32>
    %214 = arith.mulf %213, %212 : vector<8x128xf32>
    %215 = arith.addf %210, %214 : vector<8x128xf32>
    %cst_85 = arith.constant 0.797884583 : f32
    %216 = vector.broadcast %cst_85 : f32 to vector<8x128xf32>
    %217 = arith.mulf %216, %215 : vector<8x128xf32>
    %cst_86 = arith.constant 2.000000e+00 : f32
    %218 = vector.broadcast %cst_86 : f32 to vector<8x128xf32>
    %219 = arith.mulf %218, %217 : vector<8x128xf32>
    %220 = math.exp %219 : vector<8x128xf32>
    %cst_87 = arith.constant 1.000000e+00 : f32
    %221 = vector.broadcast %cst_87 : f32 to vector<8x128xf32>
    %222 = arith.addf %220, %221 : vector<8x128xf32>
    %223 = tpu.reciprocal %222 {approx = true} : vector<8x128xf32> -> vector<8x128xf32>
    %cst_88 = arith.constant 2.000000e+00 : f32
    %224 = vector.broadcast %cst_88 : f32 to vector<8x128xf32>
    %225 = arith.mulf %224, %223 : vector<8x128xf32>
    %cst_89 = arith.constant 1.000000e+00 : f32
    %226 = vector.broadcast %cst_89 : f32 to vector<8x128xf32>
    %227 = arith.subf %226, %225 : vector<8x128xf32>
    %cst_90 = arith.constant 5.000000e-01 : f32
    %228 = vector.broadcast %cst_90 : f32 to vector<8x128xf32>
    %229 = arith.mulf %228, %210 : vector<8x128xf32>
    %cst_91 = arith.constant 1.000000e+00 : f32
    %230 = vector.broadcast %cst_91 : f32 to vector<8x128xf32>
    %231 = arith.addf %230, %227 : vector<8x128xf32>
    %232 = arith.mulf %229, %231 : vector<8x128xf32>
    %cst_92 = arith.constant dense<0.000000e+00> : vector<8x128xf32>
    %233 = tpu.matmul %232, %2, %cst_92 {dimension_numbers = #tpu.dot_dimension_numbers<[1], [0], [0], [1], [0, 0, 1, 1], [], []>} : vector<8x128xf32>, vector<128x128xf32>, vector<8x128xf32> -> vector<8x128xf32>
    %234 = arith.addf %233, %11 : vector<8x128xf32>
    %235 = arith.mulf %234, %234 : vector<8x128xf32>
    %236 = arith.mulf %235, %234 : vector<8x128xf32>
    %cst_93 = arith.constant 4.471500e-02 : f32
    %237 = vector.broadcast %cst_93 : f32 to vector<8x128xf32>
    %238 = arith.mulf %237, %236 : vector<8x128xf32>
    %239 = arith.addf %234, %238 : vector<8x128xf32>
    %cst_94 = arith.constant 0.797884583 : f32
    %240 = vector.broadcast %cst_94 : f32 to vector<8x128xf32>
    %241 = arith.mulf %240, %239 : vector<8x128xf32>
    %cst_95 = arith.constant 2.000000e+00 : f32
    %242 = vector.broadcast %cst_95 : f32 to vector<8x128xf32>
    %243 = arith.mulf %242, %241 : vector<8x128xf32>
    %244 = math.exp %243 : vector<8x128xf32>
    %cst_96 = arith.constant 1.000000e+00 : f32
    %245 = vector.broadcast %cst_96 : f32 to vector<8x128xf32>
    %246 = arith.addf %244, %245 : vector<8x128xf32>
    %247 = tpu.reciprocal %246 {approx = true} : vector<8x128xf32> -> vector<8x128xf32>
    %cst_97 = arith.constant 2.000000e+00 : f32
    %248 = vector.broadcast %cst_97 : f32 to vector<8x128xf32>
    %249 = arith.mulf %248, %247 : vector<8x128xf32>
    %cst_98 = arith.constant 1.000000e+00 : f32
    %250 = vector.broadcast %cst_98 : f32 to vector<8x128xf32>
    %251 = arith.subf %250, %249 : vector<8x128xf32>
    %cst_99 = arith.constant 5.000000e-01 : f32
    %252 = vector.broadcast %cst_99 : f32 to vector<8x128xf32>
    %253 = arith.mulf %252, %234 : vector<8x128xf32>
    %cst_100 = arith.constant 1.000000e+00 : f32
    %254 = vector.broadcast %cst_100 : f32 to vector<8x128xf32>
    %255 = arith.addf %254, %251 : vector<8x128xf32>
    %256 = arith.mulf %253, %255 : vector<8x128xf32>
    %257 = arith.mulf %256, %14 : vector<8x128xf32>
    %cst_101 = arith.constant dense<0.000000e+00> : vector<8xf32>
    %258 = vector.multi_reduction <add>, %257, %cst_101 [1] : vector<8x128xf32> to vector<8xf32>
    %259 = vector.shape_cast %258 : vector<8xf32> to vector<8x1xf32>
    %260 = vector.broadcast %3 : f32 to vector<8x1xf32>
    %261 = arith.addf %259, %260 : vector<8x1xf32>
    %c3_i32 = arith.constant 3 : i32
    %262 = vector.broadcast %c3_i32 : i32 to vector<8x128xi32>
    %263 = arith.cmpi eq, %15, %262 : vector<8x128xi32>
    %cst_102 = arith.constant 0.000000e+00 : f32
    %264 = vector.shape_cast %261 : vector<8x1xf32> to vector<8x1xf32>
    %265 = vector.broadcast %264 : vector<8x1xf32> to vector<8x128xf32>
    %266 = vector.broadcast %cst_102 : f32 to vector<8x128xf32>
    %267 = arith.select %263, %265, %266 : vector<8x128xi1>, vector<8x128xf32>
    %268 = arith.addf %205, %267 : vector<8x128xf32>
    %c0_103 = arith.constant 0 : index
    %c0_104 = arith.constant 0 : index
    %269 = vector.load %arg9[%c0_103, %c0_104] : memref<8x128xf32, #tpu.memory_space<vmem>>, vector<8x128xf32>
    tpu.vector_store %arg9[%c0_103, %c0_104], %268 {strides = array<i32>} : memref<8x128xf32, #tpu.memory_space<vmem>>, vector<8x128xf32>,
    return
  }
  func.func @transform_0(%arg0: i32) -> (i32, i32) {
    %c0_i32 = arith.constant 0 : i32
    %c0_i32_0 = arith.constant 0 : i32
    return %arg0, %c0_i32 : i32, i32
  }
  func.func @transform_1(%arg0: i32) -> (i32, i32, i32) {
    %c0_i32 = arith.constant 0 : i32
    %c0_i32_0 = arith.constant 0 : i32
    %c0_i32_1 = arith.constant 0 : i32
    return %c0_i32, %arg0, %c0_i32_0 : i32, i32, i32
  }
  func.func @transform_2(%arg0: i32) -> (i32, i32) {
    %c0_i32 = arith.constant 0 : i32
    %c0_i32_0 = arith.constant 0 : i32
    %c0_i32_1 = arith.constant 0 : i32
    return %c0_i32, %c0_i32_0 : i32, i32
  }
  func.func @transform_3(%arg0: i32) -> (i32, i32) {
    %c0_i32 = arith.constant 0 : i32
    %c0_i32_0 = arith.constant 0 : i32
    %c0_i32_1 = arith.constant 0 : i32
    return %c0_i32, %c0_i32_0 : i32, i32
  }
  func.func @transform_4(%arg0: i32) -> (i32, i32) {
    %c0_i32 = arith.constant 0 : i32
    %c0_i32_0 = arith.constant 0 : i32
    %c0_i32_1 = arith.constant 0 : i32
    return %c0_i32, %c0_i32_0 : i32, i32
  }
  func.func @transform_5(%arg0: i32) -> (i32, i32) {
    %c0_i32 = arith.constant 0 : i32
    %c0_i32_0 = arith.constant 0 : i32
    %c0_i32_1 = arith.constant 0 : i32
    return %c0_i32, %c0_i32_0 : i32, i32
  }
  func.func @transform_6(%arg0: i32) -> (i32, i32) {
    %c0_i32 = arith.constant 0 : i32
    %c0_i32_0 = arith.constant 0 : i32
    %c0_i32_1 = arith.constant 0 : i32
    return %c0_i32, %c0_i32_0 : i32, i32
  }
  func.func @transform_7(%arg0: i32) -> (i32, i32) {
    %c0_i32 = arith.constant 0 : i32
    %c0_i32_0 = arith.constant 0 : i32
    %c0_i32_1 = arith.constant 0 : i32
    return %c0_i32, %c0_i32_0 : i32, i32
  }
  func.func @transform_8(%arg0: i32) -> (i32, i32) {
    %c0_i32 = arith.constant 0 : i32
    %c0_i32_0 = arith.constant 0 : i32
    return %arg0, %c0_i32 : i32, i32
  }
}

</mosaic_0001>

<bundles_post_ra>
// kernel: forward.1
= control target key start
LH: loop header
LB: loop body
LE: loop exit
PB: predicated region body
PF: predicated region fallthrough
CT: control target
= control target key end

     0   :  { %vm11361_vm0 = vmmov 0   ;;  %s16494_s2 = inlined_call_operand.vmem [shape: bf16[5248,128], index: 2, kind: input, shape index: {}]   ;;  %s16495_s0 = inlined_call_operand.vmem [shape: bf16[8,5248], index: 0, kind: input, shape index: {}]   ;;  %s16496_s1 = inlined_call_operand.vmem [shape: bf16[4,8,5248], index: 1, kind: input, shape index: {}]   ;;  %s16497_s3 = inlined_call_operand.vmem [shape: f32[1,128], index: 3, kind: input, shape index: {}]   ;;  %s16498_s4 = inlined_call_operand.vmem [shape: f32[128,128], index: 4, kind: input, shape index: {}]   ;;  %s16499_s5 = inlined_call_operand.vmem [shape: f32[1,128], index: 5, kind: input, shape index: {}]   ;;  %s16500_s6 = inlined_call_operand.vmem [shape: f32[1,128], index: 6, kind: input, shape index: {}]   ;;  %s16501_s7 = inlined_call_operand.<no memory space> [shape: f32[1,1], index: 7, kind: input, shape index: {}]   ;;  %s16502_s8 = inlined_call_operand.vmem [shape: f32[8,128], index: 8, kind: output, shape index: {}]  }
   0x1   :  { %v9901_v0 = vld [vmem:[%s16494_s2 + $0x78] sm:$0xff]   ;;  %v9905_v4 = vld [vmem:[%s16494_s2 + $0x70] sm:$0xff]   ;;  %v9909_v8 = vld [vmem:[%s16494_s2 + $0x68] sm:$0xff]  }
   0x2   :  { %v9902_v1 = vld [vmem:[%s16494_s2 + $0x38] sm:$0xff]   ;;  %7815 = vmatprep.subr.bf16.mxu0 %v9901_v0  ;;  %v9906_v5 = vld [vmem:[%s16494_s2 + $0x30] sm:$0xff]   ;;  %v9910_v9 = vld [vmem:[%s16494_s2 + $0x28] sm:$0xff]  }
   0x3   :  { %v9903_v2 = vld [vmem:[%s16494_s2 + $0xf8] sm:$0xff]   ;;  %7816 = vmatpush3.bf16.msra.mxu0 %v9902_v1  ;;  %v9907_v6 = vld [vmem:[%s16494_s2 + $0xf0] sm:$0xff]   ;;  %v9911_v10 = vld [vmem:[%s16494_s2 + $0xe8] sm:$0xff]  }
   0x4   :  { %v9904_v3 = vld [vmem:[%s16494_s2 + $0xb8] sm:$0xff]   ;;  %7837 = vmatprep.subr.bf16.mxu1 %v9903_v2  ;;  %7817 = vmatprep.subr.bf16.mxu0 %v9905_v4  ;;  %v9908_v7 = vld [vmem:[%s16494_s2 + $0xb0] sm:$0xff]   ;;  %v9912_v11 = vld [vmem:[%s16494_s2 + $0xa8] sm:$0xff]  }
   0x5   :  { %7838 = vmatpush3.bf16.msra.mxu1 %v9904_v3  ;;  %v9913_v12 = vld [vmem:[%s16494_s2 + $0x60] sm:$0xff]   ;;  %v9917_v16 = vld [vmem:[%s16494_s2 + $0x58] sm:$0xff]   ;;  %v9921_v20 = vld [vmem:[%s16494_s2 + $0x50] sm:$0xff]  }
   0x6   :  { %7839 = vmatprep.subr.bf16.mxu1 %v9907_v6  ;;  %v9914_v13 = vld [vmem:[%s16494_s2 + $0x20] sm:$0xff]   ;;  %v9918_v17 = vld [vmem:[%s16494_s2 + $0x18] sm:$0xff]   ;;  %v9922_v21 = vld [vmem:[%s16494_s2 + $0x10] sm:$0xff]  }
   0x7   :  { %7818 = vmatpush3.bf16.msra.mxu0 %v9906_v5  ;;  %v9915_v14 = vld [vmem:[%s16494_s2 + $0xe0] sm:$0xff]   ;;  %v9919_v18 = vld [vmem:[%s16494_s2 + $0xd8] sm:$0xff]   ;;  %v9923_v22 = vld [vmem:[%s16494_s2 + $0xd0] sm:$0xff]  }
   0x8   :  { %7819 = vmatprep.subr.bf16.mxu0 %v9909_v8  ;;  %v9916_v15 = vld [vmem:[%s16494_s2 + $0xa0] sm:$0xff]   ;;  %v9920_v19 = vld [vmem:[%s16494_s2 + $0x98] sm:$0xff]   ;;  %v9924_v23 = vld [vmem:[%s16494_s2 + $0x90] sm:$0xff]  }
   0x9   :  { %7840 = vmatpush3.bf16.msra.mxu1 %v9908_v7  ;;  %v9925_v24 = vld [vmem:[%s16494_s2 + $0x48] sm:$0xff]   ;;  %v9929_v28 = vld [vmem:[%s16494_s2 + $0x40] sm:$0xff]   ;;  %v9933_v35 = vld [vmem:[%s16494_s2 + $0x178] sm:$0xff]  }
   0xa   :  { %7841 = vmatprep.subr.bf16.mxu1 %v9911_v10  ;;  %v9926_v25 = vld [vmem:[%s16494_s2 + $0x8] sm:$0xff]   ;;  %v9930_v29 = vld [vmem:[%s16494_s2] sm:$0xff]   ;;  %v9934_v41 = vld [vmem:[%s16494_s2 + $0x138] sm:$0xff]  }
   0xb   :  { %7820 = vmatpush3.bf16.msra.mxu0 %v9910_v9  ;;  %v9927_v26 = vld [vmem:[%s16494_s2 + $0xc8] sm:$0xff]   ;;  %v9931_v30 = vld [vmem:[%s16494_s2 + $0xc0] sm:$0xff]   ;;  %v9935_v42 = vld [vmem:[%s16494_s2 + $0x1f8] sm:$0xff]  }
   0xc   :  { %7821 = vmatprep.subr.bf16.mxu0 %v9913_v12  ;;  %v9928_v27 = vld [vmem:[%s16494_s2 + $0x88] sm:$0xff]   ;;  %v31_v31 = vld [vmem:[%s16495_s0] sm:$0xff]  ;;  %v9936_v45 = vld [vmem:[%s16494_s2 + $0x1b8] sm:$0xff]  }
   0xd   :  { %7842 = vmatpush3.bf16.msra.mxu1 %v9912_v11  ;;  %v749_v32 = vld [vmem:[%s16496_s1] sm:$0xff]  ;;  %v32_v36 = vld [vmem:[%s16495_s0 + $0x8] sm:$0xff]  ;;  %v9937_v46 = vld [vmem:[%s16494_s2 + $0x170] sm:$0xff]  }
   0xe   :  { %7843 = vmatprep.subr.bf16.mxu1 %v9915_v14  ;;  %v770_v33 = vadd.bf16 %v749_v32, %v31_v31  ;;  %v9932_v34 = vld [vmem:[%s16494_s2 + $0x80] sm:$0xff]   ;;  %v750_v39 = vld [vmem:[%s16496_s1 + $0x8] sm:$0xff]  ;;  %v9938_v47 = vld [vmem:[%s16494_s2 + $0x130] sm:$0xff]  }
   0xf   :  { %7822 = vmatpush3.bf16.msra.mxu0 %v9914_v13  ;;  %v771_v40 = vadd.bf16 %v750_v39, %v32_v36  ;;  %v9939_v48 = vld [vmem:[%s16494_s2 + $0x1f0] sm:$0xff]   ;;  %v9941_v50 = vld [vmem:[%s16494_s2 + $0x168] sm:$0xff]   ;;  %v9945_v54 = vld [vmem:[%s16494_s2 + $0x160] sm:$0xff]  }
  0x10   :  { %7823 = vmatprep.subr.bf16.mxu0 %v9917_v16  ;;  %v7261_v37 = vcombine.high %v770_v33, %v770_v33  ;;  %v7260_v38 = vcombine.low %v770_v33, %v770_v33  ;;  %v9940_v49 = vld [vmem:[%s16494_s2 + $0x1b0] sm:$0xff]   ;;  %v9942_v51 = vld [vmem:[%s16494_s2 + $0x128] sm:$0xff]   ;;  %v9946_v55 = vld [vmem:[%s16494_s2 + $0x120] sm:$0xff]  }
  0x11   :  { %7844 = vmatpush3.bf16.msra.mxu1 %v9916_v15  ;;  %v7263_v43 = vcombine.high %v771_v40, %v771_v40  ;;  %v7262_v44 = vcombine.low %v771_v40, %v771_v40  ;;  %v9943_v52 = vld [vmem:[%s16494_s2 + $0x1e8] sm:$0xff]   ;;  %v9947_v56 = vld [vmem:[%s16494_s2 + $0x1e0] sm:$0xff]   ;;  %v9949_v58 = vld [vmem:[%s16494_s2 + $0x158] sm:$0xff]  }
  0x12   :  { %7845 = vmatprep.subr.bf16.mxu1 %v9919_v18  ;;  %2935 = vmatprep.mubr.bf16.mxu0 %v7261_v37  ;;  %v9944_v53 = vld [vmem:[%s16494_s2 + $0x1a8] sm:$0xff]   ;;  %v9948_v57 = vld [vmem:[%s16494_s2 + $0x1a0] sm:$0xff]   ;;  %v9950_v59 = vld [vmem:[%s16494_s2 + $0x118] sm:$0xff]  }
  0x13   :  { %7824 = vmatpush3.bf16.msra.mxu0 %v9918_v17  ;;  %2975 = vmatprep.mubr.bf16.mxu1 %v7263_v43  ;;  %v9951_v60 = vld [vmem:[%s16494_s2 + $0x1d8] sm:$0xff]   ;;  %v9953_v62 = vld [vmem:[%s16494_s2 + $0x150] sm:$0xff]   ;;  %v9957_v2 = vld [vmem:[%s16494_s2 + $0x148] sm:$0xff]  }
  0x14   :  { %7825 = vmatprep.subr.bf16.mxu0 %v9921_v20  ;;  %v9952_v61 = vld [vmem:[%s16494_s2 + $0x198] sm:$0xff]   ;;  %v9954_v63 = vld [vmem:[%s16494_s2 + $0x110] sm:$0xff]   ;;  %v9958_v3 = vld [vmem:[%s16494_s2 + $0x108] sm:$0xff]  }
  0x15   :  { %7846 = vmatpush3.bf16.msra.mxu1 %v9920_v19  ;;  %v9955_v0 = vld [vmem:[%s16494_s2 + $0x1d0] sm:$0xff]   ;;  %v9959_v4 = vld [vmem:[%s16494_s2 + $0x1c8] sm:$0xff]   ;;  %v9961_v6 = vld [vmem:[%s16494_s2 + $0x140] sm:$0xff]  }
  0x16   :  { %7847 = vmatprep.subr.bf16.mxu1 %v9923_v22  ;;  %v9956_v1 = vld [vmem:[%s16494_s2 + $0x190] sm:$0xff]   ;;  %v9960_v5 = vld [vmem:[%s16494_s2 + $0x188] sm:$0xff]   ;;  %v9962_v7 = vld [vmem:[%s16494_s2 + $0x100] sm:$0xff]  }
  0x17   :  { %7826 = vmatpush3.bf16.msra.mxu0 %v9922_v21  ;;  %v9963_v8 = vld [vmem:[%s16494_s2 + $0x1c0] sm:$0xff]   ;;  %v33_v9 = vld [vmem:[%s16495_s0 + $0x10] sm:$0xff]  ;;  %v9965_v13 = vld [vmem:[%s16494_s2 + $0x278] sm:$0xff]  }
  0x18   :  { %7827 = vmatprep.subr.bf16.mxu0 %v9925_v24  ;;  %v751_v10 = vld [vmem:[%s16496_s1 + $0x10] sm:$0xff]  ;;  %v9964_v12 = vld [vmem:[%s16494_s2 + $0x180] sm:$0xff]   ;;  %v34_v16 = vld [vmem:[%s16495_s0 + $0x18] sm:$0xff] }
  0x19   :  { %7848 = vmatpush3.bf16.msra.mxu1 %v9924_v23  ;;  %v772_v11 = vadd.bf16 %v751_v10, %v33_v9  ;;  %v752_v17 = vld [vmem:[%s16496_s1 + $0x18] sm:$0xff]  ;;  %v9969_v24 = vld [vmem:[%s16494_s2 + $0x270] sm:$0xff]   ;;  %v9976_v31 = vld [vmem:[%s16494_s2 + $0x2a8] sm:$0xff]  }
  0x1a   :  { %7849 = vmatprep.subr.bf16.mxu1 %v9927_v26  ;;  %v773_v18 = vadd.bf16 %v752_v17, %v34_v16  ;;  %v9966_v19 = vld [vmem:[%s16494_s2 + $0x238] sm:$0xff]   ;;  %v9971_v26 = vld [vmem:[%s16494_s2 + $0x2f0] sm:$0xff]   ;;  %v9977_v32 = vld [vmem:[%s16494_s2 + $0x260] sm:$0xff]  }
  0x1b   :  { %7828 = vmatpush3.bf16.msra.mxu0 %v9926_v25  ;;  %v7265_v14 = vcombine.high %v772_v11, %v772_v11  ;;  %v7264_v15 = vcombine.low %v772_v11, %v772_v11  ;;  %v9967_v20 = vld [vmem:[%s16494_s2 + $0x2f8] sm:$0xff]   ;;  %v9970_v25 = vld [vmem:[%s16494_s2 + $0x230] sm:$0xff]   ;;  %v9978_v33 = vld [vmem:[%s16494_s2 + $0x220] sm:$0xff]  }
  0x1c   :  { %7829 = vmatprep.subr.bf16.mxu0 %v9929_v28  ;;  %v7267_v21 = vcombine.high %v773_v18, %v773_v18  ;;  %v7266_v22 = vcombine.low %v773_v18, %v773_v18  ;;  %v9968_v23 = vld [vmem:[%s16494_s2 + $0x2b8] sm:$0xff]   ;;  %v9973_v28 = vld [vmem:[%s16494_s2 + $0x268] sm:$0xff]   ;;  %v9985_v40 = vld [vmem:[%s16494_s2 + $0x250] sm:$0xff]  }
  0x1d   :  { %7850 = vmatpush3.bf16.msra.mxu1 %v9928_v27  ;;  %v9972_v27 = vld [vmem:[%s16494_s2 + $0x2b0] sm:$0xff]   ;;  %v9981_v36 = vld [vmem:[%s16494_s2 + $0x258] sm:$0xff]   ;;  %v10008_v9 = vld [vmem:[%s16494_s2 + $0x3a8] sm:$0xff]  }
  0x1e   :  { %7851 = vmatprep.subr.bf16.mxu1 %v9931_v30  ;;  %v9975_v30 = vld [vmem:[%s16494_s2 + $0x2e8] sm:$0xff]   ;;  %v9982_v37 = vld [vmem:[%s16494_s2 + $0x218] sm:$0xff]   ;;  %v9988_v43 = vld [vmem:[%s16494_s2 + $0x290] sm:$0xff]  }
  0x1f   :  { %7830 = vmatpush3.bf16.msra.mxu0 %v9930_v29  ;;  %v9974_v29 = vld [vmem:[%s16494_s2 + $0x228] sm:$0xff]   ;;  %v9984_v39 = vld [vmem:[%s16494_s2 + $0x298] sm:$0xff]   ;;  %v10009_v10 = vld [vmem:[%s16494_s2 + $0x360] sm:$0xff]  }
  0x20   :  { %7859 = vmatprep.subr.bf16.mxu0 %v9933_v35  ;;  %v9980_v35 = vld [vmem:[%s16494_s2 + $0x2a0] sm:$0xff]   ;;  %v10015_v16 = vld [vmem:[%s16494_s2 + $0x3d8] sm:$0xff]   ;;  %v10017_v18 = vld [vmem:[%s16494_s2 + $0x350] sm:$0xff]  }
  0x21   :  { %7852 = vmatpush3.bf16.msra.mxu1 %v9932_v34  ;;  %v9979_v34 = vld [vmem:[%s16494_s2 + $0x2e0] sm:$0xff]   ;;  %v10016_v17 = vld [vmem:[%s16494_s2 + $0x398] sm:$0xff]  }
  0x22   :  { %2936 = vmatmul.mubr.bf16.vlgmr.msra.gmra.mxu0 %v7260_v38  ;;  %7881 = vmatprep.subr.bf16.mxu1 %v9935_v42  ;;  %v9983_v38 = vld [vmem:[%s16494_s2 + $0x2d8] sm:$0xff]   ;;  %v9987_v42 = vld [vmem:[%s16494_s2 + $0x2d0] sm:$0xff]   ;;  %v10010_v11 = vld [vmem:[%s16494_s2 + $0x320] sm:$0xff]  }
  0x23   :  { %7860 = vmatpush3.bf16.msra.mxu0 %v9934_v41  ;;  %3015 = vmatprep.mubr.bf16.mxu0 %v7265_v14  ;;  %v9986_v41 = vld [vmem:[%s16494_s2 + $0x210] sm:$0xff]   ;;  %v10013_v14 = vld [vmem:[%s16494_s2 + $0x358] sm:$0xff]  }
  0x24   :  { %2976 = vmatmul.mubr.bf16.vlgmr.msra.gmra.mxu1 %v7262_v44  ;;  %7861 = vmatprep.subr.bf16.mxu0 %v9937_v46  ;;  %v9989_v44 = vld [vmem:[%s16494_s2 + $0x248] sm:$0xff]  }
  0x25   :  { %7882 = vmatpush3.bf16.msra.mxu1 %v9936_v45  ;;  %3055 = vmatprep.mubr.bf16.mxu1 %v7267_v21  ;;  %v9990_v45 = vld [vmem:[%s16494_s2 + $0x208] sm:$0xff]   ;;  %v10020_v21 = vld [vmem:[%s16494_s2 + $0x390] sm:$0xff]  }
  0x26   :  { %7883 = vmatprep.subr.bf16.mxu1 %v9939_v48  ;;  %v9991_v46 = vld [vmem:[%s16494_s2 + $0x2c8] sm:$0xff]   ;;  %v9993_v48 = vld [vmem:[%s16494_s2 + $0x240] sm:$0xff]  }
  0x27   :  { %7862 = vmatpush3.bf16.msra.mxu0 %v9938_v47  ;;  %v9992_v47 = vld [vmem:[%s16494_s2 + $0x288] sm:$0xff]  }
  0x28   :  { %7863 = vmatprep.subr.bf16.mxu0 %v9941_v50  ;;  %v9995_v50 = vld [vmem:[%s16494_s2 + $0x2c0] sm:$0xff]  }
  0x29   :  { %7884 = vmatpush3.bf16.msra.mxu1 %v9940_v49  ;;  %v9994_v49 = vld [vmem:[%s16494_s2 + $0x200] sm:$0xff]  }
  0x2a   :  { %7885 = vmatprep.subr.bf16.mxu1 %v9943_v52  ;;  %v753_v52 = vld [vmem:[%s16496_s1 + $0x20] sm:$0xff] }
  0x2b   :  { %7864 = vmatpush3.bf16.msra.mxu0 %v9942_v51  ;;  %v35_v51 = vld [vmem:[%s16495_s0 + $0x20] sm:$0xff] }
  0x2c   :  { %7865 = vmatprep.subr.bf16.mxu0 %v9945_v54  ;;  %v9996_v54 = vld [vmem:[%s16494_s2 + $0x280] sm:$0xff]  }
  0x2d   :  { %7886 = vmatpush3.bf16.msra.mxu1 %v9944_v53  ;;  %v774_v53 = vadd.bf16 %v753_v52, %v35_v51  ;;  %v10040_v51 = vld [vmem:[%s16494_s2 + $0x4a8] sm:$0xff]   ;;  %v10041_v52 = vld [vmem:[%s16494_s2 + $0x460] sm:$0xff]  }
  0x2e   :  { %7887 = vmatprep.subr.bf16.mxu1 %v9947_v56  ;;  %v36_v56 = vld [vmem:[%s16495_s0 + $0x28] sm:$0xff] }
  0x2f   :  { %7866 = vmatpush3.bf16.msra.mxu0 %v9946_v55  ;;  %v9997_v55 = vld [vmem:[%s16494_s2 + $0x378] sm:$0xff]  }
  0x30   :  { %7867 = vmatprep.subr.bf16.mxu0 %v9949_v58  ;;  %v7269_v58 = vcombine.high %v774_v53, %v774_v53 }
  0x31   :  { %7888 = vmatpush3.bf16.msra.mxu1 %v9948_v57  ;;  %v754_v57 = vld [vmem:[%s16496_s1 + $0x28] sm:$0xff] }
  0x32   :  { %7889 = vmatprep.subr.bf16.mxu1 %v9951_v60  ;;  %v775_v60 = vadd.bf16 %v754_v57, %v36_v56  ;;  %v10045_v56 = vld [vmem:[%s16494_s2 + $0x458] sm:$0xff]  }
  0x33   :  { %7868 = vmatpush3.bf16.msra.mxu0 %v9950_v59  ;;  %v7268_v59 = vcombine.low %v774_v53, %v774_v53  ;;  %v10042_v53 = vld [vmem:[%s16494_s2 + $0x420] sm:$0xff]   ;;  %v10046_v57 = vld [vmem:[%s16494_s2 + $0x418] sm:$0xff]  }
  0x34   :  { %7869 = vmatprep.subr.bf16.mxu0 %v9953_v62  ;;  %v9999_v62 = vld [vmem:[%s16494_s2 + $0x3f8] sm:$0xff]  }
  0x35   :  { %7890 = vmatpush3.bf16.msra.mxu1 %v9952_v61  ;;  %v9998_v61 = vld [vmem:[%s16494_s2 + $0x338] sm:$0xff]  }
  0x36   :  { %7891 = vmatprep.subr.bf16.mxu1 %v9955_v0  ;;  %v7270_v0 = vcombine.low %v775_v60, %v775_v60 }
  0x37   :  { %7870 = vmatpush3.bf16.msra.mxu0 %v9954_v63  ;;  %v7271_v63 = vcombine.high %v775_v60, %v775_v60  ;;  %v10049_v60 = vld [vmem:[%s16494_s2 + $0x450] sm:$0xff]  }
  0x38   :  { %7871 = vmatprep.subr.bf16.mxu0 %v9957_v2  ;;  %v10001_v2 = vld [vmem:[%s16494_s2 + $0x370] sm:$0xff]  }
  0x39   :  { %7892 = vmatpush3.bf16.msra.mxu1 %v9956_v1  ;;  %v10000_v1 = vld [vmem:[%s16494_s2 + $0x3b8] sm:$0xff]  }
  0x3a   :  { %7893 = vmatprep.subr.bf16.mxu1 %v9959_v4  ;;  %v10003_v4 = vld [vmem:[%s16494_s2 + $0x3f0] sm:$0xff]  }
  0x3b   :  { %7872 = vmatpush3.bf16.msra.mxu0 %v9958_v3  ;;  %v10002_v3 = vld [vmem:[%s16494_s2 + $0x330] sm:$0xff]  }
  0x3c   :  { %7873 = vmatprep.subr.bf16.mxu0 %v9961_v6  ;;  %v10005_v6 = vld [vmem:[%s16494_s2 + $0x368] sm:$0xff]  }
  0x3d   :  { %7894 = vmatpush3.bf16.msra.mxu1 %v9960_v5  ;;  %v10004_v5 = vld [vmem:[%s16494_s2 + $0x3b0] sm:$0xff]  }
  0x3e   :  { %7895 = vmatprep.subr.bf16.mxu1 %v9963_v8  ;;  %v10007_v8 = vld [vmem:[%s16494_s2 + $0x3e8] sm:$0xff]  }
  0x3f   :  { %7874 = vmatpush3.bf16.msra.mxu0 %v9962_v7  ;;  %v10006_v7 = vld [vmem:[%s16494_s2 + $0x328] sm:$0xff]  }
  0x40   :  { %7903 = vmatprep.subr.bf16.mxu0 %v9965_v13  ;;  %v10012_v13 = vld [vmem:[%s16494_s2 + $0x3a0] sm:$0xff]  }
  0x41   :  { %7896 = vmatpush3.bf16.msra.mxu1 %v9964_v12  ;;  %v10011_v12 = vld [vmem:[%s16494_s2 + $0x3e0] sm:$0xff]  }
  0x42   :  { %3016 = vmatmul.mubr.bf16.vlgmr.msra.gmra.mxu0 %v7264_v15  ;;  %7925 = vmatprep.subr.bf16.mxu1 %v9967_v20  ;;  %v10014_v15 = vld [vmem:[%s16494_s2 + $0x318] sm:$0xff]   ;;  %v10019_v20 = vld [vmem:[%s16494_s2 + $0x3d0] sm:$0xff]  }
  0x43   :  { %7904 = vmatpush3.bf16.msra.mxu0 %v9966_v19  ;;  %3095 = vmatprep.mubr.bf16.mxu0 %v7269_v58  ;;  %v10018_v19 = vld [vmem:[%s16494_s2 + $0x310] sm:$0xff]   ;;  %v10047_v58 = vld [vmem:[%s16494_s2 + $0x4d8] sm:$0xff]  }
  0x44   :  { %3056 = vmatmul.mubr.bf16.vlgmr.msra.gmra.mxu1 %v7266_v22  ;;  %7905 = vmatprep.subr.bf16.mxu0 %v9969_v24  ;;  %v10021_v22 = vld [vmem:[%s16494_s2 + $0x348] sm:$0xff]  }
  0x45   :  { %7926 = vmatpush3.bf16.msra.mxu1 %v9968_v23  ;;  %3135 = vmatprep.mubr.bf16.mxu1 %v7271_v63  ;;  %v10022_v23 = vld [vmem:[%s16494_s2 + $0x308] sm:$0xff]   ;;  %v10052_v63 = vld [vmem:[%s16494_s2 + $0x490] sm:$0xff]  }
  0x46   :  { %7927 = vmatprep.subr.bf16.mxu1 %v9971_v26  ;;  %v10023_v24 = vld [vmem:[%s16494_s2 + $0x3c8] sm:$0xff]   ;;  %v10025_v26 = vld [vmem:[%s16494_s2 + $0x340] sm:$0xff]  }
  0x47   :  { %7906 = vmatpush3.bf16.msra.mxu0 %v9970_v25  ;;  %v10024_v25 = vld [vmem:[%s16494_s2 + $0x388] sm:$0xff]  }
  0x48   :  { %7907 = vmatprep.subr.bf16.mxu0 %v9973_v28  ;;  %v10027_v28 = vld [vmem:[%s16494_s2 + $0x3c0] sm:$0xff]  }
  0x49   :  { %7928 = vmatpush3.bf16.msra.mxu1 %v9972_v27  ;;  %v10026_v27 = vld [vmem:[%s16494_s2 + $0x300] sm:$0xff]  }
  0x4a   :  { %7929 = vmatprep.subr.bf16.mxu1 %v9975_v30  ;;  %v755_v30 = vld [vmem:[%s16496_s1 + $0x30] sm:$0xff] }
  0x4b   :  { %7908 = vmatpush3.bf16.msra.mxu0 %v9974_v29  ;;  %v37_v29 = vld [vmem:[%s16495_s0 + $0x30] sm:$0xff] }
  0x4c   :  { %7909 = vmatprep.subr.bf16.mxu0 %v9977_v32  ;;  %v10028_v32 = vld [vmem:[%s16494_s2 + $0x380] sm:$0xff]  }
  0x4d   :  { %7930 = vmatpush3.bf16.msra.mxu1 %v9976_v31  ;;  %v776_v31 = vadd.bf16 %v755_v30, %v37_v29  ;;  %v10072_v29 = vld [vmem:[%s16494_s2 + $0x5a8] sm:$0xff]   ;;  %v10073_v30 = vld [vmem:[%s16494_s2 + $0x560] sm:$0xff]  }
  0x4e   :  { %7931 = vmatprep.subr.bf16.mxu1 %v9979_v34  ;;  %v38_v34 = vld [vmem:[%s16495_s0 + $0x38] sm:$0xff] }
  0x4f   :  { %7910 = vmatpush3.bf16.msra.mxu0 %v9978_v33  ;;  %v10029_v33 = vld [vmem:[%s16494_s2 + $0x478] sm:$0xff]  }
  0x50   :  { %7911 = vmatprep.subr.bf16.mxu0 %v9981_v36  ;;  %v7272_v36 = vcombine.low %v776_v31, %v776_v31 }
  0x51   :  { %7932 = vmatpush3.bf16.msra.mxu1 %v9980_v35  ;;  %v7273_v35 = vcombine.high %v776_v31, %v776_v31  ;;  %v10074_v31 = vld [vmem:[%s16494_s2 + $0x520] sm:$0xff]  }
  0x52   :  { %7933 = vmatprep.subr.bf16.mxu1 %v9983_v38 }
  0x53   :  { %7912 = vmatpush3.bf16.msra.mxu0 %v9982_v37  ;;  %v756_v37 = vld [vmem:[%s16496_s1 + $0x38] sm:$0xff] }
  0x54   :  { %7913 = vmatprep.subr.bf16.mxu0 %v9985_v40  ;;  %v777_v38 = vadd.bf16 %v756_v37, %v38_v34  ;;  %v10031_v40 = vld [vmem:[%s16494_s2 + $0x4f8] sm:$0xff]  }
  0x55   :  { %7934 = vmatpush3.bf16.msra.mxu1 %v9984_v39  ;;  %v10030_v39 = vld [vmem:[%s16494_s2 + $0x438] sm:$0xff]  }
  0x56   :  { %7935 = vmatprep.subr.bf16.mxu1 %v9987_v42  ;;  %v7274_v42 = vcombine.low %v777_v38, %v777_v38  ;;  %v10077_v34 = vld [vmem:[%s16494_s2 + $0x558] sm:$0xff]  }
  0x57   :  { %7914 = vmatpush3.bf16.msra.mxu0 %v9986_v41  ;;  %v7275_v41 = vcombine.high %v777_v38, %v777_v38  ;;  %v10080_v37 = vld [vmem:[%s16494_s2 + $0x598] sm:$0xff]   ;;  %v10081_v38 = vld [vmem:[%s16494_s2 + $0x550] sm:$0xff]  }
  0x58   :  { %7915 = vmatprep.subr.bf16.mxu0 %v9989_v44  ;;  %v10033_v44 = vld [vmem:[%s16494_s2 + $0x470] sm:$0xff]  }
  0x59   :  { %7936 = vmatpush3.bf16.msra.mxu1 %v9988_v43  ;;  %v10032_v43 = vld [vmem:[%s16494_s2 + $0x4b8] sm:$0xff]  }
  0x5a   :  { %7937 = vmatprep.subr.bf16.mxu1 %v9991_v46  ;;  %v10035_v46 = vld [vmem:[%s16494_s2 + $0x4f0] sm:$0xff]  }
  0x5b   :  { %7916 = vmatpush3.bf16.msra.mxu0 %v9990_v45  ;;  %v10034_v45 = vld [vmem:[%s16494_s2 + $0x430] sm:$0xff]  }
  0x5c   :  { %7917 = vmatprep.subr.bf16.mxu0 %v9993_v48  ;;  %v10037_v48 = vld [vmem:[%s16494_s2 + $0x468] sm:$0xff]  }
  0x5d   :  { %7938 = vmatpush3.bf16.msra.mxu1 %v9992_v47  ;;  %v10036_v47 = vld [vmem:[%s16494_s2 + $0x4b0] sm:$0xff]  }
  0x5e   :  { %7939 = vmatprep.subr.bf16.mxu1 %v9995_v50  ;;  %v10039_v50 = vld [vmem:[%s16494_s2 + $0x4e8] sm:$0xff]  }
  0x5f   :  { %7918 = vmatpush3.bf16.msra.mxu0 %v9994_v49  ;;  %v10038_v49 = vld [vmem:[%s16494_s2 + $0x428] sm:$0xff]  }
  0x60   :  { %7947 = vmatprep.subr.bf16.mxu0 %v9997_v55  ;;  %v10044_v55 = vld [vmem:[%s16494_s2 + $0x4a0] sm:$0xff]  }
  0x61   :  { %7940 = vmatpush3.bf16.msra.mxu1 %v9996_v54  ;;  %v10043_v54 = vld [vmem:[%s16494_s2 + $0x4e0] sm:$0xff]  }
  0x62   :  { %3096 = vmatmul.mubr.bf16.vlgmr.msra.gmra.mxu0 %v7268_v59  ;;  %7969 = vmatprep.subr.bf16.mxu1 %v9999_v62  ;;  %v10048_v59 = vld [vmem:[%s16494_s2 + $0x498] sm:$0xff]   ;;  %v10051_v62 = vld [vmem:[%s16494_s2 + $0x4d0] sm:$0xff]  }
  0x63   :  { %7948 = vmatpush3.bf16.msra.mxu0 %v9998_v61  ;;  %3175 = vmatprep.mubr.bf16.mxu0 %v7273_v35  ;;  %v10050_v61 = vld [vmem:[%s16494_s2 + $0x410] sm:$0xff]   ;;  %v10078_v35 = vld [vmem:[%s16494_s2 + $0x518] sm:$0xff]  }
  0x64   :  { %3136 = vmatmul.mubr.bf16.vlgmr.msra.gmra.mxu1 %v7270_v0  ;;  %7949 = vmatprep.subr.bf16.mxu0 %v10001_v2  ;;  %v10053_v0 = vld [vmem:[%s16494_s2 + $0x448] sm:$0xff]  }
  0x65   :  { %7970 = vmatpush3.bf16.msra.mxu1 %v10000_v1  ;;  %3215 = vmatprep.mubr.bf16.mxu1 %v7275_v41  ;;  %v10054_v1 = vld [vmem:[%s16494_s2 + $0x408] sm:$0xff]   ;;  %v10084_v41 = vld [vmem:[%s16494_s2 + $0x590] sm:$0xff]  }
  0x66   :  { %7971 = vmatprep.subr.bf16.mxu1 %v10003_v4  ;;  %v10055_v2 = vld [vmem:[%s16494_s2 + $0x4c8] sm:$0xff]   ;;  %v10057_v4 = vld [vmem:[%s16494_s2 + $0x440] sm:$0xff]  }
  0x67   :  { %7950 = vmatpush3.bf16.msra.mxu0 %v10002_v3  ;;  %v10056_v3 = vld [vmem:[%s16494_s2 + $0x488] sm:$0xff]  }
  0x68   :  { %7951 = vmatprep.subr.bf16.mxu0 %v10005_v6  ;;  %v10059_v6 = vld [vmem:[%s16494_s2 + $0x4c0] sm:$0xff]  }
  0x69   :  { %7972 = vmatpush3.bf16.msra.mxu1 %v10004_v5  ;;  %v10058_v5 = vld [vmem:[%s16494_s2 + $0x400] sm:$0xff]  }
  0x6a   :  { %7973 = vmatprep.subr.bf16.mxu1 %v10007_v8  ;;  %v757_v8 = vld [vmem:[%s16496_s1 + $0x40] sm:$0xff] }
  0x6b   :  { %7952 = vmatpush3.bf16.msra.mxu0 %v10006_v7  ;;  %v39_v7 = vld [vmem:[%s16495_s0 + $0x40] sm:$0xff] }
  0x6c   :  { %7953 = vmatprep.subr.bf16.mxu0 %v10009_v10  ;;  %v10060_v10 = vld [vmem:[%s16494_s2 + $0x480] sm:$0xff]  }
  0x6d   :  { %7974 = vmatpush3.bf16.msra.mxu1 %v10008_v9  ;;  %v778_v9 = vadd.bf16 %v757_v8, %v39_v7  ;;  %v10104_v7 = vld [vmem:[%s16494_s2 + $0x6a8] sm:$0xff]   ;;  %v10105_v8 = vld [vmem:[%s16494_s2 + $0x660] sm:$0xff]  }
  0x6e   :  { %7975 = vmatprep.subr.bf16.mxu1 %v10011_v12 }
  0x6f   :  { %7954 = vmatpush3.bf16.msra.mxu0 %v10010_v11  ;;  %v10061_v11 = vld [vmem:[%s16494_s2 + $0x578] sm:$0xff]   ;;  %v7277_v12 = vcombine.high %v778_v9, %v778_v9 }
  0x70   :  { %7955 = vmatprep.subr.bf16.mxu0 %v10013_v14  ;;  %v40_v14 = vld [vmem:[%s16495_s0 + $0x48] sm:$0xff] }
  0x71   :  { %7976 = vmatpush3.bf16.msra.mxu1 %v10012_v13  ;;  %v7276_v13 = vcombine.low %v778_v9, %v778_v9  ;;  %v10106_v9 = vld [vmem:[%s16494_s2 + $0x620] sm:$0xff]  }
  0x72   :  { %7977 = vmatprep.subr.bf16.mxu1 %v10015_v16 }
  0x73   :  { %7956 = vmatpush3.bf16.msra.mxu0 %v10014_v15  ;;  %v758_v15 = vld [vmem:[%s16496_s1 + $0x48] sm:$0xff] }
  0x74   :  { %7957 = vmatprep.subr.bf16.mxu0 %v10017_v18  ;;  %v779_v16 = vadd.bf16 %v758_v15, %v40_v14  ;;  %v10063_v18 = vld [vmem:[%s16494_s2 + $0x5f8] sm:$0xff]  }
  0x75   :  { %7978 = vmatpush3.bf16.msra.mxu1 %v10016_v17  ;;  %v10062_v17 = vld [vmem:[%s16494_s2 + $0x538] sm:$0xff]  }
  0x76   :  { %7979 = vmatprep.subr.bf16.mxu1 %v10019_v20  ;;  %v7278_v20 = vcombine.low %v779_v16, %v779_v16  ;;  %v10111_v14 = vld [vmem:[%s16494_s2 + $0x6d8] sm:$0xff]  }
  0x77   :  { %7958 = vmatpush3.bf16.msra.mxu0 %v10018_v19  ;;  %v7279_v19 = vcombine.high %v779_v16, %v779_v16  ;;  %v10112_v15 = vld [vmem:[%s16494_s2 + $0x698] sm:$0xff]   ;;  %v10113_v16 = vld [vmem:[%s16494_s2 + $0x650] sm:$0xff]  }
  0x78   :  { %7959 = vmatprep.subr.bf16.mxu0 %v10021_v22  ;;  %v10065_v22 = vld [vmem:[%s16494_s2 + $0x570] sm:$0xff]  }
  0x79   :  { %7980 = vmatpush3.bf16.msra.mxu1 %v10020_v21  ;;  %v10064_v21 = vld [vmem:[%s16494_s2 + $0x5b8] sm:$0xff]  }
  0x7a   :  { %7981 = vmatprep.subr.bf16.mxu1 %v10023_v24  ;;  %v10067_v24 = vld [vmem:[%s16494_s2 + $0x5f0] sm:$0xff]  }
  0x7b   :  { %7960 = vmatpush3.bf16.msra.mxu0 %v10022_v23  ;;  %v10066_v23 = vld [vmem:[%s16494_s2 + $0x530] sm:$0xff]  }
  0x7c   :  { %7961 = vmatprep.subr.bf16.mxu0 %v10025_v26  ;;  %v10069_v26 = vld [vmem:[%s16494_s2 + $0x568] sm:$0xff]  }
  0x7d   :  { %7982 = vmatpush3.bf16.msra.mxu1 %v10024_v25  ;;  %v10068_v25 = vld [vmem:[%s16494_s2 + $0x5b0] sm:$0xff]  }
  0x7e   :  { %7983 = vmatprep.subr.bf16.mxu1 %v10027_v28  ;;  %v10071_v28 = vld [vmem:[%s16494_s2 + $0x5e8] sm:$0xff]  }
  0x7f   :  { %7962 = vmatpush3.bf16.msra.mxu0 %v10026_v27  ;;  %v10070_v27 = vld [vmem:[%s16494_s2 + $0x528] sm:$0xff]  }
  0x80   :  { %7991 = vmatprep.subr.bf16.mxu0 %v10029_v33  ;;  %v10076_v33 = vld [vmem:[%s16494_s2 + $0x5a0] sm:$0xff]  }
  0x81   :  { %7984 = vmatpush3.bf16.msra.mxu1 %v10028_v32  ;;  %v10075_v32 = vld [vmem:[%s16494_s2 + $0x5e0] sm:$0xff]  }
  0x82   :  { %3176 = vmatmul.mubr.bf16.vlgmr.msra.gmra.mxu0 %v7272_v36  ;;  %8013 = vmatprep.subr.bf16.mxu1 %v10031_v40  ;;  %v10079_v36 = vld [vmem:[%s16494_s2 + $0x5d8] sm:$0xff]   ;;  %v10083_v40 = vld [vmem:[%s16494_s2 + $0x5d0] sm:$0xff]  }
  0x83   :  { %7992 = vmatpush3.bf16.msra.mxu0 %v10030_v39  ;;  %3255 = vmatprep.mubr.bf16.mxu0 %v7277_v12  ;;  %v10082_v39 = vld [vmem:[%s16494_s2 + $0x510] sm:$0xff]   ;;  %v10109_v12 = vld [vmem:[%s16494_s2 + $0x658] sm:$0xff]  }
  0x84   :  { %3216 = vmatmul.mubr.bf16.vlgmr.msra.gmra.mxu1 %v7274_v42  ;;  %7993 = vmatprep.subr.bf16.mxu0 %v10033_v44  ;;  %v10085_v42 = vld [vmem:[%s16494_s2 + $0x548] sm:$0xff]  }
  0x85   :  { %8014 = vmatpush3.bf16.msra.mxu1 %v10032_v43  ;;  %3295 = vmatprep.mubr.bf16.mxu1 %v7279_v19  ;;  %v10086_v43 = vld [vmem:[%s16494_s2 + $0x508] sm:$0xff]   ;;  %v10116_v19 = vld [vmem:[%s16494_s2 + $0x690] sm:$0xff]  }
  0x86   :  { %8015 = vmatprep.subr.bf16.mxu1 %v10035_v46  ;;  %v10087_v44 = vld [vmem:[%s16494_s2 + $0x5c8] sm:$0xff]   ;;  %v10089_v46 = vld [vmem:[%s16494_s2 + $0x540] sm:$0xff]  }
  0x87   :  { %7994 = vmatpush3.bf16.msra.mxu0 %v10034_v45  ;;  %v10088_v45 = vld [vmem:[%s16494_s2 + $0x588] sm:$0xff]  }
  0x88   :  { %7995 = vmatprep.subr.bf16.mxu0 %v10037_v48  ;;  %v10091_v48 = vld [vmem:[%s16494_s2 + $0x5c0] sm:$0xff]  }
  0x89   :  { %8016 = vmatpush3.bf16.msra.mxu1 %v10036_v47  ;;  %v10090_v47 = vld [vmem:[%s16494_s2 + $0x500] sm:$0xff]  }
  0x8a   :  { %8017 = vmatprep.subr.bf16.mxu1 %v10039_v50  ;;  %v759_v50 = vld [vmem:[%s16496_s1 + $0x50] sm:$0xff] }
  0x8b   :  { %7996 = vmatpush3.bf16.msra.mxu0 %v10038_v49  ;;  %v41_v49 = vld [vmem:[%s16495_s0 + $0x50] sm:$0xff] }
  0x8c   :  { %7997 = vmatprep.subr.bf16.mxu0 %v10041_v52  ;;  %v10092_v52 = vld [vmem:[%s16494_s2 + $0x580] sm:$0xff]  }
  0x8d   :  { %8018 = vmatpush3.bf16.msra.mxu1 %v10040_v51  ;;  %v780_v51 = vadd.bf16 %v759_v50, %v41_v49 }
  0x8e   :  { %8019 = vmatprep.subr.bf16.mxu1 %v10043_v54  ;;  %v42_v54 = vld [vmem:[%s16495_s0 + $0x58] sm:$0xff] }
  0x8f   :  { %7998 = vmatpush3.bf16.msra.mxu0 %v10042_v53  ;;  %v10093_v53 = vld [vmem:[%s16494_s2 + $0x678] sm:$0xff]  }
  0x90   :  { %7999 = vmatprep.subr.bf16.mxu0 %v10045_v56  ;;  %v7281_v56 = vcombine.high %v780_v51, %v780_v51 }
  0x91   :  { %8020 = vmatpush3.bf16.msra.mxu1 %v10044_v55  ;;  %v760_v55 = vld [vmem:[%s16496_s1 + $0x58] sm:$0xff] }
  0x92   :  { %8021 = vmatprep.subr.bf16.mxu1 %v10047_v58  ;;  %v781_v58 = vadd.bf16 %v760_v55, %v42_v54  ;;  %v10128_v55 = vld [vmem:[%s16494_s2 + $0x7b8] sm:$0xff]  }
  0x93   :  { %8000 = vmatpush3.bf16.msra.mxu0 %v10046_v57  ;;  %v7280_v57 = vcombine.low %v780_v51, %v780_v51  ;;  %v10127_v51 = vld [vmem:[%s16494_s2 + $0x7f8] sm:$0xff]  }
  0x94   :  { %8001 = vmatprep.subr.bf16.mxu0 %v10049_v60  ;;  %v10095_v60 = vld [vmem:[%s16494_s2 + $0x6f8] sm:$0xff]  }
  0x95   :  { %8022 = vmatpush3.bf16.msra.mxu1 %v10048_v59  ;;  %v10094_v59 = vld [vmem:[%s16494_s2 + $0x638] sm:$0xff]  }
  0x96   :  { %8023 = vmatprep.subr.bf16.mxu1 %v10051_v62  ;;  %v7282_v62 = vcombine.low %v781_v58, %v781_v58 }
  0x97   :  { %8002 = vmatpush3.bf16.msra.mxu0 %v10050_v61  ;;  %v7283_v61 = vcombine.high %v781_v58, %v781_v58 }
  0x98   :  { %8003 = vmatprep.subr.bf16.mxu0 %v10053_v0  ;;  %v10097_v0 = vld [vmem:[%s16494_s2 + $0x670] sm:$0xff]  }
  0x99   :  { %8024 = vmatpush3.bf16.msra.mxu1 %v10052_v63  ;;  %v10096_v63 = vld [vmem:[%s16494_s2 + $0x6b8] sm:$0xff]  }
  0x9a   :  { %8025 = vmatprep.subr.bf16.mxu1 %v10055_v2  ;;  %v10099_v2 = vld [vmem:[%s16494_s2 + $0x6f0] sm:$0xff]  }
  0x9b   :  { %8004 = vmatpush3.bf16.msra.mxu0 %v10054_v1  ;;  %v10098_v1 = vld [vmem:[%s16494_s2 + $0x630] sm:$0xff]  }
  0x9c   :  { %8005 = vmatprep.subr.bf16.mxu0 %v10057_v4  ;;  %v10101_v4 = vld [vmem:[%s16494_s2 + $0x668] sm:$0xff]  }
  0x9d   :  { %8026 = vmatpush3.bf16.msra.mxu1 %v10056_v3  ;;  %v10100_v3 = vld [vmem:[%s16494_s2 + $0x6b0] sm:$0xff]  }
  0x9e   :  { %8027 = vmatprep.subr.bf16.mxu1 %v10059_v6  ;;  %v10103_v6 = vld [vmem:[%s16494_s2 + $0x6e8] sm:$0xff]  }
  0x9f   :  { %8006 = vmatpush3.bf16.msra.mxu0 %v10058_v5  ;;  %v10102_v5 = vld [vmem:[%s16494_s2 + $0x628] sm:$0xff]  }
  0xa0   :  { %8035 = vmatprep.subr.bf16.mxu0 %v10061_v11  ;;  %v10108_v11 = vld [vmem:[%s16494_s2 + $0x6a0] sm:$0xff]  }
  0xa1   :  { %8028 = vmatpush3.bf16.msra.mxu1 %v10060_v10  ;;  %v10107_v10 = vld [vmem:[%s16494_s2 + $0x6e0] sm:$0xff]  }
  0xa2   :  { %3256 = vmatmul.mubr.bf16.vlgmr.msra.gmra.mxu0 %v7276_v13  ;;  %8057 = vmatprep.subr.bf16.mxu1 %v10063_v18  ;;  %v10110_v13 = vld [vmem:[%s16494_s2 + $0x618] sm:$0xff]   ;;  %v10115_v18 = vld [vmem:[%s16494_s2 + $0x6d0] sm:$0xff]  }
  0xa3   :  { %8036 = vmatpush3.bf16.msra.mxu0 %v10062_v17  ;;  %3335 = vmatprep.mubr.bf16.mxu0 %v7281_v56  ;;  %v10114_v17 = vld [vmem:[%s16494_s2 + $0x610] sm:$0xff]  }
  0xa4   :  { %3296 = vmatmul.mubr.bf16.vlgmr.msra.gmra.mxu1 %v7278_v20  ;;  %8037 = vmatprep.subr.bf16.mxu0 %v10065_v22  ;;  %v10117_v20 = vld [vmem:[%s16494_s2 + $0x648] sm:$0xff]  }
  0xa5   :  { %8058 = vmatpush3.bf16.msra.mxu1 %v10064_v21  ;;  %3375 = vmatprep.mubr.bf16.mxu1 %v7283_v61  ;;  %v10118_v21 = vld [vmem:[%s16494_s2 + $0x608] sm:$0xff]   ;;  %v10131_v61 = vld [vmem:[%s16494_s2 + $0x7f0] sm:$0xff]  }
  0xa6   :  { %8059 = vmatprep.subr.bf16.mxu1 %v10067_v24  ;;  %v10119_v22 = vld [vmem:[%s16494_s2 + $0x6c8] sm:$0xff]  }
  0xa7   :  { %8038 = vmatpush3.bf16.msra.mxu0 %v10066_v23  ;;  %v728_v23 = vlaneseq  ;;  %v10120_v24 = vld [vmem:[%s16494_s2 + $0x688] sm:$0xff]  }
  0xa8   :  { %8039 = vmatprep.subr.bf16.mxu0 %v10069_v26  ;;  %v10122_v26 = vld [vmem:[%s16494_s2 + $0x600] sm:$0xff]  }
  0xa9   :  { %8060 = vmatpush3.bf16.msra.mxu1 %v10068_v25  ;;  %v10121_v25 = vld [vmem:[%s16494_s2 + $0x640] sm:$0xff]  }
  0xaa   :  { %8061 = vmatprep.subr.bf16.mxu1 %v10071_v28  ;;  %v10123_v28 = vld [vmem:[%s16494_s2 + $0x6c0] sm:$0xff]  }
  0xab   :  { %8040 = vmatpush3.bf16.msra.mxu0 %v10070_v27 }
  0xac   :  { %8041 = vmatprep.subr.bf16.mxu0 %v10073_v30  ;;  %v43_v30 = vld [vmem:[%s16495_s0 + $0x60] sm:$0xff] }
  0xad   :  { %8062 = vmatpush3.bf16.msra.mxu1 %v10072_v29  ;;  %v729_v29 = vshrl.u32 %v728_v23, 7 }
  0xae   :  { %8063 = vmatprep.subr.bf16.mxu1 %v10075_v32 }
  0xaf   :  { %8042 = vmatpush3.bf16.msra.mxu0 %v10074_v31  ;;  %v761_v31 = vld [vmem:[%s16496_s1 + $0x60] sm:$0xff] }
  0xb0   :  { %8043 = vmatprep.subr.bf16.mxu0 %v10077_v34  ;;  %v10124_v34 = vld [vmem:[%s16494_s2 + $0x680] sm:$0xff]  }
  0xb1   :  { %8064 = vmatpush3.bf16.msra.mxu1 %v10076_v33  ;;  %v782_v33 = vadd.bf16 %v761_v31, %v43_v30  ;;  %v10156_v31 = vld [vmem:[%s16494_s2 + $0x780] sm:$0xff]  }
  0xb2   :  { %8065 = vmatprep.subr.bf16.mxu1 %v10079_v36 }
  0xb3   :  { %8044 = vmatpush3.bf16.msra.mxu0 %v10078_v35 }
  0xb4   :  { %8045 = vmatprep.subr.bf16.mxu0 %v10081_v38  ;;  %v44_v38 = vld [vmem:[%s16495_s0 + $0x68] sm:$0xff] }
  0xb5   :  { %8066 = vmatpush3.bf16.msra.mxu1 %v10080_v37  ;;  %v10125_v37 = vld [vmem:[%s16494_s2 + $0x778] sm:$0xff]  }
  0xb6   :  { %8067 = vmatprep.subr.bf16.mxu1 %v10083_v40  ;;  %v7285_v40 = vcombine.high %v782_v33, %v782_v33 }
  0xb7   :  { %8046 = vmatpush3.bf16.msra.mxu0 %v10082_v39 }
  0xb8   :  { %8047 = vmatprep.subr.bf16.mxu0 %v10085_v42  ;;  %v762_v42 = vld [vmem:[%s16496_s1 + $0x68] sm:$0xff] }
  0xb9   :  { %8068 = vmatpush3.bf16.msra.mxu1 %v10084_v41  ;;  %v7284_v41 = vcombine.low %v782_v33, %v782_v33  ;;  %v10157_v33 = vld [vmem:[%s16494_s2 + $0x878] sm:$0xff]  }
  0xba   :  { %8069 = vmatprep.subr.bf16.mxu1 %v10087_v44 }
  0xbb   :  { %8048 = vmatpush3.bf16.msra.mxu0 %v10086_v43  ;;  %v730_v43 = vsub.s32 0, %v729_v29 }
  0xbc   :  { %8049 = vmatprep.subr.bf16.mxu0 %v10089_v46  ;;  %v10126_v46 = vld [vmem:[%s16494_s2 + $0x738] sm:$0xff]  }
  0xbd   :  { %8070 = vmatpush3.bf16.msra.mxu1 %v10088_v45  ;;  %v783_v45 = vadd.bf16 %v762_v42, %v44_v38 }
  0xbe   :  { %8071 = vmatprep.subr.bf16.mxu1 %v10091_v48 }
  0xbf   :  { %8050 = vmatpush3.bf16.msra.mxu0 %v10090_v47  ;;  %v725_v47 = vld [vmem:[%s16497_s3] sm:$0x1]  ;;  %v7286_v54 = vcombine.low %v783_v45, %v783_v45 }
  0xc0   :  { %8079 = vmatprep.subr.bf16.mxu0 %v10093_v53  ;;  %v726_v50 = vmul.f32 2.0, %v725_v47  ;;  %v7287_v53 = vcombine.high %v783_v45, %v783_v45 }
  0xc1   :  { %8072 = vmatpush3.bf16.msra.mxu1 %v10092_v52 }
  0xc2   :  { %3336 = vmatmul.mubr.bf16.vlgmr.msra.gmra.mxu0 %v7280_v57  ;;  %8101 = vmatprep.subr.bf16.mxu1 %v10095_v60  ;;  %v12179_v56 = vrot.slane %v726_v50, %v730_v43  ;;  %v10129_v57 = vld [vmem:[%s16494_s2 + $0x770] sm:$0xff]  }
  0xc3   :  { %8080 = vmatpush3.bf16.msra.mxu0 %v10094_v59  ;;  %3415 = vmatprep.mubr.bf16.mxu0 %v7285_v40  ;;  %v10130_v59 = vld [vmem:[%s16494_s2 + $0x730] sm:$0xff]  }
  0xc4   :  { %3376 = vmatmul.mubr.bf16.vlgmr.msra.gmra.mxu1 %v7282_v62  ;;  %8081 = vmatprep.subr.bf16.mxu0 %v10097_v0  ;;  %v10132_v62 = vld [vmem:[%s16494_s2 + $0x7b0] sm:$0xff]   ;;  %v10133_v0 = vld [vmem:[%s16494_s2 + $0x768] sm:$0xff]  }
  0xc5   :  { %8102 = vmatpush3.bf16.msra.mxu1 %v10096_v63  ;;  %3455 = vmatprep.mubr.bf16.mxu1 %v7287_v53  ;;  %v10161_v50 = vld [vmem:[%s16494_s2 + $0x870] sm:$0xff]  }
  0xc6   :  { %8103 = vmatprep.subr.bf16.mxu1 %v10099_v2  ;;  %v10135_v2 = vld [vmem:[%s16494_s2 + $0x7e8] sm:$0xff]   ;;  %v10163_v53 = vld [vmem:[%s16494_s2 + $0x8f0] sm:$0xff]  }
  0xc7   :  { %8082 = vmatpush3.bf16.msra.mxu0 %v10098_v1  ;;  %v10134_v1 = vld [vmem:[%s16494_s2 + $0x728] sm:$0xff]  }
  0xc8   :  { %8083 = vmatprep.subr.bf16.mxu0 %v10101_v4  ;;  %v10137_v4 = vld [vmem:[%s16494_s2 + $0x760] sm:$0xff]  }
  0xc9   :  { %8104 = vmatpush3.bf16.msra.mxu1 %v10100_v3  ;;  %v10136_v3 = vld [vmem:[%s16494_s2 + $0x7a8] sm:$0xff]  }
  0xca   :  { %8105 = vmatprep.subr.bf16.mxu1 %v10103_v6  ;;  %v10139_v6 = vld [vmem:[%s16494_s2 + $0x7e0] sm:$0xff]  }
  0xcb   :  { %8084 = vmatpush3.bf16.msra.mxu0 %v10102_v5  ;;  %v10138_v5 = vld [vmem:[%s16494_s2 + $0x720] sm:$0xff]  }
  0xcc   :  { %8085 = vmatprep.subr.bf16.mxu0 %v10105_v8  ;;  %v10141_v8 = vld [vmem:[%s16494_s2 + $0x758] sm:$0xff]  }
  0xcd   :  { %8106 = vmatpush3.bf16.msra.mxu1 %v10104_v7  ;;  %v10140_v7 = vld [vmem:[%s16494_s2 + $0x7a0] sm:$0xff]  }
  0xce   :  { %8107 = vmatprep.subr.bf16.mxu1 %v10107_v10  ;;  %v10143_v10 = vld [vmem:[%s16494_s2 + $0x7d8] sm:$0xff]  }
  0xcf   :  { %8086 = vmatpush3.bf16.msra.mxu0 %v10106_v9  ;;  %v10142_v9 = vld [vmem:[%s16494_s2 + $0x718] sm:$0xff]  }
  0xd0   :  { %8087 = vmatprep.subr.bf16.mxu0 %v10109_v12  ;;  %v10145_v12 = vld [vmem:[%s16494_s2 + $0x750] sm:$0xff]  }
  0xd1   :  { %8108 = vmatpush3.bf16.msra.mxu1 %v10108_v11  ;;  %v10144_v11 = vld [vmem:[%s16494_s2 + $0x798] sm:$0xff]  }
  0xd2   :  { %8109 = vmatprep.subr.bf16.mxu1 %v10111_v14  ;;  %v10147_v14 = vld [vmem:[%s16494_s2 + $0x7d0] sm:$0xff]  }
  0xd3   :  { %8088 = vmatpush3.bf16.msra.mxu0 %v10110_v13  ;;  %v10146_v13 = vld [vmem:[%s16494_s2 + $0x710] sm:$0xff]  }
  0xd4   :  { %8089 = vmatprep.subr.bf16.mxu0 %v10113_v16  ;;  %v10149_v16 = vld [vmem:[%s16494_s2 + $0x748] sm:$0xff]  }
  0xd5   :  { %8110 = vmatpush3.bf16.msra.mxu1 %v10112_v15  ;;  %v10148_v15 = vld [vmem:[%s16494_s2 + $0x790] sm:$0xff]  }
  0xd6   :  { %8111 = vmatprep.subr.bf16.mxu1 %v10115_v18  ;;  %v10151_v18 = vld [vmem:[%s16494_s2 + $0x7c8] sm:$0xff]  }
  0xd7   :  { %8090 = vmatpush3.bf16.msra.mxu0 %v10114_v17  ;;  %v10150_v17 = vld [vmem:[%s16494_s2 + $0x708] sm:$0xff]  }
  0xd8   :  { %8091 = vmatprep.subr.bf16.mxu0 %v10117_v20  ;;  %v10153_v20 = vld [vmem:[%s16494_s2 + $0x740] sm:$0xff]  }
  0xd9   :  { %8112 = vmatpush3.bf16.msra.mxu1 %v10116_v19  ;;  %v10152_v19 = vld [vmem:[%s16494_s2 + $0x788] sm:$0xff]  }
  0xda   :  { %8113 = vmatprep.subr.bf16.mxu1 %v10119_v22  ;;  %v10154_v22 = vld [vmem:[%s16494_s2 + $0x700] sm:$0xff]  }
  0xdb   :  { %8092 = vmatpush3.bf16.msra.mxu0 %v10118_v21 }
  0xdc   :  { %8093 = vmatprep.subr.bf16.mxu0 %v10121_v25  ;;  %v45_v25 = vld [vmem:[%s16495_s0 + $0x70] sm:$0xff] }
  0xdd   :  { %8114 = vmatpush3.bf16.msra.mxu1 %v10120_v24  ;;  %v10155_v24 = vld [vmem:[%s16494_s2 + $0x7c0] sm:$0xff]  }
  0xde   :  { %8115 = vmatprep.subr.bf16.mxu1 %v10123_v28 }
  0xdf   :  { %8094 = vmatpush3.bf16.msra.mxu0 %v10122_v26 }
  0xe0   :  { %8123 = vmatprep.subr.bf16.mxu0 %v10125_v37 }
  0xe1   :  { %8116 = vmatpush3.bf16.msra.mxu1 %v10124_v34  ;;  %v46_v34 = vld [vmem:[%s16495_s0 + $0x78] sm:$0xff] }
  0xe2   :  { %v7831_v27 = vpop.f32.mrf.mxu0  ;;  %3416 = vmatmul.mubr.bf16.vlgmr.msra.gmra.mxu0 %v7284_v41  ;;  %8145 = vmatprep.subr.bf16.mxu1 %v10127_v51  ;;  %v10158_v41 = vld [vmem:[%s16494_s2 + $0x838] sm:$0xff]  }
  0xe3   :  { %8124 = vmatpush3.bf16.msra.mxu0 %v10126_v46 }
  0xe4   :  { %v7832_v32 = vpop.f32.mrf.mxu0  ;;  %v7853_v36 = vpop.f32.mrf.mxu1  ;;  %3456 = vmatmul.mubr.bf16.vlgmr.msra.gmra.mxu1 %v7286_v54  ;;  %8125 = vmatprep.subr.bf16.mxu0 %v10129_v57  ;;  %v10164_v54 = vld [vmem:[%s16494_s2 + $0x8b0] sm:$0xff]   ;;  %v10166_v57 = vld [vmem:[%s16494_s2 + $0x828] sm:$0xff]  }
  0xe5   :  { %v7833_v35 = vadd.f32 %v7832_v32, %v7831_v27  ;;  %8146 = vmatpush3.bf16.msra.mxu1 %v10128_v55  ;;  %v763_v27 = vld [vmem:[%s16496_s1 + $0x70] sm:$0xff]  ;;  %v10165_v55 = vld [vmem:[%s16494_s2 + $0x868] sm:$0xff]  }
  0xe6   :  { %v7834_v39 = vpop.f32.mrf.mxu0  ;;  %v7854_v44 = vpop.f32.mrf.mxu1  ;;  %8147 = vmatprep.subr.bf16.mxu1 %v10131_v61  ;;  %v784_v30 = vadd.bf16 %v763_v27, %v45_v25  ;;  %v10170_v61 = vld [vmem:[%s16494_s2 + $0x820] sm:$0xff]   ;;  %v48_v25 = vld [vmem:[%s16495_s0 + $0x88] sm:$0xff] }
  0xe7   :  { %v7855_v48 = vadd.f32 %v7854_v44, %v7853_v36  ;;  %v2938_v60 = vadd.f32 %v7833_v35, %v12179_v56  ;;  %8126 = vmatpush3.bf16.msra.mxu0 %v10130_v59  ;;  %v764_v35 = vld [vmem:[%s16496_s1 + $0x78] sm:$0xff]  ;;  %v10168_v59 = vld [vmem:[%s16494_s2 + $0x8a8] sm:$0xff]  }
  0xe8   :  { %v7835_v49 = vpop.f32.mrf.mxu0  ;;  %v7856_v52 = vpop.f32.mrf.mxu1  ;;  %8127 = vmatprep.subr.bf16.mxu0 %v10133_v0  ;;  %v7289_v38 = vcombine.high %v784_v30, %v784_v30  ;;  %v7288_v39 = vcombine.low %v784_v30, %v784_v30  ;;  %v785_v40 = vadd.bf16 %v764_v35, %v46_v34  ;;  %v10159_v44 = vld [vmem:[%s16494_s2 + $0x8f8] sm:$0xff]   ;;  %v766_v30 = vld [vmem:[%s16496_s1 + $0x88] sm:$0xff] }
  0xe9   :  { %v2978_v63 = vadd.f32 %v7855_v48, %v2938_v60  ;;  %8148 = vmatpush3.bf16.msra.mxu1 %v10132_v62  ;;  %v10160_v48 = vld [vmem:[%s16494_s2 + $0x8b8] sm:$0xff]   ;;  %v10162_v52 = vld [vmem:[%s16494_s2 + $0x830] sm:$0xff]   ;;  %v10169_v60 = vld [vmem:[%s16494_s2 + $0x860] sm:$0xff]  }
  0xea   :  { %v7857_v58 = vpop.f32.mrf.mxu1  ;;  %8149 = vmatprep.subr.bf16.mxu1 %v10135_v2  ;;  %3495 = vmatprep.mubr.bf16.mxu0 %v7289_v38  ;;  %v7291_v46 = vcombine.high %v785_v40, %v785_v40  ;;  %v7290_v47 = vcombine.low %v785_v40, %v785_v40  ;;  %v10171_v62 = vld [vmem:[%s16494_s2 + $0x8e0] sm:$0xff]   ;;  %v10173_v0 = vld [vmem:[%s16494_s2 + $0x858] sm:$0xff]  }
  0xeb   :  { %8128 = vmatpush3.bf16.msra.mxu0 %v10134_v1  ;;  %v10167_v58 = vld [vmem:[%s16494_s2 + $0x8e8] sm:$0xff]   ;;  %v10174_v1 = vld [vmem:[%s16494_s2 + $0x818] sm:$0xff]  }
  0xec   :  { %8129 = vmatprep.subr.bf16.mxu0 %v10137_v4  ;;  %3535 = vmatprep.mubr.bf16.mxu1 %v7291_v46  ;;  %v10175_v2 = vld [vmem:[%s16494_s2 + $0x8d8] sm:$0xff]   ;;  %v10177_v4 = vld [vmem:[%s16494_s2 + $0x850] sm:$0xff]  }
  0xed   :  { %8150 = vmatpush3.bf16.msra.mxu1 %v10136_v3  ;;  %v10176_v3 = vld [vmem:[%s16494_s2 + $0x898] sm:$0xff]   ;;  %v10196_v46 = vld [vmem:[%s16494_s2 + $0x9b0] sm:$0xff]  }
  0xee   :  { %8151 = vmatprep.subr.bf16.mxu1 %v10139_v6  ;;  %v10179_v6 = vld [vmem:[%s16494_s2 + $0x8d0] sm:$0xff]   ;;  %v10190_v34 = vld [vmem:[%s16494_s2 + $0x938] sm:$0xff]  }
  0xef   :  { %8130 = vmatpush3.bf16.msra.mxu0 %v10138_v5  ;;  %v10178_v5 = vld [vmem:[%s16494_s2 + $0x810] sm:$0xff]  }
  0xf0   :  { %8131 = vmatprep.subr.bf16.mxu0 %v10141_v8  ;;  %v10181_v8 = vld [vmem:[%s16494_s2 + $0x848] sm:$0xff]  }
  0xf1   :  { %8152 = vmatpush3.bf16.msra.mxu1 %v10140_v7  ;;  %v10180_v7 = vld [vmem:[%s16494_s2 + $0x890] sm:$0xff]  }
  0xf2   :  { %8153 = vmatprep.subr.bf16.mxu1 %v10143_v10  ;;  %v10183_v10 = vld [vmem:[%s16494_s2 + $0x8c8] sm:$0xff]  }
  0xf3   :  { %8132 = vmatpush3.bf16.msra.mxu0 %v10142_v9  ;;  %v10182_v9 = vld [vmem:[%s16494_s2 + $0x808] sm:$0xff]  }
  0xf4   :  { %8133 = vmatprep.subr.bf16.mxu0 %v10145_v12  ;;  %v10185_v12 = vld [vmem:[%s16494_s2 + $0x840] sm:$0xff]  }
  0xf5   :  { %8154 = vmatpush3.bf16.msra.mxu1 %v10144_v11  ;;  %v10184_v11 = vld [vmem:[%s16494_s2 + $0x888] sm:$0xff]  }
  0xf6   :  { %8155 = vmatprep.subr.bf16.mxu1 %v10147_v14 }
  0xf7   :  { %8134 = vmatpush3.bf16.msra.mxu0 %v10146_v13  ;;  %v10186_v13 = vld [vmem:[%s16494_s2 + $0x800] sm:$0xff]  }
  0xf8   :  { %8135 = vmatprep.subr.bf16.mxu0 %v10149_v16  ;;  %v47_v16 = vld [vmem:[%s16495_s0 + $0x80] sm:$0xff] }
  0xf9   :  { %8156 = vmatpush3.bf16.msra.mxu1 %v10148_v15  ;;  %v10187_v15 = vld [vmem:[%s16494_s2 + $0x8c0] sm:$0xff]  }
  0xfa   :  { %8157 = vmatprep.subr.bf16.mxu1 %v10151_v18 }
  0xfb   :  { %8136 = vmatpush3.bf16.msra.mxu0 %v10150_v17  ;;  %v765_v17 = vld [vmem:[%s16496_s1 + $0x80] sm:$0xff] }
  0xfc   :  { %8137 = vmatprep.subr.bf16.mxu0 %v10153_v20  ;;  %v786_v20 = vadd.bf16 %v765_v17, %v47_v16  ;;  %v768_v16 = vld [vmem:[%s16496_s1 + $0x98] sm:$0xff] }
  0xfd   :  { %8158 = vmatpush3.bf16.msra.mxu1 %v10152_v19 }
  0xfe   :  { %8159 = vmatprep.subr.bf16.mxu1 %v10155_v24  ;;  %v10189_v24 = vld [vmem:[%s16494_s2 + $0x978] sm:$0xff]  }
  0xff   :  { %8138 = vmatpush3.bf16.msra.mxu0 %v10154_v22 }
 0x100   :  { %8167 = vmatprep.subr.bf16.mxu0 %v10157_v33  ;;  %v787_v33 = vadd.bf16 %v766_v30, %v48_v25 }
 0x101   :  { %8160 = vmatpush3.bf16.msra.mxu1 %v10156_v31 }
 0x102   :  { %v7875_v21 = vpop.f32.mrf.mxu0  ;;  %3496 = vmatmul.mubr.bf16.vlgmr.msra.gmra.mxu0 %v7288_v39  ;;  %8189 = vmatprep.subr.bf16.mxu1 %v10159_v44  ;;  %v7295_v39 = vcombine.high %v787_v33, %v787_v33  ;;  %v7294_v40 = vcombine.low %v787_v33, %v787_v33  ;;  %v10194_v44 = vld [vmem:[%s16494_s2 + $0x930] sm:$0xff]  }
 0x103   :  { %8168 = vmatpush3.bf16.msra.mxu0 %v10158_v41  ;;  %v10192_v41 = vld [vmem:[%s16494_s2 + $0x9b8] sm:$0xff]  }
 0x104   :  { %v7876_v26 = vpop.f32.mrf.mxu0  ;;  %v7897_v29 = vpop.f32.mrf.mxu1  ;;  %3536 = vmatmul.mubr.bf16.vlgmr.msra.gmra.mxu1 %v7290_v47  ;;  %8169 = vmatprep.subr.bf16.mxu0 %v10161_v50  ;;  %v10197_v47 = vld [vmem:[%s16494_s2 + $0x968] sm:$0xff]  }
 0x105   :  { %v7877_v28 = vadd.f32 %v7876_v26, %v7875_v21  ;;  %8190 = vmatpush3.bf16.msra.mxu1 %v10160_v48  ;;  %v10188_v21 = vld [vmem:[%s16494_s2 + $0x880] sm:$0xff]   ;;  %3615 = vmatprep.mubr.bf16.mxu1 %v7295_v39  ;;  %v10198_v48 = vld [vmem:[%s16494_s2 + $0x928] sm:$0xff]  }
 0x106   :  { %v7878_v32 = vpop.f32.mrf.mxu0  ;;  %v7898_v37 = vpop.f32.mrf.mxu1  ;;  %8191 = vmatprep.subr.bf16.mxu1 %v10163_v53  ;;  %v10200_v50 = vld [vmem:[%s16494_s2 + $0x9a8] sm:$0xff]   ;;  %v10203_v53 = vld [vmem:[%s16494_s2 + $0x9e0] sm:$0xff]  }
 0x107   :  { %v3018_v36 = vadd.f32 %v7877_v28, %v2978_v63  ;;  %v7899_v42 = vadd.f32 %v7898_v37, %v7897_v29  ;;  %8170 = vmatpush3.bf16.msra.mxu0 %v10162_v52  ;;  %v10172_v63 = vld [vmem:[%s16494_s2 + $0x8a0] sm:$0xff]   ;;  %v7293_v28 = vcombine.high %v786_v20, %v786_v20  ;;  %v7292_v29 = vcombine.low %v786_v20, %v786_v20  ;;  %v10191_v37 = vld [vmem:[%s16494_s2 + $0x9f8] sm:$0xff]  }
 0x108   :  { %v7879_v43 = vpop.f32.mrf.mxu0  ;;  %v7900_v45 = vpop.f32.mrf.mxu1  ;;  %8171 = vmatprep.subr.bf16.mxu0 %v10165_v55  ;;  %v10202_v52 = vld [vmem:[%s16494_s2 + $0x920] sm:$0xff]   ;;  %v10205_v55 = vld [vmem:[%s16494_s2 + $0x958] sm:$0xff]   ;;  %v11360_v20 = vmov 0.0  }
 0x109   :  { %v12290_v49 = vadd.f32 %v7899_v42, %v3018_v36  ;;  %8192 = vmatpush3.bf16.msra.mxu1 %v10164_v54  ;;  %3575 = vmatprep.mubr.bf16.mxu0 %v7293_v28  ;;  %v10193_v43 = vld [vmem:[%s16494_s2 + $0x970] sm:$0xff]   ;;  %v10204_v54 = vld [vmem:[%s16494_s2 + $0x9a0] sm:$0xff]  }
 0x10a   :  { %v7901_v51 = vpop.f32.mrf.mxu1  ;;  %8193 = vmatprep.subr.bf16.mxu1 %v10167_v58  ;;  %v10195_v45 = vld [vmem:[%s16494_s2 + $0x9f0] sm:$0xff]   ;;  %v10207_v58 = vld [vmem:[%s16494_s2 + $0x9d8] sm:$0xff]   ;;  %v51_v39 = vld [vmem:[%s16495_s0 + $0xa0] sm:$0xf] }
 0x10b   :  { %8172 = vmatpush3.bf16.msra.mxu0 %v10166_v57  ;;  %v10201_v51 = vld [vmem:[%s16494_s2 + $0x960] sm:$0xff]   ;;  %v10206_v57 = vld [vmem:[%s16494_s2 + $0x918] sm:$0xff]  }
 0x10c   :  { %8173 = vmatprep.subr.bf16.mxu0 %v10169_v60  ;;  %v10209_v60 = vld [vmem:[%s16494_s2 + $0x950] sm:$0xff]  }
 0x10d   :  { %8194 = vmatpush3.bf16.msra.mxu1 %v10168_v59  ;;  %v10208_v59 = vld [vmem:[%s16494_s2 + $0x998] sm:$0xff]  }
 0x10e   :  { %8195 = vmatprep.subr.bf16.mxu1 %v10171_v62  ;;  %v10211_v62 = vld [vmem:[%s16494_s2 + $0x9d0] sm:$0xff]  }
 0x10f   :  { %8174 = vmatpush3.bf16.msra.mxu0 %v10170_v61  ;;  %v10210_v61 = vld [vmem:[%s16494_s2 + $0x910] sm:$0xff]  }
 0x110   :  { %8175 = vmatprep.subr.bf16.mxu0 %v10173_v0  ;;  %v10213_v0 = vld [vmem:[%s16494_s2 + $0x948] sm:$0xff]  }
 0x111   :  { %8196 = vmatpush3.bf16.msra.mxu1 %v10172_v63  ;;  %v10212_v63 = vld [vmem:[%s16494_s2 + $0x990] sm:$0xff]  }
 0x112   :  { %8197 = vmatprep.subr.bf16.mxu1 %v10175_v2  ;;  %v10215_v2 = vld [vmem:[%s16494_s2 + $0x9c8] sm:$0xff]  }
 0x113   :  { %8176 = vmatpush3.bf16.msra.mxu0 %v10174_v1  ;;  %v10214_v1 = vld [vmem:[%s16494_s2 + $0x908] sm:$0xff]  }
 0x114   :  { %8177 = vmatprep.subr.bf16.mxu0 %v10177_v4  ;;  %v10217_v4 = vld [vmem:[%s16494_s2 + $0x940] sm:$0xff]  }
 0x115   :  { %8198 = vmatpush3.bf16.msra.mxu1 %v10176_v3  ;;  %v10216_v3 = vld [vmem:[%s16494_s2 + $0x988] sm:$0xff]  }
 0x116   :  { %8199 = vmatprep.subr.bf16.mxu1 %v10179_v6  ;;  %v10218_v6 = vld [vmem:[%s16494_s2 + $0x900] sm:$0xff]  }
 0x117   :  { %8178 = vmatpush3.bf16.msra.mxu0 %v10178_v5 }
 0x118   :  { %8179 = vmatprep.subr.bf16.mxu0 %v10181_v8  ;;  %v49_v8 = vld [vmem:[%s16495_s0 + $0x90] sm:$0xff] }
 0x119   :  { %8200 = vmatpush3.bf16.msra.mxu1 %v10180_v7  ;;  %v10219_v7 = vld [vmem:[%s16494_s2 + $0x9c0] sm:$0xff]  }
 0x11a   :  { %8201 = vmatprep.subr.bf16.mxu1 %v10183_v10 }
 0x11b   :  { %8180 = vmatpush3.bf16.msra.mxu0 %v10182_v9  ;;  %v767_v9 = vld [vmem:[%s16496_s1 + $0x90] sm:$0xff] }
 0x11c   :  { %8181 = vmatprep.subr.bf16.mxu0 %v10185_v12  ;;  %v10220_v12 = vld [vmem:[%s16494_s2 + $0x980] sm:$0xff]  }
 0x11d   :  { %8202 = vmatpush3.bf16.msra.mxu1 %v10184_v11  ;;  %v788_v11 = vadd.bf16 %v767_v9, %v49_v8 }
 0x11e   :  { %8203 = vmatprep.subr.bf16.mxu1 %v10187_v15  ;;  %v50_v15 = vld [vmem:[%s16495_s0 + $0x98] sm:$0xff] }
 0x11f   :  { %8182 = vmatpush3.bf16.msra.mxu0 %v10186_v13 }
 0x120   :  { %8211 = vmatprep.subr.bf16.mxu0 %v10189_v24 }
 0x121   :  { %8204 = vmatpush3.bf16.msra.mxu1 %v10188_v21  ;;  %v789_v21 = vadd.bf16 %v768_v16, %v50_v15 }
 0x122   :  { %v7919_v14 = vpop.f32.mrf.mxu0  ;;  %3576 = vmatmul.mubr.bf16.vlgmr.msra.gmra.mxu0 %v7292_v29  ;;  %8233 = vmatprep.subr.bf16.mxu1 %v10191_v37  ;;  %v10226_v37 = vld [vmem:[%s16494_s2 + $0xa10] sm:$0xff]  }
 0x123   :  { %8212 = vmatpush3.bf16.msra.mxu0 %v10190_v34  ;;  %v7299_v28 = vcombine.high %v789_v21, %v789_v21  ;;  %v7298_v29 = vcombine.low %v789_v21, %v789_v21  ;;  %v10223_v34 = vld [vmem:[%s16494_s2 + $0xa28] sm:$0xff]  }
 0x124   :  { %v7920_v18 = vpop.f32.mrf.mxu0  ;;  %v7941_v19 = vpop.f32.mrf.mxu1  ;;  %3616 = vmatmul.mubr.bf16.vlgmr.msra.gmra.mxu1 %v7294_v40  ;;  %8213 = vmatprep.subr.bf16.mxu0 %v10193_v43  ;;  %v769_v40 = vld [vmem:[%s16496_s1 + $0xa0] sm:$0xf] }
 0x125   :  { %v7921_v22 = vadd.f32 %v7920_v18, %v7919_v14  ;;  %8234 = vmatpush3.bf16.msra.mxu1 %v10192_v41  ;;  %v7297_v18 = vcombine.high %v788_v11, %v788_v11  ;;  %3695 = vmatprep.mubr.bf16.mxu1 %v7299_v28  ;;  %v790_v41 = vadd.bf16 %v769_v40, %v51_v39  ;;  %v720_v39 = vld [vmem:[%s16498_s4 + $0x60] sm:$0xff] }
 0x126   :  { %v7922_v26 = vpop.f32.mrf.mxu0  ;;  %v7942_v27 = vpop.f32.mrf.mxu1  ;;  %8235 = vmatprep.subr.bf16.mxu1 %v10195_v45 }
 0x127   :  { %v3098_v31 = vadd.f32 %v7921_v22, %v12290_v49  ;;  %v7943_v32 = vadd.f32 %v7942_v27, %v7941_v19  ;;  %8214 = vmatpush3.bf16.msra.mxu0 %v10194_v44  ;;  %v10199_v49 = vld [vmem:[%s16494_s2 + $0x9e8] sm:$0xff]   ;;  %v7296_v19 = vcombine.low %v788_v11, %v788_v11  ;;  %v10221_v22 = vld [vmem:[%s16494_s2 + $0xa38] sm:$0xff]   ;;  %3655 = vmatprep.mubr.bf16.mxu0 %v7297_v18  ;;  %v10276_v11 = vld [vmem:[%s16494_s2] sm:$0xff]  }
 0x128   :  { %v7923_v35 = vpop.f32.mrf.mxu0  ;;  %v7944_v36 = vpop.f32.mrf.mxu1  ;;  %8215 = vmatprep.subr.bf16.mxu0 %v10197_v47  ;;  %v7300_v45 = vcombine.low %v790_v41, %v790_v41  ;;  %v719_v41 = vld [vmem:[%s16498_s4 + $0x58] sm:$0xff] }
 0x129   :  { %v12398_v38 = vadd.f32 %v7943_v32, %v3098_v31  ;;  %8236 = vmatpush3.bf16.msra.mxu1 %v10196_v46  ;;  %v10222_v32 = vld [vmem:[%s16494_s2 + $0xa30] sm:$0xff]   ;;  %v10224_v35 = vld [vmem:[%s16494_s2 + $0xa20] sm:$0xff]   ;;  %v10225_v36 = vld [vmem:[%s16494_s2 + $0xa18] sm:$0xff]  }
 0x12a   :  { %v7945_v42 = vpop.f32.mrf.mxu1  ;;  %8237 = vmatprep.subr.bf16.mxu1 %v10199_v49 }
 0x12b   :  { %8216 = vmatpush3.bf16.msra.mxu0 %v10198_v48  ;;  %v10228_v42 = vld [vmem:[%s16494_s2 + $0xa00] sm:$0xff]  }
 0x12c   :  { %8217 = vmatprep.subr.bf16.mxu0 %v10201_v51  ;;  %v10261_v51 = vld [vmem:[%s16494_s2 + $0x78] sm:$0xff]  }
 0x12d   :  { %8238 = vmatpush3.bf16.msra.mxu1 %v10200_v50 }
 0x12e   :  { %8239 = vmatprep.subr.bf16.mxu1 %v10203_v53 }
 0x12f   :  { %8218 = vmatpush3.bf16.msra.mxu0 %v10202_v52 }
 0x130   :  { %8219 = vmatprep.subr.bf16.mxu0 %v10205_v55 }
 0x131   :  { %8240 = vmatpush3.bf16.msra.mxu1 %v10204_v54 }
 0x132   :  { %8241 = vmatprep.subr.bf16.mxu1 %v10207_v58 }
 0x133   :  { %8220 = vmatpush3.bf16.msra.mxu0 %v10206_v57  ;;  %v10262_v57 = vld [vmem:[%s16494_s2 + $0x38] sm:$0xff]  }
 0x134   :  { %8221 = vmatprep.subr.bf16.mxu0 %v10209_v60  ;;  %v10264_v60 = vld [vmem:[%s16494_s2 + $0x30] sm:$0xff]  }
 0x135   :  { %8242 = vmatpush3.bf16.msra.mxu1 %v10208_v59  ;;  %v10263_v59 = vld [vmem:[%s16494_s2 + $0x70] sm:$0xff]  }
 0x136   :  { %8243 = vmatprep.subr.bf16.mxu1 %v10211_v62  ;;  %v10266_v62 = vld [vmem:[%s16494_s2 + $0x28] sm:$0xff]  }
 0x137   :  { %8222 = vmatpush3.bf16.msra.mxu0 %v10210_v61  ;;  %v10265_v61 = vld [vmem:[%s16494_s2 + $0x68] sm:$0xff]  }
 0x138   :  { %8223 = vmatprep.subr.bf16.mxu0 %v10213_v0  ;;  %v10268_v0 = vld [vmem:[%s16494_s2 + $0x20] sm:$0xff]  }
 0x139   :  { %8244 = vmatpush3.bf16.msra.mxu1 %v10212_v63  ;;  %v10267_v63 = vld [vmem:[%s16494_s2 + $0x60] sm:$0xff]  }
 0x13a   :  { %8245 = vmatprep.subr.bf16.mxu1 %v10215_v2  ;;  %v10270_v2 = vld [vmem:[%s16494_s2 + $0x18] sm:$0xff]  }
 0x13b   :  { %8224 = vmatpush3.bf16.msra.mxu0 %v10214_v1  ;;  %v10269_v1 = vld [vmem:[%s16494_s2 + $0x58] sm:$0xff]  }
 0x13c   :  { %8225 = vmatprep.subr.bf16.mxu0 %v10217_v4  ;;  %v10272_v4 = vld [vmem:[%s16494_s2 + $0x10] sm:$0xff]  }
 0x13d   :  { %8246 = vmatpush3.bf16.msra.mxu1 %v10216_v3  ;;  %v10271_v3 = vld [vmem:[%s16494_s2 + $0x50] sm:$0xff]  }
 0x13e   :  { %8247 = vmatprep.subr.bf16.mxu1 %v10219_v7  ;;  %v10275_v7 = vld [vmem:[%s16494_s2 + $0x40] sm:$0xff]  }
 0x13f   :  { %8226 = vmatpush3.bf16.msra.mxu0 %v10218_v6  ;;  %v10274_v6 = vld [vmem:[%s16494_s2 + $0x8] sm:$0xff]  }
 0x140   :  { %9679 = vmatprep.subr.bf16.mxu0 %v11360_v20 }
 0x141   :  { %8248 = vmatpush3.bf16.msra.mxu1 %v10220_v12 }
 0x142   :  { %v7963_v5 = vpop.f32.mrf.mxu0  ;;  %3656 = vmatmul.mubr.bf16.vlgmr.msra.gmra.mxu0 %v7296_v19  ;;  %9699 = vmatprep.subr.mxu1 %v11360_v20 }
 0x143   :  { %9680 = vmatpush3.bf16.msra.mxu0 %v10221_v22  ;;  %9695 = vmatprep.mubr.msk.bf16.mxu0 %vm11361_vm0, %v11360_v20 }
 0x144   :  { %v7964_v10 = vpop.f32.mrf.mxu0  ;;  %v7985_v14 = vpop.f32.mrf.mxu1  ;;  %3696 = vmatmul.mubr.bf16.vlgmr.msra.gmra.mxu1 %v7298_v29  ;;  %9681 = vmatprep.subr.bf16.mxu0 %v11360_v20 }
 0x145   :  { %v7965_v13 = vadd.f32 %v7964_v10, %v7963_v5  ;;  %9731 = vmatprep.mubr.msk.f32.mxu1 %vm11361_vm0, %v11360_v20  ;;  %v10273_v5 = vld [vmem:[%s16494_s2 + $0x48] sm:$0xff]  }
 0x146   :  { %v7966_v17 = vpop.f32.mrf.mxu0  ;;  %v7986_v25 = vpop.f32.mrf.mxu1 }
 0x147   :  { %v3178_v24 = vadd.f32 %v7965_v13, %v12398_v38  ;;  %v7987_v26 = vadd.f32 %v7986_v25, %v7985_v14  ;;  %9682 = vmatpush3.bf16.msra.mxu0 %v10222_v32  ;;  %v10227_v38 = vld [vmem:[%s16494_s2 + $0xa08] sm:$0xff]   ;;  %v10277_v13 = vld [vmem:[%s16494_s2 + $0x178] sm:$0xff]  }
 0x148   :  { %v7967_v27 = vpop.f32.mrf.mxu0  ;;  %v7988_v30 = vpop.f32.mrf.mxu1  ;;  %9683 = vmatprep.subr.bf16.mxu0 %v11360_v20 }
 0x149   :  { %v3218_v31 = vadd.f32 %v7987_v26, %v3178_v24 }
 0x14a   :  { %v7989_v33 = vpop.f32.mrf.mxu1 }
 0x14b   :  { %9684 = vmatpush3.bf16.msra.mxu0 %v10223_v34 }
 0x14c   :  { %9685 = vmatprep.subr.bf16.mxu0 %v11360_v20 }
 0x14f   :  { %9686 = vmatpush3.bf16.msra.mxu0 %v10224_v35 }
 0x150   :  { %9687 = vmatprep.subr.bf16.mxu0 %v11360_v20 }
 0x153   :  { %9688 = vmatpush3.bf16.msra.mxu0 %v10225_v36  ;;  %v723_v36 = vld [vmem:[%s16498_s4 + $0x78] sm:$0xff] }
 0x154   :  { %9689 = vmatprep.subr.bf16.mxu0 %v11360_v20  ;;  %9700 = vmatpush3.msra.mxu1 %v723_v36  ;;  %v10296_v36 = vld [vmem:[%s16494_s2 + $0x278] sm:$0xff]  }
 0x155   :  { %9701 = vmatprep.subr.mxu1 %v11360_v20 }
 0x157   :  { %9690 = vmatpush3.bf16.msra.mxu0 %v10226_v37  ;;  %v722_v37 = vld [vmem:[%s16498_s4 + $0x70] sm:$0xff] }
 0x158   :  { %9691 = vmatprep.subr.bf16.mxu0 %v11360_v20  ;;  %9702 = vmatpush3.msra.mxu1 %v722_v37 }
 0x159   :  { %9703 = vmatprep.subr.mxu1 %v11360_v20 }
 0x15b   :  { %9692 = vmatpush3.bf16.msra.mxu0 %v10227_v38  ;;  %v721_v38 = vld [vmem:[%s16498_s4 + $0x68] sm:$0xff] }
 0x15c   :  { %9693 = vmatprep.subr.bf16.mxu0 %v11360_v20  ;;  %9704 = vmatpush3.msra.mxu1 %v721_v38  ;;  %v10297_v38 = vld [vmem:[%s16494_s2 + $0x238] sm:$0xff]  }
 0x15d   :  { %9705 = vmatprep.subr.mxu1 %v11360_v20 }
 0x15e   :  { %9706 = vmatpush3.msra.mxu1 %v720_v39  ;;  %v10298_v39 = vld [vmem:[%s16494_s2 + $0x270] sm:$0xff]  }
 0x15f   :  { %9694 = vmatpush3.bf16.msra.mxu0 %v10228_v42  ;;  %9707 = vmatprep.subr.mxu1 %v11360_v20  ;;  %v718_v42 = vld [vmem:[%s16498_s4 + $0x50] sm:$0xff] }
 0x160   :  { %8281 = vmatprep.subr.bf16.mxu0 %v10261_v51  ;;  %9708 = vmatpush3.msra.mxu1 %v719_v41  ;;  %v10300_v41 = vld [vmem:[%s16494_s2 + $0x268] sm:$0xff]  }
 0x161   :  { %9709 = vmatprep.subr.mxu1 %v11360_v20 }
 0x162   :  { %v8007_v43 = vpop.f32.mrf.mxu0  ;;  %9696 = vmatmul.mubr.bf16.vlgmr.msra.gmra.mxu0 %v7300_v45  ;;  %v717_v45 = vld [vmem:[%s16498_s4 + $0x48] sm:$0xff]  ;;  %9710 = vmatpush3.msra.mxu1 %v718_v42 }
 0x163   :  { %8282 = vmatpush3.bf16.msra.mxu0 %v10262_v57  ;;  %9711 = vmatprep.subr.mxu1 %v11360_v20 }
 0x164   :  { %v8008_v44 = vpop.f32.mrf.mxu0  ;;  %v8029_v47 = vpop.f32.mrf.mxu1  ;;  %8283 = vmatprep.subr.bf16.mxu0 %v10263_v59  ;;  %9712 = vmatpush3.msra.mxu1 %v717_v45 }
 0x165   :  { %v8009_v46 = vadd.f32 %v8008_v44, %v8007_v43  ;;  %9713 = vmatprep.subr.mxu1 %v11360_v20 }
 0x166   :  { %v8010_v48 = vpop.f32.mrf.mxu0  ;;  %v8030_v50 = vpop.f32.mrf.mxu1 }
 0x167   :  { %v3258_v49 = vadd.f32 %v8009_v46, %v3218_v31  ;;  %v8031_v52 = vadd.f32 %v8030_v50, %v8029_v47  ;;  %8284 = vmatpush3.bf16.msra.mxu0 %v10264_v60  ;;  %v7629_v50 = vld [vmem:[%s16496_s1 + $0xa4] sm:$0xff] }
 0x168   :  { %v8011_v53 = vpop.f32.mrf.mxu0  ;;  %v8032_v54 = vpop.f32.mrf.mxu1  ;;  %8285 = vmatprep.subr.bf16.mxu0 %v10265_v61 }
 0x169   :  { %v3298_v55 = vadd.f32 %v8031_v52, %v3258_v49  ;;  %v716_v49 = vld [vmem:[%s16498_s4 + $0x40] sm:$0xff] }
 0x16a   :  { %v8033_v58 = vpop.f32.mrf.mxu1  ;;  %v10278_v53 = vld [vmem:[%s16495_s0] sm:$0xff]  ;;  %9714 = vmatpush3.msra.mxu1 %v716_v49 }
 0x16b   :  { %8286 = vmatpush3.bf16.msra.mxu0 %v10266_v62  ;;  %v3873_v54 = vadd.bf16 %v10278_v53, %v7629_v50  ;;  %v715_v58 = vld [vmem:[%s16498_s4 + $0x38] sm:$0xff]  ;;  %9715 = vmatprep.subr.mxu1 %v11360_v20  ;;  %v714_v62 = vld [vmem:[%s16498_s4 + $0x30] sm:$0xff]  ;;  %v10303_v49 = vld [vmem:[%s16494_s2 + $0x220] sm:$0xff]  }
 0x16c   :  { %8287 = vmatprep.subr.bf16.mxu0 %v10267_v63  ;;  %9716 = vmatpush3.msra.mxu1 %v715_v58  ;;  %v713_v63 = vld [vmem:[%s16498_s4 + $0x28] sm:$0xff] }
 0x16d   :  { %v7651_v60 = vcombine.high %v3873_v54, %v3873_v54  ;;  %9717 = vmatprep.subr.mxu1 %v11360_v20  ;;  %v10308_v58 = vld [vmem:[%s16494_s2 + $0x248] sm:$0xff]  }
 0x16e   :  { %9718 = vmatpush3.msra.mxu1 %v714_v62  ;;  %v10310_v62 = vld [vmem:[%s16494_s2 + $0x240] sm:$0xff]  }
 0x16f   :  { %8288 = vmatpush3.bf16.msra.mxu0 %v10268_v0  ;;  %4070 = vmatprep.mubr.bf16.mxu0 %v7651_v60  ;;  %v712_v0 = vld [vmem:[%s16498_s4 + $0x20] sm:$0xff] }
 0x170   :  { %8289 = vmatprep.subr.bf16.mxu0 %v10269_v1  ;;  %9719 = vmatprep.subr.mxu1 %v11360_v20  ;;  %v711_v1 = vld [vmem:[%s16498_s4 + $0x18] sm:$0xff] }
 0x171   :  { %9720 = vmatpush3.msra.mxu1 %v713_v63  ;;  %v7633_v63 = vld [vmem:[%s16496_s1 + $0xc4] sm:$0xff] }
 0x172   :  { %9721 = vmatprep.subr.mxu1 %v11360_v20 }
 0x173   :  { %8290 = vmatpush3.bf16.msra.mxu0 %v10270_v2  ;;  %9722 = vmatpush3.msra.mxu1 %v712_v0  ;;  %v710_v2 = vld [vmem:[%s16498_s4 + $0x10] sm:$0xff]  ;;  %v10311_v0 = vld [vmem:[%s16495_s0 + $0x20] sm:$0xff] }
 0x174   :  { %8291 = vmatprep.subr.bf16.mxu0 %v10271_v3  ;;  %9723 = vmatprep.subr.mxu1 %v11360_v20  ;;  %v709_v3 = vld [vmem:[%s16498_s4 + $0x8] sm:$0xff] }
 0x175   :  { %9724 = vmatpush3.msra.mxu1 %v711_v1  ;;  %v3877_v1 = vadd.bf16 %v10311_v0, %v7633_v63  ;;  %v10342_v0 = vld [vmem:[%s16494_s2 + $0x448] sm:$0xff]  }
 0x176   :  { %9725 = vmatprep.subr.mxu1 %v11360_v20 }
 0x177   :  { %8292 = vmatpush3.bf16.msra.mxu0 %v10272_v4  ;;  %9726 = vmatpush3.msra.mxu1 %v710_v2  ;;  %v708_v4 = vld [vmem:[%s16498_s4] sm:$0xff] }
 0x178   :  { %8293 = vmatprep.subr.bf16.mxu0 %v10273_v5  ;;  %9727 = vmatprep.subr.mxu1 %v11360_v20  ;;  %v7650_v5 = vcombine.low %v3873_v54, %v3873_v54  ;;  %v10305_v54 = vld [vmem:[%s16494_s2 + $0x218] sm:$0xff]  }
 0x179   :  { %9728 = vmatpush3.msra.mxu1 %v709_v3 }
 0x17a   :  { %9729 = vmatprep.subr.mxu1 %v11360_v20 }
 0x17b   :  { %8294 = vmatpush3.bf16.msra.mxu0 %v10274_v6  ;;  %9730 = vmatpush3.msra.mxu1 %v708_v4  ;;  %v10279_v6 = vld [vmem:[%s16494_s2 + $0xf8] sm:$0xff]   ;;  %v10312_v4 = vld [vmem:[%s16494_s2 + $0x200] sm:$0xff]  }
 0x17c   :  { %8295 = vmatprep.subr.bf16.mxu0 %v10275_v7  ;;  %8303 = vmatprep.subr.bf16.mxu1 %v10279_v6  ;;  %v10280_v7 = vld [vmem:[%s16494_s2 + $0x138] sm:$0xff]  }
 0x17d   :  { %v10313_v6 = vld [vmem:[%s16494_s2 + $0x378] sm:$0xff]  }
 0x17f   :  { %8296 = vmatpush3.bf16.msra.mxu0 %v10276_v11 }
 0x180   :  { %8325 = vmatprep.subr.bf16.mxu0 %v10277_v13 }
 0x182   :  { %v8051_v8 = vpop.f32.mrf.mxu0  ;;  %4071 = vmatmul.mubr.bf16.vlgmr.msra.gmra.mxu0 %v7650_v5  ;;  %v7659_v5 = vcombine.high %v3877_v1, %v3877_v1 }
 0x183   :  { %8326 = vmatpush3.bf16.msra.mxu0 %v10280_v7  ;;  %v7658_v7 = vcombine.low %v3877_v1, %v3877_v1 }
 0x184   :  { %v8052_v9 = vpop.f32.mrf.mxu0  ;;  %v8073_v10 = vpop.f32.mrf.mxu1 }
 0x185   :  { %v8053_v12 = vadd.f32 %v8052_v9, %v8051_v8  ;;  %v10281_v8 = vld [vmem:[%s16494_s2 + $0x170] sm:$0xff]  }
 0x186   :  { %v8054_v14 = vpop.f32.mrf.mxu0  ;;  %v8074_v15 = vpop.f32.mrf.mxu1  ;;  %8327 = vmatprep.subr.bf16.mxu0 %v10281_v8  ;;  %v10282_v9 = vld [vmem:[%s16494_s2 + $0x130] sm:$0xff]  }
 0x187   :  { %v3338_v16 = vadd.f32 %v8053_v12, %v3298_v55  ;;  %v8075_v17 = vadd.f32 %v8074_v15, %v8073_v10  ;;  %8328 = vmatpush3.bf16.msra.mxu0 %v10282_v9  ;;  %v10283_v10 = vld [vmem:[%s16494_s2 + $0x168] sm:$0xff]   ;;  %v10285_v14 = vld [vmem:[%s16494_s2 + $0x160] sm:$0xff]  }
 0x188   :  { %v8055_v18 = vpop.f32.mrf.mxu0  ;;  %v8076_v19 = vpop.f32.mrf.mxu1  ;;  %8329 = vmatprep.subr.bf16.mxu0 %v10283_v10  ;;  %v10284_v12 = vld [vmem:[%s16494_s2 + $0x128] sm:$0xff]   ;;  %v10315_v10 = vld [vmem:[%s16494_s2 + $0x370] sm:$0xff]  }
 0x189   :  { %v3378_v21 = vadd.f32 %v8075_v17, %v3338_v16  ;;  %v10286_v18 = vld [vmem:[%s16494_s2 + $0x120] sm:$0xff]  }
 0x18a   :  { %v8077_v22 = vpop.f32.mrf.mxu1 }
 0x18b   :  { %8330 = vmatpush3.bf16.msra.mxu0 %v10284_v12 }
 0x18c   :  { %8331 = vmatprep.subr.bf16.mxu0 %v10285_v14  ;;  %v10317_v14 = vld [vmem:[%s16494_s2 + $0x368] sm:$0xff]  }
 0x18f   :  { %8332 = vmatpush3.bf16.msra.mxu0 %v10286_v18  ;;  %v10318_v18 = vld [vmem:[%s16494_s2 + $0x328] sm:$0xff]  }
 0x1a2   :  { %v8095_v24 = vpop.f32.mrf.mxu0 }
 0x1a4   :  { %v8096_v25 = vpop.f32.mrf.mxu0  ;;  %v8117_v27 = vpop.f32.mrf.mxu1 }
 0x1a5   :  { %v8097_v26 = vadd.f32 %v8096_v25, %v8095_v24  ;;  %v10288_v25 = vld [vmem:[%s16494_s2 + $0x118] sm:$0xff]  }
 0x1a6   :  { %v8098_v28 = vpop.f32.mrf.mxu0  ;;  %v8118_v30 = vpop.f32.mrf.mxu1 }
 0x1a7   :  { %v3418_v29 = vadd.f32 %v8097_v26, %v3378_v21  ;;  %v8119_v31 = vadd.f32 %v8118_v30, %v8117_v27  ;;  %v10287_v21 = vld [vmem:[%s16494_s2 + $0x158] sm:$0xff]   ;;  %v10289_v26 = vld [vmem:[%s16494_s2 + $0x150] sm:$0xff]   ;;  %v10291_v28 = vld [vmem:[%s16494_s2 + $0x148] sm:$0xff]  }
 0x1a8   :  { %v8099_v32 = vpop.f32.mrf.mxu0  ;;  %v8120_v33 = vpop.f32.mrf.mxu1  ;;  %8333 = vmatprep.subr.bf16.mxu0 %v10287_v21  ;;  %v10290_v27 = vld [vmem:[%s16494_s2 + $0x110] sm:$0xff]   ;;  %v10293_v30 = vld [vmem:[%s16494_s2 + $0x140] sm:$0xff]  }
 0x1a9   :  { %v3458_v34 = vadd.f32 %v8119_v31, %v3418_v29  ;;  %8334 = vmatpush3.bf16.msra.mxu0 %v10288_v25  ;;  %v10292_v29 = vld [vmem:[%s16494_s2 + $0x108] sm:$0xff]   ;;  %v7631_v31 = vld [vmem:[%s16496_s1 + $0xb4] sm:$0xff]  ;;  %v10319_v21 = vld [vmem:[%s16494_s2 + $0x360] sm:$0xff]  }
 0x1aa   :  { %v8121_v35 = vpop.f32.mrf.mxu1  ;;  %8335 = vmatprep.subr.bf16.mxu0 %v10289_v26  ;;  %v10294_v32 = vld [vmem:[%s16495_s0 + $0x10] sm:$0xff]  ;;  %v10320_v26 = vld [vmem:[%s16494_s2 + $0x320] sm:$0xff]  }
 0x1ab   :  { %v3875_v33 = vadd.bf16 %v10294_v32, %v7631_v31  ;;  %v10322_v31 = vld [vmem:[%s16494_s2 + $0x318] sm:$0xff]   ;;  %v10323_v32 = vld [vmem:[%s16494_s2 + $0x350] sm:$0xff]  }
 0x1ad   :  { %8336 = vmatpush3.bf16.msra.mxu0 %v10290_v27  ;;  %v7655_v35 = vcombine.high %v3875_v33, %v3875_v33  ;;  %v7654_v37 = vcombine.low %v3875_v33, %v3875_v33 }
 0x1ae   :  { %8337 = vmatprep.subr.bf16.mxu0 %v10291_v28  ;;  %v10321_v28 = vld [vmem:[%s16494_s2 + $0x358] sm:$0xff]  }
 0x1af   :  { %4150 = vmatprep.mubr.bf16.mxu0 %v7655_v35  ;;  %v10324_v35 = vld [vmem:[%s16494_s2 + $0x310] sm:$0xff]  }
 0x1b1   :  { %8338 = vmatpush3.bf16.msra.mxu0 %v10292_v29 }
 0x1b2   :  { %8339 = vmatprep.subr.bf16.mxu0 %v10293_v30 }
 0x1c2   :  { %v8139_v40 = vpop.f32.mrf.mxu0 }
 0x1c4   :  { %v8140_v43 = vpop.f32.mrf.mxu0  ;;  %v8161_v44 = vpop.f32.mrf.mxu1 }
 0x1c5   :  { %v8141_v46 = vadd.f32 %v8140_v43, %v8139_v40  ;;  %v10299_v40 = vld [vmem:[%s16494_s2 + $0x230] sm:$0xff]   ;;  %v10301_v43 = vld [vmem:[%s16494_s2 + $0x228] sm:$0xff]  }
 0x1c6   :  { %v8142_v47 = vpop.f32.mrf.mxu0  ;;  %v8162_v48 = vpop.f32.mrf.mxu1 }
 0x1c7   :  { %v3498_v51 = vadd.f32 %v8141_v46, %v3458_v34  ;;  %v8163_v52 = vadd.f32 %v8162_v48, %v8161_v44  ;;  %v10295_v34 = vld [vmem:[%s16494_s2 + $0x100] sm:$0xff]  }
 0x1c8   :  { %v8143_v55 = vpop.f32.mrf.mxu0  ;;  %v8164_v57 = vpop.f32.mrf.mxu1  ;;  %8340 = vmatpush3.bf16.msra.mxu0 %v10295_v34  ;;  %v10302_v46 = vld [vmem:[%s16494_s2 + $0x260] sm:$0xff]  }
 0x1c9   :  { %v12634_v59 = vadd.f32 %v8163_v52, %v3498_v51  ;;  %8369 = vmatprep.subr.bf16.mxu0 %v10296_v36  ;;  %v10304_v52 = vld [vmem:[%s16494_s2 + $0x258] sm:$0xff]   ;;  %v10306_v55 = vld [vmem:[%s16494_s2 + $0x250] sm:$0xff]   ;;  %v10325_v36 = vld [vmem:[%s16494_s2 + $0x348] sm:$0xff]  }
 0x1ca   :  { %v8165_v61 = vpop.f32.mrf.mxu1  ;;  %v10307_v57 = vld [vmem:[%s16494_s2 + $0x210] sm:$0xff]  }
 0x1cb   :  { %4151 = vmatmul.mubr.bf16.vlgmr.msra.gmra.mxu0 %v7654_v37  ;;  %v10309_v61 = vld [vmem:[%s16494_s2 + $0x208] sm:$0xff]  }
 0x1cc   :  { %8370 = vmatpush3.bf16.msra.mxu0 %v10297_v38  ;;  %4230 = vmatprep.mubr.bf16.mxu0 %v7659_v5  ;;  %v10326_v38 = vld [vmem:[%s16494_s2 + $0x308] sm:$0xff]  }
 0x1cd   :  { %8371 = vmatprep.subr.bf16.mxu0 %v10298_v39  ;;  %v10327_v39 = vld [vmem:[%s16494_s2 + $0x340] sm:$0xff]   ;;  %v10344_v5 = vld [vmem:[%s16494_s2 + $0x408] sm:$0xff]  }
 0x1d0   :  { %8372 = vmatpush3.bf16.msra.mxu0 %v10299_v40  ;;  %v7635_v40 = vld [vmem:[%s16496_s1 + $0xd4] sm:$0xff] }
 0x1d1   :  { %8373 = vmatprep.subr.bf16.mxu0 %v10300_v41  ;;  %v10328_v41 = vld [vmem:[%s16495_s0 + $0x30] sm:$0xff] }
 0x1d4   :  { %8374 = vmatpush3.bf16.msra.mxu0 %v10301_v43  ;;  %v10329_v43 = vld [vmem:[%s16494_s2 + $0x300] sm:$0xff]  }
 0x1d5   :  { %8375 = vmatprep.subr.bf16.mxu0 %v10302_v46 }
 0x1d8   :  { %8376 = vmatpush3.bf16.msra.mxu0 %v10303_v49  ;;  %v10333_v49 = vld [vmem:[%s16494_s2 + $0x430] sm:$0xff]  }
 0x1d9   :  { %8377 = vmatprep.subr.bf16.mxu0 %v10304_v52 }
 0x1dc   :  { %8378 = vmatpush3.bf16.msra.mxu0 %v10305_v54  ;;  %v10336_v54 = vld [vmem:[%s16494_s2 + $0x460] sm:$0xff]  }
 0x1dd   :  { %8379 = vmatprep.subr.bf16.mxu0 %v10306_v55  ;;  %v10337_v55 = vld [vmem:[%s16494_s2 + $0x420] sm:$0xff]  }
 0x1e0   :  { %8380 = vmatpush3.bf16.msra.mxu0 %v10307_v57  ;;  %v10338_v57 = vld [vmem:[%s16494_s2 + $0x458] sm:$0xff]  }
 0x1e1   :  { %8381 = vmatprep.subr.bf16.mxu0 %v10308_v58  ;;  %v10339_v58 = vld [vmem:[%s16494_s2 + $0x418] sm:$0xff]  }
 0x1e2   :  { %v12680_v11 = vpop.f32.mrf.mxu0 }
 0x1e4   :  { %v12685_v13 = vpop.f32.mrf.mxu0  ;;  %v12690_v15 = vpop.f32.mrf.mxu1  ;;  %8382 = vmatpush3.bf16.msra.mxu0 %v10309_v61  ;;  %v7630_v61 = vld [vmem:[%s16496_s1 + $0xac] sm:$0xff] }
 0x1e5   :  { %v8185_v60 = vadd.f32 %v12685_v13, %v12680_v11  ;;  %8383 = vmatprep.subr.bf16.mxu0 %v10310_v62  ;;  %v10316_v13 = vld [vmem:[%s16494_s2 + $0x330] sm:$0xff]  }
 0x1e6   :  { %v8186_v16 = vpop.f32.mrf.mxu0  ;;  %v12692_v17 = vpop.f32.mrf.mxu1  ;;  %v10341_v62 = vld [vmem:[%s16494_s2 + $0x410] sm:$0xff]  }
 0x1e7   :  { %v3578_v2 = vadd.f32 %v8185_v60, %v12634_v59  ;;  %v8207_v3 = vadd.f32 %v12692_v17, %v12690_v15  ;;  %v10314_v59 = vld [vmem:[%s16494_s2 + $0x338] sm:$0xff]   ;;  %v10340_v60 = vld [vmem:[%s16494_s2 + $0x450] sm:$0xff]  }
 0x1e8   :  { %v8187_v19 = vpop.f32.mrf.mxu0  ;;  %v8208_v22 = vpop.f32.mrf.mxu1  ;;  %8384 = vmatpush3.bf16.msra.mxu0 %v10312_v4 }
 0x1e9   :  { %8413 = vmatprep.subr.bf16.mxu0 %v10313_v6  ;;  %v3618_v9 = vadd.f32 %v8207_v3, %v3578_v2  ;;  %v10343_v2 = vld [vmem:[%s16495_s0 + $0x8] sm:$0xff]  ;;  %v10345_v6 = vld [vmem:[%s16494_s2 + $0x440] sm:$0xff]  }
 0x1ea   :  { %v8209_v24 = vpop.f32.mrf.mxu1  ;;  %v12891_v3 = vadd.bf16 %v10343_v2, %v7630_v61  ;;  %v10386_v2 = vld [vmem:[%s16494_s2 + $0x1b0] sm:$0xff]  }
 0x1eb   :  { %4231 = vmatmul.mubr.bf16.vlgmr.msra.gmra.mxu0 %v7658_v7  ;;  %v7637_v7 = vld [vmem:[%s16496_s1 + $0xe4] sm:$0xff] }
 0x1ec   :  { %8414 = vmatpush3.bf16.msra.mxu0 %v10314_v59  ;;  %v10346_v59 = vld [vmem:[%s16495_s0 + $0x40] sm:$0xff] }
 0x1ed   :  { %8415 = vmatprep.subr.bf16.mxu0 %v10315_v10  ;;  %v3881_v10 = vadd.bf16 %v10346_v59, %v7637_v7  ;;  %v10391_v7 = vld [vmem:[%s16494_s2 + $0x668] sm:$0xff]   ;;  %v10394_v59 = vld [vmem:[%s16494_s2 + $0x1a0] sm:$0xff]  }
 0x1f0   :  { %8416 = vmatpush3.bf16.msra.mxu0 %v10316_v13  ;;  %v10347_v13 = vld [vmem:[%s16494_s2 + $0x400] sm:$0xff]  }
 0x1f1   :  { %8417 = vmatprep.subr.bf16.mxu0 %v10317_v14  ;;  %v7667_v14 = vcombine.high %v3881_v10, %v3881_v10 }
 0x1f4   :  { %8418 = vmatpush3.bf16.msra.mxu0 %v10318_v18  ;;  %v10350_v18 = vld [vmem:[%s16494_s2 + $0xf0] sm:$0xff]  }
 0x1f5   :  { %8419 = vmatprep.subr.bf16.mxu0 %v10319_v21  ;;  %v10352_v21 = vld [vmem:[%s16494_s2 + $0x570] sm:$0xff]  }
 0x1f8   :  { %8420 = vmatpush3.bf16.msra.mxu0 %v10320_v26  ;;  %v10356_v26 = vld [vmem:[%s16494_s2 + $0x568] sm:$0xff]  }
 0x1f9   :  { %8421 = vmatprep.subr.bf16.mxu0 %v10321_v28  ;;  %v10358_v28 = vld [vmem:[%s16494_s2 + $0xe0] sm:$0xff]  }
 0x1fc   :  { %8422 = vmatpush3.bf16.msra.mxu0 %v10322_v31  ;;  %v10361_v31 = vld [vmem:[%s16494_s2 + $0xa0] sm:$0xff]  }
 0x1fd   :  { %8423 = vmatprep.subr.bf16.mxu0 %v10323_v32  ;;  %v10362_v32 = vld [vmem:[%s16494_s2 + $0xd8] sm:$0xff]  }
 0x200   :  { %8424 = vmatpush3.bf16.msra.mxu0 %v10324_v35  ;;  %v10365_v35 = vld [vmem:[%s16494_s2 + $0x98] sm:$0xff]  }
 0x201   :  { %8425 = vmatprep.subr.bf16.mxu0 %v10325_v36  ;;  %v10366_v36 = vld [vmem:[%s16494_s2 + $0xd0] sm:$0xff]  }
 0x202   :  { %v8227_v42 = vpop.f32.mrf.mxu0 }
 0x204   :  { %v8228_v44 = vpop.f32.mrf.mxu0  ;;  %v8249_v45 = vpop.f32.mrf.mxu1  ;;  %8426 = vmatpush3.bf16.msra.mxu0 %v10326_v38  ;;  %v10368_v38 = vld [vmem:[%s16494_s2 + $0x550] sm:$0xff]  }
 0x205   :  { %v8229_v8 = vadd.f32 %v8228_v44, %v8227_v42  ;;  %8427 = vmatprep.subr.bf16.mxu0 %v10327_v39  ;;  %v3879_v42 = vadd.bf16 %v10328_v41, %v7635_v40  ;;  %v10369_v39 = vld [vmem:[%s16494_s2 + $0x90] sm:$0xff]   ;;  %v10370_v40 = vld [vmem:[%s16494_s2 + $0xc8] sm:$0xff]   ;;  %v7632_v41 = vld [vmem:[%s16496_s1 + $0xbc] sm:$0xff] }
 0x206   :  { %v8230_v47 = vpop.f32.mrf.mxu0  ;;  %v8250_v48 = vpop.f32.mrf.mxu1 }
 0x207   :  { %v3658_v11 = vadd.f32 %v8229_v8, %v3618_v9  ;;  %v8251_v12 = vadd.f32 %v8250_v48, %v8249_v45  ;;  %v7663_v44 = vcombine.high %v3879_v42, %v3879_v42  ;;  %v10330_v45 = vld [vmem:[%s16494_s2 + $0x478] sm:$0xff]   ;;  %v7662_v46 = vcombine.low %v3879_v42, %v3879_v42  ;;  %v10332_v48 = vld [vmem:[%s16494_s2 + $0x470] sm:$0xff]  }
 0x208   :  { %v8231_v50 = vpop.f32.mrf.mxu0  ;;  %v8252_v51 = vpop.f32.mrf.mxu1  ;;  %8428 = vmatpush3.bf16.msra.mxu0 %v10329_v43  ;;  %v10331_v47 = vld [vmem:[%s16494_s2 + $0x438] sm:$0xff]   ;;  %v10371_v42 = vld [vmem:[%s16494_s2 + $0x510] sm:$0xff]   ;;  %v10372_v43 = vld [vmem:[%s16494_s2 + $0x548] sm:$0xff]  }
 0x209   :  { %v3698_v15 = vadd.f32 %v8251_v12, %v3658_v11  ;;  %8457 = vmatprep.subr.bf16.mxu0 %v10330_v45  ;;  %4310 = vmatprep.mubr.bf16.mxu0 %v7663_v44  ;;  %v10334_v51 = vld [vmem:[%s16494_s2 + $0x468] sm:$0xff]   ;;  %v7653_v11 = vcombine.high %v12891_v3, %v12891_v3  ;;  %v10374_v45 = vld [vmem:[%s16495_s0 + $0x18] sm:$0xff] }
 0x20a   :  { %v8253_v53 = vpop.f32.mrf.mxu1  ;;  %v10373_v44 = vld [vmem:[%s16494_s2 + $0x88] sm:$0xff]  }
 0x20b   :  { %4311 = vmatmul.mubr.bf16.vlgmr.msra.gmra.mxu0 %v7662_v46  ;;  %v10335_v53 = vld [vmem:[%s16494_s2 + $0x428] sm:$0xff]   ;;  %v12995_v46 = vadd.bf16 %v10374_v45, %v7632_v41  ;;  %v10416_v41 = vld [vmem:[%s16494_s2 + $0x2b8] sm:$0xff]  }
 0x20c   :  { %8458 = vmatpush3.bf16.msra.mxu0 %v10331_v47  ;;  %4390 = vmatprep.mubr.bf16.mxu0 %v7667_v14  ;;  %v10375_v47 = vld [vmem:[%s16494_s2 + $0xc0] sm:$0xff]   ;;  %v10399_v14 = vld [vmem:[%s16494_s2 + $0x658] sm:$0xff]  }
 0x20d   :  { %8459 = vmatprep.subr.bf16.mxu0 %v10332_v48  ;;  %v10376_v48 = vld [vmem:[%s16494_s2 + $0x508] sm:$0xff]  }
 0x210   :  { %8460 = vmatpush3.bf16.msra.mxu0 %v10333_v49  ;;  %v7639_v49 = vld [vmem:[%s16496_s1 + $0xf4] sm:$0xff] }
 0x211   :  { %8461 = vmatprep.subr.bf16.mxu0 %v10334_v51  ;;  %v10377_v51 = vld [vmem:[%s16494_s2 + $0x540] sm:$0xff]  }
 0x214   :  { %8462 = vmatpush3.bf16.msra.mxu0 %v10335_v53 }
 0x215   :  { %8463 = vmatprep.subr.bf16.mxu0 %v10336_v54  ;;  %v10379_v54 = vld [vmem:[%s16494_s2 + $0x80] sm:$0xff]  }
 0x218   :  { %8464 = vmatpush3.bf16.msra.mxu0 %v10337_v55  ;;  %v7657_v55 = vcombine.high %v12995_v46, %v12995_v46 }
 0x219   :  { %8465 = vmatprep.subr.bf16.mxu0 %v10338_v57  ;;  %v10380_v57 = vld [vmem:[%s16494_s2 + $0x1f8] sm:$0xff]  }
 0x21c   :  { %8466 = vmatpush3.bf16.msra.mxu0 %v10339_v58 }
 0x21d   :  { %8467 = vmatprep.subr.bf16.mxu0 %v10340_v60  ;;  %v10381_v60 = vld [vmem:[%s16494_s2 + $0x500] sm:$0xff]  }
 0x220   :  { %8468 = vmatpush3.bf16.msra.mxu0 %v10341_v62  ;;  %v10382_v62 = vld [vmem:[%s16494_s2 + $0x1b8] sm:$0xff]  }
 0x221   :  { %8469 = vmatprep.subr.bf16.mxu0 %v10342_v0  ;;  %v10384_v0 = vld [vmem:[%s16494_s2 + $0x678] sm:$0xff]  }
 0x222   :  { %v3737_v16 = vpop.f32.mrf.mxu0 }
 0x223   :  { %v12801_v17 = vadd.f32 %v3737_v16, %v3698_v15  ;;  %v10348_v15 = vld [vmem:[%s16494_s2 + $0x578] sm:$0xff]   ;;  %v7666_v16 = vcombine.low %v3881_v10, %v3881_v10  ;;  %v10395_v10 = vld [vmem:[%s16494_s2 + $0x660] sm:$0xff]  }
 0x224   :  { %v9697_v19 = vpop.f32.mrf.mxu0  ;;  %8470 = vmatpush3.bf16.msra.mxu0 %v10344_v5  ;;  %v10389_v5 = vld [vmem:[%s16494_s2 + $0x630] sm:$0xff]  }
 0x225   :  { %v3743_v22 = vmul.f32 %v12801_v17, %v12801_v17  ;;  %8471 = vmatprep.subr.bf16.mxu0 %v10345_v6  ;;  %v3755_v8 = vmul.f32 0.5, %v12801_v17  ;;  %v10351_v19 = vld [vmem:[%s16494_s2 + $0x538] sm:$0xff]   ;;  %v10390_v6 = vld [vmem:[%s16494_s2 + $0x1a8] sm:$0xff]  }
 0x226   :  { %v3740_v24 = vpop.f32.mrf.mxu0 }
 0x227   :  { %v3744_v25 = vmul.f32 %v3743_v22, %v12801_v17  ;;  %v10353_v22 = vld [vmem:[%s16494_s2 + $0xb0] sm:$0xff]   ;;  %v10354_v24 = vld [vmem:[%s16494_s2 + $0xe8] sm:$0xff]  }
 0x228   :  { %v9698_v27 = vpop.f32.mrf.mxu0  ;;  %8472 = vmatpush3.bf16.msra.mxu0 %v10347_v13  ;;  %v10398_v13 = vld [vmem:[%s16494_s2 + $0x198] sm:$0xff]  }
 0x229   :  { %v3745_v29 = vmul.f32 0.044715, %v3744_v25  ;;  %8501 = vmatprep.subr.bf16.mxu0 %v10348_v15  ;;  %v10355_v25 = vld [vmem:[%s16494_s2 + $0x530] sm:$0xff]   ;;  %v10357_v27 = vld [vmem:[%s16494_s2 + $0xa8] sm:$0xff]  }
 0x22a   :  { %v10400_v15 = vld [vmem:[%s16494_s2 + $0x1d0] sm:$0xff]  }
 0x22b   :  { %v3746_v30 = vadd.f32 %v3745_v29, %v12801_v17  ;;  %v10349_v17 = vld [vmem:[%s16494_s2 + $0xb8] sm:$0xff]   ;;  %4391 = vmatmul.mubr.bf16.vlgmr.msra.gmra.mxu0 %v7666_v16  ;;  %v10359_v29 = vld [vmem:[%s16494_s2 + $0x528] sm:$0xff]  }
 0x22c   :  { %8502 = vmatpush3.bf16.msra.mxu0 %v10351_v19  ;;  %v10401_v16 = vld [vmem:[%s16494_s2 + $0x618] sm:$0xff]   ;;  %v10404_v19 = vld [vmem:[%s16494_s2 + $0x1c8] sm:$0xff]  }
 0x22d   :  { %v3747_v33 = vmul.f32 0.7978846, %v3746_v30  ;;  %8503 = vmatprep.subr.bf16.mxu0 %v10352_v21  ;;  %v10360_v30 = vld [vmem:[%s16494_s2 + $0x560] sm:$0xff]   ;;  %v7634_v21 = vld [vmem:[%s16496_s1 + $0xcc] sm:$0xff] }
 0x22f   :  { %v3748_v34 = vmul.f32 2.0, %v3747_v33  ;;  %v10363_v33 = vld [vmem:[%s16494_s2 + $0x520] sm:$0xff]  }
 0x230   :  { %8504 = vmatpush3.bf16.msra.mxu0 %v10355_v25  ;;  %v10407_v25 = vld [vmem:[%s16495_s0 + $0x28] sm:$0xff] }
 0x231   :  { %v3749_v37 = vmul.f32 1.442695, %v3748_v34  ;;  %8505 = vmatprep.subr.bf16.mxu0 %v10356_v26  ;;  %v10364_v34 = vld [vmem:[%s16494_s2 + $0x558] sm:$0xff]   ;;  %v13106_v26 = vadd.bf16 %v10407_v25, %v7634_v21  ;;  %v10447_v21 = vld [vmem:[%s16494_s2 + $0x740] sm:$0xff]  }
 0x233   :  { %10229 = vpow2.f32 %v3749_v37  ;;  %v10367_v37 = vld [vmem:[%s16494_s2 + $0x518] sm:$0xff]  }
 0x234   :  { %8506 = vmatpush3.bf16.msra.mxu0 %v10359_v29  ;;  %v7641_v29 = vld [vmem:[%s16496_s1 + $0x104] sm:$0xff] }
 0x235   :  { %8507 = vmatprep.subr.bf16.mxu0 %v10360_v30  ;;  %v7656_v30 = vcombine.low %v12995_v46, %v12995_v46  ;;  %v10419_v46 = vld [vmem:[%s16494_s2 + $0x738] sm:$0xff]  }
 0x238   :  { %8508 = vmatpush3.bf16.msra.mxu0 %v10363_v33 }
 0x239   :  { %8509 = vmatprep.subr.bf16.mxu0 %v10364_v34  ;;  %v10412_v34 = vld [vmem:[%s16494_s2 + $0x180] sm:$0xff]  }
 0x23c   :  { %8510 = vmatpush3.bf16.msra.mxu0 %v10367_v37  ;;  %v10414_v37 = vld [vmem:[%s16494_s2 + $0x2f8] sm:$0xff]  }
 0x23d   :  { %8511 = vmatprep.subr.bf16.mxu0 %v10368_v38 }
 0x240   :  { %v10230_v50 = vpop.eup %10229  ;;  %8512 = vmatpush3.bf16.msra.mxu0 %v10371_v42 }
 0x241   :  { %v3751_v52 = vadd.f32 1.0, %v10230_v50  ;;  %8513 = vmatprep.subr.bf16.mxu0 %v10372_v43  ;;  %v7652_v50 = vcombine.low %v12891_v3, %v12891_v3  ;;  %v10387_v3 = vld [vmem:[%s16494_s2 + $0x670] sm:$0xff]  }
 0x242   :  { %v8297_v42 = vpop.f32.mrf.mxu0  ;;  %v10417_v43 = vld [vmem:[%s16494_s2 + $0x2f0] sm:$0xff]  }
 0x243   :  { %10231 = vrcp.f32 %v3751_v52  ;;  %v10378_v52 = vld [vmem:[%s16495_s0 + $0x50] sm:$0xff] }
 0x244   :  { %8514 = vmatpush3.bf16.msra.mxu0 %v10376_v48  ;;  %v3883_v53 = vadd.bf16 %v10378_v52, %v7639_v49  ;;  %v8298_v45 = vpop.f32.mrf.mxu0  ;;  %v10421_v48 = vld [vmem:[%s16494_s2 + $0x770] sm:$0xff]  }
 0x245   :  { %8515 = vmatprep.subr.bf16.mxu0 %v10377_v51  ;;  %v13160_v52 = vadd.f32 %v8298_v45, %v8297_v42  ;;  %v10460_v42 = vld [vmem:[%s16494_s2 + $0x3e0] sm:$0xff]  }
 0x246   :  { %v7671_v58 = vcombine.high %v3883_v53, %v3883_v53  ;;  %v7670_v61 = vcombine.low %v3883_v53, %v3883_v53  ;;  %v8300_v49 = vpop.f32.mrf.mxu0  ;;  %v10423_v53 = vld [vmem:[%s16494_s2 + $0x730] sm:$0xff]   ;;  %v10463_v45 = vld [vmem:[%s16494_s2 + $0x860] sm:$0xff]  }
 0x247   :  { %v10467_v49 = vld [vmem:[%s16494_s2 + $0x858] sm:$0xff]  }
 0x248   :  { %8516 = vmatpush3.bf16.msra.mxu0 %v10381_v60  ;;  %4470 = vmatprep.mubr.bf16.mxu0 %v7671_v58  ;;  %v8301_v51 = vpop.f32.mrf.mxu0  ;;  %v10427_v58 = vld [vmem:[%s16494_s2 + $0x728] sm:$0xff]   ;;  %v10428_v60 = vld [vmem:[%s16494_s2 + $0x2a0] sm:$0xff]  }
 0x249   :  { %8545 = vmatprep.subr.bf16.mxu0 %v10384_v0  ;;  %v10432_v0 = vld [vmem:[%s16494_s2 + $0x298] sm:$0xff]  }
 0x24a   :  { %v10469_v51 = vld [vmem:[%s16494_s2 + $0x818] sm:$0xff]  }
 0x24b   :  { %4471 = vmatmul.mubr.bf16.vlgmr.msra.gmra.mxu0 %v7670_v61  ;;  %v10429_v61 = vld [vmem:[%s16494_s2 + $0x760] sm:$0xff]  }
 0x250   :  { %v10232_v63 = vpop.eup %10231 }
 0x251   :  { %v3753_v1 = vmul.f32 2.0, %v10232_v63  ;;  %v10383_v63 = vld [vmem:[%s16494_s2 + $0x1f0] sm:$0xff]  }
 0x253   :  { %v3754_v4 = vsub.f32 1.0, %v3753_v1  ;;  %v10385_v1 = vld [vmem:[%s16494_s2 + $0x638] sm:$0xff]  }
 0x254   :  { %8546 = vmatpush3.bf16.msra.mxu0 %v10385_v1  ;;  %v10433_v1 = vld [vmem:[%s16494_s2 + $0x758] sm:$0xff]  }
 0x255   :  { %v3756_v9 = vadd.f32 1.0, %v3754_v4  ;;  %8547 = vmatprep.subr.bf16.mxu0 %v10387_v3  ;;  %v10388_v4 = vld [vmem:[%s16494_s2 + $0x1e8] sm:$0xff]   ;;  %v10435_v3 = vld [vmem:[%s16494_s2 + $0x718] sm:$0xff]  }
 0x257   :  { %v3757_v12 = vmul.f32 %v3756_v9, %v3755_v8  ;;  %v10392_v8 = vld [vmem:[%s16494_s2 + $0x1e0] sm:$0xff]   ;;  %v10393_v9 = vld [vmem:[%s16494_s2 + $0x628] sm:$0xff]  }
 0x258   :  { %8548 = vmatpush3.bf16.msra.mxu0 %v10389_v5  ;;  %v10437_v5 = vld [vmem:[%s16494_s2 + $0x750] sm:$0xff]  }
 0x259   :  { %9732 = vmatmul.mubr.f32.vlgmr.msra.gmra.mxu1 %v3757_v12  ;;  %8549 = vmatprep.subr.bf16.mxu0 %v10391_v7  ;;  %v10397_v12 = vld [vmem:[%s16494_s2 + $0x620] sm:$0xff]  }
 0x25a   :  { %8304 = vmatpush3.bf16.msra.mxu1 %v10349_v17  ;;  %4110 = vmatprep.mubr.bf16.mxu1 %v7653_v11  ;;  %v10396_v11 = vld [vmem:[%s16494_s2 + $0x1d8] sm:$0xff]   ;;  %v10402_v17 = vld [vmem:[%s16494_s2 + $0x190] sm:$0xff]  }
 0x25b   :  { %8305 = vmatprep.subr.bf16.mxu1 %v10350_v18  ;;  %v10403_v18 = vld [vmem:[%s16494_s2 + $0x650] sm:$0xff]   ;;  %v7636_v7 = vld [vmem:[%s16496_s1 + $0xdc] sm:$0xff] }
 0x25c   :  { %8550 = vmatpush3.bf16.msra.mxu0 %v10393_v9  ;;  %v10440_v9 = vld [vmem:[%s16494_s2 + $0x288] sm:$0xff]  }
 0x25d   :  { %8551 = vmatprep.subr.bf16.mxu0 %v10395_v10 }
 0x25e   :  { %8306 = vmatpush3.bf16.msra.mxu1 %v10353_v22  ;;  %v10405_v22 = vld [vmem:[%s16494_s2 + $0x610] sm:$0xff]  }
 0x25f   :  { %8307 = vmatprep.subr.bf16.mxu1 %v10354_v24  ;;  %v10406_v24 = vld [vmem:[%s16494_s2 + $0x188] sm:$0xff]  }
 0x260   :  { %8552 = vmatpush3.bf16.msra.mxu0 %v10397_v12  ;;  %v10443_v12 = vld [vmem:[%s16494_s2 + $0x2c0] sm:$0xff]  }
 0x261   :  { %8553 = vmatprep.subr.bf16.mxu0 %v10399_v14  ;;  %v7660_v14 = vcombine.low %v13106_v26, %v13106_v26 }
 0x262   :  { %8308 = vmatpush3.bf16.msra.mxu1 %v10357_v27  ;;  %v10408_v27 = vld [vmem:[%s16494_s2 + $0x648] sm:$0xff]  }
 0x263   :  { %8309 = vmatprep.subr.bf16.mxu1 %v10358_v28  ;;  %v10409_v28 = vld [vmem:[%s16494_s2 + $0x1c0] sm:$0xff]  }
 0x264   :  { %8554 = vmatpush3.bf16.msra.mxu0 %v10401_v16  ;;  %v10445_v16 = vld [vmem:[%s16495_s0 + $0x70] sm:$0xff] }
 0x265   :  { %8555 = vmatprep.subr.bf16.mxu0 %v10403_v18  ;;  %v10446_v18 = vld [vmem:[%s16494_s2 + $0x280] sm:$0xff]  }
 0x266   :  { %8310 = vmatpush3.bf16.msra.mxu1 %v10361_v31  ;;  %v10410_v31 = vld [vmem:[%s16494_s2 + $0x608] sm:$0xff]  }
 0x267   :  { %8311 = vmatprep.subr.bf16.mxu1 %v10362_v32  ;;  %v10411_v32 = vld [vmem:[%s16495_s0 + $0x60] sm:$0xff] }
 0x268   :  { %8556 = vmatpush3.bf16.msra.mxu0 %v10405_v22  ;;  %v3885_v33 = vadd.bf16 %v10411_v32, %v7641_v29  ;;  %v10448_v22 = vld [vmem:[%s16494_s2 + $0x3f8] sm:$0xff]   ;;  %v10451_v29 = vld [vmem:[%s16494_s2 + $0x3f0] sm:$0xff]  }
 0x269   :  { %8557 = vmatprep.subr.bf16.mxu0 %v10408_v27  ;;  %v10450_v27 = vld [vmem:[%s16494_s2 + $0x3b8] sm:$0xff]  }
 0x26a   :  { %8312 = vmatpush3.bf16.msra.mxu1 %v10365_v35  ;;  %v7661_v35 = vcombine.high %v13106_v26, %v13106_v26  ;;  %v7675_v38 = vcombine.high %v3885_v33, %v3885_v33  ;;  %v10449_v26 = vld [vmem:[%s16494_s2 + $0x700] sm:$0xff]   ;;  %v10453_v32 = vld [vmem:[%s16494_s2 + $0x838] sm:$0xff]  }
 0x26b   :  { %8313 = vmatprep.subr.bf16.mxu1 %v10366_v36  ;;  %v10413_v36 = vld [vmem:[%s16494_s2 + $0x640] sm:$0xff]  }
 0x26c   :  { %8558 = vmatpush3.bf16.msra.mxu0 %v10410_v31  ;;  %4550 = vmatprep.mubr.bf16.mxu0 %v7675_v38 }
 0x26d   :  { %8559 = vmatprep.subr.bf16.mxu0 %v10413_v36 }
 0x26e   :  { %8314 = vmatpush3.bf16.msra.mxu1 %v10369_v39  ;;  %v7674_v39 = vcombine.low %v3885_v33, %v3885_v33  ;;  %v10454_v33 = vld [vmem:[%s16494_s2 + $0x3b0] sm:$0xff]  }
 0x26f   :  { %8315 = vmatprep.subr.bf16.mxu1 %v10370_v40  ;;  %v10415_v40 = vld [vmem:[%s16494_s2 + $0x600] sm:$0xff]  }
 0x270   :  { %8560 = vmatpush3.bf16.msra.mxu0 %v10415_v40  ;;  %v10458_v40 = vld [vmem:[%s16494_s2 + $0x3a8] sm:$0xff]  }
 0x272   :  { %8316 = vmatpush3.bf16.msra.mxu1 %v10373_v44  ;;  %v10418_v44 = vld [vmem:[%s16494_s2 + $0x778] sm:$0xff]  }
 0x273   :  { %8317 = vmatprep.subr.bf16.mxu1 %v10375_v47  ;;  %8589 = vmatprep.subr.bf16.mxu0 %v10418_v44  ;;  %v10420_v47 = vld [vmem:[%s16494_s2 + $0x2b0] sm:$0xff]   ;;  %v10462_v44 = vld [vmem:[%s16494_s2 + $0x3a0] sm:$0xff]  }
 0x274   :  { %4551 = vmatmul.mubr.bf16.vlgmr.msra.gmra.mxu0 %v7674_v39  ;;  %v10457_v39 = vld [vmem:[%s16494_s2 + $0x830] sm:$0xff]  }
 0x275   :  { %8590 = vmatpush3.bf16.msra.mxu0 %v10419_v46  ;;  %v10464_v46 = vld [vmem:[%s16494_s2 + $0x3d8] sm:$0xff]  }
 0x276   :  { %8318 = vmatpush3.bf16.msra.mxu1 %v10379_v54  ;;  %8591 = vmatprep.subr.bf16.mxu0 %v10421_v48  ;;  %v10424_v54 = vld [vmem:[%s16494_s2 + $0x2a8] sm:$0xff]   ;;  %v10466_v48 = vld [vmem:[%s16494_s2 + $0x398] sm:$0xff]  }
 0x277   :  { %8347 = vmatprep.subr.bf16.mxu1 %v10380_v57  ;;  %v10426_v57 = vld [vmem:[%s16494_s2 + $0x2e0] sm:$0xff]  }
 0x279   :  { %4111 = vmatmul.mubr.bf16.vlgmr.msra.gmra.mxu1 %v7652_v50  ;;  %v10422_v50 = vld [vmem:[%s16494_s2 + $0x2e8] sm:$0xff]   ;;  %8592 = vmatpush3.bf16.msra.mxu0 %v10423_v53  ;;  %v10470_v53 = vld [vmem:[%s16494_s2 + $0x390] sm:$0xff]  }
 0x27a   :  { %8348 = vmatpush3.bf16.msra.mxu1 %v10382_v62  ;;  %4190 = vmatprep.mubr.bf16.mxu1 %v7657_v55  ;;  %v10425_v55 = vld [vmem:[%s16494_s2 + $0x768] sm:$0xff]   ;;  %v10430_v62 = vld [vmem:[%s16494_s2 + $0x2d8] sm:$0xff]  }
 0x27b   :  { %8349 = vmatprep.subr.bf16.mxu1 %v10383_v63  ;;  %8593 = vmatprep.subr.bf16.mxu0 %v10425_v55  ;;  %v10431_v63 = vld [vmem:[%s16494_s2 + $0x720] sm:$0xff]   ;;  %v10472_v55 = vld [vmem:[%s16494_s2 + $0x3c8] sm:$0xff]  }
 0x27d   :  { %8594 = vmatpush3.bf16.msra.mxu0 %v10427_v58  ;;  %v10473_v58 = vld [vmem:[%s16494_s2 + $0x810] sm:$0xff]  }
 0x27e   :  { %8350 = vmatpush3.bf16.msra.mxu1 %v10386_v2  ;;  %8595 = vmatprep.subr.bf16.mxu0 %v10429_v61  ;;  %v10434_v2 = vld [vmem:[%s16494_s2 + $0x2d0] sm:$0xff]   ;;  %v10475_v61 = vld [vmem:[%s16495_s0 + $0x48] sm:$0xff] }
 0x27f   :  { %8351 = vmatprep.subr.bf16.mxu1 %v10388_v4  ;;  %v10436_v4 = vld [vmem:[%s16494_s2 + $0x290] sm:$0xff]  }
 0x281   :  { %8596 = vmatpush3.bf16.msra.mxu0 %v10431_v63  ;;  %v10476_v63 = vld [vmem:[%s16494_s2 + $0x848] sm:$0xff]  }
 0x282   :  { %8352 = vmatpush3.bf16.msra.mxu1 %v10390_v6  ;;  %8597 = vmatprep.subr.bf16.mxu0 %v10433_v1  ;;  %v10438_v6 = vld [vmem:[%s16494_s2 + $0x2c8] sm:$0xff]  }
 0x283   :  { %8353 = vmatprep.subr.bf16.mxu1 %v10392_v8  ;;  %v10439_v8 = vld [vmem:[%s16494_s2 + $0x710] sm:$0xff]   ;;  %v7645_v1 = vld [vmem:[%s16496_s1 + $0x124] sm:$0xff] }
 0x285   :  { %8598 = vmatpush3.bf16.msra.mxu0 %v10435_v3  ;;  %v10478_v3 = vld [vmem:[%s16494_s2 + $0x808] sm:$0xff]  }
 0x286   :  { %8354 = vmatpush3.bf16.msra.mxu1 %v10394_v59  ;;  %8599 = vmatprep.subr.bf16.mxu0 %v10437_v5  ;;  %v10441_v59 = vld [vmem:[%s16495_s0 + $0x38] sm:$0xff] }
 0x287   :  { %8355 = vmatprep.subr.bf16.mxu1 %v10396_v11  ;;  %v13222_v10 = vadd.bf16 %v10441_v59, %v7636_v7  ;;  %v10442_v11 = vld [vmem:[%s16494_s2 + $0x748] sm:$0xff]  }
 0x289   :  { %8600 = vmatpush3.bf16.msra.mxu0 %v10439_v8  ;;  %v10481_v8 = vld [vmem:[%s16494_s2 + $0x840] sm:$0xff]  }
 0x28a   :  { %8356 = vmatpush3.bf16.msra.mxu1 %v10398_v13  ;;  %8601 = vmatprep.subr.bf16.mxu0 %v10442_v11  ;;  %v7643_v13 = vld [vmem:[%s16496_s1 + $0x114] sm:$0xff]  ;;  %v10483_v11 = vld [vmem:[%s16494_s2 + $0x800] sm:$0xff]  }
 0x28b   :  { %8357 = vmatprep.subr.bf16.mxu1 %v10400_v15  ;;  %v10444_v15 = vld [vmem:[%s16494_s2 + $0x708] sm:$0xff]  }
 0x28d   :  { %8602 = vmatpush3.bf16.msra.mxu0 %v10444_v15  ;;  %v10486_v15 = vld [vmem:[%s16494_s2 + $0x978] sm:$0xff]  }
 0x28e   :  { %8358 = vmatpush3.bf16.msra.mxu1 %v10402_v17  ;;  %v3887_v17 = vadd.bf16 %v10445_v16, %v7643_v13  ;;  %8603 = vmatprep.subr.bf16.mxu0 %v10447_v21  ;;  %v10489_v21 = vld [vmem:[%s16494_s2 + $0x970] sm:$0xff]  }
 0x28f   :  { %8359 = vmatprep.subr.bf16.mxu1 %v10404_v19  ;;  %v7665_v19 = vcombine.high %v13222_v10, %v13222_v10 }
 0x290   :  { %v7678_v25 = vcombine.low %v3887_v17, %v3887_v17 }
 0x291   :  { %8604 = vmatpush3.bf16.msra.mxu0 %v10449_v26  ;;  %v10491_v26 = vld [vmem:[%s16494_s2 + $0x930] sm:$0xff]  }
 0x292   :  { %8360 = vmatpush3.bf16.msra.mxu1 %v10406_v24  ;;  %v7679_v24 = vcombine.high %v3887_v17, %v3887_v17  ;;  %v10487_v17 = vld [vmem:[%s16494_s2 + $0x938] sm:$0xff]  }
 0x293   :  { %8361 = vmatprep.subr.bf16.mxu1 %v10409_v28  ;;  %v8341_v28 = vpop.f32.mrf.mxu0 }
 0x294   :  { %4630 = vmatprep.mubr.bf16.mxu0 %v7679_v24  ;;  %v10490_v24 = vld [vmem:[%s16494_s2 + $0x4e8] sm:$0xff]  }
 0x295   :  { %4631 = vmatmul.mubr.bf16.vlgmr.msra.gmra.mxu0 %v7678_v25  ;;  %v8342_v31 = vpop.f32.mrf.mxu0 }
 0x296   :  { %8362 = vmatpush3.bf16.msra.mxu1 %v10412_v34  ;;  %v13270_v34 = vadd.f32 %v8342_v31, %v8341_v28  ;;  %v10493_v28 = vld [vmem:[%s16494_s2 + $0x968] sm:$0xff]   ;;  %v10496_v31 = vld [vmem:[%s16494_s2 + $0x4a0] sm:$0xff]  }
 0x297   :  { %8391 = vmatprep.subr.bf16.mxu1 %v10414_v37  ;;  %v8344_v36 = vpop.f32.mrf.mxu0  ;;  %v10456_v37 = vld [vmem:[%s16494_s2 + $0x3e8] sm:$0xff]  }
 0x298   :  { %v10500_v36 = vld [vmem:[%s16494_s2 + $0x498] sm:$0xff]  }
 0x299   :  { %4191 = vmatmul.mubr.bf16.vlgmr.msra.gmra.mxu1 %v7656_v30  ;;  %v10452_v30 = vld [vmem:[%s16494_s2 + $0x878] sm:$0xff]   ;;  %v8345_v38 = vpop.f32.mrf.mxu0 }
 0x29a   :  { %8392 = vmatpush3.bf16.msra.mxu1 %v10416_v41  ;;  %4270 = vmatprep.mubr.bf16.mxu1 %v7661_v35  ;;  %v10455_v35 = vld [vmem:[%s16494_s2 + $0x870] sm:$0xff]   ;;  %v10459_v41 = vld [vmem:[%s16494_s2 + $0x868] sm:$0xff]  }
 0x29b   :  { %8393 = vmatprep.subr.bf16.mxu1 %v10417_v43  ;;  %8633 = vmatprep.subr.bf16.mxu0 %v10452_v30  ;;  %v10461_v43 = vld [vmem:[%s16494_s2 + $0x828] sm:$0xff]   ;;  %v10502_v38 = vld [vmem:[%s16494_s2 + $0x4d0] sm:$0xff]  }
 0x29c   :  { %8634 = vmatpush3.bf16.msra.mxu0 %v10453_v32  ;;  %v10495_v30 = vld [vmem:[%s16494_s2 + $0x928] sm:$0xff]   ;;  %v10497_v32 = vld [vmem:[%s16494_s2 + $0x960] sm:$0xff]  }
 0x29d   :  { %8635 = vmatprep.subr.bf16.mxu0 %v10455_v35  ;;  %v10499_v35 = vld [vmem:[%s16494_s2 + $0x920] sm:$0xff]  }
 0x29e   :  { %8394 = vmatpush3.bf16.msra.mxu1 %v10420_v47  ;;  %v10465_v47 = vld [vmem:[%s16494_s2 + $0x820] sm:$0xff]  }
 0x29f   :  { %8395 = vmatprep.subr.bf16.mxu1 %v10422_v50  ;;  %v10468_v50 = vld [vmem:[%s16494_s2 + $0x3d0] sm:$0xff]  }
 0x2a0   :  { %8636 = vmatpush3.bf16.msra.mxu0 %v10457_v39  ;;  %v10503_v39 = vld [vmem:[%s16494_s2 + $0x918] sm:$0xff]  }
 0x2a1   :  { %8637 = vmatprep.subr.bf16.mxu0 %v10459_v41  ;;  %v10505_v41 = vld [vmem:[%s16494_s2 + $0x950] sm:$0xff]  }
 0x2a2   :  { %8396 = vmatpush3.bf16.msra.mxu1 %v10424_v54  ;;  %v10471_v54 = vld [vmem:[%s16494_s2 + $0x850] sm:$0xff]  }
 0x2a3   :  { %8397 = vmatprep.subr.bf16.mxu1 %v10426_v57  ;;  %v7638_v57 = vld [vmem:[%s16496_s1 + $0xec] sm:$0xff] }
 0x2a4   :  { %8638 = vmatpush3.bf16.msra.mxu0 %v10461_v43  ;;  %v7640_v43 = vld [vmem:[%s16496_s1 + $0xfc] sm:$0xff] }
 0x2a5   :  { %8639 = vmatprep.subr.bf16.mxu0 %v10463_v45  ;;  %v10508_v45 = vld [vmem:[%s16494_s2 + $0x488] sm:$0xff]  }
 0x2a6   :  { %8398 = vmatpush3.bf16.msra.mxu1 %v10428_v60  ;;  %v10474_v60 = vld [vmem:[%s16494_s2 + $0x388] sm:$0xff]  }
 0x2a7   :  { %8399 = vmatprep.subr.bf16.mxu1 %v10430_v62  ;;  %v13338_v62 = vadd.bf16 %v10475_v61, %v7638_v57  ;;  %v10514_v57 = vld [vmem:[%s16494_s2 + $0x480] sm:$0xff]   ;;  %v10516_v61 = vld [vmem:[%s16494_s2 + $0x5f8] sm:$0xff]  }
 0x2a8   :  { %8640 = vmatpush3.bf16.msra.mxu0 %v10465_v47 }
 0x2a9   :  { %8641 = vmatprep.subr.bf16.mxu0 %v10467_v49  ;;  %v7669_v7 = vcombine.high %v13338_v62, %v13338_v62  ;;  %v10511_v49 = vld [vmem:[%s16494_s2 + $0x4c0] sm:$0xff]  }
 0x2aa   :  { %8400 = vmatpush3.bf16.msra.mxu1 %v10432_v0  ;;  %v10477_v0 = vld [vmem:[%s16494_s2 + $0x3c0] sm:$0xff]  }
 0x2ab   :  { %8401 = vmatprep.subr.bf16.mxu1 %v10434_v2  ;;  %v7664_v2 = vcombine.low %v13222_v10, %v13222_v10  ;;  %v8385_v13 = vpop.f32.mrf.mxu0 }
 0x2ac   :  { %8642 = vmatpush3.bf16.msra.mxu0 %v10469_v51  ;;  %v7668_v51 = vcombine.low %v13338_v62, %v13338_v62 }
 0x2ad   :  { %8643 = vmatprep.subr.bf16.mxu0 %v10471_v54  ;;  %v8386_v16 = vpop.f32.mrf.mxu0  ;;  %v10513_v54 = vld [vmem:[%s16495_s0 + $0x90] sm:$0xff] }
 0x2ae   :  { %8402 = vmatpush3.bf16.msra.mxu1 %v10436_v4  ;;  %v10479_v4 = vld [vmem:[%s16495_s0 + $0x80] sm:$0xff] }
 0x2af   :  { %8403 = vmatprep.subr.bf16.mxu1 %v10438_v6  ;;  %v3889_v5 = vadd.bf16 %v10479_v4, %v7645_v1  ;;  %v10480_v6 = vld [vmem:[%s16494_s2 + $0x380] sm:$0xff]   ;;  %v10518_v1 = vld [vmem:[%s16494_s2 + $0x5b8] sm:$0xff]  }
 0x2b0   :  { %8644 = vmatpush3.bf16.msra.mxu0 %v10473_v58 }
 0x2b1   :  { %8645 = vmatprep.subr.bf16.mxu0 %v10476_v63  ;;  %v7683_v59 = vcombine.high %v3889_v5, %v3889_v5  ;;  %v7682_v10 = vcombine.low %v3889_v5, %v3889_v5  ;;  %v10520_v5 = vld [vmem:[%s16494_s2 + $0xa38] sm:$0xff]  }
 0x2b2   :  { %8404 = vmatpush3.bf16.msra.mxu1 %v10440_v9  ;;  %v10482_v9 = vld [vmem:[%s16494_s2 + $0x4f8] sm:$0xff]  }
 0x2b3   :  { %8405 = vmatprep.subr.bf16.mxu1 %v10443_v12  ;;  %v10484_v12 = vld [vmem:[%s16494_s2 + $0x4b8] sm:$0xff]   ;;  %4710 = vmatprep.mubr.bf16.mxu0 %v7683_v59 }
 0x2b4   :  { %8646 = vmatpush3.bf16.msra.mxu0 %v10478_v3  ;;  %v10519_v3 = vld [vmem:[%s16494_s2 + $0x5f0] sm:$0xff]  }
 0x2b5   :  { %8647 = vmatprep.subr.bf16.mxu0 %v10481_v8 }
 0x2b6   :  { %8406 = vmatpush3.bf16.msra.mxu1 %v10446_v18  ;;  %v10488_v18 = vld [vmem:[%s16494_s2 + $0x4b0] sm:$0xff]  }
 0x2b7   :  { %8435 = vmatprep.subr.bf16.mxu1 %v10448_v22  ;;  %v8388_v22 = vpop.f32.mrf.mxu0 }
 0x2b8   :  { %8648 = vmatpush3.bf16.msra.mxu0 %v10483_v11  ;;  %v10524_v11 = vld [vmem:[%s16494_s2 + $0x5a8] sm:$0xff]   ;;  %v10533_v22 = vld [vmem:[%s16494_s2 + $0x590] sm:$0xff]  }
 0x2b9   :  { %4271 = vmatmul.mubr.bf16.vlgmr.msra.gmra.mxu1 %v7660_v14  ;;  %v10485_v14 = vld [vmem:[%s16494_s2 + $0x4f0] sm:$0xff]   ;;  %8677 = vmatprep.subr.bf16.mxu0 %v10486_v15  ;;  %v8389_v25 = vpop.f32.mrf.mxu0  ;;  %v10528_v15 = vld [vmem:[%s16494_s2 + $0x5d8] sm:$0xff]  }
 0x2ba   :  { %8436 = vmatpush3.bf16.msra.mxu1 %v10450_v27  ;;  %4350 = vmatprep.mubr.bf16.mxu1 %v7665_v19  ;;  %v13386_v19 = vadd.f32 %v8386_v16, %v8385_v13  ;;  %v10492_v27 = vld [vmem:[%s16494_s2 + $0x4a8] sm:$0xff]   ;;  %v10529_v16 = vld [vmem:[%s16494_s2 + $0xa20] sm:$0xff]  }
 0x2bb   :  { %8437 = vmatprep.subr.bf16.mxu1 %v10451_v29  ;;  %4711 = vmatmul.mubr.bf16.vlgmr.msra.gmra.mxu0 %v7682_v10  ;;  %v10494_v29 = vld [vmem:[%s16494_s2 + $0x4e0] sm:$0xff]   ;;  %v10523_v10 = vld [vmem:[%s16494_s2 + $0xa30] sm:$0xff]   ;;  %v10526_v13 = vld [vmem:[%s16494_s2 + $0xa28] sm:$0xff]  }
 0x2bc   :  { %8678 = vmatpush3.bf16.msra.mxu0 %v10487_v17  ;;  %v10530_v17 = vld [vmem:[%s16494_s2 + $0x598] sm:$0xff]   ;;  %v7642_v25 = vld [vmem:[%s16496_s1 + $0x10c] sm:$0xff] }
 0x2bd   :  { %8679 = vmatprep.subr.bf16.mxu0 %v10489_v21  ;;  %v10532_v21 = vld [vmem:[%s16494_s2 + $0xa18] sm:$0xff]  }
 0x2be   :  { %8438 = vmatpush3.bf16.msra.mxu1 %v10454_v33  ;;  %v10498_v33 = vld [vmem:[%s16494_s2 + $0x4d8] sm:$0xff]  }
 0x2bf   :  { %8439 = vmatprep.subr.bf16.mxu1 %v10456_v37  ;;  %v10501_v37 = vld [vmem:[%s16494_s2 + $0x958] sm:$0xff]  }
 0x2c0   :  { %8680 = vmatpush3.bf16.msra.mxu0 %v10491_v26  ;;  %v10535_v26 = vld [vmem:[%s16494_s2 + $0xa10] sm:$0xff]  }
 0x2c1   :  { %8681 = vmatprep.subr.bf16.mxu0 %v10493_v28  ;;  %v10537_v28 = vld [vmem:[%s16495_s0 + $0x68] sm:$0xff] }
 0x2c2   :  { %8440 = vmatpush3.bf16.msra.mxu1 %v10458_v40  ;;  %v10504_v40 = vld [vmem:[%s16494_s2 + $0x490] sm:$0xff]  }
 0x2c3   :  { %8441 = vmatprep.subr.bf16.mxu1 %v10460_v42  ;;  %v10506_v42 = vld [vmem:[%s16494_s2 + $0x4c8] sm:$0xff]  }
 0x2c4   :  { %8682 = vmatpush3.bf16.msra.mxu0 %v10495_v30  ;;  %v10538_v30 = vld [vmem:[%s16494_s2 + $0x5c0] sm:$0xff]  }
 0x2c5   :  { %8683 = vmatprep.subr.bf16.mxu0 %v10497_v32 }
 0x2c6   :  { %8442 = vmatpush3.bf16.msra.mxu1 %v10462_v44  ;;  %v10507_v44 = vld [vmem:[%s16494_s2 + $0x910] sm:$0xff]  }
 0x2c7   :  { %8443 = vmatprep.subr.bf16.mxu1 %v10464_v46  ;;  %v10509_v46 = vld [vmem:[%s16495_s0 + $0x58] sm:$0xff] }
 0x2c8   :  { %8684 = vmatpush3.bf16.msra.mxu0 %v10499_v35  ;;  %v13454_v47 = vadd.bf16 %v10509_v46, %v7640_v43  ;;  %v10540_v35 = vld [vmem:[%s16495_s0 + $0xa0] sm:$0xf] }
 0x2c9   :  { %8685 = vmatprep.subr.bf16.mxu0 %v10501_v37  ;;  %v10541_v37 = vld [vmem:[%s16494_s2 + $0x580] sm:$0xff]  }
 0x2ca   :  { %8444 = vmatpush3.bf16.msra.mxu1 %v10466_v48  ;;  %v10510_v48 = vld [vmem:[%s16494_s2 + $0x948] sm:$0xff]   ;;  %v7673_v58 = vcombine.high %v13454_v47, %v13454_v47  ;;  %v7672_v32 = vcombine.low %v13454_v47, %v13454_v47  ;;  %v10543_v43 = vld [vmem:[%s16494_s2 + $0xa00] sm:$0xff]   ;;  %v10545_v47 = vld [vmem:[%s16494_s2 + $0x6f0] sm:$0xff]  }
 0x2cb   :  { %8445 = vmatprep.subr.bf16.mxu1 %v10468_v50  ;;  %v7647_v50 = vld [vmem:[%s16496_s1 + $0x134] sm:$0xff] }
 0x2cc   :  { %8686 = vmatpush3.bf16.msra.mxu0 %v10503_v39  ;;  %v10542_v39 = vld [vmem:[%s16494_s2 + $0x6f8] sm:$0xff]  }
 0x2cd   :  { %8687 = vmatprep.subr.bf16.mxu0 %v10505_v41 }
 0x2ce   :  { %8446 = vmatpush3.bf16.msra.mxu1 %v10470_v53  ;;  %v10512_v53 = vld [vmem:[%s16494_s2 + $0x908] sm:$0xff]  }
 0x2cf   :  { %8447 = vmatprep.subr.bf16.mxu1 %v10472_v55  ;;  %v3891_v55 = vadd.bf16 %v10513_v54, %v7647_v50 }
 0x2d0   :  { %8688 = vmatpush3.bf16.msra.mxu0 %v10507_v44 }
 0x2d1   :  { %8689 = vmatprep.subr.bf16.mxu0 %v10510_v48  ;;  %v7687_v62 = vcombine.high %v3891_v55, %v3891_v55  ;;  %v7686_v63 = vcombine.low %v3891_v55, %v3891_v55  ;;  %v10548_v55 = vld [vmem:[%s16494_s2 + $0x6b0] sm:$0xff]  }
 0x2d2   :  { %8448 = vmatpush3.bf16.msra.mxu1 %v10474_v60  ;;  %v10515_v60 = vld [vmem:[%s16494_s2 + $0x940] sm:$0xff]  }
 0x2d3   :  { %8449 = vmatprep.subr.bf16.mxu1 %v10477_v0  ;;  %v10517_v0 = vld [vmem:[%s16494_s2 + $0x900] sm:$0xff]   ;;  %4790 = vmatprep.mubr.bf16.mxu0 %v7687_v62 }
 0x2d4   :  { %8690 = vmatpush3.bf16.msra.mxu0 %v10512_v53  ;;  %v10547_v53 = vld [vmem:[%s16494_s2 + $0x38] sm:$0xff]  }
 0x2d5   :  { %8691 = vmatprep.subr.bf16.mxu0 %v10515_v60  ;;  %v10550_v60 = vld [vmem:[%s16494_s2 + $0x6e8] sm:$0xff]  }
 0x2d6   :  { %8450 = vmatpush3.bf16.msra.mxu1 %v10480_v6  ;;  %v10521_v6 = vld [vmem:[%s16494_s2 + $0x5b0] sm:$0xff]  }
 0x2d7   :  { %8479 = vmatprep.subr.bf16.mxu1 %v10482_v9  ;;  %v10522_v9 = vld [vmem:[%s16494_s2 + $0x5e8] sm:$0xff]  }
 0x2d8   :  { %8692 = vmatpush3.bf16.msra.mxu0 %v10517_v0  ;;  %v10551_v0 = vld [vmem:[%s16494_s2 + $0x30] sm:$0xff]  }
 0x2d9   :  { %4351 = vmatmul.mubr.bf16.vlgmr.msra.gmra.mxu1 %v7664_v2  ;;  %v8429_v2 = vpop.f32.mrf.mxu0  ;;  %9734 = vmatprep.subr.bf16.mxu0 %v11360_v20 }
 0x2da   :  { %8480 = vmatpush3.bf16.msra.mxu1 %v10484_v12  ;;  %4430 = vmatprep.mubr.bf16.mxu1 %v7669_v7  ;;  %v10525_v12 = vld [vmem:[%s16494_s2 + $0x5e0] sm:$0xff]  }
 0x2db   :  { %8481 = vmatprep.subr.bf16.mxu1 %v10485_v14  ;;  %4791 = vmatmul.mubr.bf16.vlgmr.msra.gmra.mxu0 %v7686_v63  ;;  %v8430_v4 = vpop.f32.mrf.mxu0  ;;  %v10527_v14 = vld [vmem:[%s16494_s2 + $0x5a0] sm:$0xff]  }
 0x2dc   :  { %9735 = vmatpush3.bf16.msra.mxu0 %v10520_v5  ;;  %9750 = vmatprep.mubr.msk.bf16.mxu0 %vm11361_vm0, %v11360_v20  ;;  %v13502_v7 = vadd.f32 %v8430_v4, %v8429_v2  ;;  %v10552_v2 = vld [vmem:[%s16494_s2 + $0x6a8] sm:$0xff]   ;;  %v10554_v4 = vld [vmem:[%s16494_s2 + $0x6e0] sm:$0xff]  }
 0x2dd   :  { %9736 = vmatprep.subr.bf16.mxu0 %v11360_v20  ;;  %v8432_v8 = vpop.f32.mrf.mxu0 }
 0x2de   :  { %8482 = vmatpush3.bf16.msra.mxu1 %v10488_v18  ;;  %v10531_v18 = vld [vmem:[%s16494_s2 + $0x5d0] sm:$0xff]  }
 0x2df   :  { %8483 = vmatprep.subr.bf16.mxu1 %v10490_v24  ;;  %v8433_v59 = vpop.f32.mrf.mxu0  ;;  %v10534_v24 = vld [vmem:[%s16494_s2 + $0x5c8] sm:$0xff]  }
 0x2e0   :  { %9737 = vmatpush3.bf16.msra.mxu0 %v10523_v10  ;;  %v10557_v59 = vld [vmem:[%s16494_s2 + $0x60] sm:$0xff]   ;;  %v10558_v10 = vld [vmem:[%s16494_s2 + $0x6d8] sm:$0xff]  }
 0x2e1   :  { %9738 = vmatprep.subr.bf16.mxu0 %v11360_v20 }
 0x2e2   :  { %8484 = vmatpush3.bf16.msra.mxu1 %v10492_v27  ;;  %v10536_v27 = vld [vmem:[%s16494_s2 + $0x588] sm:$0xff]  }
 0x2e3   :  { %8485 = vmatprep.subr.bf16.mxu1 %v10494_v29  ;;  %v13560_v29 = vadd.bf16 %v10537_v28, %v7642_v25  ;;  %v10568_v25 = vld [vmem:[%s16494_s2 + $0x688] sm:$0xff]  }
 0x2e4   :  { %9739 = vmatpush3.bf16.msra.mxu0 %v10526_v13  ;;  %v10560_v13 = vld [vmem:[%s16494_s2 + $0x698] sm:$0xff]   ;;  %v10570_v28 = vld [vmem:[%s16494_s2 + $0x48] sm:$0xff]  }
 0x2e5   :  { %9740 = vmatprep.subr.bf16.mxu0 %v11360_v20 }
 0x2e6   :  { %8486 = vmatpush3.bf16.msra.mxu1 %v10496_v31  ;;  %v7649_v31 = vld [vmem:[%s16496_s1 + $0x144] sm:$0xf] }
 0x2e7   :  { %8487 = vmatprep.subr.bf16.mxu1 %v10498_v33  ;;  %v10539_v33 = vld [vmem:[%s16494_s2 + $0xa08] sm:$0xff]  }
 0x2e8   :  { %9741 = vmatpush3.bf16.msra.mxu0 %v10529_v16  ;;  %v10563_v16 = vld [vmem:[%s16494_s2 + $0x18] sm:$0xff]  }
 0x2e9   :  { %9742 = vmatprep.subr.bf16.mxu0 %v11360_v20 }
 0x2ea   :  { %8488 = vmatpush3.bf16.msra.mxu1 %v10500_v36  ;;  %v3893_v36 = vadd.bf16 %v10540_v35, %v7649_v31  ;;  %v7676_v31 = vcombine.low %v13560_v29, %v13560_v29 }
 0x2eb   :  { %8489 = vmatprep.subr.bf16.mxu1 %v10502_v38  ;;  %v7677_v38 = vcombine.high %v13560_v29, %v13560_v29  ;;  %v8473_v48 = vpop.f32.mrf.mxu0  ;;  %v10575_v29 = vld [vmem:[%s16494_s2 + $0x7f8] sm:$0xff]  }
 0x2ec   :  { %9743 = vmatpush3.bf16.msra.mxu0 %v10532_v21  ;;  %v7690_v41 = vcombine.low %v3893_v36, %v3893_v36  ;;  %v10566_v21 = vld [vmem:[%s16494_s2 + $0x6c8] sm:$0xff]   ;;  %v10574_v36 = vld [vmem:[%s16494_s2 + $0x40] sm:$0xff]  }
 0x2ed   :  { %9744 = vmatprep.subr.bf16.mxu0 %v11360_v20 }
 0x2ee   :  { %8490 = vmatpush3.bf16.msra.mxu1 %v10504_v40  ;;  %v7258_v40 = vld [vmem:[%s16499_s5] ss:$0 sm:$0xff] }
 0x2ef   :  { %8491 = vmatprep.subr.bf16.mxu1 %v10506_v42 }
 0x2f0   :  { %9745 = vmatpush3.bf16.msra.mxu0 %v10535_v26  ;;  %v10569_v26 = vld [vmem:[%s16495_s0 + $0x78] sm:$0xff] }
 0x2f1   :  { %9746 = vmatprep.subr.bf16.mxu0 %v11360_v20 }
 0x2f2   :  { %8492 = vmatpush3.bf16.msra.mxu1 %v10508_v45  ;;  %v10544_v45 = vld [vmem:[%s16494_s2 + $0x6b8] sm:$0xff]  }
 0x2f3   :  { %8493 = vmatprep.subr.bf16.mxu1 %v10511_v49  ;;  %v10546_v49 = vld [vmem:[%s16494_s2 + $0x78] sm:$0xff]  }
 0x2f4   :  { %9747 = vmatpush3.bf16.msra.mxu0 %v10539_v33  ;;  %v10573_v33 = vld [vmem:[%s16494_s2 + $0x680] sm:$0xff]  }
 0x2f5   :  { %9748 = vmatprep.subr.bf16.mxu0 %v11360_v20 }
 0x2f6   :  { %8494 = vmatpush3.bf16.msra.mxu1 %v10514_v57 }
 0x2f7   :  { %8523 = vmatprep.subr.bf16.mxu1 %v10516_v61 }
 0x2f8   :  { %9749 = vmatpush3.bf16.msra.mxu0 %v10543_v43  ;;  %v10578_v43 = vld [vmem:[%s16494_s2 + $0x7f0] sm:$0xff]  }
 0x2f9   :  { %4431 = vmatmul.mubr.bf16.vlgmr.msra.gmra.mxu1 %v7668_v51  ;;  %8747 = vmatprep.subr.bf16.mxu0 %v10546_v49  ;;  %v8474_v51 = vpop.f32.mrf.mxu0 }
 0x2fa   :  { %8524 = vmatpush3.bf16.msra.mxu1 %v10518_v1  ;;  %4510 = vmatprep.mubr.bf16.mxu1 %v7673_v58  ;;  %v13612_v57 = vadd.f32 %v8474_v51, %v8473_v48  ;;  %v10549_v58 = vld [vmem:[%s16494_s2 + $0x70] sm:$0xff]  }
 0x2fb   :  { %8525 = vmatprep.subr.bf16.mxu1 %v10519_v3  ;;  %9751 = vmatmul.mubr.bf16.vlgmr.msra.gmra.mxu0 %v7690_v41  ;;  %v8476_v61 = vpop.f32.mrf.mxu0  ;;  %v10553_v3 = vld [vmem:[%s16494_s2 + $0x68] sm:$0xff]   ;;  %v10577_v41 = vld [vmem:[%s16494_s2 + $0x7b8] sm:$0xff]   ;;  %v10580_v51 = vld [vmem:[%s16494_s2 + $0x7b0] sm:$0xff]  }
 0x2fc   :  { %8748 = vmatpush3.bf16.msra.mxu0 %v10547_v53  ;;  %v10582_v61 = vld [vmem:[%s16494_s2 + $0x7a8] sm:$0xff]  }
 0x2fd   :  { %8749 = vmatprep.subr.bf16.mxu0 %v10549_v58  ;;  %v8477_v63 = vpop.f32.mrf.mxu0 }
 0x2fe   :  { %8526 = vmatpush3.bf16.msra.mxu1 %v10521_v6  ;;  %v10555_v6 = vld [vmem:[%s16494_s2 + $0x28] sm:$0xff]   ;;  %v10583_v63 = vld [vmem:[%s16494_s2 + $0x7e0] sm:$0xff]  }
 0x2ff   :  { %8527 = vmatprep.subr.bf16.mxu1 %v10522_v9  ;;  %v10556_v9 = vld [vmem:[%s16494_s2 + $0x6a0] sm:$0xff]  }
 0x300   :  { %8750 = vmatpush3.bf16.msra.mxu0 %v10551_v0  ;;  %v10584_v0 = vld [vmem:[%s16494_s2 + $0x7a0] sm:$0xff]  }
 0x301   :  { %8751 = vmatprep.subr.bf16.mxu0 %v10553_v3  ;;  %v10586_v3 = vld [vmem:[%s16494_s2 + $0x798] sm:$0xff]  }
 0x302   :  { %8528 = vmatpush3.bf16.msra.mxu1 %v10524_v11 }
 0x303   :  { %8529 = vmatprep.subr.bf16.mxu1 %v10525_v12  ;;  %v10559_v12 = vld [vmem:[%s16494_s2 + $0x20] sm:$0xff]  }
 0x304   :  { %8752 = vmatpush3.bf16.msra.mxu0 %v10555_v6 }
 0x305   :  { %8753 = vmatprep.subr.bf16.mxu0 %v10557_v59  ;;  %v10588_v59 = vld [vmem:[%s16494_s2 + $0x790] sm:$0xff]  }
 0x306   :  { %8530 = vmatpush3.bf16.msra.mxu1 %v10527_v14  ;;  %v10561_v14 = vld [vmem:[%s16494_s2 + $0x58] sm:$0xff]  }
 0x307   :  { %8531 = vmatprep.subr.bf16.mxu1 %v10528_v15  ;;  %v10562_v15 = vld [vmem:[%s16494_s2 + $0x6d0] sm:$0xff]  }
 0x308   :  { %8754 = vmatpush3.bf16.msra.mxu0 %v10559_v12 }
 0x309   :  { %8755 = vmatprep.subr.bf16.mxu0 %v10561_v14  ;;  %v10591_v14 = vld [vmem:[%s16495_s0 + $0x88] sm:$0xff] }
 0x30a   :  { %8532 = vmatpush3.bf16.msra.mxu1 %v10530_v17  ;;  %v10564_v17 = vld [vmem:[%s16494_s2 + $0x690] sm:$0xff]  }
 0x30b   :  { %8533 = vmatprep.subr.bf16.mxu1 %v10531_v18  ;;  %v10565_v18 = vld [vmem:[%s16494_s2 + $0x50] sm:$0xff]   ;;  %v8517_v48 = vpop.f32.mrf.mxu0 }
 0x30c   :  { %8756 = vmatpush3.bf16.msra.mxu0 %v10563_v16  ;;  %v10592_v16 = vld [vmem:[%s16494_s2 + $0x7c0] sm:$0xff]  }
 0x30d   :  { %8757 = vmatprep.subr.bf16.mxu0 %v10565_v18  ;;  %v8518_v53 = vpop.f32.mrf.mxu0  ;;  %v10593_v18 = vld [vmem:[%s16494_s2 + $0x780] sm:$0xff]  }
 0x30e   :  { %8534 = vmatpush3.bf16.msra.mxu1 %v10533_v22  ;;  %v7644_v22 = vld [vmem:[%s16496_s1 + $0x11c] sm:$0xff]  ;;  %v13725_v58 = vadd.f32 %v8518_v53, %v8517_v48  ;;  %v10606_v48 = vld [vmem:[%s16494_s2 + $0x8c8] sm:$0xff]  }
 0x30f   :  { %8535 = vmatprep.subr.bf16.mxu1 %v10534_v24  ;;  %v10567_v24 = vld [vmem:[%s16494_s2 + $0x10] sm:$0xff]  }
 0x310   :  { %8758 = vmatpush3.bf16.msra.mxu0 %v10567_v24 }
 0x311   :  { %8759 = vmatprep.subr.bf16.mxu0 %v10570_v28 }
 0x312   :  { %8536 = vmatpush3.bf16.msra.mxu1 %v10536_v27  ;;  %v13681_v27 = vadd.bf16 %v10569_v26, %v7644_v22  ;;  %v10594_v22 = vld [vmem:[%s16494_s2 + $0x8f8] sm:$0xff]  }
 0x313   :  { %8537 = vmatprep.subr.bf16.mxu1 %v10538_v30  ;;  %v10571_v30 = vld [vmem:[%s16494_s2 + $0x6c0] sm:$0xff]  }
 0x314   :  { %v7681_v35 = vcombine.high %v13681_v27, %v13681_v27 }
 0x316   :  { %8538 = vmatpush3.bf16.msra.mxu1 %v10541_v37 }
 0x317   :  { %8567 = vmatprep.subr.bf16.mxu1 %v10542_v39 }
 0x319   :  { %4511 = vmatmul.mubr.bf16.vlgmr.msra.gmra.mxu1 %v7672_v32  ;;  %v3824_v42 = vpop.f32.mrf.mxu1  ;;  %v10572_v32 = vld [vmem:[%s16494_s2 + $0x8] sm:$0xff]  }
 0x31a   :  { %v13592_v44 = vadd.f32 %v7258_v40, %v3824_v42  ;;  %8568 = vmatpush3.bf16.msra.mxu1 %v10544_v45  ;;  %4590 = vmatprep.mubr.bf16.mxu1 %v7677_v38  ;;  %v10576_v40 = vld [vmem:[%s16494_s2] sm:$0xff]   ;;  %v10579_v45 = vld [vmem:[%s16494_s2 + $0x178] sm:$0xff]  }
 0x31b   :  { %v9733_v46 = vpop.f32.mrf.mxu1  ;;  %8569 = vmatprep.subr.bf16.mxu1 %v10545_v47  ;;  %8760 = vmatpush3.bf16.msra.mxu0 %v10572_v32 }
 0x31c   :  { %v3828_v50 = vmul.f32 %v13592_v44, %v13592_v44  ;;  %8761 = vmatprep.subr.bf16.mxu0 %v10574_v36  ;;  %v4073_v46 = vadd.f32 %v13160_v52, %v12179_v56  ;;  %v3840_v6 = vmul.f32 0.5, %v13592_v44 }
 0x31e   :  { %v3829_v54 = vmul.f32 %v3828_v50, %v13592_v44  ;;  %8570 = vmatpush3.bf16.msra.mxu1 %v10548_v55  ;;  %v10581_v55 = vld [vmem:[%s16494_s2 + $0x7e8] sm:$0xff]  }
 0x31f   :  { %8571 = vmatprep.subr.bf16.mxu1 %v10550_v60  ;;  %8762 = vmatpush3.bf16.msra.mxu0 %v10576_v40  ;;  %v8520_v60 = vpop.f32.mrf.mxu0  ;;  %v10599_v40 = vld [vmem:[%s16494_s2 + $0x8a8] sm:$0xff]  }
 0x320   :  { %v3830_v62 = vmul.f32 0.044715, %v3829_v54  ;;  %8791 = vmatprep.subr.bf16.mxu0 %v10579_v45  ;;  %v10603_v45 = vld [vmem:[%s16494_s2 + $0x898] sm:$0xff]  }
 0x322   :  { %v3831_v1 = vadd.f32 %v3830_v62, %v13592_v44  ;;  %8572 = vmatpush3.bf16.msra.mxu1 %v10552_v2  ;;  %v8521_v62 = vpop.f32.mrf.mxu0  ;;  %v7646_v44 = vld [vmem:[%s16496_s1 + $0x12c] sm:$0xff] }
 0x323   :  { %8573 = vmatprep.subr.bf16.mxu1 %v10554_v4 }
 0x324   :  { %v3832_v5 = vmul.f32 0.7978846, %v3831_v1 }
 0x326   :  { %v3833_v8 = vmul.f32 2.0, %v3832_v5  ;;  %8574 = vmatpush3.bf16.msra.mxu1 %v10556_v9  ;;  %v10587_v5 = vld [vmem:[%s16494_s2 + $0x7d0] sm:$0xff]   ;;  %v7259_v9 = vld [vmem:[%s16500_s6] ss:$0 sm:$0xff] }
 0x327   :  { %8575 = vmatprep.subr.bf16.mxu1 %v10558_v10 }
 0x328   :  { %v3834_v11 = vmul.f32 1.442695, %v3833_v8 }
 0x32a   :  { %10233 = vpow2.f32 %v3834_v11  ;;  %8576 = vmatpush3.bf16.msra.mxu1 %v10560_v13  ;;  %v10589_v11 = vld [vmem:[%s16494_s2 + $0x7c8] sm:$0xff]  }
 0x32b   :  { %8577 = vmatprep.subr.bf16.mxu1 %v10562_v15  ;;  %v10590_v13 = vld [vmem:[%s16494_s2 + $0x788] sm:$0xff]   ;;  %v3890_v15 = vadd.bf16 %v10591_v14, %v7646_v44  ;;  %v10618_v14 = vld [vmem:[%s16494_s2 + $0x9a0] sm:$0xff]  }
 0x32c   :  { %v10616_v44 = vld [vmem:[%s16494_s2 + $0x9a8] sm:$0xff]  }
 0x32e   :  { %8578 = vmatpush3.bf16.msra.mxu1 %v10564_v17  ;;  %v7680_v17 = vcombine.low %v13681_v27, %v13681_v27  ;;  %v10596_v27 = vld [vmem:[%s16494_s2 + $0x8f0] sm:$0xff]  }
 0x32f   :  { %8579 = vmatprep.subr.bf16.mxu1 %v10566_v21  ;;  %v7685_v21 = vcombine.high %v3890_v15, %v3890_v15 }
 0x332   :  { %8580 = vmatpush3.bf16.msra.mxu1 %v10568_v25  ;;  %v10595_v25 = vld [vmem:[%s16494_s2 + $0x8b8] sm:$0xff]  }
 0x333   :  { %8581 = vmatprep.subr.bf16.mxu1 %v10571_v30 }
 0x334   :  { %v8561_v30 = vpop.f32.mrf.mxu0 }
 0x336   :  { %8582 = vmatpush3.bf16.msra.mxu1 %v10573_v33  ;;  %v10597_v33 = vld [vmem:[%s16494_s2 + $0x8b0] sm:$0xff]  }
 0x337   :  { %v10234_v37 = vpop.eup %10233  ;;  %8611 = vmatprep.subr.bf16.mxu1 %v10575_v29 }
 0x338   :  { %v3836_v38 = vadd.f32 1.0, %v10234_v37  ;;  %v10598_v37 = vld [vmem:[%s16494_s2 + $0x8e8] sm:$0xff]  }
 0x339   :  { %v8319_v39 = vpop.f32.mrf.mxu1  ;;  %4591 = vmatmul.mubr.bf16.vlgmr.msra.gmra.mxu1 %v7676_v31 }
 0x33a   :  { %8612 = vmatpush3.bf16.msra.mxu1 %v10577_v41  ;;  %10235 = vrcp.f32 %v3836_v38  ;;  %4670 = vmatprep.mubr.bf16.mxu1 %v7681_v35  ;;  %v8562_v35 = vpop.f32.mrf.mxu0 }
 0x33b   :  { %v8320_v42 = vpop.f32.mrf.mxu1  ;;  %8613 = vmatprep.subr.bf16.mxu1 %v10578_v43  ;;  %v13788_v29 = vadd.f32 %v8562_v35, %v8561_v30  ;;  %v10601_v43 = vld [vmem:[%s16494_s2 + $0x8a0] sm:$0xff]  }
 0x33c   :  { %v8321_v47 = vadd.f32 %v8320_v42, %v8319_v39  ;;  %v8564_v39 = vpop.f32.mrf.mxu0  ;;  %v10600_v42 = vld [vmem:[%s16494_s2 + $0x8e0] sm:$0xff]  }
 0x33d   :  { %v8322_v49 = vpop.f32.mrf.mxu1 }
 0x33e   :  { %v4113_v50 = vadd.f32 %v8321_v47, %v4073_v46  ;;  %8614 = vmatpush3.bf16.msra.mxu1 %v10580_v51  ;;  %v8565_v41 = vpop.f32.mrf.mxu0  ;;  %v10604_v46 = vld [vmem:[%s16494_s2 + $0x8d0] sm:$0xff]   ;;  %v7648_v49 = vld [vmem:[%s16496_s1 + $0x13c] sm:$0xff] }
 0x33f   :  { %v8323_v54 = vpop.f32.mrf.mxu1  ;;  %8615 = vmatprep.subr.bf16.mxu1 %v10581_v55  ;;  %v10605_v47 = vld [vmem:[%s16494_s2 + $0x890] sm:$0xff]   ;;  %v10608_v51 = vld [vmem:[%s16495_s0 + $0x98] sm:$0xff]  ;;  %v7684_v55 = vcombine.low %v3890_v15, %v3890_v15 }
 0x340   :  { %v4153_v52 = vadd.f32 %v13270_v34, %v4113_v50  ;;  %v10585_v34 = vld [vmem:[%s16494_s2 + $0x7d8] sm:$0xff]   ;;  %v10607_v50 = vld [vmem:[%s16494_s2 + $0x888] sm:$0xff]   ;;  %v3892_v53 = vadd.bf16 %v10608_v51, %v7648_v49  ;;  %v10609_v54 = vld [vmem:[%s16494_s2 + $0x8c0] sm:$0xff]  }
 0x341   :  { %v10620_v15 = vld [vmem:[%s16494_s2 + $0x998] sm:$0xff]   ;;  %v10637_v49 = vld [vmem:[%s16498_s4 + $0x28] sm:$0xff] }
 0x342   :  { %8616 = vmatpush3.bf16.msra.mxu1 %v10582_v61  ;;  %v7689_v60 = vcombine.high %v3892_v53, %v3892_v53  ;;  %v10611_v61 = vld [vmem:[%s16494_s2 + $0x9f8] sm:$0xff]  }
 0x343   :  { %8617 = vmatprep.subr.bf16.mxu1 %v10583_v63  ;;  %v10612_v63 = vld [vmem:[%s16494_s2 + $0x9b8] sm:$0xff]  }
 0x344   :  { %v10639_v51 = vld [vmem:[%s16498_s4 + $0x18] sm:$0xff] }
 0x346   :  { %8618 = vmatpush3.bf16.msra.mxu1 %v10584_v0 }
 0x347   :  { %v10236_v1 = vpop.eup %10235  ;;  %8619 = vmatprep.subr.bf16.mxu1 %v10585_v34 }
 0x348   :  { %v3838_v2 = vmul.f32 2.0, %v10236_v1  ;;  %v10613_v1 = vld [vmem:[%s16494_s2 + $0x9f0] sm:$0xff]  }
 0x34a   :  { %8620 = vmatpush3.bf16.msra.mxu1 %v10586_v3  ;;  %v3839_v4 = vsub.f32 1.0, %v3838_v2 }
 0x34b   :  { %8621 = vmatprep.subr.bf16.mxu1 %v10587_v5  ;;  %v10614_v5 = vld [vmem:[%s16494_s2 + $0x9b0] sm:$0xff]  }
 0x34c   :  { %v3841_v8 = vadd.f32 1.0, %v3839_v4 }
 0x34e   :  { %8622 = vmatpush3.bf16.msra.mxu1 %v10588_v59  ;;  %v3842_v10 = vmul.f32 %v3841_v8, %v3840_v6 }
 0x34f   :  { %8623 = vmatprep.subr.bf16.mxu1 %v10589_v11 }
 0x350   :  { %v3843_v12 = vmul.f32 %v7259_v9, %v3842_v10  ;;  %v10615_v9 = vld [vmem:[%s16494_s2 + $0x9e8] sm:$0xff]  }
 0x352   :  { %8624 = vmatpush3.bf16.msra.mxu1 %v10590_v13  ;;  %3844 = vadd.xlane.f32.xlu0 %v3843_v12  ;;  %v10617_v13 = vld [vmem:[%s16494_s2 + $0x9e0] sm:$0xff]  }
 0x353   :  { %8625 = vmatprep.subr.bf16.mxu1 %v10592_v16  ;;  %v10621_v16 = vld [vmem:[%s16494_s2 + $0x9d0] sm:$0xff]  }
 0x355   :  { %v8605_v2 = vpop.f32.mrf.mxu0 }
 0x356   :  { %8626 = vmatpush3.bf16.msra.mxu1 %v10593_v18  ;;  %v10623_v18 = vld [vmem:[%s16494_s2 + $0x9c8] sm:$0xff]  }
 0x357   :  { %8655 = vmatprep.subr.bf16.mxu1 %v10594_v22  ;;  %v8606_v6 = vpop.f32.mrf.mxu0  ;;  %v10625_v22 = vld [vmem:[%s16494_s2 + $0x9c0] sm:$0xff]  }
 0x358   :  { %v13845_v59 = vadd.f32 %v8606_v6, %v8605_v2 }
 0x359   :  { %v8363_v24 = vpop.f32.mrf.mxu1  ;;  %4671 = vmatmul.mubr.bf16.vlgmr.msra.gmra.mxu1 %v7680_v17  ;;  %v8608_v11 = vpop.f32.mrf.mxu0  ;;  %v10622_v17 = vld [vmem:[%s16494_s2 + $0x990] sm:$0xff]  }
 0x35a   :  { %8656 = vmatpush3.bf16.msra.mxu1 %v10595_v25  ;;  %4750 = vmatprep.mubr.bf16.mxu1 %v7685_v21  ;;  %v10624_v21 = vld [vmem:[%s16494_s2 + $0x988] sm:$0xff]   ;;  %v10626_v25 = vld [vmem:[%s16494_s2 + $0x980] sm:$0xff]  }
 0x35b   :  { %v8364_v26 = vpop.f32.mrf.mxu1  ;;  %8657 = vmatprep.subr.bf16.mxu1 %v10596_v27  ;;  %v8609_v12 = vpop.f32.mrf.mxu0  ;;  %v10627_v27 = vld [vmem:[%s16498_s4 + $0x78] sm:$0xff] }
 0x35c   :  { %v8365_v28 = vadd.f32 %v8364_v26, %v8363_v24  ;;  %v7688_v24 = vcombine.low %v3892_v53, %v3892_v53  ;;  %v10640_v53 = vld [vmem:[%s16498_s4 + $0x10] sm:$0xff] }
 0x35d   :  { %v8366_v31 = vpop.f32.mrf.mxu1 }
 0x35e   :  { %v4193_v32 = vadd.f32 %v8365_v28, %v4153_v52  ;;  %8658 = vmatpush3.bf16.msra.mxu1 %v10597_v33  ;;  %v10610_v52 = vld [vmem:[%s16494_s2 + $0x880] sm:$0xff]  }
 0x35f   :  { %v8367_v36 = vpop.f32.mrf.mxu1  ;;  %8659 = vmatprep.subr.bf16.mxu1 %v10598_v37  ;;  %v10629_v37 = vld [vmem:[%s16498_s4 + $0x68] sm:$0xff] }
 0x360   :  { %v4233_v38 = vadd.f32 %v13386_v19, %v4193_v32  ;;  %v10602_v19 = vld [vmem:[%s16494_s2 + $0x8d8] sm:$0xff]   ;;  %v10628_v32 = vld [vmem:[%s16498_s4 + $0x70] sm:$0xff] }
 0x362   :  { %8660 = vmatpush3.bf16.msra.mxu1 %v10599_v40 }
 0x363   :  { %8661 = vmatprep.subr.bf16.mxu1 %v10600_v42  ;;  %v10630_v42 = vld [vmem:[%s16498_s4 + $0x60] sm:$0xff] }
 0x366   :  { %8662 = vmatpush3.bf16.msra.mxu1 %v10601_v43 }
 0x367   :  { %8663 = vmatprep.subr.bf16.mxu1 %v10602_v19  ;;  %v10631_v19 = vld [vmem:[%s16498_s4 + $0x58] sm:$0xff] }
 0x36a   :  { %8664 = vmatpush3.bf16.msra.mxu1 %v10603_v45  ;;  %v10633_v45 = vld [vmem:[%s16498_s4 + $0x48] sm:$0xff] }
 0x36b   :  { %8665 = vmatprep.subr.bf16.mxu1 %v10604_v46  ;;  %v10634_v46 = vld [vmem:[%s16498_s4 + $0x40] sm:$0xff] }
 0x36e   :  { %8666 = vmatpush3.bf16.msra.mxu1 %v10605_v47  ;;  %v10635_v47 = vld [vmem:[%s16498_s4 + $0x38] sm:$0xff] }
 0x36f   :  { %8667 = vmatprep.subr.bf16.mxu1 %v10606_v48  ;;  %v10636_v48 = vld [vmem:[%s16498_s4 + $0x30] sm:$0xff] }
 0x372   :  { %8668 = vmatpush3.bf16.msra.mxu1 %v10607_v50  ;;  %v10638_v50 = vld [vmem:[%s16498_s4 + $0x20] sm:$0xff] }
 0x373   :  { %8669 = vmatprep.subr.bf16.mxu1 %v10609_v54  ;;  %v10641_v54 = vld [vmem:[%s16498_s4 + $0x8] sm:$0xff] }
 0x376   :  { %8670 = vmatpush3.bf16.msra.mxu1 %v10610_v52 }
 0x377   :  { %8699 = vmatprep.subr.bf16.mxu1 %v10611_v61 }
 0x379   :  { %v8407_v62 = vpop.f32.mrf.mxu1  ;;  %4751 = vmatmul.mubr.bf16.vlgmr.msra.gmra.mxu1 %v7684_v55  ;;  %v10642_v55 = vld [vmem:[%s16498_s4] sm:$0xff] }
 0x37a   :  { %8700 = vmatpush3.bf16.msra.mxu1 %v10612_v63  ;;  %4830 = vmatprep.mubr.bf16.mxu1 %v7689_v60  ;;  %v10643_v60 = vld [vmem:[%s16494_s2 + $0xf8] sm:$0xff]  }
 0x37b   :  { %v8408_v0 = vpop.f32.mrf.mxu1  ;;  %8701 = vmatprep.subr.bf16.mxu1 %v10613_v1  ;;  %v8649_v31 = vpop.f32.mrf.mxu0 }
 0x37c   :  { %v8409_v34 = vadd.f32 %v8408_v0, %v8407_v62 }
 0x37d   :  { %v8410_v3 = vpop.f32.mrf.mxu1  ;;  %v8650_v36 = vpop.f32.mrf.mxu0 }
 0x37e   :  { %v4273_v4 = vadd.f32 %v8409_v34, %v4233_v38  ;;  %8702 = vmatpush3.bf16.msra.mxu1 %v10614_v5  ;;  %v13895_v39 = vadd.f32 %v8650_v36, %v8649_v31  ;;  %v10645_v31 = vld [vmem:[%s16494_s2 + $0x138] sm:$0xff]   ;;  %v10647_v36 = vld [vmem:[%s16494_s2 + $0x130] sm:$0xff]  }
 0x37f   :  { %v8411_v8 = vpop.f32.mrf.mxu1  ;;  %8703 = vmatprep.subr.bf16.mxu1 %v10615_v9  ;;  %v8652_v41 = vpop.f32.mrf.mxu0 }
 0x380   :  { %v4313_v10 = vadd.f32 %v13502_v7, %v4273_v4  ;;  %v10619_v7 = vld [vmem:[%s16494_s2 + $0x9d8] sm:$0xff]  }
 0x381   :  { %v8653_v43 = vpop.f32.mrf.mxu0 }
 0x382   :  { %8704 = vmatpush3.bf16.msra.mxu1 %v10616_v44 }
 0x383   :  { %8705 = vmatprep.subr.bf16.mxu1 %v10617_v13 }
 0x386   :  { %8706 = vmatpush3.bf16.msra.mxu1 %v10618_v14 }
 0x387   :  { %8707 = vmatprep.subr.bf16.mxu1 %v10619_v7 }
 0x38a   :  { %8708 = vmatpush3.bf16.msra.mxu1 %v10620_v15 }
 0x38b   :  { %8709 = vmatprep.subr.bf16.mxu1 %v10621_v16 }
 0x38e   :  { %8710 = vmatpush3.bf16.msra.mxu1 %v10622_v17  ;;  %v7691_v17 = vld [vmem:[%s16496_s1 + $0x148] sm:$0xff] }
 0x38f   :  { %8711 = vmatprep.subr.bf16.mxu1 %v10623_v18 }
 0x392   :  { %8712 = vmatpush3.bf16.msra.mxu1 %v10624_v21 }
 0x393   :  { %8713 = vmatprep.subr.bf16.mxu1 %v10625_v22 }
 0x396   :  { %8714 = vmatpush3.bf16.msra.mxu1 %v10626_v25 }
 0x397   :  { %9754 = vmatprep.subr.mxu1 %v11360_v20 }
 0x399   :  { %v8451_v26 = vpop.f32.mrf.mxu1  ;;  %4831 = vmatmul.mubr.bf16.vlgmr.msra.gmra.mxu1 %v7688_v24 }
 0x39a   :  { %9755 = vmatpush3.msra.mxu1 %v10627_v27  ;;  %9786 = vmatprep.mubr.msk.f32.mxu1 %vm11361_vm0, %v11360_v20 }
 0x39b   :  { %v8452_v28 = vpop.f32.mrf.mxu1  ;;  %9756 = vmatprep.subr.mxu1 %v11360_v20  ;;  %v8693_v63 = vpop.f32.mrf.mxu0 }
 0x39c   :  { %v8453_v30 = vadd.f32 %v8452_v28, %v8451_v26  ;;  %9757 = vmatpush3.msra.mxu1 %v10628_v32  ;;  %v10646_v32 = vld [vmem:[%s16494_s2 + $0x170] sm:$0xff]  }
 0x39d   :  { %v8454_v33 = vpop.f32.mrf.mxu1  ;;  %9758 = vmatprep.subr.mxu1 %v11360_v20  ;;  %v8694_v34 = vpop.f32.mrf.mxu0 }
 0x39e   :  { %v4353_v35 = vadd.f32 %v8453_v30, %v4313_v10  ;;  %9759 = vmatpush3.msra.mxu1 %v10629_v37  ;;  %v13953_v3 = vadd.f32 %v8694_v34, %v8693_v63  ;;  %v10648_v37 = vld [vmem:[%s16494_s2 + $0x168] sm:$0xff]  }
 0x39f   :  { %v8455_v38 = vpop.f32.mrf.mxu1  ;;  %9760 = vmatprep.subr.mxu1 %v11360_v20  ;;  %v8696_v5 = vpop.f32.mrf.mxu0 }
 0x3a0   :  { %v4393_v40 = vadd.f32 %v13612_v57, %v4353_v35  ;;  %9761 = vmatpush3.msra.mxu1 %v10630_v42  ;;  %v10632_v57 = vld [vmem:[%s16498_s4 + $0x50] sm:$0xff]  ;;  %v10649_v42 = vld [vmem:[%s16494_s2 + $0x128] sm:$0xff]  }
 0x3a1   :  { %9762 = vmatprep.subr.mxu1 %v11360_v20  ;;  %v8697_v6 = vpop.f32.mrf.mxu0  ;;  %v10665_v5 = vld [vmem:[%s16494_s2 + $0x268] sm:$0xff]  }
 0x3a2   :  { %9763 = vmatpush3.msra.mxu1 %v10631_v19  ;;  %v10650_v19 = vld [vmem:[%s16494_s2 + $0x160] sm:$0xff]  }
 0x3a3   :  { %9764 = vmatprep.subr.mxu1 %v11360_v20 }
 0x3a4   :  { %9765 = vmatpush3.msra.mxu1 %v10632_v57  ;;  %v10651_v57 = vld [vmem:[%s16494_s2 + $0x120] sm:$0xff]  }
 0x3a5   :  { %9766 = vmatprep.subr.mxu1 %v11360_v20 }
 0x3a6   :  { %9767 = vmatpush3.msra.mxu1 %v10633_v45  ;;  %v10652_v45 = vld [vmem:[%s16494_s2 + $0x158] sm:$0xff]  }
 0x3a7   :  { %9768 = vmatprep.subr.mxu1 %v11360_v20 }
 0x3a8   :  { %9769 = vmatpush3.msra.mxu1 %v10634_v46  ;;  %v10653_v46 = vld [vmem:[%s16494_s2 + $0x118] sm:$0xff]  }
 0x3a9   :  { %9770 = vmatprep.subr.mxu1 %v11360_v20 }
 0x3aa   :  { %9771 = vmatpush3.msra.mxu1 %v10635_v47  ;;  %v10655_v47 = vld [vmem:[%s16494_s2 + $0x110] sm:$0xff]  }
 0x3ab   :  { %9772 = vmatprep.subr.mxu1 %v11360_v20 }
 0x3ac   :  { %9773 = vmatpush3.msra.mxu1 %v10636_v48  ;;  %v10656_v48 = vld [vmem:[%s16494_s2 + $0x148] sm:$0xff]  }
 0x3ad   :  { %9774 = vmatprep.subr.mxu1 %v11360_v20 }
 0x3ae   :  { %9775 = vmatpush3.msra.mxu1 %v10637_v49  ;;  %v10657_v49 = vld [vmem:[%s16494_s2 + $0x108] sm:$0xff]  }
 0x3af   :  { %9776 = vmatprep.subr.mxu1 %v11360_v20 }
 0x3b0   :  { %9777 = vmatpush3.msra.mxu1 %v10638_v50  ;;  %v10658_v50 = vld [vmem:[%s16494_s2 + $0x140] sm:$0xff]  }
 0x3b1   :  { %9778 = vmatprep.subr.mxu1 %v11360_v20 }
 0x3b2   :  { %9779 = vmatpush3.msra.mxu1 %v10639_v51  ;;  %v7693_v51 = vld [vmem:[%s16496_s1 + $0x158] sm:$0xff] }
 0x3b3   :  { %9780 = vmatprep.subr.mxu1 %v11360_v20 }
 0x3b4   :  { %9781 = vmatpush3.msra.mxu1 %v10640_v53  ;;  %v10659_v53 = vld [vmem:[%s16495_s0 + $0x10] sm:$0xff] }
 0x3b5   :  { %9782 = vmatprep.subr.mxu1 %v11360_v20 }
 0x3b6   :  { %9783 = vmatpush3.msra.mxu1 %v10641_v54  ;;  %v5009_v54 = vadd.bf16 %v10659_v53, %v7693_v51  ;;  %v10691_v51 = vld [vmem:[%s16494_s2 + $0x308] sm:$0xff]   ;;  %v10692_v53 = vld [vmem:[%s16494_s2 + $0x340] sm:$0xff]  }
 0x3b7   :  { %9784 = vmatprep.subr.mxu1 %v11360_v20 }
 0x3b8   :  { %9785 = vmatpush3.msra.mxu1 %v10642_v55  ;;  %v10660_v55 = vld [vmem:[%s16494_s2 + $0x100] sm:$0xff]  }
 0x3b9   :  { %v8495_v52 = vpop.f32.mrf.mxu1  ;;  %8769 = vmatprep.subr.bf16.mxu1 %v10643_v60  ;;  %v10661_v60 = vld [vmem:[%s16494_s2 + $0x278] sm:$0xff]  }
 0x3bb   :  { %v8496_v61 = vpop.f32.mrf.mxu1  ;;  %v13956_v11 = vpop.f32.mrf.mxu0 }
 0x3bc   :  { %v8497_v62 = vadd.f32 %v8496_v61, %v8495_v52  ;;  %v7717_v52 = vcombine.high %v5009_v54, %v5009_v54  ;;  %v7716_v61 = vcombine.low %v5009_v54, %v5009_v54  ;;  %v7697_v54 = vld [vmem:[%s16496_s1 + $0x178] sm:$0xff] }
 0x3bd   :  { %v8498_v0 = vpop.f32.mrf.mxu1  ;;  %v9752_v13 = vpop.f32.mrf.mxu0 }
 0x3be   :  { %v4433_v1 = vadd.f32 %v8497_v62, %v4393_v40  ;;  %v10662_v62 = vld [vmem:[%s16494_s2 + $0x238] sm:$0xff]   ;;  %v10663_v0 = vld [vmem:[%s16494_s2 + $0x270] sm:$0xff]  }
 0x3bf   :  { %v8499_v2 = vpop.f32.mrf.mxu1  ;;  %v4875_v15 = vpop.f32.mrf.mxu0  ;;  %v10669_v13 = vld [vmem:[%s16494_s2 + $0x258] sm:$0xff]  }
 0x3c0   :  { %v4473_v4 = vadd.f32 %v13725_v58, %v4433_v1  ;;  %v10644_v58 = vld [vmem:[%s16495_s0] sm:$0xff]  ;;  %v10664_v2 = vld [vmem:[%s16494_s2 + $0x230] sm:$0xff]   ;;  %v10673_v15 = vld [vmem:[%s16494_s2 + $0x248] sm:$0xff]  }
 0x3c1   :  { %v9753_v16 = vpop.f32.mrf.mxu0  ;;  %v5007_v18 = vadd.bf16 %v10644_v58, %v7691_v17  ;;  %v10675_v17 = vld [vmem:[%s16494_s2 + $0x240] sm:$0xff]   ;;  %v7695_v58 = vld [vmem:[%s16496_s1 + $0x168] sm:$0xff] }
 0x3c2   :  { %v10674_v16 = vld [vmem:[%s16494_s2 + $0x208] sm:$0xff]  }
 0x3c3   :  { %v7713_v21 = vcombine.high %v5007_v18, %v5007_v18  ;;  %v7712_v30 = vcombine.low %v5007_v18, %v5007_v18  ;;  %v10676_v18 = vld [vmem:[%s16495_s0 + $0x20] sm:$0xff] }
 0x3c5   :  { %5204 = vmatprep.mubr.bf16.mxu0 %v7713_v21  ;;  %v5011_v21 = vadd.bf16 %v10676_v18, %v7695_v58  ;;  %v10709_v18 = vld [vmem:[%s16494_s2 + $0x408] sm:$0xff]  }
 0x3c6   :  { %5205 = vmatmul.mubr.bf16.vlgmr.msra.gmra.mxu0 %v7712_v30 }
 0x3c7   :  { %8792 = vmatpush3.bf16.msra.mxu0 %v10645_v31  ;;  %5284 = vmatprep.mubr.bf16.mxu0 %v7717_v52 }
 0x3c8   :  { %8793 = vmatprep.subr.bf16.mxu0 %v10646_v32  ;;  %v10681_v32 = vld [vmem:[%s16494_s2 + $0x330] sm:$0xff]  }
 0x3cb   :  { %8794 = vmatpush3.bf16.msra.mxu0 %v10647_v36 }
 0x3cc   :  { %8795 = vmatprep.subr.bf16.mxu0 %v10648_v37 }
 0x3cf   :  { %8796 = vmatpush3.bf16.msra.mxu0 %v10649_v42 }
 0x3d0   :  { %8797 = vmatprep.subr.bf16.mxu0 %v10650_v19 }
 0x3d3   :  { %8798 = vmatpush3.bf16.msra.mxu0 %v10651_v57 }
 0x3d4   :  { %8799 = vmatprep.subr.bf16.mxu0 %v10652_v45  ;;  %v10687_v45 = vld [vmem:[%s16494_s2 + $0x318] sm:$0xff]  }
 0x3d7   :  { %8800 = vmatpush3.bf16.msra.mxu0 %v10653_v46  ;;  %v10688_v46 = vld [vmem:[%s16494_s2 + $0x350] sm:$0xff]  }
 0x3d9   :  { %v8539_v8 = vpop.f32.mrf.mxu1 }
 0x3db   :  { %v8540_v9 = vpop.f32.mrf.mxu1 }
 0x3dc   :  { %v8541_v10 = vadd.f32 %v8540_v9, %v8539_v8 }
 0x3dd   :  { %v8542_v44 = vpop.f32.mrf.mxu1 }
 0x3de   :  { %v4513_v12 = vadd.f32 %v8541_v10, %v4473_v4  ;;  %v10666_v10 = vld [vmem:[%s16494_s2 + $0x228] sm:$0xff]   ;;  %v10667_v44 = vld [vmem:[%s16494_s2 + $0x260] sm:$0xff]  }
 0x3df   :  { %v8543_v14 = vpop.f32.mrf.mxu1 }
 0x3e0   :  { %v4553_v7 = vadd.f32 %v13788_v29, %v4513_v12  ;;  %v10668_v12 = vld [vmem:[%s16494_s2 + $0x220] sm:$0xff]   ;;  %v10671_v14 = vld [vmem:[%s16494_s2 + $0x250] sm:$0xff]  }
 0x3f9   :  { %v8583_v22 = vpop.f32.mrf.mxu1 }
 0x3fb   :  { %v8584_v24 = vpop.f32.mrf.mxu1 }
 0x3fc   :  { %v8585_v25 = vadd.f32 %v8584_v24, %v8583_v22  ;;  %v10677_v22 = vld [vmem:[%s16494_s2 + $0x200] sm:$0xff]   ;;  %v7721_v24 = vcombine.high %v5011_v21, %v5011_v21 }
 0x3fd   :  { %v8586_v26 = vpop.f32.mrf.mxu1 }
 0x3fe   :  { %v4593_v27 = vadd.f32 %v8585_v25, %v4553_v7  ;;  %v10672_v7 = vld [vmem:[%s16494_s2 + $0x210] sm:$0xff]   ;;  %v10678_v25 = vld [vmem:[%s16494_s2 + $0x378] sm:$0xff]   ;;  %v7720_v26 = vcombine.low %v5011_v21, %v5011_v21  ;;  %v10710_v21 = vld [vmem:[%s16494_s2 + $0x440] sm:$0xff]  }
 0x3ff   :  { %v8587_v28 = vpop.f32.mrf.mxu1 }
 0x400   :  { %v4633_v29 = vadd.f32 %v13845_v59, %v4593_v27  ;;  %v10679_v27 = vld [vmem:[%s16494_s2 + $0x338] sm:$0xff]  }
 0x419   :  { %v8627_v33 = vpop.f32.mrf.mxu1 }
 0x41b   :  { %v8628_v35 = vpop.f32.mrf.mxu1 }
 0x41c   :  { %v8629_v59 = vadd.f32 %v8628_v35, %v8627_v33  ;;  %v10682_v35 = vld [vmem:[%s16494_s2 + $0x368] sm:$0xff]  }
 0x41d   :  { %v8630_v38 = vpop.f32.mrf.mxu1 }
 0x41e   :  { %v4673_v40 = vadd.f32 %v8629_v59, %v4633_v29  ;;  %v10680_v29 = vld [vmem:[%s16494_s2 + $0x370] sm:$0xff]   ;;  %v10683_v38 = vld [vmem:[%s16494_s2 + $0x328] sm:$0xff]  }
 0x41f   :  { %v8631_v41 = vpop.f32.mrf.mxu1 }
 0x420   :  { %v4713_v43 = vadd.f32 %v13895_v39, %v4673_v40  ;;  %v10654_v39 = vld [vmem:[%s16494_s2 + $0x150] sm:$0xff]   ;;  %v10684_v40 = vld [vmem:[%s16494_s2 + $0x360] sm:$0xff]  }
 0x421   :  { %8801 = vmatprep.subr.bf16.mxu0 %v10654_v39 }
 0x422   :  { %8802 = vmatpush3.bf16.msra.mxu0 %v10655_v47 }
 0x423   :  { %8803 = vmatprep.subr.bf16.mxu0 %v10656_v48  ;;  %v10689_v48 = vld [vmem:[%s16494_s2 + $0x310] sm:$0xff]  }
 0x426   :  { %8804 = vmatpush3.bf16.msra.mxu0 %v10657_v49  ;;  %v10690_v49 = vld [vmem:[%s16494_s2 + $0x348] sm:$0xff]  }
 0x427   :  { %8805 = vmatprep.subr.bf16.mxu0 %v10658_v50 }
 0x42a   :  { %8806 = vmatpush3.bf16.msra.mxu0 %v10660_v55  ;;  %v10693_v55 = vld [vmem:[%s16495_s0 + $0x30] sm:$0xff] }
 0x42b   :  { %8835 = vmatprep.subr.bf16.mxu0 %v10661_v60  ;;  %v5013_v52 = vadd.bf16 %v10693_v55, %v7697_v54  ;;  %v10694_v60 = vld [vmem:[%s16494_s2 + $0x300] sm:$0xff]   ;;  %v10735_v54 = vld [vmem:[%s16494_s2 + $0xc8] sm:$0xff]  }
 0x42c   :  { %v7694_v55 = vld [vmem:[%s16496_s1 + $0x160] sm:$0xff] }
 0x42d   :  { %5285 = vmatmul.mubr.bf16.vlgmr.msra.gmra.mxu0 %v7716_v61  ;;  %v7725_v61 = vcombine.high %v5013_v52, %v5013_v52 }
 0x42e   :  { %8836 = vmatpush3.bf16.msra.mxu0 %v10662_v62  ;;  %5364 = vmatprep.mubr.bf16.mxu0 %v7721_v24  ;;  %v10695_v62 = vld [vmem:[%s16494_s2 + $0x478] sm:$0xff]  }
 0x42f   :  { %8837 = vmatprep.subr.bf16.mxu0 %v10663_v0  ;;  %v10696_v0 = vld [vmem:[%s16494_s2 + $0x438] sm:$0xff]  }
 0x432   :  { %8838 = vmatpush3.bf16.msra.mxu0 %v10664_v2 }
 0x433   :  { %8839 = vmatprep.subr.bf16.mxu0 %v10665_v5 }
 0x436   :  { %8840 = vmatpush3.bf16.msra.mxu0 %v10666_v10  ;;  %v10703_v10 = vld [vmem:[%s16494_s2 + $0x458] sm:$0xff]  }
 0x437   :  { %8841 = vmatprep.subr.bf16.mxu0 %v10667_v44  ;;  %v10704_v44 = vld [vmem:[%s16494_s2 + $0x418] sm:$0xff]  }
 0x439   :  { %v8671_v63 = vpop.f32.mrf.mxu1 }
 0x43a   :  { %8842 = vmatpush3.bf16.msra.mxu0 %v10668_v12  ;;  %v10705_v12 = vld [vmem:[%s16494_s2 + $0x450] sm:$0xff]  }
 0x43b   :  { %v8672_v1 = vpop.f32.mrf.mxu1  ;;  %8843 = vmatprep.subr.bf16.mxu0 %v10669_v13  ;;  %v7692_v13 = vld [vmem:[%s16496_s1 + $0x150] sm:$0xff] }
 0x43c   :  { %v8673_v34 = vadd.f32 %v8672_v1, %v8671_v63  ;;  %v7724_v63 = vcombine.low %v5013_v52, %v5013_v52  ;;  %v10697_v1 = vld [vmem:[%s16494_s2 + $0x470] sm:$0xff]  }
 0x43d   :  { %v8674_v4 = vpop.f32.mrf.mxu1  ;;  %v10736_v52 = vld [vmem:[%s16494_s2 + $0x510] sm:$0xff]  }
 0x43e   :  { %v4753_v6 = vadd.f32 %v8673_v34, %v4713_v43  ;;  %v10686_v43 = vld [vmem:[%s16494_s2 + $0x358] sm:$0xff]   ;;  %v10698_v34 = vld [vmem:[%s16494_s2 + $0x430] sm:$0xff]   ;;  %v10699_v4 = vld [vmem:[%s16494_s2 + $0x468] sm:$0xff]  }
 0x43f   :  { %v8675_v8 = vpop.f32.mrf.mxu1 }
 0x440   :  { %v4793_v9 = vadd.f32 %v13953_v3, %v4753_v6  ;;  %v10670_v3 = vld [vmem:[%s16494_s2 + $0x218] sm:$0xff]   ;;  %v10700_v6 = vld [vmem:[%s16494_s2 + $0x428] sm:$0xff]   ;;  %v10701_v8 = vld [vmem:[%s16494_s2 + $0x460] sm:$0xff]  }
 0x441   :  { %8844 = vmatpush3.bf16.msra.mxu0 %v10670_v3  ;;  %v10706_v3 = vld [vmem:[%s16494_s2 + $0x410] sm:$0xff]  }
 0x442   :  { %8845 = vmatprep.subr.bf16.mxu0 %v10671_v14 }
 0x445   :  { %8846 = vmatpush3.bf16.msra.mxu0 %v10672_v7  ;;  %v10707_v7 = vld [vmem:[%s16494_s2 + $0x448] sm:$0xff]  }
 0x446   :  { %8847 = vmatprep.subr.bf16.mxu0 %v10673_v15 }
 0x449   :  { %8848 = vmatpush3.bf16.msra.mxu0 %v10674_v16  ;;  %v10708_v16 = vld [vmem:[%s16495_s0 + $0x8] sm:$0xff] }
 0x44a   :  { %8849 = vmatprep.subr.bf16.mxu0 %v10675_v17  ;;  %v14179_v17 = vadd.bf16 %v10708_v16, %v7692_v13  ;;  %v10751_v16 = vld [vmem:[%s16494_s2 + $0x1b0] sm:$0xff]  }
 0x44d   :  { %8850 = vmatpush3.bf16.msra.mxu0 %v10677_v22  ;;  %v7699_v22 = vld [vmem:[%s16496_s1 + $0x188] sm:$0xff] }
 0x44e   :  { %8879 = vmatprep.subr.bf16.mxu0 %v10678_v25 }
 0x450   :  { %5365 = vmatmul.mubr.bf16.vlgmr.msra.gmra.mxu0 %v7720_v26  ;;  %v10711_v26 = vld [vmem:[%s16495_s0 + $0x40] sm:$0xff] }
 0x451   :  { %8880 = vmatpush3.bf16.msra.mxu0 %v10679_v27  ;;  %5444 = vmatprep.mubr.bf16.mxu0 %v7725_v61  ;;  %v5015_v27 = vadd.bf16 %v10711_v26, %v7699_v22  ;;  %v10738_v61 = vld [vmem:[%s16494_s2 + $0x88] sm:$0xff]   ;;  %v10759_v26 = vld [vmem:[%s16494_s2 + $0x1a0] sm:$0xff]  }
 0x452   :  { %8881 = vmatprep.subr.bf16.mxu0 %v10680_v29  ;;  %v10756_v22 = vld [vmem:[%s16494_s2 + $0x668] sm:$0xff]  }
 0x455   :  { %8882 = vmatpush3.bf16.msra.mxu0 %v10681_v32  ;;  %v10713_v32 = vld [vmem:[%s16494_s2 + $0x578] sm:$0xff]  }
 0x456   :  { %8883 = vmatprep.subr.bf16.mxu0 %v10682_v35  ;;  %v10714_v35 = vld [vmem:[%s16494_s2 + $0xb8] sm:$0xff]  }
 0x459   :  { %v8715_v28 = vpop.f32.mrf.mxu1  ;;  %8884 = vmatpush3.bf16.msra.mxu0 %v10683_v38  ;;  %v10718_v38 = vld [vmem:[%s16494_s2 + $0xb0] sm:$0xff]  }
 0x45a   :  { %8885 = vmatprep.subr.bf16.mxu0 %v10684_v40  ;;  %v10719_v40 = vld [vmem:[%s16494_s2 + $0xe8] sm:$0xff]  }
 0x45b   :  { %v8716_v30 = vpop.f32.mrf.mxu1 }
 0x45c   :  { %v8717_v31 = vadd.f32 %v8716_v30, %v8715_v28  ;;  %v7715_v28 = vcombine.high %v14179_v17, %v14179_v17  ;;  %v10712_v30 = vld [vmem:[%s16494_s2 + $0x400] sm:$0xff]  }
 0x45d   :  { %v8718_v33 = vpop.f32.mrf.mxu1 }
 0x45e   :  { %v4833_v36 = vadd.f32 %v8717_v31, %v4793_v9  ;;  %v10702_v9 = vld [vmem:[%s16494_s2 + $0x420] sm:$0xff]   ;;  %v7729_v31 = vcombine.high %v5015_v27, %v5015_v27  ;;  %v7728_v33 = vcombine.low %v5015_v27, %v5015_v27 }
 0x45f   :  { %v8719_v59 = vpop.f32.mrf.mxu1  ;;  %v10760_v27 = vld [vmem:[%s16494_s2 + $0x660] sm:$0xff]  }
 0x460   :  { %v14089_v37 = vadd.f32 %v13956_v11, %v4833_v36  ;;  %v10685_v11 = vld [vmem:[%s16494_s2 + $0x320] sm:$0xff]   ;;  %v10715_v36 = vld [vmem:[%s16494_s2 + $0xf0] sm:$0xff]   ;;  %v10716_v59 = vld [vmem:[%s16494_s2 + $0x538] sm:$0xff]  }
 0x461   :  { %8886 = vmatpush3.bf16.msra.mxu0 %v10685_v11  ;;  %v10722_v11 = vld [vmem:[%s16494_s2 + $0xa8] sm:$0xff]  }
 0x462   :  { %v4878_v41 = vmul.f32 %v14089_v37, %v14089_v37  ;;  %8887 = vmatprep.subr.bf16.mxu0 %v10686_v43  ;;  %v4890_v24 = vmul.f32 0.5, %v14089_v37  ;;  %v10723_v43 = vld [vmem:[%s16494_s2 + $0xe0] sm:$0xff]  }
 0x464   :  { %v4879_v42 = vmul.f32 %v4878_v41, %v14089_v37  ;;  %v10720_v41 = vld [vmem:[%s16494_s2 + $0x530] sm:$0xff]  }
 0x465   :  { %8888 = vmatpush3.bf16.msra.mxu0 %v10687_v45  ;;  %v10726_v45 = vld [vmem:[%s16494_s2 + $0xa0] sm:$0xff]  }
 0x466   :  { %v4880_v19 = vmul.f32 0.044715, %v4879_v42  ;;  %8889 = vmatprep.subr.bf16.mxu0 %v10688_v46  ;;  %v10721_v42 = vld [vmem:[%s16494_s2 + $0x568] sm:$0xff]   ;;  %v10727_v46 = vld [vmem:[%s16494_s2 + $0xd8] sm:$0xff]  }
 0x468   :  { %v4881_v57 = vadd.f32 %v4880_v19, %v14089_v37  ;;  %v10717_v37 = vld [vmem:[%s16494_s2 + $0x570] sm:$0xff]   ;;  %v10724_v19 = vld [vmem:[%s16494_s2 + $0x528] sm:$0xff]  }
 0x469   :  { %8890 = vmatpush3.bf16.msra.mxu0 %v10689_v48  ;;  %v10730_v48 = vld [vmem:[%s16494_s2 + $0x98] sm:$0xff]  }
 0x46a   :  { %v4882_v39 = vmul.f32 0.7978846, %v4881_v57  ;;  %8891 = vmatprep.subr.bf16.mxu0 %v10690_v49  ;;  %v10725_v57 = vld [vmem:[%s16494_s2 + $0x560] sm:$0xff]   ;;  %v10731_v49 = vld [vmem:[%s16494_s2 + $0xd0] sm:$0xff]  }
 0x46c   :  { %v4883_v47 = vmul.f32 2.0, %v4882_v39  ;;  %v10728_v39 = vld [vmem:[%s16494_s2 + $0x520] sm:$0xff]  }
 0x46d   :  { %8892 = vmatpush3.bf16.msra.mxu0 %v10691_v51  ;;  %v10733_v51 = vld [vmem:[%s16494_s2 + $0x550] sm:$0xff]  }
 0x46e   :  { %v4884_v50 = vmul.f32 1.442695, %v4883_v47  ;;  %8893 = vmatprep.subr.bf16.mxu0 %v10692_v53  ;;  %v10729_v47 = vld [vmem:[%s16494_s2 + $0x558] sm:$0xff]   ;;  %v10734_v53 = vld [vmem:[%s16494_s2 + $0x90] sm:$0xff]  }
 0x470   :  { %10237 = vpow2.f32 %v4884_v50  ;;  %v10732_v50 = vld [vmem:[%s16494_s2 + $0x518] sm:$0xff]  }
 0x471   :  { %8894 = vmatpush3.bf16.msra.mxu0 %v10694_v60  ;;  %v10737_v60 = vld [vmem:[%s16494_s2 + $0x548] sm:$0xff]  }
 0x472   :  { %8923 = vmatprep.subr.bf16.mxu0 %v10695_v62  ;;  %v10739_v62 = vld [vmem:[%s16495_s0 + $0x18] sm:$0xff] }
 0x474   :  { %5445 = vmatmul.mubr.bf16.vlgmr.msra.gmra.mxu0 %v7724_v63  ;;  %v14283_v63 = vadd.bf16 %v10739_v62, %v7694_v55  ;;  %v10781_v55 = vld [vmem:[%s16494_s2 + $0x2b8] sm:$0xff]  }
 0x475   :  { %8924 = vmatpush3.bf16.msra.mxu0 %v10696_v0  ;;  %5524 = vmatprep.mubr.bf16.mxu0 %v7729_v31  ;;  %v10740_v0 = vld [vmem:[%s16494_s2 + $0xc0] sm:$0xff]   ;;  %v10764_v31 = vld [vmem:[%s16494_s2 + $0x658] sm:$0xff]  }
 0x476   :  { %8925 = vmatprep.subr.bf16.mxu0 %v10697_v1  ;;  %v10741_v1 = vld [vmem:[%s16494_s2 + $0x508] sm:$0xff]  }
 0x479   :  { %8926 = vmatpush3.bf16.msra.mxu0 %v10698_v34  ;;  %v7701_v34 = vld [vmem:[%s16496_s1 + $0x198] sm:$0xff] }
 0x47a   :  { %8927 = vmatprep.subr.bf16.mxu0 %v10699_v4  ;;  %v10742_v4 = vld [vmem:[%s16494_s2 + $0x540] sm:$0xff]  }
 0x47d   :  { %v10238_v2 = vpop.eup %10237  ;;  %8928 = vmatpush3.bf16.msra.mxu0 %v10700_v6 }
 0x47e   :  { %v4886_v5 = vadd.f32 1.0, %v10238_v2  ;;  %8929 = vmatprep.subr.bf16.mxu0 %v10701_v8  ;;  %v7714_v2 = vcombine.low %v14179_v17, %v14179_v17  ;;  %v10744_v8 = vld [vmem:[%s16494_s2 + $0x80] sm:$0xff]   ;;  %v10752_v17 = vld [vmem:[%s16494_s2 + $0x670] sm:$0xff]  }
 0x480   :  { %10239 = vrcp.f32 %v4886_v5  ;;  %v10743_v5 = vld [vmem:[%s16495_s0 + $0x50] sm:$0xff] }
 0x481   :  { %8930 = vmatpush3.bf16.msra.mxu0 %v10702_v9  ;;  %v5017_v6 = vadd.bf16 %v10743_v5, %v7701_v34  ;;  %v7719_v9 = vcombine.high %v14283_v63, %v14283_v63 }
 0x482   :  { %8931 = vmatprep.subr.bf16.mxu0 %v10703_v10  ;;  %v10745_v10 = vld [vmem:[%s16494_s2 + $0x1f8] sm:$0xff]  }
 0x483   :  { %v7732_v13 = vcombine.low %v5017_v6, %v5017_v6 }
 0x485   :  { %8932 = vmatpush3.bf16.msra.mxu0 %v10704_v44  ;;  %v7733_v44 = vcombine.high %v5017_v6, %v5017_v6  ;;  %v10788_v6 = vld [vmem:[%s16494_s2 + $0x730] sm:$0xff]  }
 0x486   :  { %8933 = vmatprep.subr.bf16.mxu0 %v10705_v12  ;;  %v10746_v12 = vld [vmem:[%s16494_s2 + $0x500] sm:$0xff]  }
 0x489   :  { %8934 = vmatpush3.bf16.msra.mxu0 %v10706_v3  ;;  %v10747_v3 = vld [vmem:[%s16494_s2 + $0x1b8] sm:$0xff]  }
 0x48a   :  { %8935 = vmatprep.subr.bf16.mxu0 %v10707_v7  ;;  %v10749_v7 = vld [vmem:[%s16494_s2 + $0x678] sm:$0xff]  }
 0x48d   :  { %v10240_v14 = vpop.eup %10239  ;;  %8936 = vmatpush3.bf16.msra.mxu0 %v10709_v18  ;;  %v10754_v18 = vld [vmem:[%s16494_s2 + $0x630] sm:$0xff]  }
 0x48e   :  { %v4888_v15 = vmul.f32 2.0, %v10240_v14  ;;  %8937 = vmatprep.subr.bf16.mxu0 %v10710_v21  ;;  %v10748_v14 = vld [vmem:[%s16494_s2 + $0x1f0] sm:$0xff]   ;;  %v10755_v21 = vld [vmem:[%s16494_s2 + $0x1a8] sm:$0xff]  }
 0x490   :  { %v4889_v58 = vsub.f32 1.0, %v4888_v15  ;;  %v10750_v15 = vld [vmem:[%s16494_s2 + $0x638] sm:$0xff]  }
 0x491   :  { %8938 = vmatpush3.bf16.msra.mxu0 %v10712_v30  ;;  %v10763_v30 = vld [vmem:[%s16494_s2 + $0x198] sm:$0xff]  }
 0x492   :  { %v4891_v25 = vadd.f32 1.0, %v4889_v58  ;;  %8967 = vmatprep.subr.bf16.mxu0 %v10713_v32  ;;  %v10753_v58 = vld [vmem:[%s16494_s2 + $0x1e8] sm:$0xff]   ;;  %v10765_v32 = vld [vmem:[%s16494_s2 + $0x1d0] sm:$0xff]  }
 0x494   :  { %v4892_v29 = vmul.f32 %v4891_v25, %v4890_v24  ;;  %5525 = vmatmul.mubr.bf16.vlgmr.msra.gmra.mxu0 %v7728_v33  ;;  %v10757_v24 = vld [vmem:[%s16494_s2 + $0x1e0] sm:$0xff]   ;;  %v10758_v25 = vld [vmem:[%s16494_s2 + $0x628] sm:$0xff]   ;;  %v10766_v33 = vld [vmem:[%s16494_s2 + $0x618] sm:$0xff]  }
 0x495   :  { %8968 = vmatpush3.bf16.msra.mxu0 %v10716_v59  ;;  %5604 = vmatprep.mubr.bf16.mxu0 %v7733_v44  ;;  %v10769_v59 = vld [vmem:[%s16494_s2 + $0x1c8] sm:$0xff]  }
 0x496   :  { %9787 = vmatmul.mubr.f32.vlgmr.msra.gmra.mxu1 %v4892_v29  ;;  %8969 = vmatprep.subr.bf16.mxu0 %v10717_v37  ;;  %v10762_v29 = vld [vmem:[%s16494_s2 + $0x620] sm:$0xff]   ;;  %v7696_v37 = vld [vmem:[%s16496_s1 + $0x170] sm:$0xff]  ;;  %v10792_v44 = vld [vmem:[%s16494_s2 + $0x728] sm:$0xff]  }
 0x497   :  { %8770 = vmatpush3.bf16.msra.mxu1 %v10714_v35  ;;  %5244 = vmatprep.mubr.bf16.mxu1 %v7715_v28  ;;  %v10761_v28 = vld [vmem:[%s16494_s2 + $0x1d8] sm:$0xff]   ;;  %v10767_v35 = vld [vmem:[%s16494_s2 + $0x190] sm:$0xff]  }
 0x498   :  { %8771 = vmatprep.subr.bf16.mxu1 %v10715_v36  ;;  %v10768_v36 = vld [vmem:[%s16494_s2 + $0x650] sm:$0xff]  }
 0x499   :  { %8970 = vmatpush3.bf16.msra.mxu0 %v10720_v41  ;;  %v10772_v41 = vld [vmem:[%s16495_s0 + $0x28] sm:$0xff] }
 0x49a   :  { %8971 = vmatprep.subr.bf16.mxu0 %v10721_v42  ;;  %v14394_v42 = vadd.bf16 %v10772_v41, %v7696_v37  ;;  %v10812_v37 = vld [vmem:[%s16494_s2 + $0x740] sm:$0xff]  }
 0x49b   :  { %8772 = vmatpush3.bf16.msra.mxu1 %v10718_v38  ;;  %v10770_v38 = vld [vmem:[%s16494_s2 + $0x610] sm:$0xff]  }
 0x49c   :  { %8773 = vmatprep.subr.bf16.mxu1 %v10719_v40  ;;  %v10771_v40 = vld [vmem:[%s16494_s2 + $0x188] sm:$0xff]  }
 0x49d   :  { %8972 = vmatpush3.bf16.msra.mxu0 %v10724_v19  ;;  %v7703_v19 = vld [vmem:[%s16496_s1 + $0x1a8] sm:$0xff] }
 0x49e   :  { %8973 = vmatprep.subr.bf16.mxu0 %v10725_v57  ;;  %v7718_v57 = vcombine.low %v14283_v63, %v14283_v63  ;;  %v10784_v63 = vld [vmem:[%s16494_s2 + $0x738] sm:$0xff]  }
 0x49f   :  { %8774 = vmatpush3.bf16.msra.mxu1 %v10722_v11  ;;  %v10773_v11 = vld [vmem:[%s16494_s2 + $0x648] sm:$0xff]  }
 0x4a0   :  { %8775 = vmatprep.subr.bf16.mxu1 %v10723_v43  ;;  %v10774_v43 = vld [vmem:[%s16494_s2 + $0x1c0] sm:$0xff]  }
 0x4a1   :  { %8974 = vmatpush3.bf16.msra.mxu0 %v10728_v39 }
 0x4a2   :  { %8975 = vmatprep.subr.bf16.mxu0 %v10729_v47  ;;  %v10777_v47 = vld [vmem:[%s16494_s2 + $0x180] sm:$0xff]  }
 0x4a3   :  { %8776 = vmatpush3.bf16.msra.mxu1 %v10726_v45  ;;  %v10775_v45 = vld [vmem:[%s16494_s2 + $0x608] sm:$0xff]  }
 0x4a4   :  { %8777 = vmatprep.subr.bf16.mxu1 %v10727_v46  ;;  %v10776_v46 = vld [vmem:[%s16495_s0 + $0x60] sm:$0xff] }
 0x4a5   :  { %8976 = vmatpush3.bf16.msra.mxu0 %v10732_v50  ;;  %v5019_v39 = vadd.bf16 %v10776_v46, %v7703_v19  ;;  %v10779_v50 = vld [vmem:[%s16494_s2 + $0x2f8] sm:$0xff]   ;;  %v10816_v19 = vld [vmem:[%s16494_s2 + $0x3f0] sm:$0xff]  }
 0x4a6   :  { %8977 = vmatprep.subr.bf16.mxu0 %v10733_v51  ;;  %v10818_v46 = vld [vmem:[%s16494_s2 + $0x838] sm:$0xff]  }
 0x4a7   :  { %8778 = vmatpush3.bf16.msra.mxu1 %v10730_v48  ;;  %v7723_v48 = vcombine.high %v14394_v42, %v14394_v42  ;;  %v7737_v51 = vcombine.high %v5019_v39, %v5019_v39 }
 0x4a8   :  { %8779 = vmatprep.subr.bf16.mxu1 %v10731_v49  ;;  %v10778_v49 = vld [vmem:[%s16494_s2 + $0x640] sm:$0xff]  }
 0x4a9   :  { %8978 = vmatpush3.bf16.msra.mxu0 %v10736_v52  ;;  %v8763_v52 = vpop.f32.mrf.mxu0 }
 0x4aa   :  { %8979 = vmatprep.subr.bf16.mxu0 %v10737_v60  ;;  %v10782_v60 = vld [vmem:[%s16494_s2 + $0x2f0] sm:$0xff]  }
 0x4ab   :  { %8780 = vmatpush3.bf16.msra.mxu1 %v10734_v53  ;;  %v7736_v53 = vcombine.low %v5019_v39, %v5019_v39  ;;  %v8764_v62 = vpop.f32.mrf.mxu0  ;;  %v10819_v39 = vld [vmem:[%s16494_s2 + $0x3b0] sm:$0xff]  }
 0x4ac   :  { %8781 = vmatprep.subr.bf16.mxu1 %v10735_v54  ;;  %v10780_v54 = vld [vmem:[%s16494_s2 + $0x600] sm:$0xff]   ;;  %v14448_v5 = vadd.f32 %v8764_v62, %v8763_v52 }
 0x4ad   :  { %8980 = vmatpush3.bf16.msra.mxu0 %v10741_v1  ;;  %v10786_v1 = vld [vmem:[%s16494_s2 + $0x770] sm:$0xff]   ;;  %v8766_v34 = vpop.f32.mrf.mxu0  ;;  %v10825_v52 = vld [vmem:[%s16494_s2 + $0x3e0] sm:$0xff]  }
 0x4ae   :  { %8981 = vmatprep.subr.bf16.mxu0 %v10742_v4  ;;  %v10828_v62 = vld [vmem:[%s16494_s2 + $0x860] sm:$0xff]   ;;  %v10832_v34 = vld [vmem:[%s16494_s2 + $0x858] sm:$0xff]  }
 0x4af   :  { %8782 = vmatpush3.bf16.msra.mxu1 %v10738_v61  ;;  %v10783_v61 = vld [vmem:[%s16494_s2 + $0x778] sm:$0xff]   ;;  %v8767_v4 = vpop.f32.mrf.mxu0 }
 0x4b0   :  { %8783 = vmatprep.subr.bf16.mxu1 %v10740_v0  ;;  %v10785_v0 = vld [vmem:[%s16494_s2 + $0x2b0] sm:$0xff]   ;;  %v10834_v4 = vld [vmem:[%s16494_s2 + $0x818] sm:$0xff]  }
 0x4b1   :  { %8982 = vmatpush3.bf16.msra.mxu0 %v10746_v12  ;;  %v10793_v12 = vld [vmem:[%s16494_s2 + $0x2a0] sm:$0xff]  }
 0x4b2   :  { %9011 = vmatprep.subr.bf16.mxu0 %v10749_v7  ;;  %v10797_v7 = vld [vmem:[%s16494_s2 + $0x298] sm:$0xff]  }
 0x4b3   :  { %8784 = vmatpush3.bf16.msra.mxu1 %v10744_v8  ;;  %v10789_v8 = vld [vmem:[%s16494_s2 + $0x2a8] sm:$0xff]  }
 0x4b4   :  { %8813 = vmatprep.subr.bf16.mxu1 %v10745_v10  ;;  %5605 = vmatmul.mubr.bf16.vlgmr.msra.gmra.mxu0 %v7732_v13  ;;  %v10791_v10 = vld [vmem:[%s16494_s2 + $0x2e0] sm:$0xff]  }
 0x4b5   :  { %9012 = vmatpush3.bf16.msra.mxu0 %v10750_v15  ;;  %5684 = vmatprep.mubr.bf16.mxu0 %v7737_v51  ;;  %v10794_v13 = vld [vmem:[%s16494_s2 + $0x760] sm:$0xff]   ;;  %v10798_v15 = vld [vmem:[%s16494_s2 + $0x758] sm:$0xff]  }
 0x4b6   :  { %5245 = vmatmul.mubr.bf16.vlgmr.msra.gmra.mxu1 %v7714_v2  ;;  %9013 = vmatprep.subr.bf16.mxu0 %v10752_v17  ;;  %v10787_v2 = vld [vmem:[%s16494_s2 + $0x2e8] sm:$0xff]   ;;  %v10800_v17 = vld [vmem:[%s16494_s2 + $0x718] sm:$0xff]  }
 0x4b7   :  { %8814 = vmatpush3.bf16.msra.mxu1 %v10747_v3  ;;  %5324 = vmatprep.mubr.bf16.mxu1 %v7719_v9  ;;  %v10790_v9 = vld [vmem:[%s16494_s2 + $0x768] sm:$0xff]   ;;  %v10795_v3 = vld [vmem:[%s16494_s2 + $0x2d8] sm:$0xff]  }
 0x4b8   :  { %8815 = vmatprep.subr.bf16.mxu1 %v10748_v14  ;;  %v10796_v14 = vld [vmem:[%s16494_s2 + $0x720] sm:$0xff]  }
 0x4b9   :  { %9014 = vmatpush3.bf16.msra.mxu0 %v10754_v18  ;;  %v10802_v18 = vld [vmem:[%s16494_s2 + $0x750] sm:$0xff]  }
 0x4ba   :  { %9015 = vmatprep.subr.bf16.mxu0 %v10756_v22  ;;  %v7698_v22 = vld [vmem:[%s16496_s1 + $0x180] sm:$0xff] }
 0x4bb   :  { %8816 = vmatpush3.bf16.msra.mxu1 %v10751_v16  ;;  %v10799_v16 = vld [vmem:[%s16494_s2 + $0x2d0] sm:$0xff]  }
 0x4bc   :  { %8817 = vmatprep.subr.bf16.mxu1 %v10753_v58  ;;  %v10801_v58 = vld [vmem:[%s16494_s2 + $0x290] sm:$0xff]  }
 0x4bd   :  { %9016 = vmatpush3.bf16.msra.mxu0 %v10758_v25  ;;  %v10805_v25 = vld [vmem:[%s16494_s2 + $0x288] sm:$0xff]  }
 0x4be   :  { %9017 = vmatprep.subr.bf16.mxu0 %v10760_v27 }
 0x4bf   :  { %8818 = vmatpush3.bf16.msra.mxu1 %v10755_v21  ;;  %v10803_v21 = vld [vmem:[%s16494_s2 + $0x2c8] sm:$0xff]  }
 0x4c0   :  { %8819 = vmatprep.subr.bf16.mxu1 %v10757_v24  ;;  %v10804_v24 = vld [vmem:[%s16494_s2 + $0x710] sm:$0xff]  }
 0x4c1   :  { %9018 = vmatpush3.bf16.msra.mxu0 %v10762_v29  ;;  %v10808_v29 = vld [vmem:[%s16494_s2 + $0x2c0] sm:$0xff]  }
 0x4c2   :  { %9019 = vmatprep.subr.bf16.mxu0 %v10764_v31  ;;  %v7722_v31 = vcombine.low %v14394_v42, %v14394_v42  ;;  %v10814_v42 = vld [vmem:[%s16494_s2 + $0x700] sm:$0xff]  }
 0x4c3   :  { %8820 = vmatpush3.bf16.msra.mxu1 %v10759_v26  ;;  %v10806_v26 = vld [vmem:[%s16495_s0 + $0x38] sm:$0xff] }
 0x4c4   :  { %8821 = vmatprep.subr.bf16.mxu1 %v10761_v28  ;;  %v14510_v27 = vadd.bf16 %v10806_v26, %v7698_v22  ;;  %v10807_v28 = vld [vmem:[%s16494_s2 + $0x748] sm:$0xff]  }
 0x4c5   :  { %9020 = vmatpush3.bf16.msra.mxu0 %v10766_v33  ;;  %v10810_v33 = vld [vmem:[%s16495_s0 + $0x70] sm:$0xff] }
 0x4c6   :  { %9021 = vmatprep.subr.bf16.mxu0 %v10768_v36  ;;  %v10811_v36 = vld [vmem:[%s16494_s2 + $0x280] sm:$0xff]  }
 0x4c7   :  { %8822 = vmatpush3.bf16.msra.mxu1 %v10763_v30  ;;  %v7705_v30 = vld [vmem:[%s16496_s1 + $0x1b8] sm:$0xff] }
 0x4c8   :  { %8823 = vmatprep.subr.bf16.mxu1 %v10765_v32  ;;  %v10809_v32 = vld [vmem:[%s16494_s2 + $0x708] sm:$0xff]  }
 0x4c9   :  { %9022 = vmatpush3.bf16.msra.mxu0 %v10770_v38  ;;  %v10813_v38 = vld [vmem:[%s16494_s2 + $0x3f8] sm:$0xff]  }
 0x4ca   :  { %9023 = vmatprep.subr.bf16.mxu0 %v10773_v11  ;;  %v10815_v11 = vld [vmem:[%s16494_s2 + $0x3b8] sm:$0xff]  }
 0x4cb   :  { %8824 = vmatpush3.bf16.msra.mxu1 %v10767_v35  ;;  %v5021_v35 = vadd.bf16 %v10810_v33, %v7705_v30 }
 0x4cc   :  { %8825 = vmatprep.subr.bf16.mxu1 %v10769_v59  ;;  %v7727_v59 = vcombine.high %v14510_v27, %v14510_v27 }
 0x4cd   :  { %9024 = vmatpush3.bf16.msra.mxu0 %v10775_v45  ;;  %v7740_v41 = vcombine.low %v5021_v35, %v5021_v35 }
 0x4ce   :  { %9025 = vmatprep.subr.bf16.mxu0 %v10778_v49 }
 0x4cf   :  { %8826 = vmatpush3.bf16.msra.mxu1 %v10771_v40  ;;  %v7741_v40 = vcombine.high %v5021_v35, %v5021_v35  ;;  %v10852_v35 = vld [vmem:[%s16494_s2 + $0x938] sm:$0xff]  }
 0x4d0   :  { %8827 = vmatprep.subr.bf16.mxu1 %v10774_v43 }
 0x4d1   :  { %9026 = vmatpush3.bf16.msra.mxu0 %v10780_v54  ;;  %v10823_v54 = vld [vmem:[%s16494_s2 + $0x3a8] sm:$0xff]  }
 0x4d2   :  { %9055 = vmatprep.subr.bf16.mxu0 %v10783_v61  ;;  %v10827_v61 = vld [vmem:[%s16494_s2 + $0x3a0] sm:$0xff]  }
 0x4d3   :  { %8828 = vmatpush3.bf16.msra.mxu1 %v10777_v47 }
 0x4d4   :  { %8857 = vmatprep.subr.bf16.mxu1 %v10779_v50  ;;  %5685 = vmatmul.mubr.bf16.vlgmr.msra.gmra.mxu0 %v7736_v53  ;;  %v10821_v50 = vld [vmem:[%s16494_s2 + $0x3e8] sm:$0xff]   ;;  %v10822_v53 = vld [vmem:[%s16494_s2 + $0x830] sm:$0xff]  }
 0x4d5   :  { %9056 = vmatpush3.bf16.msra.mxu0 %v10784_v63  ;;  %5764 = vmatprep.mubr.bf16.mxu0 %v7741_v40  ;;  %v10829_v63 = vld [vmem:[%s16494_s2 + $0x3d8] sm:$0xff]   ;;  %v10855_v40 = vld [vmem:[%s16494_s2 + $0x4e8] sm:$0xff]  }
 0x4d6   :  { %5325 = vmatmul.mubr.bf16.vlgmr.msra.gmra.mxu1 %v7718_v57  ;;  %9057 = vmatprep.subr.bf16.mxu0 %v10786_v1  ;;  %v10817_v57 = vld [vmem:[%s16494_s2 + $0x878] sm:$0xff]  }
 0x4d7   :  { %8858 = vmatpush3.bf16.msra.mxu1 %v10781_v55  ;;  %5404 = vmatprep.mubr.bf16.mxu1 %v7723_v48  ;;  %v10820_v48 = vld [vmem:[%s16494_s2 + $0x870] sm:$0xff]   ;;  %v10824_v55 = vld [vmem:[%s16494_s2 + $0x868] sm:$0xff]   ;;  %v10831_v1 = vld [vmem:[%s16494_s2 + $0x398] sm:$0xff]  }
 0x4d8   :  { %8859 = vmatprep.subr.bf16.mxu1 %v10782_v60  ;;  %v10826_v60 = vld [vmem:[%s16494_s2 + $0x828] sm:$0xff]  }
 0x4d9   :  { %9058 = vmatpush3.bf16.msra.mxu0 %v10788_v6  ;;  %v10835_v6 = vld [vmem:[%s16494_s2 + $0x390] sm:$0xff]  }
 0x4da   :  { %9059 = vmatprep.subr.bf16.mxu0 %v10790_v9  ;;  %v10837_v9 = vld [vmem:[%s16494_s2 + $0x3c8] sm:$0xff]  }
 0x4db   :  { %8860 = vmatpush3.bf16.msra.mxu1 %v10785_v0  ;;  %v10830_v0 = vld [vmem:[%s16494_s2 + $0x820] sm:$0xff]  }
 0x4dc   :  { %8861 = vmatprep.subr.bf16.mxu1 %v10787_v2  ;;  %v10833_v2 = vld [vmem:[%s16494_s2 + $0x3d0] sm:$0xff]  }
 0x4dd   :  { %9060 = vmatpush3.bf16.msra.mxu0 %v10792_v44  ;;  %v10838_v44 = vld [vmem:[%s16494_s2 + $0x810] sm:$0xff]  }
 0x4de   :  { %9061 = vmatprep.subr.bf16.mxu0 %v10794_v13  ;;  %v10840_v13 = vld [vmem:[%s16495_s0 + $0x48] sm:$0xff] }
 0x4df   :  { %8862 = vmatpush3.bf16.msra.mxu1 %v10789_v8  ;;  %v10836_v8 = vld [vmem:[%s16494_s2 + $0x850] sm:$0xff]  }
 0x4e0   :  { %8863 = vmatprep.subr.bf16.mxu1 %v10791_v10  ;;  %v7700_v10 = vld [vmem:[%s16496_s1 + $0x190] sm:$0xff] }
 0x4e1   :  { %9062 = vmatpush3.bf16.msra.mxu0 %v10796_v14  ;;  %v10841_v14 = vld [vmem:[%s16494_s2 + $0x848] sm:$0xff]  }
 0x4e2   :  { %9063 = vmatprep.subr.bf16.mxu0 %v10798_v15  ;;  %v7707_v15 = vld [vmem:[%s16496_s1 + $0x1c8] sm:$0xff] }
 0x4e3   :  { %8864 = vmatpush3.bf16.msra.mxu1 %v10793_v12  ;;  %v10839_v12 = vld [vmem:[%s16494_s2 + $0x388] sm:$0xff]  }
 0x4e4   :  { %8865 = vmatprep.subr.bf16.mxu1 %v10795_v3  ;;  %v14626_v3 = vadd.bf16 %v10840_v13, %v7700_v10  ;;  %v10879_v10 = vld [vmem:[%s16494_s2 + $0x480] sm:$0xff]   ;;  %v10881_v13 = vld [vmem:[%s16494_s2 + $0x5f8] sm:$0xff]  }
 0x4e5   :  { %9064 = vmatpush3.bf16.msra.mxu0 %v10800_v17  ;;  %v10843_v17 = vld [vmem:[%s16494_s2 + $0x808] sm:$0xff]  }
 0x4e6   :  { %9065 = vmatprep.subr.bf16.mxu0 %v10802_v18  ;;  %v7731_v22 = vcombine.high %v14626_v3, %v14626_v3 }
 0x4e7   :  { %8866 = vmatpush3.bf16.msra.mxu1 %v10797_v7  ;;  %v10842_v7 = vld [vmem:[%s16494_s2 + $0x3c0] sm:$0xff]  }
 0x4e8   :  { %8867 = vmatprep.subr.bf16.mxu1 %v10799_v16  ;;  %v7726_v16 = vcombine.low %v14510_v27, %v14510_v27 }
 0x4e9   :  { %9066 = vmatpush3.bf16.msra.mxu0 %v10804_v24  ;;  %v10846_v24 = vld [vmem:[%s16494_s2 + $0x840] sm:$0xff]  }
 0x4ea   :  { %9067 = vmatprep.subr.bf16.mxu0 %v10807_v28  ;;  %v10848_v28 = vld [vmem:[%s16494_s2 + $0x800] sm:$0xff]  }
 0x4eb   :  { %8868 = vmatpush3.bf16.msra.mxu1 %v10801_v58  ;;  %v10844_v58 = vld [vmem:[%s16495_s0 + $0x80] sm:$0xff] }
 0x4ec   :  { %8869 = vmatprep.subr.bf16.mxu1 %v10803_v21  ;;  %v5023_v18 = vadd.bf16 %v10844_v58, %v7707_v15  ;;  %v10845_v21 = vld [vmem:[%s16494_s2 + $0x380] sm:$0xff]   ;;  %v10883_v15 = vld [vmem:[%s16494_s2 + $0x5b8] sm:$0xff]  }
 0x4ed   :  { %9068 = vmatpush3.bf16.msra.mxu0 %v10809_v32  ;;  %v8807_v43 = vpop.f32.mrf.mxu0  ;;  %v10851_v32 = vld [vmem:[%s16494_s2 + $0x978] sm:$0xff]  }
 0x4ee   :  { %9069 = vmatprep.subr.bf16.mxu0 %v10812_v37  ;;  %v7745_v26 = vcombine.high %v5023_v18, %v5023_v18  ;;  %v7744_v27 = vcombine.low %v5023_v18, %v5023_v18  ;;  %v10854_v37 = vld [vmem:[%s16494_s2 + $0x970] sm:$0xff]   ;;  %v10885_v18 = vld [vmem:[%s16494_s2 + $0xa38] sm:$0xff]  }
 0x4ef   :  { %8870 = vmatpush3.bf16.msra.mxu1 %v10805_v25  ;;  %v8808_v45 = vpop.f32.mrf.mxu0  ;;  %v10847_v25 = vld [vmem:[%s16494_s2 + $0x4f8] sm:$0xff]  }
 0x4f0   :  { %8871 = vmatprep.subr.bf16.mxu1 %v10808_v29  ;;  %v14558_v47 = vadd.f32 %v8808_v45, %v8807_v43  ;;  %v10849_v29 = vld [vmem:[%s16494_s2 + $0x4b8] sm:$0xff]   ;;  %v10858_v43 = vld [vmem:[%s16494_s2 + $0x968] sm:$0xff]   ;;  %v10861_v45 = vld [vmem:[%s16494_s2 + $0x4a0] sm:$0xff]  }
 0x4f1   :  { %9070 = vmatpush3.bf16.msra.mxu0 %v10814_v42  ;;  %v8810_v49 = vpop.f32.mrf.mxu0  ;;  %v10856_v42 = vld [vmem:[%s16494_s2 + $0x930] sm:$0xff]  }
 0x4f2   :  { %9099 = vmatprep.subr.bf16.mxu0 %v10817_v57  ;;  %v10860_v57 = vld [vmem:[%s16494_s2 + $0x928] sm:$0xff]   ;;  %v10865_v49 = vld [vmem:[%s16494_s2 + $0x498] sm:$0xff]  }
 0x4f3   :  { %8872 = vmatpush3.bf16.msra.mxu1 %v10811_v36  ;;  %v8811_v51 = vpop.f32.mrf.mxu0  ;;  %v10853_v36 = vld [vmem:[%s16494_s2 + $0x4b0] sm:$0xff]  }
 0x4f4   :  { %8901 = vmatprep.subr.bf16.mxu1 %v10813_v38  ;;  %5765 = vmatmul.mubr.bf16.vlgmr.msra.gmra.mxu0 %v7740_v41  ;;  %v10867_v51 = vld [vmem:[%s16494_s2 + $0x4d0] sm:$0xff]  }
 0x4f5   :  { %9100 = vmatpush3.bf16.msra.mxu0 %v10818_v46  ;;  %5844 = vmatprep.mubr.bf16.mxu0 %v7745_v26  ;;  %v10862_v46 = vld [vmem:[%s16494_s2 + $0x960] sm:$0xff]  }
 0x4f6   :  { %5405 = vmatmul.mubr.bf16.vlgmr.msra.gmra.mxu1 %v7722_v31  ;;  %9101 = vmatprep.subr.bf16.mxu0 %v10820_v48  ;;  %v10850_v31 = vld [vmem:[%s16494_s2 + $0x4f0] sm:$0xff]   ;;  %v10864_v48 = vld [vmem:[%s16494_s2 + $0x920] sm:$0xff]  }
 0x4f7   :  { %8902 = vmatpush3.bf16.msra.mxu1 %v10815_v11  ;;  %5484 = vmatprep.mubr.bf16.mxu1 %v7727_v59  ;;  %v10857_v11 = vld [vmem:[%s16494_s2 + $0x4a8] sm:$0xff]  }
 0x4f8   :  { %8903 = vmatprep.subr.bf16.mxu1 %v10816_v19  ;;  %v10859_v19 = vld [vmem:[%s16494_s2 + $0x4e0] sm:$0xff]  }
 0x4f9   :  { %9102 = vmatpush3.bf16.msra.mxu0 %v10822_v53  ;;  %v10868_v53 = vld [vmem:[%s16494_s2 + $0x918] sm:$0xff]  }
 0x4fa   :  { %9103 = vmatprep.subr.bf16.mxu0 %v10824_v55  ;;  %v10870_v55 = vld [vmem:[%s16494_s2 + $0x950] sm:$0xff]  }
 0x4fb   :  { %8904 = vmatpush3.bf16.msra.mxu1 %v10819_v39  ;;  %v10863_v39 = vld [vmem:[%s16494_s2 + $0x4d8] sm:$0xff]  }
 0x4fc   :  { %8905 = vmatprep.subr.bf16.mxu1 %v10821_v50  ;;  %v10866_v50 = vld [vmem:[%s16494_s2 + $0x958] sm:$0xff]  }
 0x4fd   :  { %9104 = vmatpush3.bf16.msra.mxu0 %v10826_v60  ;;  %v7702_v60 = vld [vmem:[%s16496_s1 + $0x1a0] sm:$0xff] }
 0x4fe   :  { %9105 = vmatprep.subr.bf16.mxu0 %v10828_v62  ;;  %v10873_v62 = vld [vmem:[%s16494_s2 + $0x488] sm:$0xff]  }
 0x4ff   :  { %8906 = vmatpush3.bf16.msra.mxu1 %v10823_v54  ;;  %v10869_v54 = vld [vmem:[%s16494_s2 + $0x490] sm:$0xff]  }
 0x500   :  { %8907 = vmatprep.subr.bf16.mxu1 %v10825_v52  ;;  %v10871_v52 = vld [vmem:[%s16494_s2 + $0x4c8] sm:$0xff]  }
 0x501   :  { %9106 = vmatpush3.bf16.msra.mxu0 %v10830_v0 }
 0x502   :  { %9107 = vmatprep.subr.bf16.mxu0 %v10832_v34  ;;  %v10876_v34 = vld [vmem:[%s16494_s2 + $0x4c0] sm:$0xff]  }
 0x503   :  { %8908 = vmatpush3.bf16.msra.mxu1 %v10827_v61  ;;  %v10872_v61 = vld [vmem:[%s16494_s2 + $0x910] sm:$0xff]  }
 0x504   :  { %8909 = vmatprep.subr.bf16.mxu1 %v10829_v63  ;;  %v10874_v63 = vld [vmem:[%s16495_s0 + $0x58] sm:$0xff] }
 0x505   :  { %9108 = vmatpush3.bf16.msra.mxu0 %v10834_v4  ;;  %v14742_v0 = vadd.bf16 %v10874_v63, %v7702_v60  ;;  %v7730_v4 = vcombine.low %v14626_v3, %v14626_v3  ;;  %v10909_v60 = vld [vmem:[%s16499_s5] ss:$0 sm:$0xff] }
 0x506   :  { %9109 = vmatprep.subr.bf16.mxu0 %v10836_v8  ;;  %v10878_v8 = vld [vmem:[%s16495_s0 + $0x90] sm:$0xff] }
 0x507   :  { %8910 = vmatpush3.bf16.msra.mxu1 %v10831_v1  ;;  %v10875_v1 = vld [vmem:[%s16494_s2 + $0x948] sm:$0xff]  }
 0x508   :  { %8911 = vmatprep.subr.bf16.mxu1 %v10833_v2  ;;  %v7709_v2 = vld [vmem:[%s16496_s1 + $0x1d8] sm:$0xff] }
 0x509   :  { %9110 = vmatpush3.bf16.msra.mxu0 %v10838_v44  ;;  %v7735_v44 = vcombine.high %v14742_v0, %v14742_v0 }
 0x50a   :  { %9111 = vmatprep.subr.bf16.mxu0 %v10841_v14 }
 0x50b   :  { %8912 = vmatpush3.bf16.msra.mxu1 %v10835_v6  ;;  %v10877_v6 = vld [vmem:[%s16494_s2 + $0x908] sm:$0xff]  }
 0x50c   :  { %8913 = vmatprep.subr.bf16.mxu1 %v10837_v9  ;;  %v5025_v9 = vadd.bf16 %v10878_v8, %v7709_v2 }
 0x50d   :  { %9112 = vmatpush3.bf16.msra.mxu0 %v10843_v17  ;;  %v10884_v17 = vld [vmem:[%s16494_s2 + $0x5f0] sm:$0xff]  }
 0x50e   :  { %9113 = vmatprep.subr.bf16.mxu0 %v10846_v24  ;;  %v7749_v3 = vcombine.high %v5025_v9, %v5025_v9  ;;  %v7748_v14 = vcombine.low %v5025_v9, %v5025_v9  ;;  %v10914_v9 = vld [vmem:[%s16494_s2 + $0x6b0] sm:$0xff]  }
 0x50f   :  { %8914 = vmatpush3.bf16.msra.mxu1 %v10839_v12  ;;  %v10880_v12 = vld [vmem:[%s16494_s2 + $0x940] sm:$0xff]  }
 0x510   :  { %8915 = vmatprep.subr.bf16.mxu1 %v10842_v7  ;;  %v8851_v30 = vpop.f32.mrf.mxu0  ;;  %v10882_v7 = vld [vmem:[%s16494_s2 + $0x900] sm:$0xff]  }
 0x511   :  { %9114 = vmatpush3.bf16.msra.mxu0 %v10848_v28  ;;  %v10889_v28 = vld [vmem:[%s16494_s2 + $0x5a8] sm:$0xff]  }
 0x512   :  { %9143 = vmatprep.subr.bf16.mxu0 %v10851_v32  ;;  %v8852_v33 = vpop.f32.mrf.mxu0  ;;  %v10893_v32 = vld [vmem:[%s16494_s2 + $0x5d8] sm:$0xff]  }
 0x513   :  { %8916 = vmatpush3.bf16.msra.mxu1 %v10845_v21  ;;  %v14674_v59 = vadd.f32 %v8852_v33, %v8851_v30  ;;  %v10886_v21 = vld [vmem:[%s16494_s2 + $0x5b0] sm:$0xff]   ;;  %v10891_v30 = vld [vmem:[%s16494_s2 + $0xa28] sm:$0xff]   ;;  %v10894_v33 = vld [vmem:[%s16494_s2 + $0xa20] sm:$0xff]  }
 0x514   :  { %8945 = vmatprep.subr.bf16.mxu1 %v10847_v25  ;;  %5845 = vmatmul.mubr.bf16.vlgmr.msra.gmra.mxu0 %v7744_v27  ;;  %v8854_v38 = vpop.f32.mrf.mxu0  ;;  %v10887_v25 = vld [vmem:[%s16494_s2 + $0x5e8] sm:$0xff]   ;;  %v10888_v27 = vld [vmem:[%s16494_s2 + $0xa30] sm:$0xff]  }
 0x515   :  { %9144 = vmatpush3.bf16.msra.mxu0 %v10852_v35  ;;  %5924 = vmatprep.mubr.bf16.mxu0 %v7749_v3  ;;  %v10895_v35 = vld [vmem:[%s16494_s2 + $0x598] sm:$0xff]   ;;  %v10898_v38 = vld [vmem:[%s16494_s2 + $0x590] sm:$0xff]  }
 0x516   :  { %5485 = vmatmul.mubr.bf16.vlgmr.msra.gmra.mxu1 %v7726_v16  ;;  %9145 = vmatprep.subr.bf16.mxu0 %v10854_v37  ;;  %v8855_v41 = vpop.f32.mrf.mxu0  ;;  %v10897_v37 = vld [vmem:[%s16494_s2 + $0xa18] sm:$0xff]  }
 0x517   :  { %8946 = vmatpush3.bf16.msra.mxu1 %v10849_v29  ;;  %5564 = vmatprep.mubr.bf16.mxu1 %v7731_v22  ;;  %v10890_v29 = vld [vmem:[%s16494_s2 + $0x5e0] sm:$0xff]   ;;  %v7704_v41 = vld [vmem:[%s16496_s1 + $0x1b0] sm:$0xff] }
 0x518   :  { %8947 = vmatprep.subr.bf16.mxu1 %v10850_v31  ;;  %v10892_v31 = vld [vmem:[%s16494_s2 + $0x5a0] sm:$0xff]  }
 0x519   :  { %9146 = vmatpush3.bf16.msra.mxu0 %v10856_v42  ;;  %v10900_v42 = vld [vmem:[%s16494_s2 + $0xa10] sm:$0xff]  }
 0x51a   :  { %9147 = vmatprep.subr.bf16.mxu0 %v10858_v43  ;;  %v10902_v43 = vld [vmem:[%s16495_s0 + $0x68] sm:$0xff] }
 0x51b   :  { %8948 = vmatpush3.bf16.msra.mxu1 %v10853_v36  ;;  %v10896_v36 = vld [vmem:[%s16494_s2 + $0x5d0] sm:$0xff]  }
 0x51c   :  { %8949 = vmatprep.subr.bf16.mxu1 %v10855_v40  ;;  %v10899_v40 = vld [vmem:[%s16494_s2 + $0x5c8] sm:$0xff]  }
 0x51d   :  { %9148 = vmatpush3.bf16.msra.mxu0 %v10860_v57  ;;  %v10903_v57 = vld [vmem:[%s16494_s2 + $0x5c0] sm:$0xff]  }
 0x51e   :  { %9149 = vmatprep.subr.bf16.mxu0 %v10862_v46  ;;  %v7734_v46 = vcombine.low %v14742_v0, %v14742_v0  ;;  %v10911_v0 = vld [vmem:[%s16494_s2 + $0x6f0] sm:$0xff]  }
 0x51f   :  { %8950 = vmatpush3.bf16.msra.mxu1 %v10857_v11  ;;  %v10901_v11 = vld [vmem:[%s16494_s2 + $0x588] sm:$0xff]  }
 0x520   :  { %8951 = vmatprep.subr.bf16.mxu1 %v10859_v19  ;;  %v14848_v19 = vadd.bf16 %v10902_v43, %v7704_v41  ;;  %v10934_v41 = vld [vmem:[%s16494_s2 + $0x688] sm:$0xff]  }
 0x521   :  { %9150 = vmatpush3.bf16.msra.mxu0 %v10864_v48  ;;  %v10905_v48 = vld [vmem:[%s16495_s0 + $0xa0] sm:$0xf]  ;;  %v10936_v43 = vld [vmem:[%s16494_s2 + $0x48] sm:$0xff]  }
 0x522   :  { %9151 = vmatprep.subr.bf16.mxu0 %v10866_v50  ;;  %v10906_v50 = vld [vmem:[%s16494_s2 + $0x580] sm:$0xff]  }
 0x523   :  { %8952 = vmatpush3.bf16.msra.mxu1 %v10861_v45  ;;  %v7711_v45 = vld [vmem:[%s16496_s1 + $0x1e8] sm:$0xf] }
 0x524   :  { %8953 = vmatprep.subr.bf16.mxu1 %v10863_v39  ;;  %v10904_v39 = vld [vmem:[%s16494_s2 + $0xa08] sm:$0xff]  }
 0x525   :  { %9152 = vmatpush3.bf16.msra.mxu0 %v10868_v53  ;;  %v10907_v53 = vld [vmem:[%s16494_s2 + $0x6f8] sm:$0xff]  }
 0x526   :  { %9153 = vmatprep.subr.bf16.mxu0 %v10870_v55 }
 0x527   :  { %8954 = vmatpush3.bf16.msra.mxu1 %v10865_v49  ;;  %v5027_v49 = vadd.bf16 %v10905_v48, %v7711_v45  ;;  %v7738_v45 = vcombine.low %v14848_v19, %v14848_v19 }
 0x528   :  { %8955 = vmatprep.subr.bf16.mxu1 %v10867_v51  ;;  %v7739_v51 = vcombine.high %v14848_v19, %v14848_v19  ;;  %v10941_v19 = vld [vmem:[%s16494_s2 + $0x7f8] sm:$0xff]  }
 0x529   :  { %9154 = vmatpush3.bf16.msra.mxu0 %v10872_v61 }
 0x52a   :  { %9155 = vmatprep.subr.bf16.mxu0 %v10875_v1 }
 0x52b   :  { %8956 = vmatpush3.bf16.msra.mxu1 %v10869_v54  ;;  %v7752_v54 = vcombine.low %v5027_v49, %v5027_v49  ;;  %v10940_v49 = vld [vmem:[%s16494_s2 + $0x40] sm:$0xff]  }
 0x52c   :  { %8957 = vmatprep.subr.bf16.mxu1 %v10871_v52  ;;  %v10908_v52 = vld [vmem:[%s16494_s2 + $0xa00] sm:$0xff]  }
 0x52d   :  { %9156 = vmatpush3.bf16.msra.mxu0 %v10877_v6  ;;  %v10913_v6 = vld [vmem:[%s16494_s2 + $0x38] sm:$0xff]  }
 0x52e   :  { %9157 = vmatprep.subr.bf16.mxu0 %v10880_v12  ;;  %v10916_v12 = vld [vmem:[%s16494_s2 + $0x6e8] sm:$0xff]  }
 0x52f   :  { %8958 = vmatpush3.bf16.msra.mxu1 %v10873_v62  ;;  %v10910_v62 = vld [vmem:[%s16494_s2 + $0x6b8] sm:$0xff]  }
 0x530   :  { %8959 = vmatprep.subr.bf16.mxu1 %v10876_v34  ;;  %v10912_v34 = vld [vmem:[%s16494_s2 + $0x78] sm:$0xff]  }
 0x531   :  { %9158 = vmatpush3.bf16.msra.mxu0 %v10882_v7  ;;  %v10917_v7 = vld [vmem:[%s16494_s2 + $0x30] sm:$0xff]  }
 0x532   :  { %9789 = vmatprep.subr.bf16.mxu0 %v11360_v20 }
 0x533   :  { %8960 = vmatpush3.bf16.msra.mxu1 %v10879_v10 }
 0x534   :  { %8989 = vmatprep.subr.bf16.mxu1 %v10881_v13  ;;  %v8895_v16 = vpop.f32.mrf.mxu0  ;;  %5925 = vmatmul.mubr.bf16.vlgmr.msra.gmra.mxu0 %v7748_v14 }
 0x535   :  { %9790 = vmatpush3.bf16.msra.mxu0 %v10885_v18  ;;  %9805 = vmatprep.mubr.msk.bf16.mxu0 %vm11361_vm0, %v11360_v20 }
 0x536   :  { %5565 = vmatmul.mubr.bf16.vlgmr.msra.gmra.mxu1 %v7730_v4  ;;  %v8896_v58 = vpop.f32.mrf.mxu0  ;;  %9791 = vmatprep.subr.bf16.mxu0 %v11360_v20 }
 0x537   :  { %8990 = vmatpush3.bf16.msra.mxu1 %v10883_v15  ;;  %5644 = vmatprep.mubr.bf16.mxu1 %v7735_v44  ;;  %v14790_v22 = vadd.f32 %v8896_v58, %v8895_v16  ;;  %v10915_v44 = vld [vmem:[%s16494_s2 + $0x70] sm:$0xff]   ;;  %v10918_v16 = vld [vmem:[%s16494_s2 + $0x6a8] sm:$0xff]   ;;  %v10920_v58 = vld [vmem:[%s16494_s2 + $0x6e0] sm:$0xff]  }
 0x538   :  { %8991 = vmatprep.subr.bf16.mxu1 %v10884_v17  ;;  %v8898_v24 = vpop.f32.mrf.mxu0  ;;  %v10919_v17 = vld [vmem:[%s16494_s2 + $0x68] sm:$0xff]  }
 0x539   :  { %9792 = vmatpush3.bf16.msra.mxu0 %v10888_v27  ;;  %v10924_v27 = vld [vmem:[%s16494_s2 + $0x6d8] sm:$0xff]  }
 0x53a   :  { %v8899_v26 = vpop.f32.mrf.mxu0  ;;  %9793 = vmatprep.subr.bf16.mxu0 %v11360_v20 }
 0x53b   :  { %8992 = vmatpush3.bf16.msra.mxu1 %v10886_v21  ;;  %v10921_v21 = vld [vmem:[%s16494_s2 + $0x28] sm:$0xff]   ;;  %v10923_v26 = vld [vmem:[%s16494_s2 + $0x60] sm:$0xff]  }
 0x53c   :  { %8993 = vmatprep.subr.bf16.mxu1 %v10887_v25  ;;  %v10922_v25 = vld [vmem:[%s16494_s2 + $0x6a0] sm:$0xff]  }
 0x53d   :  { %9794 = vmatpush3.bf16.msra.mxu0 %v10891_v30  ;;  %v10926_v30 = vld [vmem:[%s16494_s2 + $0x698] sm:$0xff]  }
 0x53e   :  { %9795 = vmatprep.subr.bf16.mxu0 %v11360_v20 }
 0x53f   :  { %8994 = vmatpush3.bf16.msra.mxu1 %v10889_v28 }
 0x540   :  { %8995 = vmatprep.subr.bf16.mxu1 %v10890_v29  ;;  %v10925_v29 = vld [vmem:[%s16494_s2 + $0x20] sm:$0xff]  }
 0x541   :  { %9796 = vmatpush3.bf16.msra.mxu0 %v10894_v33  ;;  %v10929_v33 = vld [vmem:[%s16494_s2 + $0x18] sm:$0xff]  }
 0x542   :  { %9797 = vmatprep.subr.bf16.mxu0 %v11360_v20 }
 0x543   :  { %8996 = vmatpush3.bf16.msra.mxu1 %v10892_v31  ;;  %v10927_v31 = vld [vmem:[%s16494_s2 + $0x58] sm:$0xff]  }
 0x544   :  { %8997 = vmatprep.subr.bf16.mxu1 %v10893_v32  ;;  %v10928_v32 = vld [vmem:[%s16494_s2 + $0x6d0] sm:$0xff]  }
 0x545   :  { %9798 = vmatpush3.bf16.msra.mxu0 %v10897_v37  ;;  %v10932_v37 = vld [vmem:[%s16494_s2 + $0x6c8] sm:$0xff]  }
 0x546   :  { %9799 = vmatprep.subr.bf16.mxu0 %v11360_v20 }
 0x547   :  { %8998 = vmatpush3.bf16.msra.mxu1 %v10895_v35  ;;  %v10930_v35 = vld [vmem:[%s16494_s2 + $0x690] sm:$0xff]  }
 0x548   :  { %8999 = vmatprep.subr.bf16.mxu1 %v10896_v36  ;;  %v10931_v36 = vld [vmem:[%s16494_s2 + $0x50] sm:$0xff]  }
 0x549   :  { %9800 = vmatpush3.bf16.msra.mxu0 %v10900_v42  ;;  %v10935_v42 = vld [vmem:[%s16495_s0 + $0x78] sm:$0xff] }
 0x54a   :  { %9801 = vmatprep.subr.bf16.mxu0 %v11360_v20 }
 0x54b   :  { %9000 = vmatpush3.bf16.msra.mxu1 %v10898_v38  ;;  %v7706_v38 = vld [vmem:[%s16496_s1 + $0x1c0] sm:$0xff] }
 0x54c   :  { %9001 = vmatprep.subr.bf16.mxu1 %v10899_v40  ;;  %v10933_v40 = vld [vmem:[%s16494_s2 + $0x10] sm:$0xff]  }
 0x54d   :  { %9802 = vmatpush3.bf16.msra.mxu0 %v10904_v39  ;;  %v10939_v39 = vld [vmem:[%s16494_s2 + $0x680] sm:$0xff]  }
 0x54e   :  { %9803 = vmatprep.subr.bf16.mxu0 %v11360_v20 }
 0x54f   :  { %9002 = vmatpush3.bf16.msra.mxu1 %v10901_v11  ;;  %v14969_v11 = vadd.bf16 %v10935_v42, %v7706_v38  ;;  %v10961_v38 = vld [vmem:[%s16494_s2 + $0x8f8] sm:$0xff]  }
 0x550   :  { %9003 = vmatprep.subr.bf16.mxu1 %v10903_v57  ;;  %v10937_v57 = vld [vmem:[%s16494_s2 + $0x6c0] sm:$0xff]  }
 0x551   :  { %9804 = vmatpush3.bf16.msra.mxu0 %v10908_v52  ;;  %v7743_v48 = vcombine.high %v14969_v11, %v14969_v11 }
 0x552   :  { %9213 = vmatprep.subr.bf16.mxu0 %v10912_v34 }
 0x553   :  { %9004 = vmatpush3.bf16.msra.mxu1 %v10906_v50 }
 0x554   :  { %9033 = vmatprep.subr.bf16.mxu1 %v10907_v53  ;;  %v8939_v1 = vpop.f32.mrf.mxu0  ;;  %9806 = vmatmul.mubr.bf16.vlgmr.msra.gmra.mxu0 %v7752_v54  ;;  %v10942_v54 = vld [vmem:[%s16494_s2] sm:$0xff]  }
 0x555   :  { %9214 = vmatpush3.bf16.msra.mxu0 %v10913_v6 }
 0x556   :  { %5645 = vmatmul.mubr.bf16.vlgmr.msra.gmra.mxu1 %v7734_v46  ;;  %v4959_v55 = vpop.f32.mrf.mxu1  ;;  %v8940_v4 = vpop.f32.mrf.mxu0  ;;  %9215 = vmatprep.subr.bf16.mxu0 %v10915_v44  ;;  %v10938_v46 = vld [vmem:[%s16494_s2 + $0x8] sm:$0xff]  }
 0x557   :  { %v14880_v61 = vadd.f32 %v10909_v60, %v4959_v55  ;;  %9034 = vmatpush3.bf16.msra.mxu1 %v10910_v62  ;;  %5724 = vmatprep.mubr.bf16.mxu1 %v7739_v51  ;;  %v14900_v10 = vadd.f32 %v8940_v4, %v8939_v1  ;;  %v10943_v55 = vld [vmem:[%s16494_s2 + $0x7b8] sm:$0xff]   ;;  %v10944_v60 = vld [vmem:[%s16494_s2 + $0x7f0] sm:$0xff]  }
 0x558   :  { %v9788_v63 = vpop.f32.mrf.mxu1  ;;  %9035 = vmatprep.subr.bf16.mxu1 %v10911_v0  ;;  %v8942_v13 = vpop.f32.mrf.mxu0  ;;  %v10945_v62 = vld [vmem:[%s16494_s2 + $0x178] sm:$0xff]   ;;  %v10946_v4 = vld [vmem:[%s16494_s2 + $0x7b0] sm:$0xff]  }
 0x559   :  { %v4963_v2 = vmul.f32 %v14880_v61, %v14880_v61  ;;  %9216 = vmatpush3.bf16.msra.mxu0 %v10917_v7  ;;  %v5207_v63 = vadd.f32 %v14448_v5, %v12179_v56  ;;  %v10948_v13 = vld [vmem:[%s16494_s2 + $0x7a8] sm:$0xff]   ;;  %v10950_v7 = vld [vmem:[%s16494_s2 + $0x7a0] sm:$0xff]  }
 0x55a   :  { %v8943_v14 = vpop.f32.mrf.mxu0  ;;  %9217 = vmatprep.subr.bf16.mxu0 %v10919_v17  ;;  %v10952_v17 = vld [vmem:[%s16494_s2 + $0x798] sm:$0xff]  }
 0x55b   :  { %v4964_v8 = vmul.f32 %v4963_v2, %v14880_v61  ;;  %9036 = vmatpush3.bf16.msra.mxu1 %v10914_v9  ;;  %v10947_v9 = vld [vmem:[%s16494_s2 + $0x7e8] sm:$0xff]   ;;  %v10949_v14 = vld [vmem:[%s16494_s2 + $0x7e0] sm:$0xff]  }
 0x55c   :  { %9037 = vmatprep.subr.bf16.mxu1 %v10916_v12 }
 0x55d   :  { %v4965_v3 = vmul.f32 0.044715, %v4964_v8  ;;  %9218 = vmatpush3.bf16.msra.mxu0 %v10921_v21  ;;  %v4975_v21 = vmul.f32 0.5, %v14880_v61 }
 0x55e   :  { %9219 = vmatprep.subr.bf16.mxu0 %v10923_v26 }
 0x55f   :  { %v4966_v15 = vadd.f32 %v4965_v3, %v14880_v61  ;;  %9038 = vmatpush3.bf16.msra.mxu1 %v10918_v16  ;;  %v10956_v61 = vld [vmem:[%s16500_s6] ss:$0 sm:$0xff] }
 0x560   :  { %9039 = vmatprep.subr.bf16.mxu1 %v10920_v58 }
 0x561   :  { %v4967_v18 = vmul.f32 0.7978846, %v4966_v15  ;;  %9220 = vmatpush3.bf16.msra.mxu0 %v10925_v29 }
 0x562   :  { %9221 = vmatprep.subr.bf16.mxu0 %v10927_v31  ;;  %v10958_v31 = vld [vmem:[%s16495_s0 + $0x88] sm:$0xff] }
 0x563   :  { %v4968_v24 = vmul.f32 2.0, %v4967_v18  ;;  %9040 = vmatpush3.bf16.msra.mxu1 %v10922_v25  ;;  %v10953_v18 = vld [vmem:[%s16494_s2 + $0x7d0] sm:$0xff]  }
 0x564   :  { %9041 = vmatprep.subr.bf16.mxu1 %v10924_v27  ;;  %v10954_v25 = vld [vmem:[%s16494_s2 + $0x790] sm:$0xff]   ;;  %v10955_v27 = vld [vmem:[%s16494_s2 + $0x7c8] sm:$0xff]  }
 0x565   :  { %v4969_v28 = vmul.f32 1.442695, %v4968_v24  ;;  %9222 = vmatpush3.bf16.msra.mxu0 %v10929_v33  ;;  %v10959_v33 = vld [vmem:[%s16494_s2 + $0x7c0] sm:$0xff]  }
 0x566   :  { %9223 = vmatprep.subr.bf16.mxu0 %v10931_v36  ;;  %v10960_v36 = vld [vmem:[%s16494_s2 + $0x780] sm:$0xff]  }
 0x567   :  { %10241 = vpow2.f32 %v4969_v28  ;;  %9042 = vmatpush3.bf16.msra.mxu1 %v10926_v30  ;;  %v7708_v28 = vld [vmem:[%s16496_s1 + $0x1d0] sm:$0xff]  ;;  %v10957_v30 = vld [vmem:[%s16494_s2 + $0x788] sm:$0xff]  }
 0x568   :  { %9043 = vmatprep.subr.bf16.mxu1 %v10928_v32  ;;  %v5024_v32 = vadd.bf16 %v10958_v31, %v7708_v28  ;;  %v10985_v31 = vld [vmem:[%s16494_s2 + $0x9a0] sm:$0xff]  }
 0x569   :  { %9224 = vmatpush3.bf16.msra.mxu0 %v10933_v40 }
 0x56a   :  { %9225 = vmatprep.subr.bf16.mxu0 %v10936_v43 }
 0x56b   :  { %9044 = vmatpush3.bf16.msra.mxu1 %v10930_v35  ;;  %v7742_v35 = vcombine.low %v14969_v11, %v14969_v11  ;;  %v10963_v11 = vld [vmem:[%s16494_s2 + $0x8f0] sm:$0xff]  }
 0x56c   :  { %9045 = vmatprep.subr.bf16.mxu1 %v10932_v37  ;;  %v7747_v37 = vcombine.high %v5024_v32, %v5024_v32 }
 0x56d   :  { %9226 = vmatpush3.bf16.msra.mxu0 %v10938_v46 }
 0x56e   :  { %9227 = vmatprep.subr.bf16.mxu0 %v10940_v49 }
 0x56f   :  { %9046 = vmatpush3.bf16.msra.mxu1 %v10934_v41  ;;  %v10962_v41 = vld [vmem:[%s16494_s2 + $0x8b8] sm:$0xff]  }
 0x570   :  { %9047 = vmatprep.subr.bf16.mxu1 %v10937_v57 }
 0x571   :  { %9228 = vmatpush3.bf16.msra.mxu0 %v10942_v54  ;;  %v10966_v54 = vld [vmem:[%s16494_s2 + $0x8a8] sm:$0xff]  }
 0x572   :  { %9257 = vmatprep.subr.bf16.mxu0 %v10945_v62  ;;  %v10970_v62 = vld [vmem:[%s16494_s2 + $0x898] sm:$0xff]  }
 0x573   :  { %9048 = vmatpush3.bf16.msra.mxu1 %v10939_v39  ;;  %v10964_v39 = vld [vmem:[%s16494_s2 + $0x8b0] sm:$0xff]  }
 0x574   :  { %v10242_v50 = vpop.eup %10241  ;;  %9077 = vmatprep.subr.bf16.mxu1 %v10941_v19  ;;  %v8983_v1 = vpop.f32.mrf.mxu0 }
 0x575   :  { %v4971_v51 = vadd.f32 1.0, %v10242_v50  ;;  %v10965_v50 = vld [vmem:[%s16494_s2 + $0x8e8] sm:$0xff]  }
 0x576   :  { %v8785_v53 = vpop.f32.mrf.mxu1  ;;  %5725 = vmatmul.mubr.bf16.vlgmr.msra.gmra.mxu1 %v7738_v45  ;;  %v8984_v6 = vpop.f32.mrf.mxu0 }
 0x577   :  { %9078 = vmatpush3.bf16.msra.mxu1 %v10943_v55  ;;  %10243 = vrcp.f32 %v4971_v51  ;;  %5804 = vmatprep.mubr.bf16.mxu1 %v7743_v48  ;;  %v15013_v44 = vadd.f32 %v8984_v6, %v8983_v1  ;;  %v10973_v1 = vld [vmem:[%s16494_s2 + $0x8c8] sm:$0xff]  }
 0x578   :  { %v8786_v52 = vpop.f32.mrf.mxu1  ;;  %9079 = vmatprep.subr.bf16.mxu1 %v10944_v60  ;;  %v8986_v12 = vpop.f32.mrf.mxu0  ;;  %v10968_v60 = vld [vmem:[%s16494_s2 + $0x8a0] sm:$0xff]  }
 0x579   :  { %v8787_v0 = vadd.f32 %v8786_v52, %v8785_v53  ;;  %v10967_v52 = vld [vmem:[%s16494_s2 + $0x8e0] sm:$0xff]  }
 0x57a   :  { %v8788_v34 = vpop.f32.mrf.mxu1  ;;  %v8987_v3 = vpop.f32.mrf.mxu0 }
 0x57b   :  { %v5247_v2 = vadd.f32 %v8787_v0, %v5207_v63  ;;  %9080 = vmatpush3.bf16.msra.mxu1 %v10946_v4  ;;  %v10971_v63 = vld [vmem:[%s16494_s2 + $0x8d0] sm:$0xff]   ;;  %v7710_v34 = vld [vmem:[%s16496_s1 + $0x1e0] sm:$0xff]  ;;  %v10975_v4 = vld [vmem:[%s16495_s0 + $0x98] sm:$0xff] }
 0x57c   :  { %v8789_v8 = vpop.f32.mrf.mxu1  ;;  %9081 = vmatprep.subr.bf16.mxu1 %v10947_v9  ;;  %v10972_v0 = vld [vmem:[%s16494_s2 + $0x890] sm:$0xff]   ;;  %v5026_v6 = vadd.bf16 %v10975_v4, %v7710_v34  ;;  %v7746_v9 = vcombine.low %v5024_v32, %v5024_v32  ;;  %v10987_v32 = vld [vmem:[%s16494_s2 + $0x998] sm:$0xff]   ;;  %v11004_v34 = vld [vmem:[%s16498_s4 + $0x28] sm:$0xff] }
 0x57d   :  { %v5287_v5 = vadd.f32 %v14558_v47, %v5247_v2  ;;  %v10951_v47 = vld [vmem:[%s16494_s2 + $0x7d8] sm:$0xff]   ;;  %v10974_v2 = vld [vmem:[%s16494_s2 + $0x888] sm:$0xff]   ;;  %v10976_v8 = vld [vmem:[%s16494_s2 + $0x8c0] sm:$0xff]  }
 0x57e   :  { %v7751_v12 = vcombine.high %v5026_v6, %v5026_v6  ;;  %v11006_v4 = vld [vmem:[%s16498_s4 + $0x18] sm:$0xff] }
 0x57f   :  { %9082 = vmatpush3.bf16.msra.mxu1 %v10948_v13  ;;  %v10978_v13 = vld [vmem:[%s16494_s2 + $0x9f8] sm:$0xff]  }
 0x580   :  { %9083 = vmatprep.subr.bf16.mxu1 %v10949_v14  ;;  %v10979_v14 = vld [vmem:[%s16494_s2 + $0x9b8] sm:$0xff]  }
 0x583   :  { %9084 = vmatpush3.bf16.msra.mxu1 %v10950_v7 }
 0x584   :  { %v10244_v15 = vpop.eup %10243  ;;  %9085 = vmatprep.subr.bf16.mxu1 %v10951_v47 }
 0x585   :  { %v4973_v16 = vmul.f32 2.0, %v10244_v15  ;;  %v10980_v15 = vld [vmem:[%s16494_s2 + $0x9f0] sm:$0xff]  }
 0x587   :  { %9086 = vmatpush3.bf16.msra.mxu1 %v10952_v17  ;;  %v4974_v58 = vsub.f32 1.0, %v4973_v16 }
 0x588   :  { %9087 = vmatprep.subr.bf16.mxu1 %v10953_v18  ;;  %v10981_v18 = vld [vmem:[%s16494_s2 + $0x9b0] sm:$0xff]  }
 0x589   :  { %v4976_v24 = vadd.f32 1.0, %v4974_v58 }
 0x58b   :  { %9088 = vmatpush3.bf16.msra.mxu1 %v10954_v25  ;;  %v4977_v26 = vmul.f32 %v4976_v24, %v4975_v21  ;;  %v10982_v25 = vld [vmem:[%s16494_s2 + $0x9e8] sm:$0xff]  }
 0x58c   :  { %9089 = vmatprep.subr.bf16.mxu1 %v10955_v27 }
 0x58d   :  { %v4978_v29 = vmul.f32 %v10956_v61, %v4977_v26  ;;  %v10983_v61 = vld [vmem:[%s16494_s2 + $0x9a8] sm:$0xff]  }
 0x58f   :  { %9090 = vmatpush3.bf16.msra.mxu1 %v10957_v30  ;;  %4979 = vadd.xlane.f32.xlu0 %v4978_v29  ;;  %v10984_v30 = vld [vmem:[%s16494_s2 + $0x9e0] sm:$0xff]  }
 0x590   :  { %9091 = vmatprep.subr.bf16.mxu1 %v10959_v33  ;;  %v10988_v33 = vld [vmem:[%s16494_s2 + $0x9d0] sm:$0xff]  }
 0x593   :  { %9092 = vmatpush3.bf16.msra.mxu1 %v10960_v36  ;;  %v10990_v36 = vld [vmem:[%s16494_s2 + $0x9c8] sm:$0xff]  }
 0x594   :  { %9121 = vmatprep.subr.bf16.mxu1 %v10961_v38  ;;  %v9027_v57 = vpop.f32.mrf.mxu0  ;;  %v10992_v38 = vld [vmem:[%s16494_s2 + $0x9c0] sm:$0xff]  }
 0x596   :  { %v8829_v40 = vpop.f32.mrf.mxu1  ;;  %5805 = vmatmul.mubr.bf16.vlgmr.msra.gmra.mxu1 %v7742_v35  ;;  %v9028_v48 = vpop.f32.mrf.mxu0  ;;  %v10989_v35 = vld [vmem:[%s16494_s2 + $0x990] sm:$0xff]  }
 0x597   :  { %9122 = vmatpush3.bf16.msra.mxu1 %v10962_v41  ;;  %5884 = vmatprep.mubr.bf16.mxu1 %v7747_v37  ;;  %v15076_v19 = vadd.f32 %v9028_v48, %v9027_v57  ;;  %v10991_v37 = vld [vmem:[%s16494_s2 + $0x988] sm:$0xff]   ;;  %v10993_v41 = vld [vmem:[%s16494_s2 + $0x980] sm:$0xff]  }
 0x598   :  { %v8830_v42 = vpop.f32.mrf.mxu1  ;;  %9123 = vmatprep.subr.bf16.mxu1 %v10963_v11  ;;  %v9030_v53 = vpop.f32.mrf.mxu0  ;;  %v10994_v11 = vld [vmem:[%s16498_s4 + $0x78] sm:$0xff] }
 0x599   :  { %v8831_v43 = vadd.f32 %v8830_v42, %v8829_v40  ;;  %v7750_v40 = vcombine.low %v5026_v6, %v5026_v6  ;;  %v11007_v6 = vld [vmem:[%s16498_s4 + $0x10] sm:$0xff] }
 0x59a   :  { %v8832_v45 = vpop.f32.mrf.mxu1  ;;  %v9031_v55 = vpop.f32.mrf.mxu0 }
 0x59b   :  { %v5327_v46 = vadd.f32 %v8831_v43, %v5287_v5  ;;  %9124 = vmatpush3.bf16.msra.mxu1 %v10964_v39  ;;  %v10977_v5 = vld [vmem:[%s16494_s2 + $0x880] sm:$0xff]  }
 0x59c   :  { %v8833_v49 = vpop.f32.mrf.mxu1  ;;  %9125 = vmatprep.subr.bf16.mxu1 %v10965_v50  ;;  %v10996_v50 = vld [vmem:[%s16498_s4 + $0x68] sm:$0xff] }
 0x59d   :  { %v5367_v51 = vadd.f32 %v14674_v59, %v5327_v46  ;;  %v10969_v59 = vld [vmem:[%s16494_s2 + $0x8d8] sm:$0xff]   ;;  %v10995_v46 = vld [vmem:[%s16498_s4 + $0x70] sm:$0xff] }
 0x59f   :  { %9126 = vmatpush3.bf16.msra.mxu1 %v10966_v54 }
 0x5a0   :  { %9127 = vmatprep.subr.bf16.mxu1 %v10967_v52  ;;  %v10997_v52 = vld [vmem:[%s16498_s4 + $0x60] sm:$0xff] }
 0x5a3   :  { %9128 = vmatpush3.bf16.msra.mxu1 %v10968_v60 }
 0x5a4   :  { %9129 = vmatprep.subr.bf16.mxu1 %v10969_v59  ;;  %v10998_v59 = vld [vmem:[%s16498_s4 + $0x58] sm:$0xff] }
 0x5a7   :  { %9130 = vmatpush3.bf16.msra.mxu1 %v10970_v62  ;;  %v11000_v62 = vld [vmem:[%s16498_s4 + $0x48] sm:$0xff] }
 0x5a8   :  { %9131 = vmatprep.subr.bf16.mxu1 %v10971_v63  ;;  %v11001_v63 = vld [vmem:[%s16498_s4 + $0x40] sm:$0xff] }
 0x5ab   :  { %9132 = vmatpush3.bf16.msra.mxu1 %v10972_v0  ;;  %v11002_v0 = vld [vmem:[%s16498_s4 + $0x38] sm:$0xff] }
 0x5ac   :  { %9133 = vmatprep.subr.bf16.mxu1 %v10973_v1  ;;  %v11003_v1 = vld [vmem:[%s16498_s4 + $0x30] sm:$0xff] }
 0x5af   :  { %9134 = vmatpush3.bf16.msra.mxu1 %v10974_v2  ;;  %v11005_v2 = vld [vmem:[%s16498_s4 + $0x20] sm:$0xff] }
 0x5b0   :  { %9135 = vmatprep.subr.bf16.mxu1 %v10976_v8  ;;  %v11008_v8 = vld [vmem:[%s16498_s4 + $0x8] sm:$0xff] }
 0x5b3   :  { %9136 = vmatpush3.bf16.msra.mxu1 %v10977_v5 }
 0x5b4   :  { %9165 = vmatprep.subr.bf16.mxu1 %v10978_v13  ;;  %v9071_v16 = vpop.f32.mrf.mxu0 }
 0x5b6   :  { %v8873_v3 = vpop.f32.mrf.mxu1  ;;  %5885 = vmatmul.mubr.bf16.vlgmr.msra.gmra.mxu1 %v7746_v9  ;;  %v9072_v21 = vpop.f32.mrf.mxu0  ;;  %v11009_v9 = vld [vmem:[%s16498_s4] sm:$0xff] }
 0x5b7   :  { %9166 = vmatpush3.bf16.msra.mxu1 %v10979_v14  ;;  %5964 = vmatprep.mubr.bf16.mxu1 %v7751_v12  ;;  %v15133_v26 = vadd.f32 %v9072_v21, %v9071_v16  ;;  %v11010_v12 = vld [vmem:[%s16494_s2 + $0xf8] sm:$0xff]  }
 0x5b8   :  { %v8874_v7 = vpop.f32.mrf.mxu1  ;;  %9167 = vmatprep.subr.bf16.mxu1 %v10980_v15  ;;  %v9074_v28 = vpop.f32.mrf.mxu0 }
 0x5b9   :  { %v8875_v47 = vadd.f32 %v8874_v7, %v8873_v3 }
 0x5ba   :  { %v8876_v17 = vpop.f32.mrf.mxu1  ;;  %v9075_v29 = vpop.f32.mrf.mxu0 }
 0x5bb   :  { %v5407_v58 = vadd.f32 %v8875_v47, %v5367_v51  ;;  %9168 = vmatpush3.bf16.msra.mxu1 %v10981_v18 }
 0x5bc   :  { %v8877_v24 = vpop.f32.mrf.mxu1  ;;  %9169 = vmatprep.subr.bf16.mxu1 %v10982_v25 }
 0x5bd   :  { %v5447_v27 = vadd.f32 %v14790_v22, %v5407_v58  ;;  %v10986_v22 = vld [vmem:[%s16494_s2 + $0x9d8] sm:$0xff]  }
 0x5bf   :  { %9170 = vmatpush3.bf16.msra.mxu1 %v10983_v61 }
 0x5c0   :  { %9171 = vmatprep.subr.bf16.mxu1 %v10984_v30 }
 0x5c3   :  { %9172 = vmatpush3.bf16.msra.mxu1 %v10985_v31 }
 0x5c4   :  { %9173 = vmatprep.subr.bf16.mxu1 %v10986_v22 }
 0x5c7   :  { %9174 = vmatpush3.bf16.msra.mxu1 %v10987_v32 }
 0x5c8   :  { %9175 = vmatprep.subr.bf16.mxu1 %v10988_v33 }
 0x5cb   :  { %9176 = vmatpush3.bf16.msra.mxu1 %v10989_v35 }
 0x5cc   :  { %9177 = vmatprep.subr.bf16.mxu1 %v10990_v36 }
 0x5cf   :  { %9178 = vmatpush3.bf16.msra.mxu1 %v10991_v37 }
 0x5d0   :  { %9179 = vmatprep.subr.bf16.mxu1 %v10992_v38 }
 0x5d3   :  { %9180 = vmatpush3.bf16.msra.mxu1 %v10993_v41 }
 0x5d4   :  { %9809 = vmatprep.subr.mxu1 %v11360_v20  ;;  %v9115_v45 = vpop.f32.mrf.mxu0 }
 0x5d6   :  { %v8917_v42 = vpop.f32.mrf.mxu1  ;;  %5965 = vmatmul.mubr.bf16.vlgmr.msra.gmra.mxu1 %v7750_v40  ;;  %v9116_v49 = vpop.f32.mrf.mxu0  ;;  %v7753_v40 = vld [vmem:[%s16496_s1 + $0x1ec] sm:$0xff] }
 0x5d7   :  { %9810 = vmatpush3.msra.mxu1 %v10994_v11  ;;  %9841 = vmatprep.mubr.msk.f32.mxu1 %vm11361_vm0, %v11360_v20  ;;  %v15183_v53 = vadd.f32 %v9116_v49, %v9115_v45  ;;  %v11012_v45 = vld [vmem:[%s16494_s2 + $0x138] sm:$0xff]   ;;  %v11017_v49 = vld [vmem:[%s16494_s2 + $0x160] sm:$0xff]  }
 0x5d8   :  { %v8918_v43 = vpop.f32.mrf.mxu1  ;;  %9811 = vmatprep.subr.mxu1 %v11360_v20  ;;  %v9118_v55 = vpop.f32.mrf.mxu0 }
 0x5d9   :  { %v8919_v57 = vadd.f32 %v8918_v43, %v8917_v42  ;;  %9812 = vmatpush3.msra.mxu1 %v10995_v46  ;;  %v11011_v42 = vld [vmem:[%s16495_s0] sm:$0xff]  ;;  %v11013_v46 = vld [vmem:[%s16494_s2 + $0x170] sm:$0xff]  }
 0x5da   :  { %v8920_v39 = vpop.f32.mrf.mxu1  ;;  %9813 = vmatprep.subr.mxu1 %v11360_v20  ;;  %v9119_v60 = vpop.f32.mrf.mxu0  ;;  %v6141_v11 = vadd.bf16 %v11011_v42, %v7753_v40  ;;  %v11021_v55 = vld [vmem:[%s16494_s2 + $0x150] sm:$0xff]   ;;  %v11045_v42 = vld [vmem:[%s16494_s2 + $0x378] sm:$0xff]  }
 0x5db   :  { %v5487_v48 = vadd.f32 %v8919_v57, %v5447_v27  ;;  %9814 = vmatpush3.msra.mxu1 %v10996_v50  ;;  %v11014_v39 = vld [vmem:[%s16494_s2 + $0x130] sm:$0xff]   ;;  %v11018_v50 = vld [vmem:[%s16494_s2 + $0x120] sm:$0xff]  }
 0x5dc   :  { %v8921_v51 = vpop.f32.mrf.mxu1  ;;  %9815 = vmatprep.subr.mxu1 %v11360_v20  ;;  %v7775_v57 = vcombine.high %v6141_v11, %v6141_v11  ;;  %v11022_v60 = vld [vmem:[%s16494_s2 + $0x110] sm:$0xff]  }
 0x5dd   :  { %v5527_v54 = vadd.f32 %v14900_v10, %v5487_v48  ;;  %9816 = vmatpush3.msra.mxu1 %v10997_v52  ;;  %v10999_v10 = vld [vmem:[%s16498_s4 + $0x50] sm:$0xff]  ;;  %v11016_v48 = vld [vmem:[%s16494_s2 + $0x128] sm:$0xff]   ;;  %v11019_v51 = vld [vmem:[%s16494_s2 + $0x158] sm:$0xff]  }
 0x5de   :  { %9817 = vmatprep.subr.mxu1 %v11360_v20  ;;  %6338 = vmatprep.mubr.bf16.mxu0 %v7775_v57 }
 0x5df   :  { %9818 = vmatpush3.msra.mxu1 %v10998_v59  ;;  %v11023_v59 = vld [vmem:[%s16494_s2 + $0x148] sm:$0xff]  }
 0x5e0   :  { %9819 = vmatprep.subr.mxu1 %v11360_v20 }
 0x5e1   :  { %9820 = vmatpush3.msra.mxu1 %v10999_v10 }
 0x5e2   :  { %9821 = vmatprep.subr.mxu1 %v11360_v20 }
 0x5e3   :  { %9822 = vmatpush3.msra.mxu1 %v11000_v62 }
 0x5e4   :  { %9823 = vmatprep.subr.mxu1 %v11360_v20 }
 0x5e5   :  { %9824 = vmatpush3.msra.mxu1 %v11001_v63 }
 0x5e6   :  { %9825 = vmatprep.subr.mxu1 %v11360_v20 }
 0x5e7   :  { %9826 = vmatpush3.msra.mxu1 %v11002_v0  ;;  %v11024_v0 = vld [vmem:[%s16494_s2 + $0x108] sm:$0xff]  }
 0x5e8   :  { %9827 = vmatprep.subr.mxu1 %v11360_v20 }
 0x5e9   :  { %9828 = vmatpush3.msra.mxu1 %v11003_v1 }
 0x5ea   :  { %9829 = vmatprep.subr.mxu1 %v11360_v20 }
 0x5eb   :  { %9830 = vmatpush3.msra.mxu1 %v11004_v34  ;;  %v11025_v34 = vld [vmem:[%s16494_s2 + $0x140] sm:$0xff]  }
 0x5ec   :  { %9831 = vmatprep.subr.mxu1 %v11360_v20 }
 0x5ed   :  { %9832 = vmatpush3.msra.mxu1 %v11005_v2 }
 0x5ee   :  { %9833 = vmatprep.subr.mxu1 %v11360_v20 }
 0x5ef   :  { %9834 = vmatpush3.msra.mxu1 %v11006_v4 }
 0x5f0   :  { %9835 = vmatprep.subr.mxu1 %v11360_v20 }
 0x5f1   :  { %9836 = vmatpush3.msra.mxu1 %v11007_v6  ;;  %v11026_v6 = vld [vmem:[%s16494_s2 + $0x100] sm:$0xff]  }
 0x5f2   :  { %9837 = vmatprep.subr.mxu1 %v11360_v20 }
 0x5f3   :  { %9838 = vmatpush3.msra.mxu1 %v11008_v8  ;;  %v11027_v8 = vld [vmem:[%s16494_s2 + $0x278] sm:$0xff]  }
 0x5f4   :  { %9839 = vmatprep.subr.mxu1 %v11360_v20  ;;  %v9159_v14 = vpop.f32.mrf.mxu0 }
 0x5f5   :  { %9840 = vmatpush3.msra.mxu1 %v11009_v9  ;;  %v7755_v9 = vld [vmem:[%s16496_s1 + $0x1fc] sm:$0xff] }
 0x5f6   :  { %v8961_v5 = vpop.f32.mrf.mxu1  ;;  %9235 = vmatprep.subr.bf16.mxu1 %v11010_v12  ;;  %v9160_v47 = vpop.f32.mrf.mxu0 }
 0x5f7   :  { %v15241_v17 = vadd.f32 %v9160_v47, %v9159_v14 }
 0x5f8   :  { %v8962_v13 = vpop.f32.mrf.mxu1  ;;  %v9162_v18 = vpop.f32.mrf.mxu0 }
 0x5f9   :  { %v8963_v3 = vadd.f32 %v8962_v13, %v8961_v5  ;;  %v11028_v5 = vld [vmem:[%s16495_s0 + $0x10] sm:$0xff]  ;;  %v11032_v18 = vld [vmem:[%s16494_s2 + $0x268] sm:$0xff]  }
 0x5fa   :  { %v8964_v7 = vpop.f32.mrf.mxu1  ;;  %v9163_v21 = vpop.f32.mrf.mxu0  ;;  %v6143_v12 = vadd.bf16 %v11028_v5, %v7755_v9  ;;  %v7759_v9 = vld [vmem:[%s16496_s1 + $0x21c] sm:$0xff]  ;;  %v11060_v5 = vld [vmem:[%s16495_s0 + $0x30] sm:$0xff] }
 0x5fb   :  { %v5567_v15 = vadd.f32 %v8963_v3, %v5527_v54  ;;  %v11020_v54 = vld [vmem:[%s16494_s2 + $0x118] sm:$0xff]   ;;  %v11030_v7 = vld [vmem:[%s16494_s2 + $0x270] sm:$0xff]  }
 0x5fc   :  { %v8965_v16 = vpop.f32.mrf.mxu1  ;;  %v7778_v13 = vcombine.low %v6143_v12, %v6143_v12  ;;  %v11029_v3 = vld [vmem:[%s16494_s2 + $0x238] sm:$0xff]  }
 0x5fd   :  { %v5607_v58 = vadd.f32 %v15013_v44, %v5567_v15  ;;  %v11031_v16 = vld [vmem:[%s16494_s2 + $0x230] sm:$0xff]  }
 0x614   :  { %v15244_v28 = vpop.f32.mrf.mxu0 }
 0x616   :  { %v9005_v24 = vpop.f32.mrf.mxu1  ;;  %v9807_v30 = vpop.f32.mrf.mxu0 }
 0x617   :  { %v11036_v30 = vld [vmem:[%s16494_s2 + $0x258] sm:$0xff]  }
 0x618   :  { %v9006_v25 = vpop.f32.mrf.mxu1  ;;  %v6009_v32 = vpop.f32.mrf.mxu0 }
 0x619   :  { %v9007_v27 = vadd.f32 %v9006_v25, %v9005_v24  ;;  %v11040_v32 = vld [vmem:[%s16494_s2 + $0x248] sm:$0xff]  }
 0x61a   :  { %v9008_v61 = vpop.f32.mrf.mxu1  ;;  %v9808_v33 = vpop.f32.mrf.mxu0 }
 0x61b   :  { %v5647_v29 = vadd.f32 %v9007_v27, %v5607_v58  ;;  %v11033_v27 = vld [vmem:[%s16494_s2 + $0x228] sm:$0xff]   ;;  %v11034_v61 = vld [vmem:[%s16494_s2 + $0x260] sm:$0xff]  }
 0x61c   :  { %v9009_v31 = vpop.f32.mrf.mxu1  ;;  %v11041_v33 = vld [vmem:[%s16494_s2 + $0x208] sm:$0xff]  }
 0x61d   :  { %v5687_v22 = vadd.f32 %v15076_v19, %v5647_v29  ;;  %v7774_v19 = vcombine.low %v6141_v11, %v6141_v11  ;;  %v11035_v29 = vld [vmem:[%s16494_s2 + $0x220] sm:$0xff]   ;;  %v11038_v31 = vld [vmem:[%s16494_s2 + $0x250] sm:$0xff]   ;;  %v11046_v11 = vld [vmem:[%s16494_s2 + $0x338] sm:$0xff]  }
 0x61f   :  { %6339 = vmatmul.mubr.bf16.vlgmr.msra.gmra.mxu0 %v7774_v19  ;;  %v11047_v19 = vld [vmem:[%s16494_s2 + $0x370] sm:$0xff]  }
 0x620   :  { %9258 = vmatpush3.bf16.msra.mxu0 %v11012_v45 }
 0x621   :  { %9259 = vmatprep.subr.bf16.mxu0 %v11013_v46  ;;  %v11048_v46 = vld [vmem:[%s16494_s2 + $0x330] sm:$0xff]  }
 0x624   :  { %9260 = vmatpush3.bf16.msra.mxu0 %v11014_v39 }
 0x636   :  { %v9049_v35 = vpop.f32.mrf.mxu1 }
 0x638   :  { %v9050_v36 = vpop.f32.mrf.mxu1 }
 0x639   :  { %v9051_v37 = vadd.f32 %v9050_v36, %v9049_v35  ;;  %v11042_v35 = vld [vmem:[%s16494_s2 + $0x240] sm:$0xff]   ;;  %v7757_v36 = vld [vmem:[%s16496_s1 + $0x20c] sm:$0xff] }
 0x63a   :  { %v9052_v38 = vpop.f32.mrf.mxu1 }
 0x63b   :  { %v5727_v44 = vadd.f32 %v9051_v37, %v5687_v22  ;;  %v11039_v22 = vld [vmem:[%s16494_s2 + $0x210] sm:$0xff]   ;;  %v11043_v37 = vld [vmem:[%s16495_s0 + $0x20] sm:$0xff] }
 0x63c   :  { %v9053_v41 = vpop.f32.mrf.mxu1  ;;  %v6145_v38 = vadd.bf16 %v11043_v37, %v7757_v36  ;;  %v11076_v37 = vld [vmem:[%s16494_s2 + $0x408] sm:$0xff]  }
 0x63d   :  { %v5767_v43 = vadd.f32 %v15133_v26, %v5727_v44  ;;  %v11015_v26 = vld [vmem:[%s16494_s2 + $0x168] sm:$0xff]   ;;  %v11044_v44 = vld [vmem:[%s16494_s2 + $0x200] sm:$0xff]  }
 0x63e   :  { %9261 = vmatprep.subr.bf16.mxu0 %v11015_v26  ;;  %v7783_v40 = vcombine.high %v6145_v38, %v6145_v38  ;;  %v7782_v41 = vcombine.low %v6145_v38, %v6145_v38  ;;  %v11049_v26 = vld [vmem:[%s16494_s2 + $0x368] sm:$0xff]   ;;  %v11077_v38 = vld [vmem:[%s16494_s2 + $0x440] sm:$0xff]  }
 0x63f   :  { %9262 = vmatpush3.bf16.msra.mxu0 %v11016_v48 }
 0x640   :  { %9263 = vmatprep.subr.bf16.mxu0 %v11017_v49 }
 0x643   :  { %9264 = vmatpush3.bf16.msra.mxu0 %v11018_v50 }
 0x644   :  { %9265 = vmatprep.subr.bf16.mxu0 %v11019_v51  ;;  %v11050_v51 = vld [vmem:[%s16494_s2 + $0x328] sm:$0xff]  }
 0x647   :  { %9266 = vmatpush3.bf16.msra.mxu0 %v11020_v54  ;;  %v11051_v54 = vld [vmem:[%s16494_s2 + $0x360] sm:$0xff]  }
 0x648   :  { %9267 = vmatprep.subr.bf16.mxu0 %v11021_v55 }
 0x64b   :  { %9268 = vmatpush3.bf16.msra.mxu0 %v11022_v60  ;;  %v11053_v60 = vld [vmem:[%s16494_s2 + $0x358] sm:$0xff]  }
 0x64c   :  { %9269 = vmatprep.subr.bf16.mxu0 %v11023_v59 }
 0x64f   :  { %9270 = vmatpush3.bf16.msra.mxu0 %v11024_v0 }
 0x650   :  { %9271 = vmatprep.subr.bf16.mxu0 %v11025_v34  ;;  %v11056_v34 = vld [vmem:[%s16494_s2 + $0x310] sm:$0xff]  }
 0x653   :  { %9272 = vmatpush3.bf16.msra.mxu0 %v11026_v6  ;;  %v11058_v6 = vld [vmem:[%s16494_s2 + $0x308] sm:$0xff]  }
 0x654   :  { %9301 = vmatprep.subr.bf16.mxu0 %v11027_v8  ;;  %v11059_v8 = vld [vmem:[%s16494_s2 + $0x340] sm:$0xff]  }
 0x656   :  { %v9093_v52 = vpop.f32.mrf.mxu1 }
 0x658   :  { %v9094_v10 = vpop.f32.mrf.mxu1 }
 0x659   :  { %v9095_v62 = vadd.f32 %v9094_v10, %v9093_v52 }
 0x65a   :  { %v9096_v63 = vpop.f32.mrf.mxu1 }
 0x65b   :  { %v5807_v1 = vadd.f32 %v9095_v62, %v5767_v43  ;;  %v11054_v62 = vld [vmem:[%s16494_s2 + $0x318] sm:$0xff]   ;;  %v11055_v63 = vld [vmem:[%s16494_s2 + $0x350] sm:$0xff]  }
 0x65c   :  { %v9097_v2 = vpop.f32.mrf.mxu1 }
 0x65d   :  { %v5847_v4 = vadd.f32 %v15183_v53, %v5807_v1  ;;  %v7779_v53 = vcombine.high %v6143_v12, %v6143_v12  ;;  %v11057_v2 = vld [vmem:[%s16494_s2 + $0x348] sm:$0xff]   ;;  %v6147_v12 = vadd.bf16 %v11060_v5, %v7759_v9 }
 0x65e   :  { %v11102_v9 = vld [vmem:[%s16494_s2 + $0xc8] sm:$0xff]  }
 0x65f   :  { %6418 = vmatprep.mubr.bf16.mxu0 %v7779_v53  ;;  %v11061_v53 = vld [vmem:[%s16494_s2 + $0x300] sm:$0xff]  }
 0x660   :  { %6419 = vmatmul.mubr.bf16.vlgmr.msra.gmra.mxu0 %v7778_v13  ;;  %v7787_v13 = vcombine.high %v6147_v12, %v6147_v12  ;;  %v7756_v5 = vld [vmem:[%s16496_s1 + $0x204] sm:$0xff] }
 0x661   :  { %9302 = vmatpush3.bf16.msra.mxu0 %v11029_v3  ;;  %6498 = vmatprep.mubr.bf16.mxu0 %v7783_v40  ;;  %v7786_v3 = vcombine.low %v6147_v12, %v6147_v12  ;;  %v11103_v12 = vld [vmem:[%s16494_s2 + $0x510] sm:$0xff]  }
 0x662   :  { %9303 = vmatprep.subr.bf16.mxu0 %v11030_v7  ;;  %v11063_v7 = vld [vmem:[%s16494_s2 + $0x438] sm:$0xff]  }
 0x665   :  { %9304 = vmatpush3.bf16.msra.mxu0 %v11031_v16 }
 0x666   :  { %9305 = vmatprep.subr.bf16.mxu0 %v11032_v18 }
 0x669   :  { %9306 = vmatpush3.bf16.msra.mxu0 %v11033_v27  ;;  %v11070_v27 = vld [vmem:[%s16494_s2 + $0x458] sm:$0xff]  }
 0x66a   :  { %9307 = vmatprep.subr.bf16.mxu0 %v11034_v61  ;;  %v11071_v61 = vld [vmem:[%s16494_s2 + $0x418] sm:$0xff]  }
 0x66d   :  { %9308 = vmatpush3.bf16.msra.mxu0 %v11035_v29  ;;  %v11072_v29 = vld [vmem:[%s16494_s2 + $0x450] sm:$0xff]  }
 0x66e   :  { %9309 = vmatprep.subr.bf16.mxu0 %v11036_v30  ;;  %v7754_v30 = vld [vmem:[%s16496_s1 + $0x1f4] sm:$0xff] }
 0x676   :  { %v9137_v14 = vpop.f32.mrf.mxu1 }
 0x678   :  { %v9138_v15 = vpop.f32.mrf.mxu1 }
 0x679   :  { %v9139_v47 = vadd.f32 %v9138_v15, %v9137_v14  ;;  %v11062_v14 = vld [vmem:[%s16494_s2 + $0x478] sm:$0xff]   ;;  %v11064_v15 = vld [vmem:[%s16494_s2 + $0x470] sm:$0xff]  }
 0x67a   :  { %v9140_v58 = vpop.f32.mrf.mxu1 }
 0x67b   :  { %v5887_v21 = vadd.f32 %v9139_v47, %v5847_v4  ;;  %v11065_v47 = vld [vmem:[%s16494_s2 + $0x430] sm:$0xff]   ;;  %v11066_v58 = vld [vmem:[%s16494_s2 + $0x468] sm:$0xff]  }
 0x67c   :  { %v9141_v24 = vpop.f32.mrf.mxu1 }
 0x67d   :  { %v5927_v25 = vadd.f32 %v15241_v17, %v5887_v21  ;;  %v11037_v17 = vld [vmem:[%s16494_s2 + $0x218] sm:$0xff]   ;;  %v11067_v21 = vld [vmem:[%s16494_s2 + $0x428] sm:$0xff]   ;;  %v11068_v24 = vld [vmem:[%s16494_s2 + $0x460] sm:$0xff]  }
 0x67e   :  { %9310 = vmatpush3.bf16.msra.mxu0 %v11037_v17  ;;  %v11073_v17 = vld [vmem:[%s16494_s2 + $0x410] sm:$0xff]  }
 0x67f   :  { %9311 = vmatprep.subr.bf16.mxu0 %v11038_v31 }
 0x682   :  { %9312 = vmatpush3.bf16.msra.mxu0 %v11039_v22  ;;  %v11074_v22 = vld [vmem:[%s16494_s2 + $0x448] sm:$0xff]  }
 0x683   :  { %9313 = vmatprep.subr.bf16.mxu0 %v11040_v32 }
 0x686   :  { %9314 = vmatpush3.bf16.msra.mxu0 %v11041_v33  ;;  %v11075_v33 = vld [vmem:[%s16495_s0 + $0x8] sm:$0xff] }
 0x687   :  { %9315 = vmatprep.subr.bf16.mxu0 %v11042_v35  ;;  %v15467_v35 = vadd.bf16 %v11075_v33, %v7754_v30  ;;  %v11118_v33 = vld [vmem:[%s16494_s2 + $0x1b0] sm:$0xff]  }
 0x68a   :  { %9316 = vmatpush3.bf16.msra.mxu0 %v11044_v44  ;;  %v7761_v44 = vld [vmem:[%s16496_s1 + $0x22c] sm:$0xff] }
 0x68b   :  { %9345 = vmatprep.subr.bf16.mxu0 %v11045_v42  ;;  %v11078_v42 = vld [vmem:[%s16495_s0 + $0x40] sm:$0xff] }
 0x68d   :  { %6499 = vmatmul.mubr.bf16.vlgmr.msra.gmra.mxu0 %v7782_v41 }
 0x68e   :  { %9346 = vmatpush3.bf16.msra.mxu0 %v11046_v11  ;;  %6578 = vmatprep.mubr.bf16.mxu0 %v7787_v13  ;;  %v6149_v11 = vadd.bf16 %v11078_v42, %v7761_v44  ;;  %v11105_v13 = vld [vmem:[%s16494_s2 + $0x88] sm:$0xff]   ;;  %v11126_v42 = vld [vmem:[%s16494_s2 + $0x1a0] sm:$0xff]  }
 0x68f   :  { %9347 = vmatprep.subr.bf16.mxu0 %v11047_v19  ;;  %v11123_v44 = vld [vmem:[%s16494_s2 + $0x668] sm:$0xff]  }
 0x692   :  { %9348 = vmatpush3.bf16.msra.mxu0 %v11048_v46  ;;  %v7790_v46 = vcombine.low %v6149_v11, %v6149_v11 }
 0x693   :  { %9349 = vmatprep.subr.bf16.mxu0 %v11049_v26  ;;  %v11081_v26 = vld [vmem:[%s16494_s2 + $0xb8] sm:$0xff]  }
 0x696   :  { %v9181_v43 = vpop.f32.mrf.mxu1  ;;  %9350 = vmatpush3.bf16.msra.mxu0 %v11050_v51  ;;  %v11085_v51 = vld [vmem:[%s16494_s2 + $0xb0] sm:$0xff]  }
 0x697   :  { %9351 = vmatprep.subr.bf16.mxu0 %v11051_v54  ;;  %v11086_v54 = vld [vmem:[%s16494_s2 + $0xe8] sm:$0xff]  }
 0x698   :  { %v9182_v57 = vpop.f32.mrf.mxu1 }
 0x699   :  { %v9183_v45 = vadd.f32 %v9182_v57, %v9181_v43  ;;  %v7777_v43 = vcombine.high %v15467_v35, %v15467_v35  ;;  %v11079_v57 = vld [vmem:[%s16494_s2 + $0x400] sm:$0xff]  }
 0x69a   :  { %v9184_v39 = vpop.f32.mrf.mxu1 }
 0x69b   :  { %v5967_v48 = vadd.f32 %v9183_v45, %v5927_v25  ;;  %v11069_v25 = vld [vmem:[%s16494_s2 + $0x420] sm:$0xff]   ;;  %v7791_v45 = vcombine.high %v6149_v11, %v6149_v11  ;;  %v11080_v39 = vld [vmem:[%s16494_s2 + $0x578] sm:$0xff]  }
 0x69c   :  { %v9185_v49 = vpop.f32.mrf.mxu1  ;;  %v11127_v11 = vld [vmem:[%s16494_s2 + $0x660] sm:$0xff]  }
 0x69d   :  { %v15377_v50 = vadd.f32 %v15244_v28, %v5967_v48  ;;  %v11052_v28 = vld [vmem:[%s16494_s2 + $0x320] sm:$0xff]   ;;  %v11082_v48 = vld [vmem:[%s16494_s2 + $0xf0] sm:$0xff]   ;;  %v11083_v49 = vld [vmem:[%s16494_s2 + $0x538] sm:$0xff]  }
 0x69e   :  { %9352 = vmatpush3.bf16.msra.mxu0 %v11052_v28  ;;  %v11089_v28 = vld [vmem:[%s16494_s2 + $0xa8] sm:$0xff]  }
 0x69f   :  { %v6012_v55 = vmul.f32 %v15377_v50, %v15377_v50  ;;  %9353 = vmatprep.subr.bf16.mxu0 %v11053_v60  ;;  %v6024_v40 = vmul.f32 0.5, %v15377_v50  ;;  %v11090_v60 = vld [vmem:[%s16494_s2 + $0xe0] sm:$0xff]  }
 0x6a1   :  { %v6013_v52 = vmul.f32 %v6012_v55, %v15377_v50  ;;  %v11087_v55 = vld [vmem:[%s16494_s2 + $0x530] sm:$0xff]  }
 0x6a2   :  { %9354 = vmatpush3.bf16.msra.mxu0 %v11054_v62  ;;  %v11093_v62 = vld [vmem:[%s16494_s2 + $0xa0] sm:$0xff]  }
 0x6a3   :  { %v6014_v59 = vmul.f32 0.044715, %v6013_v52  ;;  %9355 = vmatprep.subr.bf16.mxu0 %v11055_v63  ;;  %v11088_v52 = vld [vmem:[%s16494_s2 + $0x568] sm:$0xff]   ;;  %v11094_v63 = vld [vmem:[%s16494_s2 + $0xd8] sm:$0xff]  }
 0x6a5   :  { %v6015_v10 = vadd.f32 %v6014_v59, %v15377_v50  ;;  %v11084_v50 = vld [vmem:[%s16494_s2 + $0x570] sm:$0xff]   ;;  %v11091_v59 = vld [vmem:[%s16494_s2 + $0x528] sm:$0xff]  }
 0x6a6   :  { %9356 = vmatpush3.bf16.msra.mxu0 %v11056_v34  ;;  %v11097_v34 = vld [vmem:[%s16494_s2 + $0x98] sm:$0xff]  }
 0x6a7   :  { %v6016_v0 = vmul.f32 0.7978846, %v6015_v10  ;;  %9357 = vmatprep.subr.bf16.mxu0 %v11057_v2  ;;  %v11092_v10 = vld [vmem:[%s16494_s2 + $0x560] sm:$0xff]   ;;  %v11098_v2 = vld [vmem:[%s16494_s2 + $0xd0] sm:$0xff]  }
 0x6a9   :  { %v6017_v1 = vmul.f32 2.0, %v6016_v0  ;;  %v11095_v0 = vld [vmem:[%s16494_s2 + $0x520] sm:$0xff]  }
 0x6aa   :  { %9358 = vmatpush3.bf16.msra.mxu0 %v11058_v6  ;;  %v11100_v6 = vld [vmem:[%s16494_s2 + $0x550] sm:$0xff]  }
 0x6ab   :  { %v6018_v4 = vmul.f32 1.442695, %v6017_v1  ;;  %9359 = vmatprep.subr.bf16.mxu0 %v11059_v8  ;;  %v11096_v1 = vld [vmem:[%s16494_s2 + $0x558] sm:$0xff]   ;;  %v11101_v8 = vld [vmem:[%s16494_s2 + $0x90] sm:$0xff]  }
 0x6ad   :  { %10245 = vpow2.f32 %v6018_v4  ;;  %v11099_v4 = vld [vmem:[%s16494_s2 + $0x518] sm:$0xff]  }
 0x6ae   :  { %9360 = vmatpush3.bf16.msra.mxu0 %v11061_v53  ;;  %v11104_v53 = vld [vmem:[%s16494_s2 + $0x548] sm:$0xff]  }
 0x6af   :  { %9389 = vmatprep.subr.bf16.mxu0 %v11062_v14 }
 0x6b1   :  { %6579 = vmatmul.mubr.bf16.vlgmr.msra.gmra.mxu0 %v7786_v3  ;;  %v11106_v3 = vld [vmem:[%s16495_s0 + $0x18] sm:$0xff] }
 0x6b2   :  { %9390 = vmatpush3.bf16.msra.mxu0 %v11063_v7  ;;  %6658 = vmatprep.mubr.bf16.mxu0 %v7791_v45  ;;  %v15571_v14 = vadd.bf16 %v11106_v3, %v7756_v5  ;;  %v11107_v7 = vld [vmem:[%s16494_s2 + $0xc0] sm:$0xff]   ;;  %v11131_v45 = vld [vmem:[%s16494_s2 + $0x658] sm:$0xff]  }
 0x6b3   :  { %9391 = vmatprep.subr.bf16.mxu0 %v11064_v15  ;;  %v11108_v15 = vld [vmem:[%s16494_s2 + $0x508] sm:$0xff]   ;;  %v11148_v5 = vld [vmem:[%s16494_s2 + $0x2b8] sm:$0xff]  }
 0x6b6   :  { %9392 = vmatpush3.bf16.msra.mxu0 %v11065_v47  ;;  %v7763_v47 = vld [vmem:[%s16496_s1 + $0x23c] sm:$0xff] }
 0x6b7   :  { %9393 = vmatprep.subr.bf16.mxu0 %v11066_v58  ;;  %v11109_v58 = vld [vmem:[%s16494_s2 + $0x540] sm:$0xff]  }
 0x6ba   :  { %v10246_v16 = vpop.eup %10245  ;;  %9394 = vmatpush3.bf16.msra.mxu0 %v11067_v21 }
 0x6bb   :  { %v6020_v18 = vadd.f32 1.0, %v10246_v16  ;;  %9395 = vmatprep.subr.bf16.mxu0 %v11068_v24  ;;  %v7776_v16 = vcombine.low %v15467_v35, %v15467_v35  ;;  %v11111_v24 = vld [vmem:[%s16494_s2 + $0x80] sm:$0xff]   ;;  %v11119_v35 = vld [vmem:[%s16494_s2 + $0x670] sm:$0xff]  }
 0x6bd   :  { %10247 = vrcp.f32 %v6020_v18  ;;  %v11110_v18 = vld [vmem:[%s16495_s0 + $0x50] sm:$0xff] }
 0x6be   :  { %9396 = vmatpush3.bf16.msra.mxu0 %v11069_v25  ;;  %v6151_v21 = vadd.bf16 %v11110_v18, %v7763_v47  ;;  %v7781_v25 = vcombine.high %v15571_v14, %v15571_v14 }
 0x6bf   :  { %9397 = vmatprep.subr.bf16.mxu0 %v11070_v27  ;;  %v11112_v27 = vld [vmem:[%s16494_s2 + $0x1f8] sm:$0xff]  }
 0x6c0   :  { %v7794_v30 = vcombine.low %v6151_v21, %v6151_v21 }
 0x6c2   :  { %9398 = vmatpush3.bf16.msra.mxu0 %v11071_v61  ;;  %v7795_v61 = vcombine.high %v6151_v21, %v6151_v21  ;;  %v11155_v21 = vld [vmem:[%s16494_s2 + $0x730] sm:$0xff]  }
 0x6c3   :  { %9399 = vmatprep.subr.bf16.mxu0 %v11072_v29  ;;  %v11113_v29 = vld [vmem:[%s16494_s2 + $0x500] sm:$0xff]  }
 0x6c6   :  { %9400 = vmatpush3.bf16.msra.mxu0 %v11073_v17  ;;  %v11114_v17 = vld [vmem:[%s16494_s2 + $0x1b8] sm:$0xff]  }
 0x6c7   :  { %9401 = vmatprep.subr.bf16.mxu0 %v11074_v22  ;;  %v11116_v22 = vld [vmem:[%s16494_s2 + $0x678] sm:$0xff]  }
 0x6ca   :  { %v10248_v31 = vpop.eup %10247  ;;  %9402 = vmatpush3.bf16.msra.mxu0 %v11076_v37  ;;  %v11121_v37 = vld [vmem:[%s16494_s2 + $0x630] sm:$0xff]  }
 0x6cb   :  { %v6022_v32 = vmul.f32 2.0, %v10248_v31  ;;  %9403 = vmatprep.subr.bf16.mxu0 %v11077_v38  ;;  %v11115_v31 = vld [vmem:[%s16494_s2 + $0x1f0] sm:$0xff]   ;;  %v11122_v38 = vld [vmem:[%s16494_s2 + $0x1a8] sm:$0xff]  }
 0x6cd   :  { %v6023_v36 = vsub.f32 1.0, %v6022_v32  ;;  %v11117_v32 = vld [vmem:[%s16494_s2 + $0x638] sm:$0xff]  }
 0x6ce   :  { %9404 = vmatpush3.bf16.msra.mxu0 %v11079_v57  ;;  %v11130_v57 = vld [vmem:[%s16494_s2 + $0x198] sm:$0xff]  }
 0x6cf   :  { %v6025_v41 = vadd.f32 1.0, %v6023_v36  ;;  %9433 = vmatprep.subr.bf16.mxu0 %v11080_v39  ;;  %v11120_v36 = vld [vmem:[%s16494_s2 + $0x1e8] sm:$0xff]   ;;  %v11133_v39 = vld [vmem:[%s16494_s2 + $0x618] sm:$0xff]  }
 0x6d1   :  { %v6026_v19 = vmul.f32 %v6025_v41, %v6024_v40  ;;  %6659 = vmatmul.mubr.bf16.vlgmr.msra.gmra.mxu0 %v7790_v46  ;;  %v11124_v40 = vld [vmem:[%s16494_s2 + $0x1e0] sm:$0xff]   ;;  %v11125_v41 = vld [vmem:[%s16494_s2 + $0x628] sm:$0xff]   ;;  %v11132_v46 = vld [vmem:[%s16494_s2 + $0x1d0] sm:$0xff]  }
 0x6d2   :  { %9434 = vmatpush3.bf16.msra.mxu0 %v11083_v49  ;;  %6738 = vmatprep.mubr.bf16.mxu0 %v7795_v61  ;;  %v11136_v49 = vld [vmem:[%s16494_s2 + $0x1c8] sm:$0xff]  }
 0x6d3   :  { %9842 = vmatmul.mubr.f32.vlgmr.msra.gmra.mxu1 %v6026_v19  ;;  %9435 = vmatprep.subr.bf16.mxu0 %v11084_v50  ;;  %v11129_v19 = vld [vmem:[%s16494_s2 + $0x620] sm:$0xff]   ;;  %v7758_v50 = vld [vmem:[%s16496_s1 + $0x214] sm:$0xff]  ;;  %v11159_v61 = vld [vmem:[%s16494_s2 + $0x728] sm:$0xff]  }
 0x6d4   :  { %9236 = vmatpush3.bf16.msra.mxu1 %v11081_v26  ;;  %6378 = vmatprep.mubr.bf16.mxu1 %v7777_v43  ;;  %v11128_v43 = vld [vmem:[%s16494_s2 + $0x1d8] sm:$0xff]   ;;  %v11134_v26 = vld [vmem:[%s16494_s2 + $0x190] sm:$0xff]  }
 0x6d5   :  { %9237 = vmatprep.subr.bf16.mxu1 %v11082_v48  ;;  %v11135_v48 = vld [vmem:[%s16494_s2 + $0x650] sm:$0xff]  }
 0x6d6   :  { %9436 = vmatpush3.bf16.msra.mxu0 %v11087_v55  ;;  %v11139_v55 = vld [vmem:[%s16495_s0 + $0x28] sm:$0xff] }
 0x6d7   :  { %9437 = vmatprep.subr.bf16.mxu0 %v11088_v52  ;;  %v15682_v52 = vadd.bf16 %v11139_v55, %v7758_v50  ;;  %v11179_v50 = vld [vmem:[%s16494_s2 + $0x740] sm:$0xff]  }
 0x6d8   :  { %9238 = vmatpush3.bf16.msra.mxu1 %v11085_v51  ;;  %v11137_v51 = vld [vmem:[%s16494_s2 + $0x610] sm:$0xff]  }
 0x6d9   :  { %9239 = vmatprep.subr.bf16.mxu1 %v11086_v54  ;;  %v11138_v54 = vld [vmem:[%s16494_s2 + $0x188] sm:$0xff]  }
 0x6da   :  { %9438 = vmatpush3.bf16.msra.mxu0 %v11091_v59  ;;  %v7765_v59 = vld [vmem:[%s16496_s1 + $0x24c] sm:$0xff] }
 0x6db   :  { %9439 = vmatprep.subr.bf16.mxu0 %v11092_v10  ;;  %v7780_v10 = vcombine.low %v15571_v14, %v15571_v14  ;;  %v11151_v14 = vld [vmem:[%s16494_s2 + $0x738] sm:$0xff]  }
 0x6dc   :  { %9240 = vmatpush3.bf16.msra.mxu1 %v11089_v28  ;;  %v11140_v28 = vld [vmem:[%s16494_s2 + $0x648] sm:$0xff]  }
 0x6dd   :  { %9241 = vmatprep.subr.bf16.mxu1 %v11090_v60  ;;  %v11141_v60 = vld [vmem:[%s16494_s2 + $0x1c0] sm:$0xff]  }
 0x6de   :  { %9440 = vmatpush3.bf16.msra.mxu0 %v11095_v0 }
 0x6df   :  { %9441 = vmatprep.subr.bf16.mxu0 %v11096_v1  ;;  %v11144_v1 = vld [vmem:[%s16494_s2 + $0x180] sm:$0xff]  }
 0x6e0   :  { %9242 = vmatpush3.bf16.msra.mxu1 %v11093_v62  ;;  %v11142_v62 = vld [vmem:[%s16494_s2 + $0x608] sm:$0xff]  }
 0x6e1   :  { %9243 = vmatprep.subr.bf16.mxu1 %v11094_v63  ;;  %v11143_v63 = vld [vmem:[%s16495_s0 + $0x60] sm:$0xff] }
 0x6e2   :  { %9442 = vmatpush3.bf16.msra.mxu0 %v11099_v4  ;;  %v6153_v0 = vadd.bf16 %v11143_v63, %v7765_v59  ;;  %v11146_v4 = vld [vmem:[%s16494_s2 + $0x2f8] sm:$0xff]   ;;  %v11183_v59 = vld [vmem:[%s16494_s2 + $0x3f0] sm:$0xff]  }
 0x6e3   :  { %9443 = vmatprep.subr.bf16.mxu0 %v11100_v6  ;;  %v11185_v63 = vld [vmem:[%s16494_s2 + $0x838] sm:$0xff]  }
 0x6e4   :  { %9244 = vmatpush3.bf16.msra.mxu1 %v11097_v34  ;;  %v7785_v34 = vcombine.high %v15682_v52, %v15682_v52  ;;  %v7799_v6 = vcombine.high %v6153_v0, %v6153_v0 }
 0x6e5   :  { %9245 = vmatprep.subr.bf16.mxu1 %v11098_v2  ;;  %v11145_v2 = vld [vmem:[%s16494_s2 + $0x640] sm:$0xff]  }
 0x6e6   :  { %9444 = vmatpush3.bf16.msra.mxu0 %v11103_v12  ;;  %v9229_v12 = vpop.f32.mrf.mxu0 }
 0x6e7   :  { %9445 = vmatprep.subr.bf16.mxu0 %v11104_v53  ;;  %v11149_v53 = vld [vmem:[%s16494_s2 + $0x2f0] sm:$0xff]  }
 0x6e8   :  { %9246 = vmatpush3.bf16.msra.mxu1 %v11101_v8  ;;  %v7798_v8 = vcombine.low %v6153_v0, %v6153_v0  ;;  %v9230_v3 = vpop.f32.mrf.mxu0  ;;  %v11186_v0 = vld [vmem:[%s16494_s2 + $0x3b0] sm:$0xff]  }
 0x6e9   :  { %9247 = vmatprep.subr.bf16.mxu1 %v11102_v9  ;;  %v11147_v9 = vld [vmem:[%s16494_s2 + $0x600] sm:$0xff]   ;;  %v15736_v18 = vadd.f32 %v9230_v3, %v9229_v12 }
 0x6ea   :  { %9446 = vmatpush3.bf16.msra.mxu0 %v11108_v15  ;;  %v11153_v15 = vld [vmem:[%s16494_s2 + $0x770] sm:$0xff]   ;;  %v9232_v47 = vpop.f32.mrf.mxu0  ;;  %v11192_v12 = vld [vmem:[%s16494_s2 + $0x3e0] sm:$0xff]  }
 0x6eb   :  { %9447 = vmatprep.subr.bf16.mxu0 %v11109_v58  ;;  %v11195_v3 = vld [vmem:[%s16494_s2 + $0x860] sm:$0xff]   ;;  %v11199_v47 = vld [vmem:[%s16494_s2 + $0x858] sm:$0xff]  }
 0x6ec   :  { %9248 = vmatpush3.bf16.msra.mxu1 %v11105_v13  ;;  %v11150_v13 = vld [vmem:[%s16494_s2 + $0x778] sm:$0xff]   ;;  %v9233_v58 = vpop.f32.mrf.mxu0 }
 0x6ed   :  { %9249 = vmatprep.subr.bf16.mxu1 %v11107_v7  ;;  %v11152_v7 = vld [vmem:[%s16494_s2 + $0x2b0] sm:$0xff]   ;;  %v11201_v58 = vld [vmem:[%s16494_s2 + $0x818] sm:$0xff]  }
 0x6ee   :  { %9448 = vmatpush3.bf16.msra.mxu0 %v11113_v29  ;;  %v11160_v29 = vld [vmem:[%s16494_s2 + $0x2a0] sm:$0xff]  }
 0x6ef   :  { %9477 = vmatprep.subr.bf16.mxu0 %v11116_v22  ;;  %v11164_v22 = vld [vmem:[%s16494_s2 + $0x298] sm:$0xff]  }
 0x6f0   :  { %9250 = vmatpush3.bf16.msra.mxu1 %v11111_v24  ;;  %v11156_v24 = vld [vmem:[%s16494_s2 + $0x2a8] sm:$0xff]  }
 0x6f1   :  { %9279 = vmatprep.subr.bf16.mxu1 %v11112_v27  ;;  %6739 = vmatmul.mubr.bf16.vlgmr.msra.gmra.mxu0 %v7794_v30  ;;  %v11158_v27 = vld [vmem:[%s16494_s2 + $0x2e0] sm:$0xff]  }
 0x6f2   :  { %9478 = vmatpush3.bf16.msra.mxu0 %v11117_v32  ;;  %6818 = vmatprep.mubr.bf16.mxu0 %v7799_v6  ;;  %v11161_v30 = vld [vmem:[%s16494_s2 + $0x760] sm:$0xff]   ;;  %v11165_v32 = vld [vmem:[%s16494_s2 + $0x758] sm:$0xff]  }
 0x6f3   :  { %6379 = vmatmul.mubr.bf16.vlgmr.msra.gmra.mxu1 %v7776_v16  ;;  %9479 = vmatprep.subr.bf16.mxu0 %v11119_v35  ;;  %v11154_v16 = vld [vmem:[%s16494_s2 + $0x2e8] sm:$0xff]   ;;  %v11167_v35 = vld [vmem:[%s16494_s2 + $0x718] sm:$0xff]  }
 0x6f4   :  { %9280 = vmatpush3.bf16.msra.mxu1 %v11114_v17  ;;  %6458 = vmatprep.mubr.bf16.mxu1 %v7781_v25  ;;  %v11157_v25 = vld [vmem:[%s16494_s2 + $0x768] sm:$0xff]   ;;  %v11162_v17 = vld [vmem:[%s16494_s2 + $0x2d8] sm:$0xff]  }
 0x6f5   :  { %9281 = vmatprep.subr.bf16.mxu1 %v11115_v31  ;;  %v11163_v31 = vld [vmem:[%s16494_s2 + $0x720] sm:$0xff]  }
 0x6f6   :  { %9480 = vmatpush3.bf16.msra.mxu0 %v11121_v37  ;;  %v11169_v37 = vld [vmem:[%s16494_s2 + $0x750] sm:$0xff]  }
 0x6f7   :  { %9481 = vmatprep.subr.bf16.mxu0 %v11123_v44  ;;  %v7760_v44 = vld [vmem:[%s16496_s1 + $0x224] sm:$0xff] }
 0x6f8   :  { %9282 = vmatpush3.bf16.msra.mxu1 %v11118_v33  ;;  %v11166_v33 = vld [vmem:[%s16494_s2 + $0x2d0] sm:$0xff]  }
 0x6f9   :  { %9283 = vmatprep.subr.bf16.mxu1 %v11120_v36  ;;  %v11168_v36 = vld [vmem:[%s16494_s2 + $0x290] sm:$0xff]  }
 0x6fa   :  { %9482 = vmatpush3.bf16.msra.mxu0 %v11125_v41  ;;  %v11172_v41 = vld [vmem:[%s16494_s2 + $0x288] sm:$0xff]  }
 0x6fb   :  { %9483 = vmatprep.subr.bf16.mxu0 %v11127_v11 }
 0x6fc   :  { %9284 = vmatpush3.bf16.msra.mxu1 %v11122_v38  ;;  %v11170_v38 = vld [vmem:[%s16494_s2 + $0x2c8] sm:$0xff]  }
 0x6fd   :  { %9285 = vmatprep.subr.bf16.mxu1 %v11124_v40  ;;  %v11171_v40 = vld [vmem:[%s16494_s2 + $0x710] sm:$0xff]  }
 0x6fe   :  { %9484 = vmatpush3.bf16.msra.mxu0 %v11129_v19  ;;  %v11175_v19 = vld [vmem:[%s16494_s2 + $0x2c0] sm:$0xff]  }
 0x6ff   :  { %9485 = vmatprep.subr.bf16.mxu0 %v11131_v45  ;;  %v7784_v45 = vcombine.low %v15682_v52, %v15682_v52  ;;  %v11181_v52 = vld [vmem:[%s16494_s2 + $0x700] sm:$0xff]  }
 0x700   :  { %9286 = vmatpush3.bf16.msra.mxu1 %v11126_v42  ;;  %v11173_v42 = vld [vmem:[%s16495_s0 + $0x38] sm:$0xff] }
 0x701   :  { %9287 = vmatprep.subr.bf16.mxu1 %v11128_v43  ;;  %v15798_v11 = vadd.bf16 %v11173_v42, %v7760_v44  ;;  %v11174_v43 = vld [vmem:[%s16494_s2 + $0x748] sm:$0xff]  }
 0x702   :  { %9486 = vmatpush3.bf16.msra.mxu0 %v11133_v39  ;;  %v11177_v39 = vld [vmem:[%s16495_s0 + $0x70] sm:$0xff] }
 0x703   :  { %9487 = vmatprep.subr.bf16.mxu0 %v11135_v48  ;;  %v11178_v48 = vld [vmem:[%s16494_s2 + $0x280] sm:$0xff]  }
 0x704   :  { %9288 = vmatpush3.bf16.msra.mxu1 %v11130_v57  ;;  %v7767_v57 = vld [vmem:[%s16496_s1 + $0x25c] sm:$0xff] }
 0x705   :  { %9289 = vmatprep.subr.bf16.mxu1 %v11132_v46  ;;  %v11176_v46 = vld [vmem:[%s16494_s2 + $0x708] sm:$0xff]  }
 0x706   :  { %9488 = vmatpush3.bf16.msra.mxu0 %v11137_v51  ;;  %v11180_v51 = vld [vmem:[%s16494_s2 + $0x3f8] sm:$0xff]  }
 0x707   :  { %9489 = vmatprep.subr.bf16.mxu0 %v11140_v28  ;;  %v11182_v28 = vld [vmem:[%s16494_s2 + $0x3b8] sm:$0xff]  }
 0x708   :  { %9290 = vmatpush3.bf16.msra.mxu1 %v11134_v26  ;;  %v6155_v26 = vadd.bf16 %v11177_v39, %v7767_v57 }
 0x709   :  { %9291 = vmatprep.subr.bf16.mxu1 %v11136_v49  ;;  %v7789_v49 = vcombine.high %v15798_v11, %v15798_v11 }
 0x70a   :  { %9490 = vmatpush3.bf16.msra.mxu0 %v11142_v62  ;;  %v7802_v55 = vcombine.low %v6155_v26, %v6155_v26 }
 0x70b   :  { %9491 = vmatprep.subr.bf16.mxu0 %v11145_v2 }
 0x70c   :  { %9292 = vmatpush3.bf16.msra.mxu1 %v11138_v54  ;;  %v7803_v54 = vcombine.high %v6155_v26, %v6155_v26  ;;  %v11219_v26 = vld [vmem:[%s16494_s2 + $0x938] sm:$0xff]  }
 0x70d   :  { %9293 = vmatprep.subr.bf16.mxu1 %v11141_v60 }
 0x70e   :  { %9492 = vmatpush3.bf16.msra.mxu0 %v11147_v9  ;;  %v11190_v9 = vld [vmem:[%s16494_s2 + $0x3a8] sm:$0xff]  }
 0x70f   :  { %9521 = vmatprep.subr.bf16.mxu0 %v11150_v13  ;;  %v11194_v13 = vld [vmem:[%s16494_s2 + $0x3a0] sm:$0xff]  }
 0x710   :  { %9294 = vmatpush3.bf16.msra.mxu1 %v11144_v1 }
 0x711   :  { %9323 = vmatprep.subr.bf16.mxu1 %v11146_v4  ;;  %6819 = vmatmul.mubr.bf16.vlgmr.msra.gmra.mxu0 %v7798_v8  ;;  %v11188_v4 = vld [vmem:[%s16494_s2 + $0x3e8] sm:$0xff]   ;;  %v11189_v8 = vld [vmem:[%s16494_s2 + $0x830] sm:$0xff]  }
 0x712   :  { %9522 = vmatpush3.bf16.msra.mxu0 %v11151_v14  ;;  %6898 = vmatprep.mubr.bf16.mxu0 %v7803_v54  ;;  %v11196_v14 = vld [vmem:[%s16494_s2 + $0x3d8] sm:$0xff]   ;;  %v11222_v54 = vld [vmem:[%s16494_s2 + $0x4e8] sm:$0xff]  }
 0x713   :  { %6459 = vmatmul.mubr.bf16.vlgmr.msra.gmra.mxu1 %v7780_v10  ;;  %9523 = vmatprep.subr.bf16.mxu0 %v11153_v15  ;;  %v11184_v10 = vld [vmem:[%s16494_s2 + $0x878] sm:$0xff]  }
 0x714   :  { %9324 = vmatpush3.bf16.msra.mxu1 %v11148_v5  ;;  %6538 = vmatprep.mubr.bf16.mxu1 %v7785_v34  ;;  %v11187_v34 = vld [vmem:[%s16494_s2 + $0x870] sm:$0xff]   ;;  %v11191_v5 = vld [vmem:[%s16494_s2 + $0x868] sm:$0xff]   ;;  %v11198_v15 = vld [vmem:[%s16494_s2 + $0x398] sm:$0xff]  }
 0x715   :  { %9325 = vmatprep.subr.bf16.mxu1 %v11149_v53  ;;  %v11193_v53 = vld [vmem:[%s16494_s2 + $0x828] sm:$0xff]  }
 0x716   :  { %9524 = vmatpush3.bf16.msra.mxu0 %v11155_v21  ;;  %v11202_v21 = vld [vmem:[%s16494_s2 + $0x390] sm:$0xff]  }
 0x717   :  { %9525 = vmatprep.subr.bf16.mxu0 %v11157_v25  ;;  %v11204_v25 = vld [vmem:[%s16494_s2 + $0x3c8] sm:$0xff]  }
 0x718   :  { %9326 = vmatpush3.bf16.msra.mxu1 %v11152_v7  ;;  %v11197_v7 = vld [vmem:[%s16494_s2 + $0x820] sm:$0xff]  }
 0x719   :  { %9327 = vmatprep.subr.bf16.mxu1 %v11154_v16  ;;  %v11200_v16 = vld [vmem:[%s16494_s2 + $0x3d0] sm:$0xff]  }
 0x71a   :  { %9526 = vmatpush3.bf16.msra.mxu0 %v11159_v61  ;;  %v11205_v61 = vld [vmem:[%s16494_s2 + $0x810] sm:$0xff]  }
 0x71b   :  { %9527 = vmatprep.subr.bf16.mxu0 %v11161_v30  ;;  %v11207_v30 = vld [vmem:[%s16495_s0 + $0x48] sm:$0xff] }
 0x71c   :  { %9328 = vmatpush3.bf16.msra.mxu1 %v11156_v24  ;;  %v11203_v24 = vld [vmem:[%s16494_s2 + $0x850] sm:$0xff]  }
 0x71d   :  { %9329 = vmatprep.subr.bf16.mxu1 %v11158_v27  ;;  %v7762_v27 = vld [vmem:[%s16496_s1 + $0x234] sm:$0xff] }
 0x71e   :  { %9528 = vmatpush3.bf16.msra.mxu0 %v11163_v31  ;;  %v11208_v31 = vld [vmem:[%s16494_s2 + $0x848] sm:$0xff]  }
 0x71f   :  { %9529 = vmatprep.subr.bf16.mxu0 %v11165_v32  ;;  %v7769_v32 = vld [vmem:[%s16496_s1 + $0x26c] sm:$0xff] }
 0x720   :  { %9330 = vmatpush3.bf16.msra.mxu1 %v11160_v29  ;;  %v9273_v60 = vpop.f32.mrf.mxu0  ;;  %v11206_v29 = vld [vmem:[%s16494_s2 + $0x388] sm:$0xff]  }
 0x721   :  { %9331 = vmatprep.subr.bf16.mxu1 %v11162_v17  ;;  %v15914_v17 = vadd.bf16 %v11207_v30, %v7762_v27  ;;  %v11246_v27 = vld [vmem:[%s16494_s2 + $0x480] sm:$0xff]   ;;  %v11248_v30 = vld [vmem:[%s16494_s2 + $0x5f8] sm:$0xff]  }
 0x722   :  { %9530 = vmatpush3.bf16.msra.mxu0 %v11167_v35  ;;  %v9274_v62 = vpop.f32.mrf.mxu0  ;;  %v11210_v35 = vld [vmem:[%s16494_s2 + $0x808] sm:$0xff]  }
 0x723   :  { %9531 = vmatprep.subr.bf16.mxu0 %v11169_v37  ;;  %v15846_v1 = vadd.f32 %v9274_v62, %v9273_v60  ;;  %v7793_v44 = vcombine.high %v15914_v17, %v15914_v17  ;;  %v11225_v60 = vld [vmem:[%s16494_s2 + $0x968] sm:$0xff]   ;;  %v11228_v62 = vld [vmem:[%s16494_s2 + $0x4a0] sm:$0xff]  }
 0x724   :  { %9332 = vmatpush3.bf16.msra.mxu1 %v11164_v22  ;;  %v9276_v2 = vpop.f32.mrf.mxu0  ;;  %v11209_v22 = vld [vmem:[%s16494_s2 + $0x3c0] sm:$0xff]  }
 0x725   :  { %9333 = vmatprep.subr.bf16.mxu1 %v11166_v33  ;;  %v7788_v33 = vcombine.low %v15798_v11, %v15798_v11  ;;  %v11232_v2 = vld [vmem:[%s16494_s2 + $0x498] sm:$0xff]  }
 0x726   :  { %9532 = vmatpush3.bf16.msra.mxu0 %v11171_v40  ;;  %v9277_v6 = vpop.f32.mrf.mxu0  ;;  %v11213_v40 = vld [vmem:[%s16494_s2 + $0x840] sm:$0xff]  }
 0x727   :  { %9533 = vmatprep.subr.bf16.mxu0 %v11174_v43  ;;  %v11215_v43 = vld [vmem:[%s16494_s2 + $0x800] sm:$0xff]   ;;  %v11234_v6 = vld [vmem:[%s16494_s2 + $0x4d0] sm:$0xff]  }
 0x728   :  { %9334 = vmatpush3.bf16.msra.mxu1 %v11168_v36  ;;  %v11211_v36 = vld [vmem:[%s16495_s0 + $0x80] sm:$0xff] }
 0x729   :  { %9335 = vmatprep.subr.bf16.mxu1 %v11170_v38  ;;  %v6157_v37 = vadd.bf16 %v11211_v36, %v7769_v32  ;;  %v11212_v38 = vld [vmem:[%s16494_s2 + $0x380] sm:$0xff]   ;;  %v11250_v32 = vld [vmem:[%s16494_s2 + $0x5b8] sm:$0xff]  }
 0x72a   :  { %9534 = vmatpush3.bf16.msra.mxu0 %v11176_v46  ;;  %v11218_v46 = vld [vmem:[%s16494_s2 + $0x978] sm:$0xff]  }
 0x72b   :  { %9535 = vmatprep.subr.bf16.mxu0 %v11179_v50  ;;  %v7807_v42 = vcombine.high %v6157_v37, %v6157_v37  ;;  %v7806_v11 = vcombine.low %v6157_v37, %v6157_v37  ;;  %v11221_v50 = vld [vmem:[%s16494_s2 + $0x970] sm:$0xff]   ;;  %v11252_v37 = vld [vmem:[%s16494_s2 + $0xa38] sm:$0xff]  }
 0x72c   :  { %9336 = vmatpush3.bf16.msra.mxu1 %v11172_v41  ;;  %v11214_v41 = vld [vmem:[%s16494_s2 + $0x4f8] sm:$0xff]  }
 0x72d   :  { %9337 = vmatprep.subr.bf16.mxu1 %v11175_v19  ;;  %v11216_v19 = vld [vmem:[%s16494_s2 + $0x4b8] sm:$0xff]  }
 0x72e   :  { %9536 = vmatpush3.bf16.msra.mxu0 %v11181_v52  ;;  %v11223_v52 = vld [vmem:[%s16494_s2 + $0x930] sm:$0xff]  }
 0x72f   :  { %9565 = vmatprep.subr.bf16.mxu0 %v11184_v10  ;;  %v11227_v10 = vld [vmem:[%s16494_s2 + $0x928] sm:$0xff]  }
 0x730   :  { %9338 = vmatpush3.bf16.msra.mxu1 %v11178_v48  ;;  %v11220_v48 = vld [vmem:[%s16494_s2 + $0x4b0] sm:$0xff]  }
 0x731   :  { %9367 = vmatprep.subr.bf16.mxu1 %v11180_v51  ;;  %6899 = vmatmul.mubr.bf16.vlgmr.msra.gmra.mxu0 %v7802_v55 }
 0x732   :  { %9566 = vmatpush3.bf16.msra.mxu0 %v11185_v63  ;;  %6978 = vmatprep.mubr.bf16.mxu0 %v7807_v42  ;;  %v11229_v63 = vld [vmem:[%s16494_s2 + $0x960] sm:$0xff]  }
 0x733   :  { %6539 = vmatmul.mubr.bf16.vlgmr.msra.gmra.mxu1 %v7784_v45  ;;  %9567 = vmatprep.subr.bf16.mxu0 %v11187_v34  ;;  %v11217_v45 = vld [vmem:[%s16494_s2 + $0x4f0] sm:$0xff]   ;;  %v11231_v34 = vld [vmem:[%s16494_s2 + $0x920] sm:$0xff]  }
 0x734   :  { %9368 = vmatpush3.bf16.msra.mxu1 %v11182_v28  ;;  %6618 = vmatprep.mubr.bf16.mxu1 %v7789_v49  ;;  %v11224_v28 = vld [vmem:[%s16494_s2 + $0x4a8] sm:$0xff]  }
 0x735   :  { %9369 = vmatprep.subr.bf16.mxu1 %v11183_v59  ;;  %v11226_v59 = vld [vmem:[%s16494_s2 + $0x4e0] sm:$0xff]  }
 0x736   :  { %9568 = vmatpush3.bf16.msra.mxu0 %v11189_v8  ;;  %v11235_v8 = vld [vmem:[%s16494_s2 + $0x918] sm:$0xff]  }
 0x737   :  { %9569 = vmatprep.subr.bf16.mxu0 %v11191_v5  ;;  %v11237_v5 = vld [vmem:[%s16494_s2 + $0x950] sm:$0xff]  }
 0x738   :  { %9370 = vmatpush3.bf16.msra.mxu1 %v11186_v0  ;;  %v11230_v0 = vld [vmem:[%s16494_s2 + $0x4d8] sm:$0xff]  }
 0x739   :  { %9371 = vmatprep.subr.bf16.mxu1 %v11188_v4  ;;  %v11233_v4 = vld [vmem:[%s16494_s2 + $0x958] sm:$0xff]  }
 0x73a   :  { %9570 = vmatpush3.bf16.msra.mxu0 %v11193_v53  ;;  %v7764_v53 = vld [vmem:[%s16496_s1 + $0x244] sm:$0xff] }
 0x73b   :  { %9571 = vmatprep.subr.bf16.mxu0 %v11195_v3  ;;  %v11240_v3 = vld [vmem:[%s16494_s2 + $0x488] sm:$0xff]  }
 0x73c   :  { %9372 = vmatpush3.bf16.msra.mxu1 %v11190_v9  ;;  %v11236_v9 = vld [vmem:[%s16494_s2 + $0x490] sm:$0xff]  }
 0x73d   :  { %9373 = vmatprep.subr.bf16.mxu1 %v11192_v12  ;;  %v11238_v12 = vld [vmem:[%s16494_s2 + $0x4c8] sm:$0xff]  }
 0x73e   :  { %9572 = vmatpush3.bf16.msra.mxu0 %v11197_v7 }
 0x73f   :  { %9573 = vmatprep.subr.bf16.mxu0 %v11199_v47  ;;  %v11243_v47 = vld [vmem:[%s16494_s2 + $0x4c0] sm:$0xff]  }
 0x740   :  { %9374 = vmatpush3.bf16.msra.mxu1 %v11194_v13  ;;  %v11239_v13 = vld [vmem:[%s16494_s2 + $0x910] sm:$0xff]  }
 0x741   :  { %9375 = vmatprep.subr.bf16.mxu1 %v11196_v14  ;;  %v11241_v14 = vld [vmem:[%s16495_s0 + $0x58] sm:$0xff] }
 0x742   :  { %9574 = vmatpush3.bf16.msra.mxu0 %v11201_v58  ;;  %v16030_v7 = vadd.bf16 %v11241_v14, %v7764_v53  ;;  %v7792_v58 = vcombine.low %v15914_v17, %v15914_v17  ;;  %v16168_v53 = vld [vmem:[%s16499_s5] ss:$0 sm:$0xff] }
 0x743   :  { %9575 = vmatprep.subr.bf16.mxu0 %v11203_v24  ;;  %v11245_v24 = vld [vmem:[%s16495_s0 + $0x90] sm:$0xff] }
 0x744   :  { %9376 = vmatpush3.bf16.msra.mxu1 %v11198_v15  ;;  %v11242_v15 = vld [vmem:[%s16494_s2 + $0x948] sm:$0xff]  }
 0x745   :  { %9377 = vmatprep.subr.bf16.mxu1 %v11200_v16  ;;  %v7771_v16 = vld [vmem:[%s16496_s1 + $0x27c] sm:$0xff] }
 0x746   :  { %9576 = vmatpush3.bf16.msra.mxu0 %v11205_v61  ;;  %v7797_v61 = vcombine.high %v16030_v7, %v16030_v7 }
 0x747   :  { %9577 = vmatprep.subr.bf16.mxu0 %v11208_v31 }
 0x748   :  { %9378 = vmatpush3.bf16.msra.mxu1 %v11202_v21  ;;  %v11244_v21 = vld [vmem:[%s16494_s2 + $0x908] sm:$0xff]  }
 0x749   :  { %9379 = vmatprep.subr.bf16.mxu1 %v11204_v25  ;;  %v6159_v25 = vadd.bf16 %v11245_v24, %v7771_v16 }
 0x74a   :  { %9578 = vmatpush3.bf16.msra.mxu0 %v11210_v35  ;;  %v11251_v35 = vld [vmem:[%s16494_s2 + $0x5f0] sm:$0xff]  }
 0x74b   :  { %9579 = vmatprep.subr.bf16.mxu0 %v11213_v40  ;;  %v7811_v17 = vcombine.high %v6159_v25, %v6159_v25  ;;  %v7810_v31 = vcombine.low %v6159_v25, %v6159_v25  ;;  %v11280_v25 = vld [vmem:[%s16494_s2 + $0x6e8] sm:$0xff]  }
 0x74c   :  { %9380 = vmatpush3.bf16.msra.mxu1 %v11206_v29  ;;  %v11247_v29 = vld [vmem:[%s16494_s2 + $0x940] sm:$0xff]  }
 0x74d   :  { %9381 = vmatprep.subr.bf16.mxu1 %v11209_v22  ;;  %v9317_v57 = vpop.f32.mrf.mxu0  ;;  %v11249_v22 = vld [vmem:[%s16494_s2 + $0x900] sm:$0xff]  }
 0x74e   :  { %9580 = vmatpush3.bf16.msra.mxu0 %v11215_v43  ;;  %v11256_v43 = vld [vmem:[%s16494_s2 + $0x5a8] sm:$0xff]  }
 0x74f   :  { %9609 = vmatprep.subr.bf16.mxu0 %v11218_v46  ;;  %v9318_v39 = vpop.f32.mrf.mxu0  ;;  %v11260_v46 = vld [vmem:[%s16494_s2 + $0x5d8] sm:$0xff]  }
 0x750   :  { %9382 = vmatpush3.bf16.msra.mxu1 %v11212_v38  ;;  %v15962_v49 = vadd.f32 %v9318_v39, %v9317_v57  ;;  %v11253_v38 = vld [vmem:[%s16494_s2 + $0x5b0] sm:$0xff]   ;;  %v11258_v57 = vld [vmem:[%s16494_s2 + $0xa28] sm:$0xff]   ;;  %v11261_v39 = vld [vmem:[%s16494_s2 + $0xa20] sm:$0xff]  }
 0x751   :  { %9411 = vmatprep.subr.bf16.mxu1 %v11214_v41  ;;  %6979 = vmatmul.mubr.bf16.vlgmr.msra.gmra.mxu0 %v7806_v11  ;;  %v9320_v51 = vpop.f32.mrf.mxu0  ;;  %v11254_v41 = vld [vmem:[%s16494_s2 + $0x5e8] sm:$0xff]   ;;  %v11255_v11 = vld [vmem:[%s16494_s2 + $0xa30] sm:$0xff]  }
 0x752   :  { %9610 = vmatpush3.bf16.msra.mxu0 %v11219_v26  ;;  %7058 = vmatprep.mubr.bf16.mxu0 %v7811_v17  ;;  %v11262_v26 = vld [vmem:[%s16494_s2 + $0x598] sm:$0xff]   ;;  %v11265_v51 = vld [vmem:[%s16494_s2 + $0x590] sm:$0xff]   ;;  %v11281_v17 = vld [vmem:[%s16494_s2 + $0x6a8] sm:$0xff]  }
 0x753   :  { %6619 = vmatmul.mubr.bf16.vlgmr.msra.gmra.mxu1 %v7788_v33  ;;  %9611 = vmatprep.subr.bf16.mxu0 %v11221_v50  ;;  %v9321_v55 = vpop.f32.mrf.mxu0  ;;  %v11264_v50 = vld [vmem:[%s16494_s2 + $0xa18] sm:$0xff]  }
 0x754   :  { %9412 = vmatpush3.bf16.msra.mxu1 %v11216_v19  ;;  %6698 = vmatprep.mubr.bf16.mxu1 %v7793_v44  ;;  %v11257_v19 = vld [vmem:[%s16494_s2 + $0x5e0] sm:$0xff]   ;;  %v7766_v55 = vld [vmem:[%s16496_s1 + $0x254] sm:$0xff] }
 0x755   :  { %9413 = vmatprep.subr.bf16.mxu1 %v11217_v45  ;;  %v11259_v45 = vld [vmem:[%s16494_s2 + $0x5a0] sm:$0xff]  }
 0x756   :  { %9612 = vmatpush3.bf16.msra.mxu0 %v11223_v52  ;;  %v11267_v52 = vld [vmem:[%s16494_s2 + $0xa10] sm:$0xff]  }
 0x757   :  { %9613 = vmatprep.subr.bf16.mxu0 %v11225_v60  ;;  %v11269_v60 = vld [vmem:[%s16495_s0 + $0x68] sm:$0xff] }
 0x758   :  { %9414 = vmatpush3.bf16.msra.mxu1 %v11220_v48  ;;  %v11263_v48 = vld [vmem:[%s16494_s2 + $0x5d0] sm:$0xff]  }
 0x759   :  { %9415 = vmatprep.subr.bf16.mxu1 %v11222_v54  ;;  %v11266_v54 = vld [vmem:[%s16494_s2 + $0x5c8] sm:$0xff]  }
 0x75a   :  { %9614 = vmatpush3.bf16.msra.mxu0 %v11227_v10  ;;  %v11270_v10 = vld [vmem:[%s16494_s2 + $0x5c0] sm:$0xff]  }
 0x75b   :  { %9615 = vmatprep.subr.bf16.mxu0 %v11229_v63  ;;  %v7796_v63 = vcombine.low %v16030_v7, %v16030_v7  ;;  %v11278_v7 = vld [vmem:[%s16494_s2 + $0x6f0] sm:$0xff]  }
 0x75c   :  { %9416 = vmatpush3.bf16.msra.mxu1 %v11224_v28  ;;  %v11268_v28 = vld [vmem:[%s16494_s2 + $0x588] sm:$0xff]  }
 0x75d   :  { %9417 = vmatprep.subr.bf16.mxu1 %v11226_v59  ;;  %v16136_v59 = vadd.bf16 %v11269_v60, %v7766_v55 }
 0x75e   :  { %9616 = vmatpush3.bf16.msra.mxu0 %v11231_v34  ;;  %v11272_v34 = vld [vmem:[%s16495_s0 + $0xa0] sm:$0xf] }
 0x75f   :  { %9617 = vmatprep.subr.bf16.mxu0 %v11233_v4  ;;  %v11273_v4 = vld [vmem:[%s16494_s2 + $0x580] sm:$0xff]  }
 0x760   :  { %9418 = vmatpush3.bf16.msra.mxu1 %v11228_v62  ;;  %v7773_v62 = vld [vmem:[%s16496_s1 + $0x28c] sm:$0xf] }
 0x761   :  { %9419 = vmatprep.subr.bf16.mxu1 %v11230_v0  ;;  %v11271_v0 = vld [vmem:[%s16494_s2 + $0xa08] sm:$0xff]  }
 0x762   :  { %9618 = vmatpush3.bf16.msra.mxu0 %v11235_v8  ;;  %v11274_v8 = vld [vmem:[%s16494_s2 + $0x6f8] sm:$0xff]  }
 0x763   :  { %9619 = vmatprep.subr.bf16.mxu0 %v11237_v5 }
 0x764   :  { %9420 = vmatpush3.bf16.msra.mxu1 %v11232_v2  ;;  %v6161_v2 = vadd.bf16 %v11272_v34, %v7773_v62 }
 0x765   :  { %9421 = vmatprep.subr.bf16.mxu1 %v11234_v6  ;;  %v7801_v6 = vcombine.high %v16136_v59, %v16136_v59 }
 0x766   :  { %9620 = vmatpush3.bf16.msra.mxu0 %v11239_v13 }
 0x767   :  { %9621 = vmatprep.subr.bf16.mxu0 %v11242_v15 }
 0x768   :  { %9422 = vmatpush3.bf16.msra.mxu1 %v11236_v9  ;;  %v7814_v9 = vcombine.low %v6161_v2, %v6161_v2  ;;  %v11297_v2 = vld [vmem:[%s16494_s2 + $0x7e8] sm:$0xff]  }
 0x769   :  { %9423 = vmatprep.subr.bf16.mxu1 %v11238_v12  ;;  %v11275_v12 = vld [vmem:[%s16494_s2 + $0xa00] sm:$0xff]  }
 0x76a   :  { %9622 = vmatpush3.bf16.msra.mxu0 %v11244_v21  ;;  %v11279_v21 = vld [vmem:[%s16494_s2 + $0x6b0] sm:$0xff]  }
 0x76b   :  { %9623 = vmatprep.subr.bf16.mxu0 %v11247_v29 }
 0x76c   :  { %9424 = vmatpush3.bf16.msra.mxu1 %v11240_v3  ;;  %v11277_v3 = vld [vmem:[%s16494_s2 + $0x6b8] sm:$0xff]  }
 0x76d   :  { %9425 = vmatprep.subr.bf16.mxu1 %v11243_v47 }
 0x76e   :  { %9624 = vmatpush3.bf16.msra.mxu0 %v11249_v22 }
 0x76f   :  { %9844 = vmatprep.subr.bf16.mxu0 %v11360_v20 }
 0x770   :  { %9426 = vmatpush3.bf16.msra.mxu1 %v11246_v27 }
 0x771   :  { %9455 = vmatprep.subr.bf16.mxu1 %v11248_v30  ;;  %v9361_v33 = vpop.f32.mrf.mxu0  ;;  %7059 = vmatmul.mubr.bf16.vlgmr.msra.gmra.mxu0 %v7810_v31  ;;  %v11282_v31 = vld [vmem:[%s16494_s2 + $0x6e0] sm:$0xff]  }
 0x772   :  { %9845 = vmatpush3.bf16.msra.mxu0 %v11252_v37  ;;  %9860 = vmatprep.mubr.msk.bf16.mxu0 %vm11361_vm0, %v11360_v20  ;;  %v11285_v37 = vld [vmem:[%s16494_s2 + $0x698] sm:$0xff]  }
 0x773   :  { %6699 = vmatmul.mubr.bf16.vlgmr.msra.gmra.mxu1 %v7792_v58  ;;  %v9362_v36 = vpop.f32.mrf.mxu0  ;;  %9846 = vmatprep.subr.bf16.mxu0 %v11360_v20 }
 0x774   :  { %9456 = vmatpush3.bf16.msra.mxu1 %v11250_v32  ;;  %6778 = vmatprep.mubr.bf16.mxu1 %v7797_v61  ;;  %v16078_v44 = vadd.f32 %v9362_v36, %v9361_v33  ;;  %v11283_v33 = vld [vmem:[%s16494_s2 + $0x6a0] sm:$0xff]  }
 0x775   :  { %9457 = vmatprep.subr.bf16.mxu1 %v11251_v35  ;;  %v9364_v40 = vpop.f32.mrf.mxu0  ;;  %v11284_v35 = vld [vmem:[%s16494_s2 + $0x6d8] sm:$0xff]  }
 0x776   :  { %9847 = vmatpush3.bf16.msra.mxu0 %v11255_v11  ;;  %v11287_v40 = vld [vmem:[%s16494_s2 + $0x690] sm:$0xff]   ;;  %v11289_v11 = vld [vmem:[%s16494_s2 + $0x688] sm:$0xff]  }
 0x777   :  { %v9365_v42 = vpop.f32.mrf.mxu0  ;;  %9848 = vmatprep.subr.bf16.mxu0 %v11360_v20 }
 0x778   :  { %9458 = vmatpush3.bf16.msra.mxu1 %v11253_v38  ;;  %v11286_v38 = vld [vmem:[%s16494_s2 + $0x6d0] sm:$0xff]   ;;  %v7768_v42 = vld [vmem:[%s16496_s1 + $0x264] sm:$0xff] }
 0x779   :  { %9459 = vmatprep.subr.bf16.mxu1 %v11254_v41  ;;  %v11288_v41 = vld [vmem:[%s16494_s2 + $0x6c8] sm:$0xff]  }
 0x77a   :  { %9849 = vmatpush3.bf16.msra.mxu0 %v11258_v57  ;;  %v11291_v57 = vld [vmem:[%s16494_s2 + $0x6c0] sm:$0xff]  }
 0x77b   :  { %9850 = vmatprep.subr.bf16.mxu0 %v11360_v20 }
 0x77c   :  { %9460 = vmatpush3.bf16.msra.mxu1 %v11256_v43  ;;  %v11290_v43 = vld [vmem:[%s16495_s0 + $0x78] sm:$0xff] }
 0x77d   :  { %9461 = vmatprep.subr.bf16.mxu1 %v11257_v19  ;;  %v16224_v19 = vadd.bf16 %v11290_v43, %v7768_v42 }
 0x77e   :  { %9851 = vmatpush3.bf16.msra.mxu0 %v11261_v39 }
 0x77f   :  { %9852 = vmatprep.subr.bf16.mxu0 %v11360_v20  ;;  %v7805_v39 = vcombine.high %v16224_v19, %v16224_v19 }
 0x780   :  { %9462 = vmatpush3.bf16.msra.mxu1 %v11259_v45  ;;  %v7800_v45 = vcombine.low %v16136_v59, %v16136_v59 }
 0x781   :  { %9463 = vmatprep.subr.bf16.mxu1 %v11260_v46  ;;  %v11292_v46 = vld [vmem:[%s16494_s2 + $0x680] sm:$0xff]  }
 0x782   :  { %9853 = vmatpush3.bf16.msra.mxu0 %v11264_v50 }
 0x783   :  { %9854 = vmatprep.subr.bf16.mxu0 %v11360_v20 }
 0x784   :  { %9464 = vmatpush3.bf16.msra.mxu1 %v11262_v26 }
 0x785   :  { %9465 = vmatprep.subr.bf16.mxu1 %v11263_v48  ;;  %v11293_v48 = vld [vmem:[%s16494_s2 + $0x7f8] sm:$0xff]  }
 0x786   :  { %9855 = vmatpush3.bf16.msra.mxu0 %v11267_v52  ;;  %v11295_v52 = vld [vmem:[%s16494_s2 + $0x7f0] sm:$0xff]  }
 0x787   :  { %9856 = vmatprep.subr.bf16.mxu0 %v11360_v20 }
 0x788   :  { %9466 = vmatpush3.bf16.msra.mxu1 %v11265_v51 }
 0x789   :  { %9467 = vmatprep.subr.bf16.mxu1 %v11266_v54  ;;  %v11294_v54 = vld [vmem:[%s16494_s2 + $0x7b8] sm:$0xff]  }
 0x78a   :  { %9857 = vmatpush3.bf16.msra.mxu0 %v11271_v0 }
 0x78b   :  { %9858 = vmatprep.subr.bf16.mxu0 %v11360_v20 }
 0x78c   :  { %9468 = vmatpush3.bf16.msra.mxu1 %v11268_v28  ;;  %v6341_v28 = vadd.f32 %v15736_v18, %v12179_v56 }
 0x78d   :  { %9469 = vmatprep.subr.bf16.mxu1 %v11270_v10 }
 0x78e   :  { %9859 = vmatpush3.bf16.msra.mxu0 %v11275_v12 }
 0x790   :  { %9470 = vmatpush3.bf16.msra.mxu1 %v11273_v4 }
 0x791   :  { %9499 = vmatprep.subr.bf16.mxu1 %v11274_v8  ;;  %v9405_v15 = vpop.f32.mrf.mxu0  ;;  %9861 = vmatmul.mubr.bf16.vlgmr.msra.gmra.mxu0 %v7814_v9  ;;  %v11299_v9 = vld [vmem:[%s16494_s2 + $0x7e0] sm:$0xff]  }
 0x793   :  { %6779 = vmatmul.mubr.bf16.vlgmr.msra.gmra.mxu1 %v7796_v63  ;;  %v6093_v5 = vpop.f32.mrf.mxu1  ;;  %v9406_v16 = vpop.f32.mrf.mxu0  ;;  %v11296_v63 = vld [vmem:[%s16494_s2 + $0x7b0] sm:$0xff]  }
 0x794   :  { %v16171_v13 = vadd.f32 %v16168_v53, %v6093_v5  ;;  %9500 = vmatpush3.bf16.msra.mxu1 %v11277_v3  ;;  %6858 = vmatprep.mubr.bf16.mxu1 %v7801_v6  ;;  %v16185_v24 = vadd.f32 %v9406_v16, %v9405_v15  ;;  %v11298_v6 = vld [vmem:[%s16494_s2 + $0x7a8] sm:$0xff]   ;;  %v11300_v5 = vld [vmem:[%s16494_s2 + $0x7a0] sm:$0xff]   ;;  %v11303_v15 = vld [vmem:[%s16494_s2 + $0x7d0] sm:$0xff]  }
 0x795   :  { %v9843_v14 = vpop.f32.mrf.mxu1  ;;  %9501 = vmatprep.subr.bf16.mxu1 %v11278_v7  ;;  %v9408_v27 = vpop.f32.mrf.mxu0 }
 0x796   :  { %v6097_v47 = vmul.f32 %v16171_v13, %v16171_v13  ;;  %v11302_v14 = vld [vmem:[%s16494_s2 + $0x798] sm:$0xff]  }
 0x797   :  { %v9409_v29 = vpop.f32.mrf.mxu0  ;;  %v7770_v27 = vld [vmem:[%s16496_s1 + $0x274] sm:$0xff] }
 0x798   :  { %v6098_v58 = vmul.f32 %v6097_v47, %v16171_v13  ;;  %9502 = vmatpush3.bf16.msra.mxu1 %v11279_v21  ;;  %v6109_v47 = vmul.f32 0.5, %v16171_v13  ;;  %v11307_v29 = vld [vmem:[%s16494_s2 + $0x788] sm:$0xff]  }
 0x799   :  { %9503 = vmatprep.subr.bf16.mxu1 %v11280_v25  ;;  %v11305_v25 = vld [vmem:[%s16494_s2 + $0x7c8] sm:$0xff]  }
 0x79a   :  { %v6099_v61 = vmul.f32 0.044715, %v6098_v58  ;;  %v11304_v58 = vld [vmem:[%s16494_s2 + $0x790] sm:$0xff]  }
 0x79c   :  { %v6100_v30 = vadd.f32 %v6099_v61, %v16171_v13  ;;  %9504 = vmatpush3.bf16.msra.mxu1 %v11281_v17  ;;  %v16287_v13 = vld [vmem:[%s16500_s6] ss:$0 sm:$0xff] }
 0x79d   :  { %9505 = vmatprep.subr.bf16.mxu1 %v11282_v31  ;;  %v11309_v31 = vld [vmem:[%s16494_s2 + $0x7c0] sm:$0xff]  }
 0x79e   :  { %v6101_v22 = vmul.f32 0.7978846, %v6100_v30  ;;  %v11308_v30 = vld [vmem:[%s16495_s0 + $0x88] sm:$0xff] }
 0x79f   :  { %v6158_v17 = vadd.bf16 %v11308_v30, %v7770_v27  ;;  %v11334_v30 = vld [vmem:[%s16494_s2 + $0x9e0] sm:$0xff]  }
 0x7a0   :  { %v6102_v32 = vmul.f32 2.0, %v6101_v22  ;;  %9506 = vmatpush3.bf16.msra.mxu1 %v11283_v33  ;;  %v7804_v22 = vcombine.low %v16224_v19, %v16224_v19  ;;  %v11314_v19 = vld [vmem:[%s16494_s2 + $0x8b0] sm:$0xff]  }
 0x7a1   :  { %9507 = vmatprep.subr.bf16.mxu1 %v11284_v35  ;;  %v7809_v33 = vcombine.high %v6158_v17, %v6158_v17  ;;  %v11311_v35 = vld [vmem:[%s16494_s2 + $0x8f8] sm:$0xff]  }
 0x7a2   :  { %v6103_v36 = vmul.f32 1.442695, %v6102_v32  ;;  %v11310_v32 = vld [vmem:[%s16494_s2 + $0x780] sm:$0xff]  }
 0x7a4   :  { %10249 = vpow2.f32 %v6103_v36  ;;  %9508 = vmatpush3.bf16.msra.mxu1 %v11285_v37  ;;  %v11312_v37 = vld [vmem:[%s16494_s2 + $0x8b8] sm:$0xff]  }
 0x7a5   :  { %9509 = vmatprep.subr.bf16.mxu1 %v11286_v38 }
 0x7a8   :  { %9510 = vmatpush3.bf16.msra.mxu1 %v11287_v40  ;;  %v11313_v40 = vld [vmem:[%s16494_s2 + $0x8f0] sm:$0xff]  }
 0x7a9   :  { %9511 = vmatprep.subr.bf16.mxu1 %v11288_v41 }
 0x7ac   :  { %9512 = vmatpush3.bf16.msra.mxu1 %v11289_v11 }
 0x7ad   :  { %9513 = vmatprep.subr.bf16.mxu1 %v11291_v57 }
 0x7b0   :  { %9514 = vmatpush3.bf16.msra.mxu1 %v11292_v46  ;;  %v11315_v46 = vld [vmem:[%s16494_s2 + $0x8e8] sm:$0xff]  }
 0x7b1   :  { %v10250_v26 = vpop.eup %10249  ;;  %9543 = vmatprep.subr.bf16.mxu1 %v11293_v48  ;;  %v9449_v59 = vpop.f32.mrf.mxu0 }
 0x7b2   :  { %v6105_v50 = vadd.f32 1.0, %v10250_v26 }
 0x7b3   :  { %v9251_v51 = vpop.f32.mrf.mxu1  ;;  %6859 = vmatmul.mubr.bf16.vlgmr.msra.gmra.mxu1 %v7800_v45  ;;  %v9450_v0 = vpop.f32.mrf.mxu0 }
 0x7b4   :  { %9544 = vmatpush3.bf16.msra.mxu1 %v11294_v54  ;;  %10251 = vrcp.f32 %v6105_v50  ;;  %6938 = vmatprep.mubr.bf16.mxu1 %v7805_v39  ;;  %v16253_v4 = vadd.f32 %v9450_v0, %v9449_v59  ;;  %v11316_v50 = vld [vmem:[%s16494_s2 + $0x8a8] sm:$0xff]   ;;  %v11317_v54 = vld [vmem:[%s16494_s2 + $0x8e0] sm:$0xff]  }
 0x7b5   :  { %v9252_v55 = vpop.f32.mrf.mxu1  ;;  %9545 = vmatprep.subr.bf16.mxu1 %v11295_v52  ;;  %v9452_v18 = vpop.f32.mrf.mxu0  ;;  %v11320_v52 = vld [vmem:[%s16494_s2 + $0x898] sm:$0xff]   ;;  %v11323_v59 = vld [vmem:[%s16494_s2 + $0x8c8] sm:$0xff]  }
 0x7b6   :  { %v9253_v60 = vadd.f32 %v9252_v55, %v9251_v51  ;;  %v11318_v55 = vld [vmem:[%s16494_s2 + $0x8a0] sm:$0xff]  }
 0x7b7   :  { %v9254_v10 = vpop.f32.mrf.mxu1  ;;  %v9453_v8 = vpop.f32.mrf.mxu0 }
 0x7b8   :  { %v6381_v62 = vadd.f32 %v9253_v60, %v6341_v28  ;;  %9546 = vmatpush3.bf16.msra.mxu1 %v11296_v63  ;;  %v11321_v28 = vld [vmem:[%s16494_s2 + $0x8d0] sm:$0xff]   ;;  %v7772_v10 = vld [vmem:[%s16496_s1 + $0x284] sm:$0xff]  ;;  %v11325_v63 = vld [vmem:[%s16495_s0 + $0x98] sm:$0xff] }
 0x7b9   :  { %v9255_v34 = vpop.f32.mrf.mxu1  ;;  %9547 = vmatprep.subr.bf16.mxu1 %v11297_v2  ;;  %v11322_v60 = vld [vmem:[%s16494_s2 + $0x890] sm:$0xff]   ;;  %v6160_v0 = vadd.bf16 %v11325_v63, %v7772_v10  ;;  %v7808_v2 = vcombine.low %v6158_v17, %v6158_v17  ;;  %v11335_v17 = vld [vmem:[%s16494_s2 + $0x9a0] sm:$0xff]  }
 0x7ba   :  { %v6421_v56 = vadd.f32 %v15846_v1, %v6381_v62  ;;  %v11301_v1 = vld [vmem:[%s16494_s2 + $0x7d8] sm:$0xff]   ;;  %v11324_v62 = vld [vmem:[%s16494_s2 + $0x888] sm:$0xff]   ;;  %v11326_v34 = vld [vmem:[%s16494_s2 + $0x8c0] sm:$0xff]  }
 0x7bb   :  { %v7813_v18 = vcombine.high %v6160_v0, %v6160_v0  ;;  %v11353_v10 = vld [vmem:[%s16498_s4 + $0x30] sm:$0xff]  ;;  %v11355_v63 = vld [vmem:[%s16498_s4 + $0x20] sm:$0xff] }
 0x7bc   :  { %9548 = vmatpush3.bf16.msra.mxu1 %v11298_v6  ;;  %v11328_v6 = vld [vmem:[%s16494_s2 + $0x9f8] sm:$0xff]  }
 0x7bd   :  { %9549 = vmatprep.subr.bf16.mxu1 %v11299_v9  ;;  %v11329_v9 = vld [vmem:[%s16494_s2 + $0x9b8] sm:$0xff]  }
 0x7c0   :  { %9550 = vmatpush3.bf16.msra.mxu1 %v11300_v5 }
 0x7c1   :  { %v10252_v12 = vpop.eup %10251  ;;  %9551 = vmatprep.subr.bf16.mxu1 %v11301_v1 }
 0x7c2   :  { %v6107_v3 = vmul.f32 2.0, %v10252_v12  ;;  %v11330_v12 = vld [vmem:[%s16494_s2 + $0x9f0] sm:$0xff]  }
 0x7c4   :  { %9552 = vmatpush3.bf16.msra.mxu1 %v11302_v14  ;;  %v6108_v7 = vsub.f32 1.0, %v6107_v3 }
 0x7c5   :  { %9553 = vmatprep.subr.bf16.mxu1 %v11303_v15  ;;  %v11331_v15 = vld [vmem:[%s16494_s2 + $0x9b0] sm:$0xff]  }
 0x7c6   :  { %v6110_v16 = vadd.f32 1.0, %v6108_v7 }
 0x7c8   :  { %9554 = vmatpush3.bf16.msra.mxu1 %v11304_v58  ;;  %v6111_v21 = vmul.f32 %v6110_v16, %v6109_v47  ;;  %v11332_v58 = vld [vmem:[%s16494_s2 + $0x9e8] sm:$0xff]  }
 0x7c9   :  { %9555 = vmatprep.subr.bf16.mxu1 %v11305_v25 }
 0x7ca   :  { %v6112_v61 = vmul.f32 %v16287_v13, %v6111_v21 }
 0x7cc   :  { %9556 = vmatpush3.bf16.msra.mxu1 %v11307_v29  ;;  %6113 = vadd.xlane.f32.xlu1 %v6112_v61  ;;  %v11333_v61 = vld [vmem:[%s16494_s2 + $0x9a8] sm:$0xff]  }
 0x7cd   :  { %9557 = vmatprep.subr.bf16.mxu1 %v11309_v31  ;;  %v11337_v31 = vld [vmem:[%s16494_s2 + $0x998] sm:$0xff]  }
 0x7d0   :  { %9558 = vmatpush3.bf16.msra.mxu1 %v11310_v32  ;;  %v11339_v32 = vld [vmem:[%s16494_s2 + $0x990] sm:$0xff]  }
 0x7d1   :  { %9587 = vmatprep.subr.bf16.mxu1 %v11311_v35  ;;  %v9493_v42 = vpop.f32.mrf.mxu0  ;;  %v11341_v35 = vld [vmem:[%s16494_s2 + $0x988] sm:$0xff]  }
 0x7d3   :  { %v9295_v36 = vpop.f32.mrf.mxu1  ;;  %6939 = vmatmul.mubr.bf16.vlgmr.msra.gmra.mxu1 %v7804_v22  ;;  %v9494_v57 = vpop.f32.mrf.mxu0  ;;  %v11338_v22 = vld [vmem:[%s16494_s2 + $0x9d0] sm:$0xff]  }
 0x7d4   :  { %9588 = vmatpush3.bf16.msra.mxu1 %v11312_v37  ;;  %7018 = vmatprep.mubr.bf16.mxu1 %v7809_v33  ;;  %v16319_v39 = vadd.f32 %v9494_v57, %v9493_v42  ;;  %v11340_v33 = vld [vmem:[%s16494_s2 + $0x9c8] sm:$0xff]   ;;  %v7812_v37 = vcombine.low %v6160_v0, %v6160_v0  ;;  %v11356_v0 = vld [vmem:[%s16498_s4 + $0x18] sm:$0xff] }
 0x7d5   :  { %v9296_v38 = vpop.f32.mrf.mxu1  ;;  %9589 = vmatprep.subr.bf16.mxu1 %v11313_v40  ;;  %v9496_v48 = vpop.f32.mrf.mxu0 }
 0x7d6   :  { %v9297_v41 = vadd.f32 %v9296_v38, %v9295_v36  ;;  %v11342_v36 = vld [vmem:[%s16494_s2 + $0x9c0] sm:$0xff]  }
 0x7d7   :  { %v9298_v11 = vpop.f32.mrf.mxu1  ;;  %v9497_v51 = vpop.f32.mrf.mxu0  ;;  %v11343_v38 = vld [vmem:[%s16494_s2 + $0x980] sm:$0xff]  }
 0x7d8   :  { %v6461_v43 = vadd.f32 %v9297_v41, %v6421_v56  ;;  %9590 = vmatpush3.bf16.msra.mxu1 %v11314_v19  ;;  %v11327_v56 = vld [vmem:[%s16494_s2 + $0x880] sm:$0xff]   ;;  %v11344_v41 = vld [vmem:[%s16498_s4 + $0x78] sm:$0xff]  ;;  %v11345_v19 = vld [vmem:[%s16498_s4 + $0x70] sm:$0xff] }
 0x7d9   :  { %v9299_v45 = vpop.f32.mrf.mxu1  ;;  %9591 = vmatprep.subr.bf16.mxu1 %v11315_v46 }
 0x7da   :  { %v6501_v26 = vadd.f32 %v15962_v49, %v6461_v43  ;;  %v11319_v49 = vld [vmem:[%s16494_s2 + $0x8d8] sm:$0xff]  }
 0x7dc   :  { %9592 = vmatpush3.bf16.msra.mxu1 %v11316_v50 }
 0x7dd   :  { %9593 = vmatprep.subr.bf16.mxu1 %v11317_v54 }
 0x7e0   :  { %9594 = vmatpush3.bf16.msra.mxu1 %v11318_v55  ;;  %v11347_v55 = vld [vmem:[%s16498_s4 + $0x60] sm:$0xff] }
 0x7e1   :  { %9595 = vmatprep.subr.bf16.mxu1 %v11319_v49 }
 0x7e4   :  { %9596 = vmatpush3.bf16.msra.mxu1 %v11320_v52  ;;  %v11348_v52 = vld [vmem:[%s16498_s4 + $0x58] sm:$0xff] }
 0x7e5   :  { %9597 = vmatprep.subr.bf16.mxu1 %v11321_v28  ;;  %v11350_v28 = vld [vmem:[%s16498_s4 + $0x48] sm:$0xff] }
 0x7e8   :  { %9598 = vmatpush3.bf16.msra.mxu1 %v11322_v60  ;;  %v11351_v60 = vld [vmem:[%s16498_s4 + $0x40] sm:$0xff] }
 0x7e9   :  { %9599 = vmatprep.subr.bf16.mxu1 %v11323_v59  ;;  %v11352_v59 = vld [vmem:[%s16498_s4 + $0x38] sm:$0xff] }
 0x7ec   :  { %9600 = vmatpush3.bf16.msra.mxu1 %v11324_v62  ;;  %v11354_v62 = vld [vmem:[%s16498_s4 + $0x28] sm:$0xff] }
 0x7ed   :  { %9601 = vmatprep.subr.bf16.mxu1 %v11326_v34  ;;  %v11357_v34 = vld [vmem:[%s16498_s4 + $0x10] sm:$0xff] }
 0x7f0   :  { %9602 = vmatpush3.bf16.msra.mxu1 %v11327_v56  ;;  %v11359_v56 = vld [vmem:[%s16498_s4] sm:$0xff] }
 0x7f1   :  { %9631 = vmatprep.subr.bf16.mxu1 %v11328_v6  ;;  %v9537_v3 = vpop.f32.mrf.mxu0 }
 0x7f3   :  { %v9339_v8 = vpop.f32.mrf.mxu1  ;;  %7019 = vmatmul.mubr.bf16.vlgmr.msra.gmra.mxu1 %v7808_v2  ;;  %v9538_v47 = vpop.f32.mrf.mxu0  ;;  %v11358_v2 = vld [vmem:[%s16498_s4 + $0x8] sm:$0xff] }
 0x7f4   :  { %9632 = vmatpush3.bf16.msra.mxu1 %v11329_v9  ;;  %7098 = vmatprep.mubr.bf16.mxu1 %v7813_v18  ;;  %v16376_v21 = vadd.f32 %v9538_v47, %v9537_v3 }
 0x7f5   :  { %v9340_v5 = vpop.f32.mrf.mxu1  ;;  %9633 = vmatprep.subr.bf16.mxu1 %v11330_v12  ;;  %v9540_v27 = vpop.f32.mrf.mxu0 }
 0x7f6   :  { %v9341_v1 = vadd.f32 %v9340_v5, %v9339_v8 }
 0x7f7   :  { %v9342_v14 = vpop.f32.mrf.mxu1  ;;  %v9541_v29 = vpop.f32.mrf.mxu0 }
 0x7f8   :  { %v6541_v7 = vadd.f32 %v9341_v1, %v6501_v26  ;;  %9634 = vmatpush3.bf16.msra.mxu1 %v11331_v15  ;;  %v11346_v26 = vld [vmem:[%s16498_s4 + $0x68] sm:$0xff] }
 0x7f9   :  { %v9343_v16 = vpop.f32.mrf.mxu1  ;;  %9635 = vmatprep.subr.bf16.mxu1 %v11332_v58 }
 0x7fa   :  { %v6581_v25 = vadd.f32 %v16078_v44, %v6541_v7  ;;  %v11336_v44 = vld [vmem:[%s16494_s2 + $0x9d8] sm:$0xff]  }
 0x7fc   :  { %9636 = vmatpush3.bf16.msra.mxu1 %v11333_v61 }
 0x7fd   :  { %9637 = vmatprep.subr.bf16.mxu1 %v11334_v30 }
 0x800   :  { %9638 = vmatpush3.bf16.msra.mxu1 %v11335_v17 }
 0x801   :  { %9639 = vmatprep.subr.bf16.mxu1 %v11336_v44 }
 0x804   :  { %9640 = vmatpush3.bf16.msra.mxu1 %v11337_v31 }
 0x805   :  { %9641 = vmatprep.subr.bf16.mxu1 %v11338_v22 }
 0x808   :  { %9642 = vmatpush3.bf16.msra.mxu1 %v11339_v32 }
 0x809   :  { %9643 = vmatprep.subr.bf16.mxu1 %v11340_v33 }
 0x80c   :  { %9644 = vmatpush3.bf16.msra.mxu1 %v11341_v35 }
 0x80d   :  { %9645 = vmatprep.subr.bf16.mxu1 %v11342_v36 }
 0x810   :  { %9646 = vmatpush3.bf16.msra.mxu1 %v11343_v38 }
 0x811   :  { %9864 = vmatprep.subr.mxu1 %v11360_v20  ;;  %v9581_v43 = vpop.f32.mrf.mxu0 }
 0x813   :  { %v9383_v40 = vpop.f32.mrf.mxu1  ;;  %7099 = vmatmul.mubr.bf16.vlgmr.msra.gmra.mxu1 %v7812_v37  ;;  %v9582_v46 = vpop.f32.mrf.mxu0 }
 0x814   :  { %9865 = vmatpush3.msra.mxu1 %v11344_v41  ;;  %9896 = vmatprep.mubr.msk.f32.mxu1 %vm11361_vm0, %v11360_v20  ;;  %v16426_v50 = vadd.f32 %v9582_v46, %v9581_v43 }
 0x815   :  { %v9384_v42 = vpop.f32.mrf.mxu1  ;;  %9866 = vmatprep.subr.mxu1 %v11360_v20  ;;  %v9584_v54 = vpop.f32.mrf.mxu0 }
 0x816   :  { %v9385_v11 = vadd.f32 %v9384_v42, %v9383_v40  ;;  %9867 = vmatpush3.msra.mxu1 %v11345_v19 }
 0x817   :  { %v9386_v57 = vpop.f32.mrf.mxu1  ;;  %9868 = vmatprep.subr.mxu1 %v11360_v20  ;;  %v9585_v49 = vpop.f32.mrf.mxu0 }
 0x818   :  { %v6621_v45 = vadd.f32 %v9385_v11, %v6581_v25  ;;  %9869 = vmatpush3.msra.mxu1 %v11346_v26 }
 0x819   :  { %v9387_v48 = vpop.f32.mrf.mxu1  ;;  %9870 = vmatprep.subr.mxu1 %v11360_v20 }
 0x81a   :  { %v6661_v51 = vadd.f32 %v16185_v24, %v6621_v45  ;;  %9871 = vmatpush3.msra.mxu1 %v11347_v55  ;;  %v11349_v24 = vld [vmem:[%s16498_s4 + $0x50] sm:$0xff] }
 0x81b   :  { %9872 = vmatprep.subr.mxu1 %v11360_v20 }
 0x81c   :  { %9873 = vmatpush3.msra.mxu1 %v11348_v52 }
 0x81d   :  { %9874 = vmatprep.subr.mxu1 %v11360_v20 }
 0x81e   :  { %9875 = vmatpush3.msra.mxu1 %v11349_v24 }
 0x81f   :  { %9876 = vmatprep.subr.mxu1 %v11360_v20 }
 0x820   :  { %9877 = vmatpush3.msra.mxu1 %v11350_v28 }
 0x821   :  { %9878 = vmatprep.subr.mxu1 %v11360_v20 }
 0x822   :  { %9879 = vmatpush3.msra.mxu1 %v11351_v60 }
 0x823   :  { %9880 = vmatprep.subr.mxu1 %v11360_v20 }
 0x824   :  { %9881 = vmatpush3.msra.mxu1 %v11352_v59 }
 0x825   :  { %9882 = vmatprep.subr.mxu1 %v11360_v20 }
 0x826   :  { %9883 = vmatpush3.msra.mxu1 %v11353_v10 }
 0x827   :  { %9884 = vmatprep.subr.mxu1 %v11360_v20 }
 0x828   :  { %9885 = vmatpush3.msra.mxu1 %v11354_v62 }
 0x829   :  { %9886 = vmatprep.subr.mxu1 %v11360_v20 }
 0x82a   :  { %9887 = vmatpush3.msra.mxu1 %v11355_v63 }
 0x82b   :  { %9888 = vmatprep.subr.mxu1 %v11360_v20 }
 0x82c   :  { %9889 = vmatpush3.msra.mxu1 %v11356_v0 }
 0x82d   :  { %9890 = vmatprep.subr.mxu1 %v11360_v20 }
 0x82e   :  { %9891 = vmatpush3.msra.mxu1 %v11357_v34 }
 0x82f   :  { %9892 = vmatprep.subr.mxu1 %v11360_v20 }
 0x830   :  { %9893 = vmatpush3.msra.mxu1 %v11358_v2 }
 0x831   :  { %9894 = vmatprep.subr.mxu1 %v11360_v20  ;;  %v9625_v9 = vpop.f32.mrf.mxu0 }
 0x832   :  { %9895 = vmatpush3.msra.mxu1 %v11359_v56 }
 0x833   :  { %v9427_v18 = vpop.f32.mrf.mxu1  ;;  %v9626_v1 = vpop.f32.mrf.mxu0 }
 0x834   :  { %v9627_v14 = vadd.f32 %v9626_v1, %v9625_v9 }
 0x835   :  { %v9428_v6 = vpop.f32.mrf.mxu1  ;;  %v9628_v15 = vpop.f32.mrf.mxu0 }
 0x836   :  { %v9429_v8 = vadd.f32 %v9428_v6, %v9427_v18 }
 0x837   :  { %v9430_v5 = vpop.f32.mrf.mxu1  ;;  %v9629_v47 = vpop.f32.mrf.mxu0 }
 0x838   :  { %v6701_v12 = vadd.f32 %v9429_v8, %v6661_v51 }
 0x839   :  { %v9431_v3 = vpop.f32.mrf.mxu1 }
 0x83a   :  { %v6741_v7 = vadd.f32 %v16253_v4, %v6701_v12 }
 0x851   :  { %v7140_v25 = vpop.f32.mrf.mxu0 }
 0x853   :  { %v9471_v16 = vpop.f32.mrf.mxu1  ;;  %v9862_v29 = vpop.f32.mrf.mxu0 }
 0x855   :  { %v9472_v20 = vpop.f32.mrf.mxu1  ;;  %v7143_v44 = vpop.f32.mrf.mxu0 }
 0x856   :  { %v9473_v58 = vadd.f32 %v9472_v20, %v9471_v16 }
 0x857   :  { %v9474_v27 = vpop.f32.mrf.mxu1  ;;  %v9863_v31 = vpop.f32.mrf.mxu0 }
 0x858   :  { %v6781_v61 = vadd.f32 %v9473_v58, %v6741_v7 }
 0x859   :  { %v9475_v30 = vpop.f32.mrf.mxu1 }
 0x85a   :  { %v6821_v17 = vadd.f32 %v16319_v39, %v6781_v61 }
 0x873   :  { %v9515_v22 = vpop.f32.mrf.mxu1 }
 0x875   :  { %v9516_v32 = vpop.f32.mrf.mxu1 }
 0x876   :  { %v9517_v33 = vadd.f32 %v9516_v32, %v9515_v22  ;;  %v3845_v22 = vpop.xlane.xlu0 %3844 }
 0x877   :  { %v9518_v35 = vpop.f32.mrf.mxu1 }
 0x878   :  { %v6861_v36 = vadd.f32 %v9517_v33, %v6821_v17  ;;  %v748_v33 = vand.u32 127, %v728_v23  ;;  %v3846_v35 = vstv %s16501_s7 }
 0x879   :  { %v9519_v4 = vpop.f32.mrf.mxu1 }
 0x87a   :  { %v6901_v37 = vadd.f32 %v16376_v21, %v6861_v36  ;;  %v4980_v32 = vpop.xlane.xlu0 %4979  ;;  %v6114_v36 = vpop.xlane.xlu1 %6113  ;;  %vm4982_vm1 = vcmp.eq.s32.totalorder %v748_v33, 1  ;;  %vm3848_vm2 = vcmp.eq.s32.totalorder %v748_v33, 0  ;;  %vm6116_vm3 = vcmp.eq.s32.totalorder %v748_v33, 2 }
 0x87b   :  { %v4981_v4 = vadd.f32 %v4980_v32, %v3846_v35  ;;  %vm7250_vm4 = vcmp.eq.s32.totalorder %v748_v33, 3 }
 0x893   :  { %v9559_v38 = vpop.f32.mrf.mxu1 }
 0x895   :  { %v9560_v40 = vpop.f32.mrf.mxu1 }
 0x896   :  { %v9561_v41 = vadd.f32 %v9560_v40, %v9559_v38  ;;  %v6115_v38 = vadd.f32 %v6114_v36, %v3846_v35  ;;  %v4983_v40 = vsel %vm4982_vm1, %v4981_v4, 0.0 }
 0x897   :  { %v9562_v42 = vpop.f32.mrf.mxu1 }
 0x898   :  { %v6941_v11 = vadd.f32 %v9561_v41, %v6901_v37  ;;  %v3847_v37 = vadd.f32 %v3846_v35, %v3845_v22  ;;  %v6117_v42 = vsel %vm6116_vm3, %v6115_v38, 0.0 }
 0x899   :  { %v9563_v43 = vpop.f32.mrf.mxu1 }
 0x89a   :  { %v6981_v19 = vadd.f32 %v16426_v50, %v6941_v11  ;;  %v3849_v41 = vsel %vm3848_vm2, %v3847_v37, 0.0 }
 0x8b3   :  { %v9603_v57 = vpop.f32.mrf.mxu1 }
 0x8b5   :  { %v9604_v39 = vpop.f32.mrf.mxu1 }
 0x8b6   :  { %v9605_v45 = vadd.f32 %v9604_v39, %v9603_v57 }
 0x8b7   :  { %v9606_v46 = vpop.f32.mrf.mxu1 }
 0x8b8   :  { %v7021_v26 = vadd.f32 %v9605_v45, %v6981_v19 }
 0x8b9   :  { %v9607_v48 = vpop.f32.mrf.mxu1 }
 0x8ba   :  { %v7061_v51 = vadd.f32 %v9627_v14, %v7021_v26 }
 0x8d3   :  { %v9647_v54 = vpop.f32.mrf.mxu1 }
 0x8d5   :  { %v9648_v55 = vpop.f32.mrf.mxu1 }
 0x8d6   :  { %v9649_v49 = vadd.f32 %v9648_v55, %v9647_v54 }
 0x8d7   :  { %v9650_v52 = vpop.f32.mrf.mxu1 }
 0x8d8   :  { %v7101_v21 = vadd.f32 %v9649_v49, %v7061_v51 }
 0x8d9   :  { %v9651_v24 = vpop.f32.mrf.mxu1 }
 0x8da   :  { %v7141_v28 = vadd.f32 %v7140_v25, %v7101_v21 }
 0x8dc   :  { %v7146_v60 = vmul.f32 %v7141_v28, %v7141_v28  ;;  %v7158_v8 = vmul.f32 0.5, %v7141_v28 }
 0x8de   :  { %v7147_v59 = vmul.f32 %v7146_v60, %v7141_v28 }
 0x8e0   :  { %v7148_v10 = vmul.f32 0.044715, %v7147_v59 }
 0x8e2   :  { %v7149_v62 = vadd.f32 %v7148_v10, %v7141_v28 }
 0x8e4   :  { %v7150_v63 = vmul.f32 0.7978846, %v7149_v62 }
 0x8e6   :  { %v7151_v50 = vmul.f32 2.0, %v7150_v63 }
 0x8e8   :  { %v7152_v0 = vmul.f32 1.442695, %v7151_v50 }
 0x8ea   :  { %10253 = vpow2.f32 %v7152_v0 }
 0x8f7   :  { %v10254_v34 = vpop.eup %10253 }
 0x8f8   :  { %v7154_v2 = vadd.f32 1.0, %v10254_v34 }
 0x8fa   :  { %10255 = vrcp.f32 %v7154_v2 }
 0x907   :  { %v10256_v56 = vpop.eup %10255 }
 0x908   :  { %v7156_v18 = vmul.f32 2.0, %v10256_v56 }
 0x90a   :  { %v7157_v6 = vsub.f32 1.0, %v7156_v18 }
 0x90c   :  { %v7159_v9 = vadd.f32 1.0, %v7157_v6 }
 0x90e   :  { %v7160_v5 = vmul.f32 %v7159_v9, %v7158_v8 }
 0x910   :  { %9897 = vmatmul.mubr.f32.vlgmr.msra.gmra.mxu1 %v7160_v5 }
 0x9d0   :  { %v7227_v12 = vpop.f32.mrf.mxu1 }
 0x9d1   :  { %v7228_v1 = vadd.f32 %v16168_v53, %v7227_v12 }
 0x9d2   :  { %v9898_v3 = vpop.f32.mrf.mxu1 }
 0x9d3   :  { %v7231_v14 = vmul.f32 %v7228_v1, %v7228_v1  ;;  %v7243_v17 = vmul.f32 0.5, %v7228_v1 }
 0x9d5   :  { %v7232_v7 = vmul.f32 %v7231_v14, %v7228_v1 }
 0x9d7   :  { %v7233_v15 = vmul.f32 0.044715, %v7232_v7 }
 0x9d9   :  { %v7234_v47 = vadd.f32 %v7233_v15, %v7228_v1 }
 0x9db   :  { %v7235_v16 = vmul.f32 0.7978846, %v7234_v47 }
 0x9dd   :  { %v7236_v20 = vmul.f32 2.0, %v7235_v16 }
 0x9df   :  { %v7237_v58 = vmul.f32 1.442695, %v7236_v20 }
 0x9e1   :  { %10257 = vpow2.f32 %v7237_v58 }
 0x9ee   :  { %v10258_v25 = vpop.eup %10257 }
 0x9ef   :  { %v7239_v27 = vadd.f32 1.0, %v10258_v25 }
 0x9f1   :  { %10259 = vrcp.f32 %v7239_v27 }
 0x9fe   :  { %v10260_v61 = vpop.eup %10259 }
 0x9ff   :  { %v7241_v29 = vmul.f32 2.0, %v10260_v61 }
 0xa01   :  { %v7242_v30 = vsub.f32 1.0, %v7241_v29 }
 0xa03   :  { %v7244_v44 = vadd.f32 1.0, %v7242_v30 }
 0xa05   :  { %v7245_v31 = vmul.f32 %v7244_v44, %v7243_v17 }
 0xa07   :  { %v7246_v53 = vmul.f32 %v16287_v13, %v7245_v31  ;;  %v4984_v13 = vadd.f32 %v4983_v40, %v3849_v41 }
 0xa09   :  { %7247 = vadd.xlane.f32.xlu1 %v7246_v53  ;;  %v6118_v19 = vadd.f32 %v6117_v42, %v4984_v13 }
 0xa92   :  { %v7248_v11 = vpop.xlane.xlu1 %7247 }
 0xa93   :  { %v7249_v43 = vadd.f32 %v7248_v11, %v3846_v35 }
 0xa95   :  { %v7251_v23 = vsel %vm7250_vm4, %v7249_v43, 0.0 }
 0xa96   :  { %v7252_v57 = vadd.f32 %v7251_v23, %v6118_v19 }
 0xa98   :  { %7253 = vst [vmem:[%s16502_s8] sm:$0xff] %v7252_v57 }

</bundles_post_ra>
